<compile_context>
chip_gen: v5e
topology: v5e:2x2
jax: 0.10.0
libtpu: 0.0.40
codegen_flags: <defaults>
</compile_context>

<pallas_src>
import functools

import jax
import jax.numpy as jnp
from jax import lax
from jax.experimental import pallas as pl
from jax.experimental.pallas import tpu as pltpu

# DaNN(n_input=3, n_hidden1=120, n_hidden2=84, n_class=88)
N_INPUT, N_H1, N_H2, N_CLASS = 3, 120, 84, 88
BASE_LR = 0.01          # self.base_lr = 1 * 0.01
UPDATE_STEP = 3         # inner-loop update_step (small value)

D = 128                 # lane-dense padded width for every feature dim
NEG_PAD = -1e9          # bias padding for invalid logit lanes (kills softmax mass)


def _round_up(x, m):
    return (x + m - 1) // m * m


def _pick_group(task_num, max_g=4):
    """Tasks per grid step. Prefer G>1 (interleave) while keeping >=2 grid
    steps so v7x's two TensorCores both get work; fall back gracefully."""
    best = 1
    for g in range(1, min(max_g, task_num) + 1):
        if task_num % g == 0 and task_num // g >= 2:
            best = g
    if best == 1 and task_num <= max_g:
        best = task_num     # single grid step, but tasks still interleave
    return best


# ---------------------------------------------------------------------------
# Fused multi-task MAML kernel
# ---------------------------------------------------------------------------
def _make_maml_kernel(update_step, base_lr, n_spt, n_qry, n_spt_p, n_qry_p,
                      group):
    lr = float(base_lr)              # Python literal -> no captured constant
    s_p = n_spt_p + n_qry_p          # stacked (support + query) row count

    def fused_fwd(x, p):
        w1, b1, w2, b2, w3, b3 = p
        z1 = jnp.dot(x, w1, preferred_element_type=jnp.float32) + b1
        h1 = jnp.maximum(z1, 0.0)
        z2 = jnp.dot(h1, w2, preferred_element_type=jnp.float32) + b2
        h2 = jnp.maximum(z2, 0.0)
        logits = jnp.dot(h2, w3, preferred_element_type=jnp.float32) + b3
        return z1, h1, z2, h2, logits

    def softmax_parts(logits, oh, qry_scale):
        # One softmax over the stacked (support+query) logits.
        m = jnp.max(logits, axis=-1, keepdims=True)
        sh = logits - m
        e = jnp.exp(sh)
        s = jnp.sum(e, axis=-1, keepdims=True)
        prob = e / s                           # exact divide: feeds gradients
        logp = sh - jnp.log(s)
        lq = -jnp.sum(oh * logp * qry_scale)   # mean CE over the query rows
        return prob, lq

    def grads(x, oh, acts, p, prob, spt_scale):
        w1, b1, w2, b2, w3, b3 = p
        z1, h1, z2, h2, _ = acts
        # spt_scale zeroes the query (and padding) rows -> their contribution
        # to every weight gradient is exactly zero.
        dl = (prob - oh) * spt_scale
        dw3 = lax.dot_general(h2, dl, (((0,), (0,)), ((), ())),
                              preferred_element_type=jnp.float32)
        db3 = jnp.sum(dl, axis=0, keepdims=True)
        dh2 = lax.dot_general(dl, w3, (((1,), (1,)), ((), ())),
                              preferred_element_type=jnp.float32)
        dh2 = jnp.where(z2 > 0.0, dh2, 0.0)
        dw2 = lax.dot_general(h1, dh2, (((0,), (0,)), ((), ())),
                              preferred_element_type=jnp.float32)
        db2 = jnp.sum(dh2, axis=0, keepdims=True)
        dh1 = lax.dot_general(dh2, w2, (((1,), (1,)), ((), ())),
                              preferred_element_type=jnp.float32)
        dh1 = jnp.where(z1 > 0.0, dh1, 0.0)
        dw1 = lax.dot_general(x, dh1, (((0,), (0,)), ((), ())),
                              preferred_element_type=jnp.float32)
        db1 = jnp.sum(dh1, axis=0, keepdims=True)
        return dw1, db1, dw2, db2, dw3, db3

    def kernel(data_ref, w1_ref, b1_ref, w2_ref, b2_ref, w3_ref, b3_ref,
               yhat_ref, loss_ref,
               fw1, fb1, fw2, fb2, fw3, fb3):
        # Loop-invariant masks, hoisted once (JAX does not CSE broadcasts).
        row = lax.broadcasted_iota(jnp.int32, (s_p, 1), 0)
        spt_scale = jnp.where(row < n_spt, 1.0 / n_spt, 0.0)
        qry_scale = jnp.where((row >= n_spt_p) & (row < n_spt_p + n_qry),
                              1.0 / n_qry, 0.0)
        lane = lax.broadcasted_iota(jnp.int32, (1, D), 1)

        # Shared meta parameters, loaded once for all G tasks.
        meta = (w1_ref[...], b1_ref[...], w2_ref[...], b2_ref[...],
                w3_ref[...], b3_ref[...])
        fast_refs = (fw1, fb1, fw2, fb2, fw3, fb3)

        # Static Python loop over G independent tasks -> one basic block; the
        # scheduler interleaves their dependent matmul chains on the MXU.
        for g in range(group):
            x = data_ref[g, :s_p, :]     # [x_spt ; x_qry] stacked rows
            oh = data_ref[g, s_p:, :]    # [oh_spt ; oh_qry] stacked rows

            losses_g = []
            p = meta
            for _ in range(update_step):
                acts = fused_fwd(x, p)                       # one fused fwd
                prob, lq = softmax_parts(acts[-1], oh, qry_scale)
                losses_g.append(lq)                          # query loss @ p
                gr = grads(x, oh, acts, p, prob, spt_scale)  # support grads
                # Fused SGD step, fast weights held in VMEM scratch in place.
                for ref, pi, gi in zip(fast_refs, p, gr):
                    ref[g] = pi - lr * gi
                p = tuple(ref[g] for ref in fast_refs)

            # Final query evaluation under the last fast weights.
            logits = fused_fwd(x, p)[-1]
            _, lq_last = softmax_parts(logits, oh, qry_scale)
            losses_g.append(lq_last)

            yhat_ref[g] = logits
            # Lane-dense loss vector, built once at the end (off the per-step
            # critical path): lane k holds loss_list_qry[k] for this task.
            lv = jnp.zeros((1, D), jnp.float32)
            for k, l in enumerate(losses_g):
                lv = lv + jnp.where(lane == k, l, 0.0)
            loss_ref[g] = lv

    return kernel


# ---------------------------------------------------------------------------
# Lane-dense padding helpers
# ---------------------------------------------------------------------------
def _pad_lanes(x):
    pad = D - x.shape[-1]
    return jnp.pad(x, [(0, 0)] * (x.ndim - 1) + [(0, pad)])


def _pad_rows(x, n_p):
    return jnp.pad(x, ((0, 0), (0, n_p - x.shape[1]), (0, 0)))


def _pad_params(params):
    w1, b1, w2, b2, w3, b3 = params
    w1p = jnp.zeros((D, D), jnp.float32).at[:N_INPUT, :N_H1].set(w1)
    b1p = jnp.zeros((1, D), jnp.float32).at[:, :N_H1].set(b1)
    w2p = jnp.zeros((D, D), jnp.float32).at[:N_H1, :N_H2].set(w2)
    b2p = jnp.zeros((1, D), jnp.float32).at[:, :N_H2].set(b2)
    w3p = jnp.zeros((D, D), jnp.float32).at[:N_H2, :N_CLASS].set(w3)
    # Padded class lanes get a huge negative bias -> zero softmax mass and
    # exactly zero gradient through them; valid 88 logits sliced outside.
    b3p = jnp.full((1, D), NEG_PAD, jnp.float32).at[:, :N_CLASS].set(b3)
    return w1p, b1p, w2p, b2p, w3p, b3p


# ---------------------------------------------------------------------------
# MetaLearner.forward equivalent
# ---------------------------------------------------------------------------
@functools.partial(jax.jit, static_argnames=("update_step", "base_lr"))
def meta_learner_forward(x_spt, y_spt, x_qry, y_qry, params,
                         update_step=UPDATE_STEP, base_lr=BASE_LR):
    """Mirrors MetaLearner.forward; returns y_hat1 (last task's final query
    logits).  One fused Pallas kernel: G tasks per grid step, the inner
    update loop unrolled inside the body, fast weights in VMEM scratch.
    NOTE: labels must be < 88 (padded logit lanes are masked with -1e9)."""
    task_num, n_spt, _ = x_spt.shape
    n_qry = x_qry.shape[1]
    n_spt_p = _round_up(n_spt, 8)
    n_qry_p = _round_up(n_qry, 8)
    s_p = n_spt_p + n_qry_p
    group = _pick_group(task_num)
    n_steps = task_num // group

    xs = _pad_rows(_pad_lanes(x_spt.astype(jnp.float32)), n_spt_p)
    xq = _pad_rows(_pad_lanes(x_qry.astype(jnp.float32)), n_qry_p)
    ohs = _pad_rows(jax.nn.one_hot(y_spt, D, dtype=jnp.float32), n_spt_p)
    ohq = _pad_rows(jax.nn.one_hot(y_qry, D, dtype=jnp.float32), n_qry_p)
    # Single per-task slab -> one DMA per grid step: [xs ; xq ; ohs ; ohq].
    data = jnp.concatenate([xs, xq, ohs, ohq], axis=1)   # (T, 2*s_p, D)

    w1p, b1p, w2p, b2p, w3p, b3p = _pad_params(params)

    kernel = _make_maml_kernel(update_step, base_lr, n_spt, n_qry,
                               n_spt_p, n_qry_p, group)

    data_spec = pl.BlockSpec((group, 2 * s_p, D), lambda i: (i, 0, 0))
    w_spec = pl.BlockSpec((D, D), lambda i: (0, 0))
    b_spec = pl.BlockSpec((1, D), lambda i: (0, 0))

    yhat_all, losses = pl.pallas_call(
        kernel,
        out_shape=(
            jax.ShapeDtypeStruct((task_num, s_p, D), jnp.float32),
            jax.ShapeDtypeStruct((task_num, 1, D), jnp.float32),
        ),
        grid=(n_steps,),
        in_specs=[data_spec, w_spec, b_spec, w_spec, b_spec, w_spec, b_spec],
        out_specs=(
            pl.BlockSpec((group, s_p, D), lambda i: (i, 0, 0)),
            pl.BlockSpec((group, 1, D), lambda i: (i, 0, 0)),
        ),
        scratch_shapes=[
            pltpu.VMEM((group, D, D), jnp.float32),   # fast w1
            pltpu.VMEM((group, 1, D), jnp.float32),   # fast b1
            pltpu.VMEM((group, D, D), jnp.float32),   # fast w2
            pltpu.VMEM((group, 1, D), jnp.float32),   # fast b2
            pltpu.VMEM((group, D, D), jnp.float32),   # fast w3
            pltpu.VMEM((group, 1, D), jnp.float32),   # fast b3
        ],
        compiler_params=pltpu.CompilerParams(
            dimension_semantics=("parallel",)),
    )(data, w1p, b1p, w2p, b2p, w3p, b3p)

    # Bookkeeping MetaLearner.forward accumulates (loss_list_qry).
    loss_list_qry = jnp.sum(losses[:, 0, :update_step + 1], axis=0)
    _loss_qry = loss_list_qry[-1] / task_num
    # TODO(synk): Adam meta-optimizer outer step on _loss_qry not implemented.

    # y_hat1: last task's query logits after the final inner update step.
    return yhat_all[-1, n_spt_p:n_spt_p + n_qry, :N_CLASS]


def init_params(key):
    k1, k2, k3 = jax.random.split(key, 3)
    w1 = 0.1 * jax.random.normal(k1, (N_INPUT, N_H1), jnp.float32)
    b1 = jnp.zeros((1, N_H1), jnp.float32)
    w2 = 0.1 * jax.random.normal(k2, (N_H1, N_H2), jnp.float32)
    b2 = jnp.zeros((1, N_H2), jnp.float32)
    w3 = 0.1 * jax.random.normal(k3, (N_H2, N_CLASS), jnp.float32)
    b3 = jnp.zeros((1, N_CLASS), jnp.float32)
    return [w1, b1, w2, b2, w3, b3]


if __name__ == "__main__":
    key = jax.random.PRNGKey(0)
    kx1, ky1, kx2, ky2, kp = jax.random.split(key, 5)

    task_num, n_spt, n_qry = 4, 8, 8
    x_spt = jax.random.normal(kx1, (task_num, n_spt, N_INPUT), jnp.float32)
    y_spt = jax.random.randint(ky1, (task_num, n_spt), 0, N_CLASS, jnp.int32)
    x_qry = jax.random.normal(kx2, (task_num, n_qry, N_INPUT), jnp.float32)
    y_qry = jax.random.randint(ky2, (task_num, n_qry), 0, N_CLASS, jnp.int32)

    params = init_params(kp)

    y_hat1 = meta_learner_forward(x_spt, y_spt, x_qry, y_qry, params)
    y_hat1 = jax.block_until_ready(y_hat1)

    assert y_hat1.shape == (n_qry, N_CLASS)
    assert bool(jnp.all(jnp.isfinite(y_hat1)))

    # (bookkeeping in the torch code: softmax-argmax accuracy on the query set)
    _pred = jnp.argmax(y_hat1, axis=1)

    print("KERNEL_OK")
</pallas_src>

<mosaic_0001>
module attributes {stable_mosaic.version = 11 : i64} {
  func.func @kernel(%arg0: i32, %arg1: memref<2x32x128xf32, #tpu.memory_space<vmem>>, %arg2: memref<128x128xf32, #tpu.memory_space<vmem>>, %arg3: memref<1x128xf32, #tpu.memory_space<vmem>>, %arg4: memref<128x128xf32, #tpu.memory_space<vmem>>, %arg5: memref<1x128xf32, #tpu.memory_space<vmem>>, %arg6: memref<128x128xf32, #tpu.memory_space<vmem>>, %arg7: memref<1x128xf32, #tpu.memory_space<vmem>>, %arg8: memref<2x16x128xf32, #tpu.memory_space<vmem>>, %arg9: memref<2x1x128xf32, #tpu.memory_space<vmem>>, %arg10: memref<2x128x128xf32, #tpu.memory_space<vmem>>, %arg11: memref<2x1x128xf32, #tpu.memory_space<vmem>>, %arg12: memref<2x128x128xf32, #tpu.memory_space<vmem>>, %arg13: memref<2x1x128xf32, #tpu.memory_space<vmem>>, %arg14: memref<2x128x128xf32, #tpu.memory_space<vmem>>, %arg15: memref<2x1x128xf32, #tpu.memory_space<vmem>>) attributes {dimension_semantics = [#tpu.dimension_semantics<parallel>], iteration_bounds = array<i64: 2>, scalar_prefetch = 0 : i64, scratch_operands = 6 : i64, tpu.core_type = #tpu.core_type<tc>, window_params = [{transform_indices = @transform_0, window_bounds = array<i64: 2, 32, 128>}, {pipeline_mode = #tpu.pipeline_mode<synchronous>, transform_indices = @transform_1, window_bounds = array<i64: 128, 128>}, {pipeline_mode = #tpu.pipeline_mode<synchronous>, transform_indices = @transform_2, window_bounds = array<i64: 1, 128>}, {pipeline_mode = #tpu.pipeline_mode<synchronous>, transform_indices = @transform_3, window_bounds = array<i64: 128, 128>}, {pipeline_mode = #tpu.pipeline_mode<synchronous>, transform_indices = @transform_4, window_bounds = array<i64: 1, 128>}, {pipeline_mode = #tpu.pipeline_mode<synchronous>, transform_indices = @transform_5, window_bounds = array<i64: 128, 128>}, {pipeline_mode = #tpu.pipeline_mode<synchronous>, transform_indices = @transform_6, window_bounds = array<i64: 1, 128>}, {transform_indices = @transform_7, window_bounds = array<i64: 2, 16, 128>}, {transform_indices = @transform_8, window_bounds = array<i64: 2, 1, 128>}]} {
    %0 = tpu.iota {dimensions = array<i32: 0>} : vector<16x1xi32>
    %c8_i32 = arith.constant 8 : i32
    %1 = vector.broadcast %c8_i32 : i32 to vector<16x1xi32>
    %2 = arith.cmpi slt, %0, %1 : vector<16x1xi32>
    %cst = arith.constant 1.250000e-01 : f32
    %cst_0 = arith.constant 0.000000e+00 : f32
    %3 = vector.broadcast %cst : f32 to vector<16x1xf32>
    %4 = vector.broadcast %cst_0 : f32 to vector<16x1xf32>
    %5 = arith.select %2, %3, %4 : vector<16x1xi1>, vector<16x1xf32>
    %c8_i32_1 = arith.constant 8 : i32
    %6 = vector.broadcast %c8_i32_1 : i32 to vector<16x1xi32>
    %7 = arith.cmpi sge, %0, %6 : vector<16x1xi32>
    %c16_i32 = arith.constant 16 : i32
    %8 = vector.broadcast %c16_i32 : i32 to vector<16x1xi32>
    %9 = arith.cmpi slt, %0, %8 : vector<16x1xi32>
    %10 = arith.andi %7, %9 : vector<16x1xi1>
    %cst_2 = arith.constant 1.250000e-01 : f32
    %cst_3 = arith.constant 0.000000e+00 : f32
    %11 = vector.broadcast %cst_2 : f32 to vector<16x1xf32>
    %12 = vector.broadcast %cst_3 : f32 to vector<16x1xf32>
    %13 = arith.select %10, %11, %12 : vector<16x1xi1>, vector<16x1xf32>
    %14 = tpu.iota {dimensions = array<i32: 1>} : vector<1x128xi32>
    %c0 = arith.constant 0 : index
    %c0_4 = arith.constant 0 : index
    %15 = vector.load %arg2[%c0, %c0_4] : memref<128x128xf32, #tpu.memory_space<vmem>>, vector<128x128xf32>
    %c0_5 = arith.constant 0 : index
    %c0_6 = arith.constant 0 : index
    %16 = vector.load %arg3[%c0_5, %c0_6] : memref<1x128xf32, #tpu.memory_space<vmem>>, vector<1x128xf32>
    %c0_7 = arith.constant 0 : index
    %c0_8 = arith.constant 0 : index
    %17 = vector.load %arg4[%c0_7, %c0_8] : memref<128x128xf32, #tpu.memory_space<vmem>>, vector<128x128xf32>
    %c0_9 = arith.constant 0 : index
    %c0_10 = arith.constant 0 : index
    %18 = vector.load %arg5[%c0_9, %c0_10] : memref<1x128xf32, #tpu.memory_space<vmem>>, vector<1x128xf32>
    %c0_11 = arith.constant 0 : index
    %c0_12 = arith.constant 0 : index
    %19 = vector.load %arg6[%c0_11, %c0_12] : memref<128x128xf32, #tpu.memory_space<vmem>>, vector<128x128xf32>
    %c0_13 = arith.constant 0 : index
    %c0_14 = arith.constant 0 : index
    %20 = vector.load %arg7[%c0_13, %c0_14] : memref<1x128xf32, #tpu.memory_space<vmem>>, vector<1x128xf32>
    %c0_15 = arith.constant 0 : index
    %c0_16 = arith.constant 0 : index
    %c0_17 = arith.constant 0 : index
    %21 = vector.load %arg1[%c0_15, %c0_16, %c0_17] : memref<2x32x128xf32, #tpu.memory_space<vmem>>, vector<1x16x128xf32>
    %22 = vector.shape_cast %21 : vector<1x16x128xf32> to vector<16x128xf32>
    %c0_18 = arith.constant 0 : index
    %c16 = arith.constant 16 : index
    %c0_19 = arith.constant 0 : index
    %23 = vector.load %arg1[%c0_18, %c16, %c0_19] : memref<2x32x128xf32, #tpu.memory_space<vmem>>, vector<1x16x128xf32>
    %24 = vector.shape_cast %23 : vector<1x16x128xf32> to vector<16x128xf32>
    %cst_20 = arith.constant dense<0.000000e+00> : vector<16x128xf32>
    %25 = tpu.matmul %22, %15, %cst_20 {dimension_numbers = #tpu.dot_dimension_numbers<[1], [0], [0], [1], [0, 0, 1, 1], [], []>} : vector<16x128xf32>, vector<128x128xf32>, vector<16x128xf32> -> vector<16x128xf32>
    %26 = vector.broadcast %16 : vector<1x128xf32> to vector<16x128xf32>
    %27 = arith.addf %25, %26 : vector<16x128xf32>
    %cst_21 = arith.constant 0.000000e+00 : f32
    %28 = vector.broadcast %cst_21 : f32 to vector<16x128xf32>
    %29 = arith.maximumf %27, %28 : vector<16x128xf32>
    %cst_22 = arith.constant dense<0.000000e+00> : vector<16x128xf32>
    %30 = tpu.matmul %29, %17, %cst_22 {dimension_numbers = #tpu.dot_dimension_numbers<[1], [0], [0], [1], [0, 0, 1, 1], [], []>} : vector<16x128xf32>, vector<128x128xf32>, vector<16x128xf32> -> vector<16x128xf32>
    %31 = vector.broadcast %18 : vector<1x128xf32> to vector<16x128xf32>
    %32 = arith.addf %30, %31 : vector<16x128xf32>
    %cst_23 = arith.constant 0.000000e+00 : f32
    %33 = vector.broadcast %cst_23 : f32 to vector<16x128xf32>
    %34 = arith.maximumf %32, %33 : vector<16x128xf32>
    %cst_24 = arith.constant dense<0.000000e+00> : vector<16x128xf32>
    %35 = tpu.matmul %34, %19, %cst_24 {dimension_numbers = #tpu.dot_dimension_numbers<[1], [0], [0], [1], [0, 0, 1, 1], [], []>} : vector<16x128xf32>, vector<128x128xf32>, vector<16x128xf32> -> vector<16x128xf32>
    %36 = vector.broadcast %20 : vector<1x128xf32> to vector<16x128xf32>
    %37 = arith.addf %35, %36 : vector<16x128xf32>
    %cst_25 = arith.constant dense<0xFF800000> : vector<16xf32>
    %38 = vector.multi_reduction <maximumf>, %37, %cst_25 [1] : vector<16x128xf32> to vector<16xf32>
    %39 = vector.shape_cast %38 : vector<16xf32> to vector<16x1xf32>
    %40 = vector.broadcast %39 : vector<16x1xf32> to vector<16x128xf32>
    %41 = arith.subf %37, %40 : vector<16x128xf32>
    %42 = math.exp %41 : vector<16x128xf32>
    %cst_26 = arith.constant dense<0.000000e+00> : vector<16xf32>
    %43 = vector.multi_reduction <add>, %42, %cst_26 [1] : vector<16x128xf32> to vector<16xf32>
    %44 = vector.shape_cast %43 : vector<16xf32> to vector<16x1xf32>
    %45 = vector.broadcast %44 : vector<16x1xf32> to vector<16x128xf32>
    %46 = arith.divf %42, %45 : vector<16x128xf32>
    %47 = math.log %44 : vector<16x1xf32>
    %48 = vector.broadcast %47 : vector<16x1xf32> to vector<16x128xf32>
    %49 = arith.subf %41, %48 : vector<16x128xf32>
    %50 = arith.mulf %24, %49 : vector<16x128xf32>
    %51 = vector.broadcast %13 : vector<16x1xf32> to vector<16x128xf32>
    %52 = arith.mulf %50, %51 : vector<16x128xf32>
    %53 = vector.shape_cast %52 : vector<16x128xf32> to vector<1x16x128xf32>
    %cst_27 = arith.constant dense<0.000000e+00> : vector<1xf32>
    %54 = vector.multi_reduction <add>, %53, %cst_27 [1, 2] : vector<1x16x128xf32> to vector<1xf32>
    %55 = vector.shape_cast %54 : vector<1xf32> to vector<1x1x1xf32>
    %56 = vector.extract %55[0, 0, 0] : f32 from vector<1x1x1xf32>
    %cst_28 = arith.constant 0.000000e+00 : f32
    %57 = arith.subf %cst_28, %56 : f32
    %58 = arith.subf %46, %24 : vector<16x128xf32>
    %59 = vector.broadcast %5 : vector<16x1xf32> to vector<16x128xf32>
    %60 = arith.mulf %58, %59 : vector<16x128xf32>
    %cst_29 = arith.constant dense<0.000000e+00> : vector<128x128xf32>
    %61 = tpu.matmul %34, %60, %cst_29 {dimension_numbers = #tpu.dot_dimension_numbers<[0], [0], [1], [1], [0, 1, 1, 1], [], []>} : vector<16x128xf32>, vector<16x128xf32>, vector<128x128xf32> -> vector<128x128xf32>
    %cst_30 = arith.constant dense<0.000000e+00> : vector<128xf32>
    %62 = vector.multi_reduction <add>, %60, %cst_30 [0] : vector<16x128xf32> to vector<128xf32>
    %63 = vector.shape_cast %62 : vector<128xf32> to vector<1x128xf32>
    %cst_31 = arith.constant dense<0.000000e+00> : vector<16x128xf32>
    %64 = tpu.matmul %60, %19, %cst_31 {dimension_numbers = #tpu.dot_dimension_numbers<[1], [1], [0], [0], [0, 0, 1, 0], [], []>} : vector<16x128xf32>, vector<128x128xf32>, vector<16x128xf32> -> vector<16x128xf32>
    %cst_32 = arith.constant 0.000000e+00 : f32
    %65 = vector.broadcast %cst_32 : f32 to vector<16x128xf32>
    %66 = arith.cmpf ogt, %32, %65 : vector<16x128xf32>
    %cst_33 = arith.constant 0.000000e+00 : f32
    %67 = vector.broadcast %cst_33 : f32 to vector<16x128xf32>
    %68 = arith.select %66, %64, %67 : vector<16x128xi1>, vector<16x128xf32>
    %cst_34 = arith.constant dense<0.000000e+00> : vector<128x128xf32>
    %69 = tpu.matmul %29, %68, %cst_34 {dimension_numbers = #tpu.dot_dimension_numbers<[0], [0], [1], [1], [0, 1, 1, 1], [], []>} : vector<16x128xf32>, vector<16x128xf32>, vector<128x128xf32> -> vector<128x128xf32>
    %cst_35 = arith.constant dense<0.000000e+00> : vector<128xf32>
    %70 = vector.multi_reduction <add>, %68, %cst_35 [0] : vector<16x128xf32> to vector<128xf32>
    %71 = vector.shape_cast %70 : vector<128xf32> to vector<1x128xf32>
    %cst_36 = arith.constant dense<0.000000e+00> : vector<16x128xf32>
    %72 = tpu.matmul %68, %17, %cst_36 {dimension_numbers = #tpu.dot_dimension_numbers<[1], [1], [0], [0], [0, 0, 1, 0], [], []>} : vector<16x128xf32>, vector<128x128xf32>, vector<16x128xf32> -> vector<16x128xf32>
    %cst_37 = arith.constant 0.000000e+00 : f32
    %73 = vector.broadcast %cst_37 : f32 to vector<16x128xf32>
    %74 = arith.cmpf ogt, %27, %73 : vector<16x128xf32>
    %cst_38 = arith.constant 0.000000e+00 : f32
    %75 = vector.broadcast %cst_38 : f32 to vector<16x128xf32>
    %76 = arith.select %74, %72, %75 : vector<16x128xi1>, vector<16x128xf32>
    %cst_39 = arith.constant dense<0.000000e+00> : vector<128x128xf32>
    %77 = tpu.matmul %22, %76, %cst_39 {dimension_numbers = #tpu.dot_dimension_numbers<[0], [0], [1], [1], [0, 1, 1, 1], [], []>} : vector<16x128xf32>, vector<16x128xf32>, vector<128x128xf32> -> vector<128x128xf32>
    %cst_40 = arith.constant dense<0.000000e+00> : vector<128xf32>
    %78 = vector.multi_reduction <add>, %76, %cst_40 [0] : vector<16x128xf32> to vector<128xf32>
    %79 = vector.shape_cast %78 : vector<128xf32> to vector<1x128xf32>
    %cst_41 = arith.constant 0.00999999977 : f32
    %80 = vector.broadcast %cst_41 : f32 to vector<128x128xf32>
    %81 = arith.mulf %80, %77 : vector<128x128xf32>
    %82 = arith.subf %15, %81 : vector<128x128xf32>
    %c0_42 = arith.constant 0 : index
    %c0_43 = arith.constant 0 : index
    %c0_44 = arith.constant 0 : index
    %83 = vector.load %arg10[%c0_42, %c0_43, %c0_44] : memref<2x128x128xf32, #tpu.memory_space<vmem>>, vector<1x128x128xf32>
    %84 = vector.shape_cast %83 : vector<1x128x128xf32> to vector<128x128xf32>
    %85 = vector.shape_cast %82 : vector<128x128xf32> to vector<1x128x128xf32>
    tpu.vector_store %arg10[%c0_42, %c0_43, %c0_44], %85 {strides = array<i32>} : memref<2x128x128xf32, #tpu.memory_space<vmem>>, vector<1x128x128xf32>,
    %cst_45 = arith.constant 0.00999999977 : f32
    %86 = vector.broadcast %cst_45 : f32 to vector<1x128xf32>
    %87 = arith.mulf %86, %79 : vector<1x128xf32>
    %88 = arith.subf %16, %87 : vector<1x128xf32>
    %c0_46 = arith.constant 0 : index
    %c0_47 = arith.constant 0 : index
    %c0_48 = arith.constant 0 : index
    %89 = vector.load %arg11[%c0_46, %c0_47, %c0_48] : memref<2x1x128xf32, #tpu.memory_space<vmem>>, vector<1x1x128xf32>
    %90 = vector.shape_cast %89 : vector<1x1x128xf32> to vector<1x128xf32>
    %91 = vector.shape_cast %88 : vector<1x128xf32> to vector<1x1x128xf32>
    tpu.vector_store %arg11[%c0_46, %c0_47, %c0_48], %91 {strides = array<i32>} : memref<2x1x128xf32, #tpu.memory_space<vmem>>, vector<1x1x128xf32>,
    %cst_49 = arith.constant 0.00999999977 : f32
    %92 = vector.broadcast %cst_49 : f32 to vector<128x128xf32>
    %93 = arith.mulf %92, %69 : vector<128x128xf32>
    %94 = arith.subf %17, %93 : vector<128x128xf32>
    %c0_50 = arith.constant 0 : index
    %c0_51 = arith.constant 0 : index
    %c0_52 = arith.constant 0 : index
    %95 = vector.load %arg12[%c0_50, %c0_51, %c0_52] : memref<2x128x128xf32, #tpu.memory_space<vmem>>, vector<1x128x128xf32>
    %96 = vector.shape_cast %95 : vector<1x128x128xf32> to vector<128x128xf32>
    %97 = vector.shape_cast %94 : vector<128x128xf32> to vector<1x128x128xf32>
    tpu.vector_store %arg12[%c0_50, %c0_51, %c0_52], %97 {strides = array<i32>} : memref<2x128x128xf32, #tpu.memory_space<vmem>>, vector<1x128x128xf32>,
    %cst_53 = arith.constant 0.00999999977 : f32
    %98 = vector.broadcast %cst_53 : f32 to vector<1x128xf32>
    %99 = arith.mulf %98, %71 : vector<1x128xf32>
    %100 = arith.subf %18, %99 : vector<1x128xf32>
    %c0_54 = arith.constant 0 : index
    %c0_55 = arith.constant 0 : index
    %c0_56 = arith.constant 0 : index
    %101 = vector.load %arg13[%c0_54, %c0_55, %c0_56] : memref<2x1x128xf32, #tpu.memory_space<vmem>>, vector<1x1x128xf32>
    %102 = vector.shape_cast %101 : vector<1x1x128xf32> to vector<1x128xf32>
    %103 = vector.shape_cast %100 : vector<1x128xf32> to vector<1x1x128xf32>
    tpu.vector_store %arg13[%c0_54, %c0_55, %c0_56], %103 {strides = array<i32>} : memref<2x1x128xf32, #tpu.memory_space<vmem>>, vector<1x1x128xf32>,
    %cst_57 = arith.constant 0.00999999977 : f32
    %104 = vector.broadcast %cst_57 : f32 to vector<128x128xf32>
    %105 = arith.mulf %104, %61 : vector<128x128xf32>
    %106 = arith.subf %19, %105 : vector<128x128xf32>
    %c0_58 = arith.constant 0 : index
    %c0_59 = arith.constant 0 : index
    %c0_60 = arith.constant 0 : index
    %107 = vector.load %arg14[%c0_58, %c0_59, %c0_60] : memref<2x128x128xf32, #tpu.memory_space<vmem>>, vector<1x128x128xf32>
    %108 = vector.shape_cast %107 : vector<1x128x128xf32> to vector<128x128xf32>
    %109 = vector.shape_cast %106 : vector<128x128xf32> to vector<1x128x128xf32>
    tpu.vector_store %arg14[%c0_58, %c0_59, %c0_60], %109 {strides = array<i32>} : memref<2x128x128xf32, #tpu.memory_space<vmem>>, vector<1x128x128xf32>,
    %cst_61 = arith.constant 0.00999999977 : f32
    %110 = vector.broadcast %cst_61 : f32 to vector<1x128xf32>
    %111 = arith.mulf %110, %63 : vector<1x128xf32>
    %112 = arith.subf %20, %111 : vector<1x128xf32>
    %c0_62 = arith.constant 0 : index
    %c0_63 = arith.constant 0 : index
    %c0_64 = arith.constant 0 : index
    %113 = vector.load %arg15[%c0_62, %c0_63, %c0_64] : memref<2x1x128xf32, #tpu.memory_space<vmem>>, vector<1x1x128xf32>
    %114 = vector.shape_cast %113 : vector<1x1x128xf32> to vector<1x128xf32>
    %115 = vector.shape_cast %112 : vector<1x128xf32> to vector<1x1x128xf32>
    tpu.vector_store %arg15[%c0_62, %c0_63, %c0_64], %115 {strides = array<i32>} : memref<2x1x128xf32, #tpu.memory_space<vmem>>, vector<1x1x128xf32>,
    %c0_65 = arith.constant 0 : index
    %c0_66 = arith.constant 0 : index
    %c0_67 = arith.constant 0 : index
    %116 = vector.load %arg10[%c0_65, %c0_66, %c0_67] : memref<2x128x128xf32, #tpu.memory_space<vmem>>, vector<1x128x128xf32>
    %117 = vector.shape_cast %116 : vector<1x128x128xf32> to vector<128x128xf32>
    %c0_68 = arith.constant 0 : index
    %c0_69 = arith.constant 0 : index
    %c0_70 = arith.constant 0 : index
    %118 = vector.load %arg11[%c0_68, %c0_69, %c0_70] : memref<2x1x128xf32, #tpu.memory_space<vmem>>, vector<1x1x128xf32>
    %119 = vector.shape_cast %118 : vector<1x1x128xf32> to vector<1x128xf32>
    %c0_71 = arith.constant 0 : index
    %c0_72 = arith.constant 0 : index
    %c0_73 = arith.constant 0 : index
    %120 = vector.load %arg12[%c0_71, %c0_72, %c0_73] : memref<2x128x128xf32, #tpu.memory_space<vmem>>, vector<1x128x128xf32>
    %121 = vector.shape_cast %120 : vector<1x128x128xf32> to vector<128x128xf32>
    %c0_74 = arith.constant 0 : index
    %c0_75 = arith.constant 0 : index
    %c0_76 = arith.constant 0 : index
    %122 = vector.load %arg13[%c0_74, %c0_75, %c0_76] : memref<2x1x128xf32, #tpu.memory_space<vmem>>, vector<1x1x128xf32>
    %123 = vector.shape_cast %122 : vector<1x1x128xf32> to vector<1x128xf32>
    %c0_77 = arith.constant 0 : index
    %c0_78 = arith.constant 0 : index
    %c0_79 = arith.constant 0 : index
    %124 = vector.load %arg14[%c0_77, %c0_78, %c0_79] : memref<2x128x128xf32, #tpu.memory_space<vmem>>, vector<1x128x128xf32>
    %125 = vector.shape_cast %124 : vector<1x128x128xf32> to vector<128x128xf32>
    %c0_80 = arith.constant 0 : index
    %c0_81 = arith.constant 0 : index
    %c0_82 = arith.constant 0 : index
    %126 = vector.load %arg15[%c0_80, %c0_81, %c0_82] : memref<2x1x128xf32, #tpu.memory_space<vmem>>, vector<1x1x128xf32>
    %127 = vector.shape_cast %126 : vector<1x1x128xf32> to vector<1x128xf32>
    %cst_83 = arith.constant dense<0.000000e+00> : vector<16x128xf32>
    %128 = tpu.matmul %22, %117, %cst_83 {dimension_numbers = #tpu.dot_dimension_numbers<[1], [0], [0], [1], [0, 0, 1, 1], [], []>} : vector<16x128xf32>, vector<128x128xf32>, vector<16x128xf32> -> vector<16x128xf32>
    %129 = vector.broadcast %119 : vector<1x128xf32> to vector<16x128xf32>
    %130 = arith.addf %128, %129 : vector<16x128xf32>
    %cst_84 = arith.constant 0.000000e+00 : f32
    %131 = vector.broadcast %cst_84 : f32 to vector<16x128xf32>
    %132 = arith.maximumf %130, %131 : vector<16x128xf32>
    %cst_85 = arith.constant dense<0.000000e+00> : vector<16x128xf32>
    %133 = tpu.matmul %132, %121, %cst_85 {dimension_numbers = #tpu.dot_dimension_numbers<[1], [0], [0], [1], [0, 0, 1, 1], [], []>} : vector<16x128xf32>, vector<128x128xf32>, vector<16x128xf32> -> vector<16x128xf32>
    %134 = vector.broadcast %123 : vector<1x128xf32> to vector<16x128xf32>
    %135 = arith.addf %133, %134 : vector<16x128xf32>
    %cst_86 = arith.constant 0.000000e+00 : f32
    %136 = vector.broadcast %cst_86 : f32 to vector<16x128xf32>
    %137 = arith.maximumf %135, %136 : vector<16x128xf32>
    %cst_87 = arith.constant dense<0.000000e+00> : vector<16x128xf32>
    %138 = tpu.matmul %137, %125, %cst_87 {dimension_numbers = #tpu.dot_dimension_numbers<[1], [0], [0], [1], [0, 0, 1, 1], [], []>} : vector<16x128xf32>, vector<128x128xf32>, vector<16x128xf32> -> vector<16x128xf32>
    %139 = vector.broadcast %127 : vector<1x128xf32> to vector<16x128xf32>
    %140 = arith.addf %138, %139 : vector<16x128xf32>
    %cst_88 = arith.constant dense<0xFF800000> : vector<16xf32>
    %141 = vector.multi_reduction <maximumf>, %140, %cst_88 [1] : vector<16x128xf32> to vector<16xf32>
    %142 = vector.shape_cast %141 : vector<16xf32> to vector<16x1xf32>
    %143 = vector.broadcast %142 : vector<16x1xf32> to vector<16x128xf32>
    %144 = arith.subf %140, %143 : vector<16x128xf32>
    %145 = math.exp %144 : vector<16x128xf32>
    %cst_89 = arith.constant dense<0.000000e+00> : vector<16xf32>
    %146 = vector.multi_reduction <add>, %145, %cst_89 [1] : vector<16x128xf32> to vector<16xf32>
    %147 = vector.shape_cast %146 : vector<16xf32> to vector<16x1xf32>
    %148 = vector.broadcast %147 : vector<16x1xf32> to vector<16x128xf32>
    %149 = arith.divf %145, %148 : vector<16x128xf32>
    %150 = math.log %147 : vector<16x1xf32>
    %151 = vector.broadcast %150 : vector<16x1xf32> to vector<16x128xf32>
    %152 = arith.subf %144, %151 : vector<16x128xf32>
    %153 = arith.mulf %24, %152 : vector<16x128xf32>
    %154 = vector.broadcast %13 : vector<16x1xf32> to vector<16x128xf32>
    %155 = arith.mulf %153, %154 : vector<16x128xf32>
    %156 = vector.shape_cast %155 : vector<16x128xf32> to vector<1x16x128xf32>
    %cst_90 = arith.constant dense<0.000000e+00> : vector<1xf32>
    %157 = vector.multi_reduction <add>, %156, %cst_90 [1, 2] : vector<1x16x128xf32> to vector<1xf32>
    %158 = vector.shape_cast %157 : vector<1xf32> to vector<1x1x1xf32>
    %159 = vector.extract %158[0, 0, 0] : f32 from vector<1x1x1xf32>
    %cst_91 = arith.constant 0.000000e+00 : f32
    %160 = arith.subf %cst_91, %159 : f32
    %161 = arith.subf %149, %24 : vector<16x128xf32>
    %162 = vector.broadcast %5 : vector<16x1xf32> to vector<16x128xf32>
    %163 = arith.mulf %161, %162 : vector<16x128xf32>
    %cst_92 = arith.constant dense<0.000000e+00> : vector<128x128xf32>
    %164 = tpu.matmul %137, %163, %cst_92 {dimension_numbers = #tpu.dot_dimension_numbers<[0], [0], [1], [1], [0, 1, 1, 1], [], []>} : vector<16x128xf32>, vector<16x128xf32>, vector<128x128xf32> -> vector<128x128xf32>
    %cst_93 = arith.constant dense<0.000000e+00> : vector<128xf32>
    %165 = vector.multi_reduction <add>, %163, %cst_93 [0] : vector<16x128xf32> to vector<128xf32>
    %166 = vector.shape_cast %165 : vector<128xf32> to vector<1x128xf32>
    %cst_94 = arith.constant dense<0.000000e+00> : vector<16x128xf32>
    %167 = tpu.matmul %163, %125, %cst_94 {dimension_numbers = #tpu.dot_dimension_numbers<[1], [1], [0], [0], [0, 0, 1, 0], [], []>} : vector<16x128xf32>, vector<128x128xf32>, vector<16x128xf32> -> vector<16x128xf32>
    %cst_95 = arith.constant 0.000000e+00 : f32
    %168 = vector.broadcast %cst_95 : f32 to vector<16x128xf32>
    %169 = arith.cmpf ogt, %135, %168 : vector<16x128xf32>
    %cst_96 = arith.constant 0.000000e+00 : f32
    %170 = vector.broadcast %cst_96 : f32 to vector<16x128xf32>
    %171 = arith.select %169, %167, %170 : vector<16x128xi1>, vector<16x128xf32>
    %cst_97 = arith.constant dense<0.000000e+00> : vector<128x128xf32>
    %172 = tpu.matmul %132, %171, %cst_97 {dimension_numbers = #tpu.dot_dimension_numbers<[0], [0], [1], [1], [0, 1, 1, 1], [], []>} : vector<16x128xf32>, vector<16x128xf32>, vector<128x128xf32> -> vector<128x128xf32>
    %cst_98 = arith.constant dense<0.000000e+00> : vector<128xf32>
    %173 = vector.multi_reduction <add>, %171, %cst_98 [0] : vector<16x128xf32> to vector<128xf32>
    %174 = vector.shape_cast %173 : vector<128xf32> to vector<1x128xf32>
    %cst_99 = arith.constant dense<0.000000e+00> : vector<16x128xf32>
    %175 = tpu.matmul %171, %121, %cst_99 {dimension_numbers = #tpu.dot_dimension_numbers<[1], [1], [0], [0], [0, 0, 1, 0], [], []>} : vector<16x128xf32>, vector<128x128xf32>, vector<16x128xf32> -> vector<16x128xf32>
    %cst_100 = arith.constant 0.000000e+00 : f32
    %176 = vector.broadcast %cst_100 : f32 to vector<16x128xf32>
    %177 = arith.cmpf ogt, %130, %176 : vector<16x128xf32>
    %cst_101 = arith.constant 0.000000e+00 : f32
    %178 = vector.broadcast %cst_101 : f32 to vector<16x128xf32>
    %179 = arith.select %177, %175, %178 : vector<16x128xi1>, vector<16x128xf32>
    %cst_102 = arith.constant dense<0.000000e+00> : vector<128x128xf32>
    %180 = tpu.matmul %22, %179, %cst_102 {dimension_numbers = #tpu.dot_dimension_numbers<[0], [0], [1], [1], [0, 1, 1, 1], [], []>} : vector<16x128xf32>, vector<16x128xf32>, vector<128x128xf32> -> vector<128x128xf32>
    %cst_103 = arith.constant dense<0.000000e+00> : vector<128xf32>
    %181 = vector.multi_reduction <add>, %179, %cst_103 [0] : vector<16x128xf32> to vector<128xf32>
    %182 = vector.shape_cast %181 : vector<128xf32> to vector<1x128xf32>
    %cst_104 = arith.constant 0.00999999977 : f32
    %183 = vector.broadcast %cst_104 : f32 to vector<128x128xf32>
    %184 = arith.mulf %183, %180 : vector<128x128xf32>
    %185 = arith.subf %117, %184 : vector<128x128xf32>
    %c0_105 = arith.constant 0 : index
    %c0_106 = arith.constant 0 : index
    %c0_107 = arith.constant 0 : index
    %186 = vector.load %arg10[%c0_105, %c0_106, %c0_107] : memref<2x128x128xf32, #tpu.memory_space<vmem>>, vector<1x128x128xf32>
    %187 = vector.shape_cast %186 : vector<1x128x128xf32> to vector<128x128xf32>
    %188 = vector.shape_cast %185 : vector<128x128xf32> to vector<1x128x128xf32>
    tpu.vector_store %arg10[%c0_105, %c0_106, %c0_107], %188 {strides = array<i32>} : memref<2x128x128xf32, #tpu.memory_space<vmem>>, vector<1x128x128xf32>,
    %cst_108 = arith.constant 0.00999999977 : f32
    %189 = vector.broadcast %cst_108 : f32 to vector<1x128xf32>
    %190 = arith.mulf %189, %182 : vector<1x128xf32>
    %191 = arith.subf %119, %190 : vector<1x128xf32>
    %c0_109 = arith.constant 0 : index
    %c0_110 = arith.constant 0 : index
    %c0_111 = arith.constant 0 : index
    %192 = vector.load %arg11[%c0_109, %c0_110, %c0_111] : memref<2x1x128xf32, #tpu.memory_space<vmem>>, vector<1x1x128xf32>
    %193 = vector.shape_cast %192 : vector<1x1x128xf32> to vector<1x128xf32>
    %194 = vector.shape_cast %191 : vector<1x128xf32> to vector<1x1x128xf32>
    tpu.vector_store %arg11[%c0_109, %c0_110, %c0_111], %194 {strides = array<i32>} : memref<2x1x128xf32, #tpu.memory_space<vmem>>, vector<1x1x128xf32>,
    %cst_112 = arith.constant 0.00999999977 : f32
    %195 = vector.broadcast %cst_112 : f32 to vector<128x128xf32>
    %196 = arith.mulf %195, %172 : vector<128x128xf32>
    %197 = arith.subf %121, %196 : vector<128x128xf32>
    %c0_113 = arith.constant 0 : index
    %c0_114 = arith.constant 0 : index
    %c0_115 = arith.constant 0 : index
    %198 = vector.load %arg12[%c0_113, %c0_114, %c0_115] : memref<2x128x128xf32, #tpu.memory_space<vmem>>, vector<1x128x128xf32>
    %199 = vector.shape_cast %198 : vector<1x128x128xf32> to vector<128x128xf32>
    %200 = vector.shape_cast %197 : vector<128x128xf32> to vector<1x128x128xf32>
    tpu.vector_store %arg12[%c0_113, %c0_114, %c0_115], %200 {strides = array<i32>} : memref<2x128x128xf32, #tpu.memory_space<vmem>>, vector<1x128x128xf32>,
    %cst_116 = arith.constant 0.00999999977 : f32
    %201 = vector.broadcast %cst_116 : f32 to vector<1x128xf32>
    %202 = arith.mulf %201, %174 : vector<1x128xf32>
    %203 = arith.subf %123, %202 : vector<1x128xf32>
    %c0_117 = arith.constant 0 : index
    %c0_118 = arith.constant 0 : index
    %c0_119 = arith.constant 0 : index
    %204 = vector.load %arg13[%c0_117, %c0_118, %c0_119] : memref<2x1x128xf32, #tpu.memory_space<vmem>>, vector<1x1x128xf32>
    %205 = vector.shape_cast %204 : vector<1x1x128xf32> to vector<1x128xf32>
    %206 = vector.shape_cast %203 : vector<1x128xf32> to vector<1x1x128xf32>
    tpu.vector_store %arg13[%c0_117, %c0_118, %c0_119], %206 {strides = array<i32>} : memref<2x1x128xf32, #tpu.memory_space<vmem>>, vector<1x1x128xf32>,
    %cst_120 = arith.constant 0.00999999977 : f32
    %207 = vector.broadcast %cst_120 : f32 to vector<128x128xf32>
    %208 = arith.mulf %207, %164 : vector<128x128xf32>
    %209 = arith.subf %125, %208 : vector<128x128xf32>
    %c0_121 = arith.constant 0 : index
    %c0_122 = arith.constant 0 : index
    %c0_123 = arith.constant 0 : index
    %210 = vector.load %arg14[%c0_121, %c0_122, %c0_123] : memref<2x128x128xf32, #tpu.memory_space<vmem>>, vector<1x128x128xf32>
    %211 = vector.shape_cast %210 : vector<1x128x128xf32> to vector<128x128xf32>
    %212 = vector.shape_cast %209 : vector<128x128xf32> to vector<1x128x128xf32>
    tpu.vector_store %arg14[%c0_121, %c0_122, %c0_123], %212 {strides = array<i32>} : memref<2x128x128xf32, #tpu.memory_space<vmem>>, vector<1x128x128xf32>,
    %cst_124 = arith.constant 0.00999999977 : f32
    %213 = vector.broadcast %cst_124 : f32 to vector<1x128xf32>
    %214 = arith.mulf %213, %166 : vector<1x128xf32>
    %215 = arith.subf %127, %214 : vector<1x128xf32>
    %c0_125 = arith.constant 0 : index
    %c0_126 = arith.constant 0 : index
    %c0_127 = arith.constant 0 : index
    %216 = vector.load %arg15[%c0_125, %c0_126, %c0_127] : memref<2x1x128xf32, #tpu.memory_space<vmem>>, vector<1x1x128xf32>
    %217 = vector.shape_cast %216 : vector<1x1x128xf32> to vector<1x128xf32>
    %218 = vector.shape_cast %215 : vector<1x128xf32> to vector<1x1x128xf32>
    tpu.vector_store %arg15[%c0_125, %c0_126, %c0_127], %218 {strides = array<i32>} : memref<2x1x128xf32, #tpu.memory_space<vmem>>, vector<1x1x128xf32>,
    %c0_128 = arith.constant 0 : index
    %c0_129 = arith.constant 0 : index
    %c0_130 = arith.constant 0 : index
    %219 = vector.load %arg10[%c0_128, %c0_129, %c0_130] : memref<2x128x128xf32, #tpu.memory_space<vmem>>, vector<1x128x128xf32>
    %220 = vector.shape_cast %219 : vector<1x128x128xf32> to vector<128x128xf32>
    %c0_131 = arith.constant 0 : index
    %c0_132 = arith.constant 0 : index
    %c0_133 = arith.constant 0 : index
    %221 = vector.load %arg11[%c0_131, %c0_132, %c0_133] : memref<2x1x128xf32, #tpu.memory_space<vmem>>, vector<1x1x128xf32>
    %222 = vector.shape_cast %221 : vector<1x1x128xf32> to vector<1x128xf32>
    %c0_134 = arith.constant 0 : index
    %c0_135 = arith.constant 0 : index
    %c0_136 = arith.constant 0 : index
    %223 = vector.load %arg12[%c0_134, %c0_135, %c0_136] : memref<2x128x128xf32, #tpu.memory_space<vmem>>, vector<1x128x128xf32>
    %224 = vector.shape_cast %223 : vector<1x128x128xf32> to vector<128x128xf32>
    %c0_137 = arith.constant 0 : index
    %c0_138 = arith.constant 0 : index
    %c0_139 = arith.constant 0 : index
    %225 = vector.load %arg13[%c0_137, %c0_138, %c0_139] : memref<2x1x128xf32, #tpu.memory_space<vmem>>, vector<1x1x128xf32>
    %226 = vector.shape_cast %225 : vector<1x1x128xf32> to vector<1x128xf32>
    %c0_140 = arith.constant 0 : index
    %c0_141 = arith.constant 0 : index
    %c0_142 = arith.constant 0 : index
    %227 = vector.load %arg14[%c0_140, %c0_141, %c0_142] : memref<2x128x128xf32, #tpu.memory_space<vmem>>, vector<1x128x128xf32>
    %228 = vector.shape_cast %227 : vector<1x128x128xf32> to vector<128x128xf32>
    %c0_143 = arith.constant 0 : index
    %c0_144 = arith.constant 0 : index
    %c0_145 = arith.constant 0 : index
    %229 = vector.load %arg15[%c0_143, %c0_144, %c0_145] : memref<2x1x128xf32, #tpu.memory_space<vmem>>, vector<1x1x128xf32>
    %230 = vector.shape_cast %229 : vector<1x1x128xf32> to vector<1x128xf32>
    %cst_146 = arith.constant dense<0.000000e+00> : vector<16x128xf32>
    %231 = tpu.matmul %22, %220, %cst_146 {dimension_numbers = #tpu.dot_dimension_numbers<[1], [0], [0], [1], [0, 0, 1, 1], [], []>} : vector<16x128xf32>, vector<128x128xf32>, vector<16x128xf32> -> vector<16x128xf32>
    %232 = vector.broadcast %222 : vector<1x128xf32> to vector<16x128xf32>
    %233 = arith.addf %231, %232 : vector<16x128xf32>
    %cst_147 = arith.constant 0.000000e+00 : f32
    %234 = vector.broadcast %cst_147 : f32 to vector<16x128xf32>
    %235 = arith.maximumf %233, %234 : vector<16x128xf32>
    %cst_148 = arith.constant dense<0.000000e+00> : vector<16x128xf32>
    %236 = tpu.matmul %235, %224, %cst_148 {dimension_numbers = #tpu.dot_dimension_numbers<[1], [0], [0], [1], [0, 0, 1, 1], [], []>} : vector<16x128xf32>, vector<128x128xf32>, vector<16x128xf32> -> vector<16x128xf32>
    %237 = vector.broadcast %226 : vector<1x128xf32> to vector<16x128xf32>
    %238 = arith.addf %236, %237 : vector<16x128xf32>
    %cst_149 = arith.constant 0.000000e+00 : f32
    %239 = vector.broadcast %cst_149 : f32 to vector<16x128xf32>
    %240 = arith.maximumf %238, %239 : vector<16x128xf32>
    %cst_150 = arith.constant dense<0.000000e+00> : vector<16x128xf32>
    %241 = tpu.matmul %240, %228, %cst_150 {dimension_numbers = #tpu.dot_dimension_numbers<[1], [0], [0], [1], [0, 0, 1, 1], [], []>} : vector<16x128xf32>, vector<128x128xf32>, vector<16x128xf32> -> vector<16x128xf32>
    %242 = vector.broadcast %230 : vector<1x128xf32> to vector<16x128xf32>
    %243 = arith.addf %241, %242 : vector<16x128xf32>
    %cst_151 = arith.constant dense<0xFF800000> : vector<16xf32>
    %244 = vector.multi_reduction <maximumf>, %243, %cst_151 [1] : vector<16x128xf32> to vector<16xf32>
    %245 = vector.shape_cast %244 : vector<16xf32> to vector<16x1xf32>
    %246 = vector.broadcast %245 : vector<16x1xf32> to vector<16x128xf32>
    %247 = arith.subf %243, %246 : vector<16x128xf32>
    %248 = math.exp %247 : vector<16x128xf32>
    %cst_152 = arith.constant dense<0.000000e+00> : vector<16xf32>
    %249 = vector.multi_reduction <add>, %248, %cst_152 [1] : vector<16x128xf32> to vector<16xf32>
    %250 = vector.shape_cast %249 : vector<16xf32> to vector<16x1xf32>
    %251 = vector.broadcast %250 : vector<16x1xf32> to vector<16x128xf32>
    %252 = arith.divf %248, %251 : vector<16x128xf32>
    %253 = math.log %250 : vector<16x1xf32>
    %254 = vector.broadcast %253 : vector<16x1xf32> to vector<16x128xf32>
    %255 = arith.subf %247, %254 : vector<16x128xf32>
    %256 = arith.mulf %24, %255 : vector<16x128xf32>
    %257 = vector.broadcast %13 : vector<16x1xf32> to vector<16x128xf32>
    %258 = arith.mulf %256, %257 : vector<16x128xf32>
    %259 = vector.shape_cast %258 : vector<16x128xf32> to vector<1x16x128xf32>
    %cst_153 = arith.constant dense<0.000000e+00> : vector<1xf32>
    %260 = vector.multi_reduction <add>, %259, %cst_153 [1, 2] : vector<1x16x128xf32> to vector<1xf32>
    %261 = vector.shape_cast %260 : vector<1xf32> to vector<1x1x1xf32>
    %262 = vector.extract %261[0, 0, 0] : f32 from vector<1x1x1xf32>
    %cst_154 = arith.constant 0.000000e+00 : f32
    %263 = arith.subf %cst_154, %262 : f32
    %264 = arith.subf %252, %24 : vector<16x128xf32>
    %265 = vector.broadcast %5 : vector<16x1xf32> to vector<16x128xf32>
    %266 = arith.mulf %264, %265 : vector<16x128xf32>
    %cst_155 = arith.constant dense<0.000000e+00> : vector<128x128xf32>
    %267 = tpu.matmul %240, %266, %cst_155 {dimension_numbers = #tpu.dot_dimension_numbers<[0], [0], [1], [1], [0, 1, 1, 1], [], []>} : vector<16x128xf32>, vector<16x128xf32>, vector<128x128xf32> -> vector<128x128xf32>
    %cst_156 = arith.constant dense<0.000000e+00> : vector<128xf32>
    %268 = vector.multi_reduction <add>, %266, %cst_156 [0] : vector<16x128xf32> to vector<128xf32>
    %269 = vector.shape_cast %268 : vector<128xf32> to vector<1x128xf32>
    %cst_157 = arith.constant dense<0.000000e+00> : vector<16x128xf32>
    %270 = tpu.matmul %266, %228, %cst_157 {dimension_numbers = #tpu.dot_dimension_numbers<[1], [1], [0], [0], [0, 0, 1, 0], [], []>} : vector<16x128xf32>, vector<128x128xf32>, vector<16x128xf32> -> vector<16x128xf32>
    %cst_158 = arith.constant 0.000000e+00 : f32
    %271 = vector.broadcast %cst_158 : f32 to vector<16x128xf32>
    %272 = arith.cmpf ogt, %238, %271 : vector<16x128xf32>
    %cst_159 = arith.constant 0.000000e+00 : f32
    %273 = vector.broadcast %cst_159 : f32 to vector<16x128xf32>
    %274 = arith.select %272, %270, %273 : vector<16x128xi1>, vector<16x128xf32>
    %cst_160 = arith.constant dense<0.000000e+00> : vector<128x128xf32>
    %275 = tpu.matmul %235, %274, %cst_160 {dimension_numbers = #tpu.dot_dimension_numbers<[0], [0], [1], [1], [0, 1, 1, 1], [], []>} : vector<16x128xf32>, vector<16x128xf32>, vector<128x128xf32> -> vector<128x128xf32>
    %cst_161 = arith.constant dense<0.000000e+00> : vector<128xf32>
    %276 = vector.multi_reduction <add>, %274, %cst_161 [0] : vector<16x128xf32> to vector<128xf32>
    %277 = vector.shape_cast %276 : vector<128xf32> to vector<1x128xf32>
    %cst_162 = arith.constant dense<0.000000e+00> : vector<16x128xf32>
    %278 = tpu.matmul %274, %224, %cst_162 {dimension_numbers = #tpu.dot_dimension_numbers<[1], [1], [0], [0], [0, 0, 1, 0], [], []>} : vector<16x128xf32>, vector<128x128xf32>, vector<16x128xf32> -> vector<16x128xf32>
    %cst_163 = arith.constant 0.000000e+00 : f32
    %279 = vector.broadcast %cst_163 : f32 to vector<16x128xf32>
    %280 = arith.cmpf ogt, %233, %279 : vector<16x128xf32>
    %cst_164 = arith.constant 0.000000e+00 : f32
    %281 = vector.broadcast %cst_164 : f32 to vector<16x128xf32>
    %282 = arith.select %280, %278, %281 : vector<16x128xi1>, vector<16x128xf32>
    %cst_165 = arith.constant dense<0.000000e+00> : vector<128x128xf32>
    %283 = tpu.matmul %22, %282, %cst_165 {dimension_numbers = #tpu.dot_dimension_numbers<[0], [0], [1], [1], [0, 1, 1, 1], [], []>} : vector<16x128xf32>, vector<16x128xf32>, vector<128x128xf32> -> vector<128x128xf32>
    %cst_166 = arith.constant dense<0.000000e+00> : vector<128xf32>
    %284 = vector.multi_reduction <add>, %282, %cst_166 [0] : vector<16x128xf32> to vector<128xf32>
    %285 = vector.shape_cast %284 : vector<128xf32> to vector<1x128xf32>
    %cst_167 = arith.constant 0.00999999977 : f32
    %286 = vector.broadcast %cst_167 : f32 to vector<128x128xf32>
    %287 = arith.mulf %286, %283 : vector<128x128xf32>
    %288 = arith.subf %220, %287 : vector<128x128xf32>
    %c0_168 = arith.constant 0 : index
    %c0_169 = arith.constant 0 : index
    %c0_170 = arith.constant 0 : index
    %289 = vector.load %arg10[%c0_168, %c0_169, %c0_170] : memref<2x128x128xf32, #tpu.memory_space<vmem>>, vector<1x128x128xf32>
    %290 = vector.shape_cast %289 : vector<1x128x128xf32> to vector<128x128xf32>
    %291 = vector.shape_cast %288 : vector<128x128xf32> to vector<1x128x128xf32>
    tpu.vector_store %arg10[%c0_168, %c0_169, %c0_170], %291 {strides = array<i32>} : memref<2x128x128xf32, #tpu.memory_space<vmem>>, vector<1x128x128xf32>,
    %cst_171 = arith.constant 0.00999999977 : f32
    %292 = vector.broadcast %cst_171 : f32 to vector<1x128xf32>
    %293 = arith.mulf %292, %285 : vector<1x128xf32>
    %294 = arith.subf %222, %293 : vector<1x128xf32>
    %c0_172 = arith.constant 0 : index
    %c0_173 = arith.constant 0 : index
    %c0_174 = arith.constant 0 : index
    %295 = vector.load %arg11[%c0_172, %c0_173, %c0_174] : memref<2x1x128xf32, #tpu.memory_space<vmem>>, vector<1x1x128xf32>
    %296 = vector.shape_cast %295 : vector<1x1x128xf32> to vector<1x128xf32>
    %297 = vector.shape_cast %294 : vector<1x128xf32> to vector<1x1x128xf32>
    tpu.vector_store %arg11[%c0_172, %c0_173, %c0_174], %297 {strides = array<i32>} : memref<2x1x128xf32, #tpu.memory_space<vmem>>, vector<1x1x128xf32>,
    %cst_175 = arith.constant 0.00999999977 : f32
    %298 = vector.broadcast %cst_175 : f32 to vector<128x128xf32>
    %299 = arith.mulf %298, %275 : vector<128x128xf32>
    %300 = arith.subf %224, %299 : vector<128x128xf32>
    %c0_176 = arith.constant 0 : index
    %c0_177 = arith.constant 0 : index
    %c0_178 = arith.constant 0 : index
    %301 = vector.load %arg12[%c0_176, %c0_177, %c0_178] : memref<2x128x128xf32, #tpu.memory_space<vmem>>, vector<1x128x128xf32>
    %302 = vector.shape_cast %301 : vector<1x128x128xf32> to vector<128x128xf32>
    %303 = vector.shape_cast %300 : vector<128x128xf32> to vector<1x128x128xf32>
    tpu.vector_store %arg12[%c0_176, %c0_177, %c0_178], %303 {strides = array<i32>} : memref<2x128x128xf32, #tpu.memory_space<vmem>>, vector<1x128x128xf32>,
    %cst_179 = arith.constant 0.00999999977 : f32
    %304 = vector.broadcast %cst_179 : f32 to vector<1x128xf32>
    %305 = arith.mulf %304, %277 : vector<1x128xf32>
    %306 = arith.subf %226, %305 : vector<1x128xf32>
    %c0_180 = arith.constant 0 : index
    %c0_181 = arith.constant 0 : index
    %c0_182 = arith.constant 0 : index
    %307 = vector.load %arg13[%c0_180, %c0_181, %c0_182] : memref<2x1x128xf32, #tpu.memory_space<vmem>>, vector<1x1x128xf32>
    %308 = vector.shape_cast %307 : vector<1x1x128xf32> to vector<1x128xf32>
    %309 = vector.shape_cast %306 : vector<1x128xf32> to vector<1x1x128xf32>
    tpu.vector_store %arg13[%c0_180, %c0_181, %c0_182], %309 {strides = array<i32>} : memref<2x1x128xf32, #tpu.memory_space<vmem>>, vector<1x1x128xf32>,
    %cst_183 = arith.constant 0.00999999977 : f32
    %310 = vector.broadcast %cst_183 : f32 to vector<128x128xf32>
    %311 = arith.mulf %310, %267 : vector<128x128xf32>
    %312 = arith.subf %228, %311 : vector<128x128xf32>
    %c0_184 = arith.constant 0 : index
    %c0_185 = arith.constant 0 : index
    %c0_186 = arith.constant 0 : index
    %313 = vector.load %arg14[%c0_184, %c0_185, %c0_186] : memref<2x128x128xf32, #tpu.memory_space<vmem>>, vector<1x128x128xf32>
    %314 = vector.shape_cast %313 : vector<1x128x128xf32> to vector<128x128xf32>
    %315 = vector.shape_cast %312 : vector<128x128xf32> to vector<1x128x128xf32>
    tpu.vector_store %arg14[%c0_184, %c0_185, %c0_186], %315 {strides = array<i32>} : memref<2x128x128xf32, #tpu.memory_space<vmem>>, vector<1x128x128xf32>,
    %cst_187 = arith.constant 0.00999999977 : f32
    %316 = vector.broadcast %cst_187 : f32 to vector<1x128xf32>
    %317 = arith.mulf %316, %269 : vector<1x128xf32>
    %318 = arith.subf %230, %317 : vector<1x128xf32>
    %c0_188 = arith.constant 0 : index
    %c0_189 = arith.constant 0 : index
    %c0_190 = arith.constant 0 : index
    %319 = vector.load %arg15[%c0_188, %c0_189, %c0_190] : memref<2x1x128xf32, #tpu.memory_space<vmem>>, vector<1x1x128xf32>
    %320 = vector.shape_cast %319 : vector<1x1x128xf32> to vector<1x128xf32>
    %321 = vector.shape_cast %318 : vector<1x128xf32> to vector<1x1x128xf32>
    tpu.vector_store %arg15[%c0_188, %c0_189, %c0_190], %321 {strides = array<i32>} : memref<2x1x128xf32, #tpu.memory_space<vmem>>, vector<1x1x128xf32>,
    %c0_191 = arith.constant 0 : index
    %c0_192 = arith.constant 0 : index
    %c0_193 = arith.constant 0 : index
    %322 = vector.load %arg10[%c0_191, %c0_192, %c0_193] : memref<2x128x128xf32, #tpu.memory_space<vmem>>, vector<1x128x128xf32>
    %323 = vector.shape_cast %322 : vector<1x128x128xf32> to vector<128x128xf32>
    %c0_194 = arith.constant 0 : index
    %c0_195 = arith.constant 0 : index
    %c0_196 = arith.constant 0 : index
    %324 = vector.load %arg11[%c0_194, %c0_195, %c0_196] : memref<2x1x128xf32, #tpu.memory_space<vmem>>, vector<1x1x128xf32>
    %325 = vector.shape_cast %324 : vector<1x1x128xf32> to vector<1x128xf32>
    %c0_197 = arith.constant 0 : index
    %c0_198 = arith.constant 0 : index
    %c0_199 = arith.constant 0 : index
    %326 = vector.load %arg12[%c0_197, %c0_198, %c0_199] : memref<2x128x128xf32, #tpu.memory_space<vmem>>, vector<1x128x128xf32>
    %327 = vector.shape_cast %326 : vector<1x128x128xf32> to vector<128x128xf32>
    %c0_200 = arith.constant 0 : index
    %c0_201 = arith.constant 0 : index
    %c0_202 = arith.constant 0 : index
    %328 = vector.load %arg13[%c0_200, %c0_201, %c0_202] : memref<2x1x128xf32, #tpu.memory_space<vmem>>, vector<1x1x128xf32>
    %329 = vector.shape_cast %328 : vector<1x1x128xf32> to vector<1x128xf32>
    %c0_203 = arith.constant 0 : index
    %c0_204 = arith.constant 0 : index
    %c0_205 = arith.constant 0 : index
    %330 = vector.load %arg14[%c0_203, %c0_204, %c0_205] : memref<2x128x128xf32, #tpu.memory_space<vmem>>, vector<1x128x128xf32>
    %331 = vector.shape_cast %330 : vector<1x128x128xf32> to vector<128x128xf32>
    %c0_206 = arith.constant 0 : index
    %c0_207 = arith.constant 0 : index
    %c0_208 = arith.constant 0 : index
    %332 = vector.load %arg15[%c0_206, %c0_207, %c0_208] : memref<2x1x128xf32, #tpu.memory_space<vmem>>, vector<1x1x128xf32>
    %333 = vector.shape_cast %332 : vector<1x1x128xf32> to vector<1x128xf32>
    %cst_209 = arith.constant dense<0.000000e+00> : vector<16x128xf32>
    %334 = tpu.matmul %22, %323, %cst_209 {dimension_numbers = #tpu.dot_dimension_numbers<[1], [0], [0], [1], [0, 0, 1, 1], [], []>} : vector<16x128xf32>, vector<128x128xf32>, vector<16x128xf32> -> vector<16x128xf32>
    %335 = vector.broadcast %325 : vector<1x128xf32> to vector<16x128xf32>
    %336 = arith.addf %334, %335 : vector<16x128xf32>
    %cst_210 = arith.constant 0.000000e+00 : f32
    %337 = vector.broadcast %cst_210 : f32 to vector<16x128xf32>
    %338 = arith.maximumf %336, %337 : vector<16x128xf32>
    %cst_211 = arith.constant dense<0.000000e+00> : vector<16x128xf32>
    %339 = tpu.matmul %338, %327, %cst_211 {dimension_numbers = #tpu.dot_dimension_numbers<[1], [0], [0], [1], [0, 0, 1, 1], [], []>} : vector<16x128xf32>, vector<128x128xf32>, vector<16x128xf32> -> vector<16x128xf32>
    %340 = vector.broadcast %329 : vector<1x128xf32> to vector<16x128xf32>
    %341 = arith.addf %339, %340 : vector<16x128xf32>
    %cst_212 = arith.constant 0.000000e+00 : f32
    %342 = vector.broadcast %cst_212 : f32 to vector<16x128xf32>
    %343 = arith.maximumf %341, %342 : vector<16x128xf32>
    %cst_213 = arith.constant dense<0.000000e+00> : vector<16x128xf32>
    %344 = tpu.matmul %343, %331, %cst_213 {dimension_numbers = #tpu.dot_dimension_numbers<[1], [0], [0], [1], [0, 0, 1, 1], [], []>} : vector<16x128xf32>, vector<128x128xf32>, vector<16x128xf32> -> vector<16x128xf32>
    %345 = vector.broadcast %333 : vector<1x128xf32> to vector<16x128xf32>
    %346 = arith.addf %344, %345 : vector<16x128xf32>
    %cst_214 = arith.constant dense<0xFF800000> : vector<16xf32>
    %347 = vector.multi_reduction <maximumf>, %346, %cst_214 [1] : vector<16x128xf32> to vector<16xf32>
    %348 = vector.shape_cast %347 : vector<16xf32> to vector<16x1xf32>
    %349 = vector.broadcast %348 : vector<16x1xf32> to vector<16x128xf32>
    %350 = arith.subf %346, %349 : vector<16x128xf32>
    %351 = math.exp %350 : vector<16x128xf32>
    %cst_215 = arith.constant dense<0.000000e+00> : vector<16xf32>
    %352 = vector.multi_reduction <add>, %351, %cst_215 [1] : vector<16x128xf32> to vector<16xf32>
    %353 = vector.shape_cast %352 : vector<16xf32> to vector<16x1xf32>
    %354 = math.log %353 : vector<16x1xf32>
    %355 = vector.broadcast %354 : vector<16x1xf32> to vector<16x128xf32>
    %356 = arith.subf %350, %355 : vector<16x128xf32>
    %357 = arith.mulf %24, %356 : vector<16x128xf32>
    %358 = vector.broadcast %13 : vector<16x1xf32> to vector<16x128xf32>
    %359 = arith.mulf %357, %358 : vector<16x128xf32>
    %360 = vector.shape_cast %359 : vector<16x128xf32> to vector<1x16x128xf32>
    %cst_216 = arith.constant dense<0.000000e+00> : vector<1xf32>
    %361 = vector.multi_reduction <add>, %360, %cst_216 [1, 2] : vector<1x16x128xf32> to vector<1xf32>
    %362 = vector.shape_cast %361 : vector<1xf32> to vector<1x1x1xf32>
    %363 = vector.extract %362[0, 0, 0] : f32 from vector<1x1x1xf32>
    %cst_217 = arith.constant 0.000000e+00 : f32
    %364 = arith.subf %cst_217, %363 : f32
    %c0_218 = arith.constant 0 : index
    %c0_219 = arith.constant 0 : index
    %c0_220 = arith.constant 0 : index
    %365 = vector.load %arg8[%c0_218, %c0_219, %c0_220] : memref<2x16x128xf32, #tpu.memory_space<vmem>>, vector<1x16x128xf32>
    %366 = vector.shape_cast %365 : vector<1x16x128xf32> to vector<16x128xf32>
    %367 = vector.shape_cast %346 : vector<16x128xf32> to vector<1x16x128xf32>
    tpu.vector_store %arg8[%c0_218, %c0_219, %c0_220], %367 {strides = array<i32>} : memref<2x16x128xf32, #tpu.memory_space<vmem>>, vector<1x16x128xf32>,
    %cst_221 = arith.constant 0.000000e+00 : f32
    %368 = vector.broadcast %cst_221 : f32 to vector<1x128xf32>
    %c0_i32 = arith.constant 0 : i32
    %369 = vector.broadcast %c0_i32 : i32 to vector<1x128xi32>
    %370 = arith.cmpi eq, %14, %369 : vector<1x128xi32>
    %cst_222 = arith.constant 0.000000e+00 : f32
    %371 = vector.broadcast %57 : f32 to vector<1x128xf32>
    %372 = vector.broadcast %cst_222 : f32 to vector<1x128xf32>
    %373 = arith.select %370, %371, %372 : vector<1x128xi1>, vector<1x128xf32>
    %374 = arith.addf %368, %373 : vector<1x128xf32>
    %c1_i32 = arith.constant 1 : i32
    %375 = vector.broadcast %c1_i32 : i32 to vector<1x128xi32>
    %376 = arith.cmpi eq, %14, %375 : vector<1x128xi32>
    %cst_223 = arith.constant 0.000000e+00 : f32
    %377 = vector.broadcast %160 : f32 to vector<1x128xf32>
    %378 = vector.broadcast %cst_223 : f32 to vector<1x128xf32>
    %379 = arith.select %376, %377, %378 : vector<1x128xi1>, vector<1x128xf32>
    %380 = arith.addf %374, %379 : vector<1x128xf32>
    %c2_i32 = arith.constant 2 : i32
    %381 = vector.broadcast %c2_i32 : i32 to vector<1x128xi32>
    %382 = arith.cmpi eq, %14, %381 : vector<1x128xi32>
    %cst_224 = arith.constant 0.000000e+00 : f32
    %383 = vector.broadcast %263 : f32 to vector<1x128xf32>
    %384 = vector.broadcast %cst_224 : f32 to vector<1x128xf32>
    %385 = arith.select %382, %383, %384 : vector<1x128xi1>, vector<1x128xf32>
    %386 = arith.addf %380, %385 : vector<1x128xf32>
    %c3_i32 = arith.constant 3 : i32
    %387 = vector.broadcast %c3_i32 : i32 to vector<1x128xi32>
    %388 = arith.cmpi eq, %14, %387 : vector<1x128xi32>
    %cst_225 = arith.constant 0.000000e+00 : f32
    %389 = vector.broadcast %364 : f32 to vector<1x128xf32>
    %390 = vector.broadcast %cst_225 : f32 to vector<1x128xf32>
    %391 = arith.select %388, %389, %390 : vector<1x128xi1>, vector<1x128xf32>
    %392 = arith.addf %386, %391 : vector<1x128xf32>
    %c0_226 = arith.constant 0 : index
    %c0_227 = arith.constant 0 : index
    %c0_228 = arith.constant 0 : index
    %393 = vector.load %arg9[%c0_226, %c0_227, %c0_228] : memref<2x1x128xf32, #tpu.memory_space<vmem>>, vector<1x1x128xf32>
    %394 = vector.shape_cast %393 : vector<1x1x128xf32> to vector<1x128xf32>
    %395 = vector.shape_cast %392 : vector<1x128xf32> to vector<1x1x128xf32>
    tpu.vector_store %arg9[%c0_226, %c0_227, %c0_228], %395 {strides = array<i32>} : memref<2x1x128xf32, #tpu.memory_space<vmem>>, vector<1x1x128xf32>,
    %c1 = arith.constant 1 : index
    %c0_229 = arith.constant 0 : index
    %c0_230 = arith.constant 0 : index
    %396 = vector.load %arg1[%c1, %c0_229, %c0_230] : memref<2x32x128xf32, #tpu.memory_space<vmem>>, vector<1x16x128xf32>
    %397 = vector.shape_cast %396 : vector<1x16x128xf32> to vector<16x128xf32>
    %c1_231 = arith.constant 1 : index
    %c16_232 = arith.constant 16 : index
    %c0_233 = arith.constant 0 : index
    %398 = vector.load %arg1[%c1_231, %c16_232, %c0_233] : memref<2x32x128xf32, #tpu.memory_space<vmem>>, vector<1x16x128xf32>
    %399 = vector.shape_cast %398 : vector<1x16x128xf32> to vector<16x128xf32>
    %cst_234 = arith.constant dense<0.000000e+00> : vector<16x128xf32>
    %400 = tpu.matmul %397, %15, %cst_234 {dimension_numbers = #tpu.dot_dimension_numbers<[1], [0], [0], [1], [0, 0, 1, 1], [], []>} : vector<16x128xf32>, vector<128x128xf32>, vector<16x128xf32> -> vector<16x128xf32>
    %401 = vector.broadcast %16 : vector<1x128xf32> to vector<16x128xf32>
    %402 = arith.addf %400, %401 : vector<16x128xf32>
    %cst_235 = arith.constant 0.000000e+00 : f32
    %403 = vector.broadcast %cst_235 : f32 to vector<16x128xf32>
    %404 = arith.maximumf %402, %403 : vector<16x128xf32>
    %cst_236 = arith.constant dense<0.000000e+00> : vector<16x128xf32>
    %405 = tpu.matmul %404, %17, %cst_236 {dimension_numbers = #tpu.dot_dimension_numbers<[1], [0], [0], [1], [0, 0, 1, 1], [], []>} : vector<16x128xf32>, vector<128x128xf32>, vector<16x128xf32> -> vector<16x128xf32>
    %406 = vector.broadcast %18 : vector<1x128xf32> to vector<16x128xf32>
    %407 = arith.addf %405, %406 : vector<16x128xf32>
    %cst_237 = arith.constant 0.000000e+00 : f32
    %408 = vector.broadcast %cst_237 : f32 to vector<16x128xf32>
    %409 = arith.maximumf %407, %408 : vector<16x128xf32>
    %cst_238 = arith.constant dense<0.000000e+00> : vector<16x128xf32>
    %410 = tpu.matmul %409, %19, %cst_238 {dimension_numbers = #tpu.dot_dimension_numbers<[1], [0], [0], [1], [0, 0, 1, 1], [], []>} : vector<16x128xf32>, vector<128x128xf32>, vector<16x128xf32> -> vector<16x128xf32>
    %411 = vector.broadcast %20 : vector<1x128xf32> to vector<16x128xf32>
    %412 = arith.addf %410, %411 : vector<16x128xf32>
    %cst_239 = arith.constant dense<0xFF800000> : vector<16xf32>
    %413 = vector.multi_reduction <maximumf>, %412, %cst_239 [1] : vector<16x128xf32> to vector<16xf32>
    %414 = vector.shape_cast %413 : vector<16xf32> to vector<16x1xf32>
    %415 = vector.broadcast %414 : vector<16x1xf32> to vector<16x128xf32>
    %416 = arith.subf %412, %415 : vector<16x128xf32>
    %417 = math.exp %416 : vector<16x128xf32>
    %cst_240 = arith.constant dense<0.000000e+00> : vector<16xf32>
    %418 = vector.multi_reduction <add>, %417, %cst_240 [1] : vector<16x128xf32> to vector<16xf32>
    %419 = vector.shape_cast %418 : vector<16xf32> to vector<16x1xf32>
    %420 = vector.broadcast %419 : vector<16x1xf32> to vector<16x128xf32>
    %421 = arith.divf %417, %420 : vector<16x128xf32>
    %422 = math.log %419 : vector<16x1xf32>
    %423 = vector.broadcast %422 : vector<16x1xf32> to vector<16x128xf32>
    %424 = arith.subf %416, %423 : vector<16x128xf32>
    %425 = arith.mulf %399, %424 : vector<16x128xf32>
    %426 = vector.broadcast %13 : vector<16x1xf32> to vector<16x128xf32>
    %427 = arith.mulf %425, %426 : vector<16x128xf32>
    %428 = vector.shape_cast %427 : vector<16x128xf32> to vector<1x16x128xf32>
    %cst_241 = arith.constant dense<0.000000e+00> : vector<1xf32>
    %429 = vector.multi_reduction <add>, %428, %cst_241 [1, 2] : vector<1x16x128xf32> to vector<1xf32>
    %430 = vector.shape_cast %429 : vector<1xf32> to vector<1x1x1xf32>
    %431 = vector.extract %430[0, 0, 0] : f32 from vector<1x1x1xf32>
    %cst_242 = arith.constant 0.000000e+00 : f32
    %432 = arith.subf %cst_242, %431 : f32
    %433 = arith.subf %421, %399 : vector<16x128xf32>
    %434 = vector.broadcast %5 : vector<16x1xf32> to vector<16x128xf32>
    %435 = arith.mulf %433, %434 : vector<16x128xf32>
    %cst_243 = arith.constant dense<0.000000e+00> : vector<128x128xf32>
    %436 = tpu.matmul %409, %435, %cst_243 {dimension_numbers = #tpu.dot_dimension_numbers<[0], [0], [1], [1], [0, 1, 1, 1], [], []>} : vector<16x128xf32>, vector<16x128xf32>, vector<128x128xf32> -> vector<128x128xf32>
    %cst_244 = arith.constant dense<0.000000e+00> : vector<128xf32>
    %437 = vector.multi_reduction <add>, %435, %cst_244 [0] : vector<16x128xf32> to vector<128xf32>
    %438 = vector.shape_cast %437 : vector<128xf32> to vector<1x128xf32>
    %cst_245 = arith.constant dense<0.000000e+00> : vector<16x128xf32>
    %439 = tpu.matmul %435, %19, %cst_245 {dimension_numbers = #tpu.dot_dimension_numbers<[1], [1], [0], [0], [0, 0, 1, 0], [], []>} : vector<16x128xf32>, vector<128x128xf32>, vector<16x128xf32> -> vector<16x128xf32>
    %cst_246 = arith.constant 0.000000e+00 : f32
    %440 = vector.broadcast %cst_246 : f32 to vector<16x128xf32>
    %441 = arith.cmpf ogt, %407, %440 : vector<16x128xf32>
    %cst_247 = arith.constant 0.000000e+00 : f32
    %442 = vector.broadcast %cst_247 : f32 to vector<16x128xf32>
    %443 = arith.select %441, %439, %442 : vector<16x128xi1>, vector<16x128xf32>
    %cst_248 = arith.constant dense<0.000000e+00> : vector<128x128xf32>
    %444 = tpu.matmul %404, %443, %cst_248 {dimension_numbers = #tpu.dot_dimension_numbers<[0], [0], [1], [1], [0, 1, 1, 1], [], []>} : vector<16x128xf32>, vector<16x128xf32>, vector<128x128xf32> -> vector<128x128xf32>
    %cst_249 = arith.constant dense<0.000000e+00> : vector<128xf32>
    %445 = vector.multi_reduction <add>, %443, %cst_249 [0] : vector<16x128xf32> to vector<128xf32>
    %446 = vector.shape_cast %445 : vector<128xf32> to vector<1x128xf32>
    %cst_250 = arith.constant dense<0.000000e+00> : vector<16x128xf32>
    %447 = tpu.matmul %443, %17, %cst_250 {dimension_numbers = #tpu.dot_dimension_numbers<[1], [1], [0], [0], [0, 0, 1, 0], [], []>} : vector<16x128xf32>, vector<128x128xf32>, vector<16x128xf32> -> vector<16x128xf32>
    %cst_251 = arith.constant 0.000000e+00 : f32
    %448 = vector.broadcast %cst_251 : f32 to vector<16x128xf32>
    %449 = arith.cmpf ogt, %402, %448 : vector<16x128xf32>
    %cst_252 = arith.constant 0.000000e+00 : f32
    %450 = vector.broadcast %cst_252 : f32 to vector<16x128xf32>
    %451 = arith.select %449, %447, %450 : vector<16x128xi1>, vector<16x128xf32>
    %cst_253 = arith.constant dense<0.000000e+00> : vector<128x128xf32>
    %452 = tpu.matmul %397, %451, %cst_253 {dimension_numbers = #tpu.dot_dimension_numbers<[0], [0], [1], [1], [0, 1, 1, 1], [], []>} : vector<16x128xf32>, vector<16x128xf32>, vector<128x128xf32> -> vector<128x128xf32>
    %cst_254 = arith.constant dense<0.000000e+00> : vector<128xf32>
    %453 = vector.multi_reduction <add>, %451, %cst_254 [0] : vector<16x128xf32> to vector<128xf32>
    %454 = vector.shape_cast %453 : vector<128xf32> to vector<1x128xf32>
    %cst_255 = arith.constant 0.00999999977 : f32
    %455 = vector.broadcast %cst_255 : f32 to vector<128x128xf32>
    %456 = arith.mulf %455, %452 : vector<128x128xf32>
    %457 = arith.subf %15, %456 : vector<128x128xf32>
    %c1_256 = arith.constant 1 : index
    %c0_257 = arith.constant 0 : index
    %c0_258 = arith.constant 0 : index
    %458 = vector.load %arg10[%c1_256, %c0_257, %c0_258] : memref<2x128x128xf32, #tpu.memory_space<vmem>>, vector<1x128x128xf32>
    %459 = vector.shape_cast %458 : vector<1x128x128xf32> to vector<128x128xf32>
    %460 = vector.shape_cast %457 : vector<128x128xf32> to vector<1x128x128xf32>
    tpu.vector_store %arg10[%c1_256, %c0_257, %c0_258], %460 {strides = array<i32>} : memref<2x128x128xf32, #tpu.memory_space<vmem>>, vector<1x128x128xf32>,
    %cst_259 = arith.constant 0.00999999977 : f32
    %461 = vector.broadcast %cst_259 : f32 to vector<1x128xf32>
    %462 = arith.mulf %461, %454 : vector<1x128xf32>
    %463 = arith.subf %16, %462 : vector<1x128xf32>
    %c1_260 = arith.constant 1 : index
    %c0_261 = arith.constant 0 : index
    %c0_262 = arith.constant 0 : index
    %464 = vector.load %arg11[%c1_260, %c0_261, %c0_262] : memref<2x1x128xf32, #tpu.memory_space<vmem>>, vector<1x1x128xf32>
    %465 = vector.shape_cast %464 : vector<1x1x128xf32> to vector<1x128xf32>
    %466 = vector.shape_cast %463 : vector<1x128xf32> to vector<1x1x128xf32>
    tpu.vector_store %arg11[%c1_260, %c0_261, %c0_262], %466 {strides = array<i32>} : memref<2x1x128xf32, #tpu.memory_space<vmem>>, vector<1x1x128xf32>,
    %cst_263 = arith.constant 0.00999999977 : f32
    %467 = vector.broadcast %cst_263 : f32 to vector<128x128xf32>
    %468 = arith.mulf %467, %444 : vector<128x128xf32>
    %469 = arith.subf %17, %468 : vector<128x128xf32>
    %c1_264 = arith.constant 1 : index
    %c0_265 = arith.constant 0 : index
    %c0_266 = arith.constant 0 : index
    %470 = vector.load %arg12[%c1_264, %c0_265, %c0_266] : memref<2x128x128xf32, #tpu.memory_space<vmem>>, vector<1x128x128xf32>
    %471 = vector.shape_cast %470 : vector<1x128x128xf32> to vector<128x128xf32>
    %472 = vector.shape_cast %469 : vector<128x128xf32> to vector<1x128x128xf32>
    tpu.vector_store %arg12[%c1_264, %c0_265, %c0_266], %472 {strides = array<i32>} : memref<2x128x128xf32, #tpu.memory_space<vmem>>, vector<1x128x128xf32>,
    %cst_267 = arith.constant 0.00999999977 : f32
    %473 = vector.broadcast %cst_267 : f32 to vector<1x128xf32>
    %474 = arith.mulf %473, %446 : vector<1x128xf32>
    %475 = arith.subf %18, %474 : vector<1x128xf32>
    %c1_268 = arith.constant 1 : index
    %c0_269 = arith.constant 0 : index
    %c0_270 = arith.constant 0 : index
    %476 = vector.load %arg13[%c1_268, %c0_269, %c0_270] : memref<2x1x128xf32, #tpu.memory_space<vmem>>, vector<1x1x128xf32>
    %477 = vector.shape_cast %476 : vector<1x1x128xf32> to vector<1x128xf32>
    %478 = vector.shape_cast %475 : vector<1x128xf32> to vector<1x1x128xf32>
    tpu.vector_store %arg13[%c1_268, %c0_269, %c0_270], %478 {strides = array<i32>} : memref<2x1x128xf32, #tpu.memory_space<vmem>>, vector<1x1x128xf32>,
    %cst_271 = arith.constant 0.00999999977 : f32
    %479 = vector.broadcast %cst_271 : f32 to vector<128x128xf32>
    %480 = arith.mulf %479, %436 : vector<128x128xf32>
    %481 = arith.subf %19, %480 : vector<128x128xf32>
    %c1_272 = arith.constant 1 : index
    %c0_273 = arith.constant 0 : index
    %c0_274 = arith.constant 0 : index
    %482 = vector.load %arg14[%c1_272, %c0_273, %c0_274] : memref<2x128x128xf32, #tpu.memory_space<vmem>>, vector<1x128x128xf32>
    %483 = vector.shape_cast %482 : vector<1x128x128xf32> to vector<128x128xf32>
    %484 = vector.shape_cast %481 : vector<128x128xf32> to vector<1x128x128xf32>
    tpu.vector_store %arg14[%c1_272, %c0_273, %c0_274], %484 {strides = array<i32>} : memref<2x128x128xf32, #tpu.memory_space<vmem>>, vector<1x128x128xf32>,
    %cst_275 = arith.constant 0.00999999977 : f32
    %485 = vector.broadcast %cst_275 : f32 to vector<1x128xf32>
    %486 = arith.mulf %485, %438 : vector<1x128xf32>
    %487 = arith.subf %20, %486 : vector<1x128xf32>
    %c1_276 = arith.constant 1 : index
    %c0_277 = arith.constant 0 : index
    %c0_278 = arith.constant 0 : index
    %488 = vector.load %arg15[%c1_276, %c0_277, %c0_278] : memref<2x1x128xf32, #tpu.memory_space<vmem>>, vector<1x1x128xf32>
    %489 = vector.shape_cast %488 : vector<1x1x128xf32> to vector<1x128xf32>
    %490 = vector.shape_cast %487 : vector<1x128xf32> to vector<1x1x128xf32>
    tpu.vector_store %arg15[%c1_276, %c0_277, %c0_278], %490 {strides = array<i32>} : memref<2x1x128xf32, #tpu.memory_space<vmem>>, vector<1x1x128xf32>,
    %c1_279 = arith.constant 1 : index
    %c0_280 = arith.constant 0 : index
    %c0_281 = arith.constant 0 : index
    %491 = vector.load %arg10[%c1_279, %c0_280, %c0_281] : memref<2x128x128xf32, #tpu.memory_space<vmem>>, vector<1x128x128xf32>
    %492 = vector.shape_cast %491 : vector<1x128x128xf32> to vector<128x128xf32>
    %c1_282 = arith.constant 1 : index
    %c0_283 = arith.constant 0 : index
    %c0_284 = arith.constant 0 : index
    %493 = vector.load %arg11[%c1_282, %c0_283, %c0_284] : memref<2x1x128xf32, #tpu.memory_space<vmem>>, vector<1x1x128xf32>
    %494 = vector.shape_cast %493 : vector<1x1x128xf32> to vector<1x128xf32>
    %c1_285 = arith.constant 1 : index
    %c0_286 = arith.constant 0 : index
    %c0_287 = arith.constant 0 : index
    %495 = vector.load %arg12[%c1_285, %c0_286, %c0_287] : memref<2x128x128xf32, #tpu.memory_space<vmem>>, vector<1x128x128xf32>
    %496 = vector.shape_cast %495 : vector<1x128x128xf32> to vector<128x128xf32>
    %c1_288 = arith.constant 1 : index
    %c0_289 = arith.constant 0 : index
    %c0_290 = arith.constant 0 : index
    %497 = vector.load %arg13[%c1_288, %c0_289, %c0_290] : memref<2x1x128xf32, #tpu.memory_space<vmem>>, vector<1x1x128xf32>
    %498 = vector.shape_cast %497 : vector<1x1x128xf32> to vector<1x128xf32>
    %c1_291 = arith.constant 1 : index
    %c0_292 = arith.constant 0 : index
    %c0_293 = arith.constant 0 : index
    %499 = vector.load %arg14[%c1_291, %c0_292, %c0_293] : memref<2x128x128xf32, #tpu.memory_space<vmem>>, vector<1x128x128xf32>
    %500 = vector.shape_cast %499 : vector<1x128x128xf32> to vector<128x128xf32>
    %c1_294 = arith.constant 1 : index
    %c0_295 = arith.constant 0 : index
    %c0_296 = arith.constant 0 : index
    %501 = vector.load %arg15[%c1_294, %c0_295, %c0_296] : memref<2x1x128xf32, #tpu.memory_space<vmem>>, vector<1x1x128xf32>
    %502 = vector.shape_cast %501 : vector<1x1x128xf32> to vector<1x128xf32>
    %cst_297 = arith.constant dense<0.000000e+00> : vector<16x128xf32>
    %503 = tpu.matmul %397, %492, %cst_297 {dimension_numbers = #tpu.dot_dimension_numbers<[1], [0], [0], [1], [0, 0, 1, 1], [], []>} : vector<16x128xf32>, vector<128x128xf32>, vector<16x128xf32> -> vector<16x128xf32>
    %504 = vector.broadcast %494 : vector<1x128xf32> to vector<16x128xf32>
    %505 = arith.addf %503, %504 : vector<16x128xf32>
    %cst_298 = arith.constant 0.000000e+00 : f32
    %506 = vector.broadcast %cst_298 : f32 to vector<16x128xf32>
    %507 = arith.maximumf %505, %506 : vector<16x128xf32>
    %cst_299 = arith.constant dense<0.000000e+00> : vector<16x128xf32>
    %508 = tpu.matmul %507, %496, %cst_299 {dimension_numbers = #tpu.dot_dimension_numbers<[1], [0], [0], [1], [0, 0, 1, 1], [], []>} : vector<16x128xf32>, vector<128x128xf32>, vector<16x128xf32> -> vector<16x128xf32>
    %509 = vector.broadcast %498 : vector<1x128xf32> to vector<16x128xf32>
    %510 = arith.addf %508, %509 : vector<16x128xf32>
    %cst_300 = arith.constant 0.000000e+00 : f32
    %511 = vector.broadcast %cst_300 : f32 to vector<16x128xf32>
    %512 = arith.maximumf %510, %511 : vector<16x128xf32>
    %cst_301 = arith.constant dense<0.000000e+00> : vector<16x128xf32>
    %513 = tpu.matmul %512, %500, %cst_301 {dimension_numbers = #tpu.dot_dimension_numbers<[1], [0], [0], [1], [0, 0, 1, 1], [], []>} : vector<16x128xf32>, vector<128x128xf32>, vector<16x128xf32> -> vector<16x128xf32>
    %514 = vector.broadcast %502 : vector<1x128xf32> to vector<16x128xf32>
    %515 = arith.addf %513, %514 : vector<16x128xf32>
    %cst_302 = arith.constant dense<0xFF800000> : vector<16xf32>
    %516 = vector.multi_reduction <maximumf>, %515, %cst_302 [1] : vector<16x128xf32> to vector<16xf32>
    %517 = vector.shape_cast %516 : vector<16xf32> to vector<16x1xf32>
    %518 = vector.broadcast %517 : vector<16x1xf32> to vector<16x128xf32>
    %519 = arith.subf %515, %518 : vector<16x128xf32>
    %520 = math.exp %519 : vector<16x128xf32>
    %cst_303 = arith.constant dense<0.000000e+00> : vector<16xf32>
    %521 = vector.multi_reduction <add>, %520, %cst_303 [1] : vector<16x128xf32> to vector<16xf32>
    %522 = vector.shape_cast %521 : vector<16xf32> to vector<16x1xf32>
    %523 = vector.broadcast %522 : vector<16x1xf32> to vector<16x128xf32>
    %524 = arith.divf %520, %523 : vector<16x128xf32>
    %525 = math.log %522 : vector<16x1xf32>
    %526 = vector.broadcast %525 : vector<16x1xf32> to vector<16x128xf32>
    %527 = arith.subf %519, %526 : vector<16x128xf32>
    %528 = arith.mulf %399, %527 : vector<16x128xf32>
    %529 = vector.broadcast %13 : vector<16x1xf32> to vector<16x128xf32>
    %530 = arith.mulf %528, %529 : vector<16x128xf32>
    %531 = vector.shape_cast %530 : vector<16x128xf32> to vector<1x16x128xf32>
    %cst_304 = arith.constant dense<0.000000e+00> : vector<1xf32>
    %532 = vector.multi_reduction <add>, %531, %cst_304 [1, 2] : vector<1x16x128xf32> to vector<1xf32>
    %533 = vector.shape_cast %532 : vector<1xf32> to vector<1x1x1xf32>
    %534 = vector.extract %533[0, 0, 0] : f32 from vector<1x1x1xf32>
    %cst_305 = arith.constant 0.000000e+00 : f32
    %535 = arith.subf %cst_305, %534 : f32
    %536 = arith.subf %524, %399 : vector<16x128xf32>
    %537 = vector.broadcast %5 : vector<16x1xf32> to vector<16x128xf32>
    %538 = arith.mulf %536, %537 : vector<16x128xf32>
    %cst_306 = arith.constant dense<0.000000e+00> : vector<128x128xf32>
    %539 = tpu.matmul %512, %538, %cst_306 {dimension_numbers = #tpu.dot_dimension_numbers<[0], [0], [1], [1], [0, 1, 1, 1], [], []>} : vector<16x128xf32>, vector<16x128xf32>, vector<128x128xf32> -> vector<128x128xf32>
    %cst_307 = arith.constant dense<0.000000e+00> : vector<128xf32>
    %540 = vector.multi_reduction <add>, %538, %cst_307 [0] : vector<16x128xf32> to vector<128xf32>
    %541 = vector.shape_cast %540 : vector<128xf32> to vector<1x128xf32>
    %cst_308 = arith.constant dense<0.000000e+00> : vector<16x128xf32>
    %542 = tpu.matmul %538, %500, %cst_308 {dimension_numbers = #tpu.dot_dimension_numbers<[1], [1], [0], [0], [0, 0, 1, 0], [], []>} : vector<16x128xf32>, vector<128x128xf32>, vector<16x128xf32> -> vector<16x128xf32>
    %cst_309 = arith.constant 0.000000e+00 : f32
    %543 = vector.broadcast %cst_309 : f32 to vector<16x128xf32>
    %544 = arith.cmpf ogt, %510, %543 : vector<16x128xf32>
    %cst_310 = arith.constant 0.000000e+00 : f32
    %545 = vector.broadcast %cst_310 : f32 to vector<16x128xf32>
    %546 = arith.select %544, %542, %545 : vector<16x128xi1>, vector<16x128xf32>
    %cst_311 = arith.constant dense<0.000000e+00> : vector<128x128xf32>
    %547 = tpu.matmul %507, %546, %cst_311 {dimension_numbers = #tpu.dot_dimension_numbers<[0], [0], [1], [1], [0, 1, 1, 1], [], []>} : vector<16x128xf32>, vector<16x128xf32>, vector<128x128xf32> -> vector<128x128xf32>
    %cst_312 = arith.constant dense<0.000000e+00> : vector<128xf32>
    %548 = vector.multi_reduction <add>, %546, %cst_312 [0] : vector<16x128xf32> to vector<128xf32>
    %549 = vector.shape_cast %548 : vector<128xf32> to vector<1x128xf32>
    %cst_313 = arith.constant dense<0.000000e+00> : vector<16x128xf32>
    %550 = tpu.matmul %546, %496, %cst_313 {dimension_numbers = #tpu.dot_dimension_numbers<[1], [1], [0], [0], [0, 0, 1, 0], [], []>} : vector<16x128xf32>, vector<128x128xf32>, vector<16x128xf32> -> vector<16x128xf32>
    %cst_314 = arith.constant 0.000000e+00 : f32
    %551 = vector.broadcast %cst_314 : f32 to vector<16x128xf32>
    %552 = arith.cmpf ogt, %505, %551 : vector<16x128xf32>
    %cst_315 = arith.constant 0.000000e+00 : f32
    %553 = vector.broadcast %cst_315 : f32 to vector<16x128xf32>
    %554 = arith.select %552, %550, %553 : vector<16x128xi1>, vector<16x128xf32>
    %cst_316 = arith.constant dense<0.000000e+00> : vector<128x128xf32>
    %555 = tpu.matmul %397, %554, %cst_316 {dimension_numbers = #tpu.dot_dimension_numbers<[0], [0], [1], [1], [0, 1, 1, 1], [], []>} : vector<16x128xf32>, vector<16x128xf32>, vector<128x128xf32> -> vector<128x128xf32>
    %cst_317 = arith.constant dense<0.000000e+00> : vector<128xf32>
    %556 = vector.multi_reduction <add>, %554, %cst_317 [0] : vector<16x128xf32> to vector<128xf32>
    %557 = vector.shape_cast %556 : vector<128xf32> to vector<1x128xf32>
    %cst_318 = arith.constant 0.00999999977 : f32
    %558 = vector.broadcast %cst_318 : f32 to vector<128x128xf32>
    %559 = arith.mulf %558, %555 : vector<128x128xf32>
    %560 = arith.subf %492, %559 : vector<128x128xf32>
    %c1_319 = arith.constant 1 : index
    %c0_320 = arith.constant 0 : index
    %c0_321 = arith.constant 0 : index
    %561 = vector.load %arg10[%c1_319, %c0_320, %c0_321] : memref<2x128x128xf32, #tpu.memory_space<vmem>>, vector<1x128x128xf32>
    %562 = vector.shape_cast %561 : vector<1x128x128xf32> to vector<128x128xf32>
    %563 = vector.shape_cast %560 : vector<128x128xf32> to vector<1x128x128xf32>
    tpu.vector_store %arg10[%c1_319, %c0_320, %c0_321], %563 {strides = array<i32>} : memref<2x128x128xf32, #tpu.memory_space<vmem>>, vector<1x128x128xf32>,
    %cst_322 = arith.constant 0.00999999977 : f32
    %564 = vector.broadcast %cst_322 : f32 to vector<1x128xf32>
    %565 = arith.mulf %564, %557 : vector<1x128xf32>
    %566 = arith.subf %494, %565 : vector<1x128xf32>
    %c1_323 = arith.constant 1 : index
    %c0_324 = arith.constant 0 : index
    %c0_325 = arith.constant 0 : index
    %567 = vector.load %arg11[%c1_323, %c0_324, %c0_325] : memref<2x1x128xf32, #tpu.memory_space<vmem>>, vector<1x1x128xf32>
    %568 = vector.shape_cast %567 : vector<1x1x128xf32> to vector<1x128xf32>
    %569 = vector.shape_cast %566 : vector<1x128xf32> to vector<1x1x128xf32>
    tpu.vector_store %arg11[%c1_323, %c0_324, %c0_325], %569 {strides = array<i32>} : memref<2x1x128xf32, #tpu.memory_space<vmem>>, vector<1x1x128xf32>,
    %cst_326 = arith.constant 0.00999999977 : f32
    %570 = vector.broadcast %cst_326 : f32 to vector<128x128xf32>
    %571 = arith.mulf %570, %547 : vector<128x128xf32>
    %572 = arith.subf %496, %571 : vector<128x128xf32>
    %c1_327 = arith.constant 1 : index
    %c0_328 = arith.constant 0 : index
    %c0_329 = arith.constant 0 : index
    %573 = vector.load %arg12[%c1_327, %c0_328, %c0_329] : memref<2x128x128xf32, #tpu.memory_space<vmem>>, vector<1x128x128xf32>
    %574 = vector.shape_cast %573 : vector<1x128x128xf32> to vector<128x128xf32>
    %575 = vector.shape_cast %572 : vector<128x128xf32> to vector<1x128x128xf32>
    tpu.vector_store %arg12[%c1_327, %c0_328, %c0_329], %575 {strides = array<i32>} : memref<2x128x128xf32, #tpu.memory_space<vmem>>, vector<1x128x128xf32>,
    %cst_330 = arith.constant 0.00999999977 : f32
    %576 = vector.broadcast %cst_330 : f32 to vector<1x128xf32>
    %577 = arith.mulf %576, %549 : vector<1x128xf32>
    %578 = arith.subf %498, %577 : vector<1x128xf32>
    %c1_331 = arith.constant 1 : index
    %c0_332 = arith.constant 0 : index
    %c0_333 = arith.constant 0 : index
    %579 = vector.load %arg13[%c1_331, %c0_332, %c0_333] : memref<2x1x128xf32, #tpu.memory_space<vmem>>, vector<1x1x128xf32>
    %580 = vector.shape_cast %579 : vector<1x1x128xf32> to vector<1x128xf32>
    %581 = vector.shape_cast %578 : vector<1x128xf32> to vector<1x1x128xf32>
    tpu.vector_store %arg13[%c1_331, %c0_332, %c0_333], %581 {strides = array<i32>} : memref<2x1x128xf32, #tpu.memory_space<vmem>>, vector<1x1x128xf32>,
    %cst_334 = arith.constant 0.00999999977 : f32
    %582 = vector.broadcast %cst_334 : f32 to vector<128x128xf32>
    %583 = arith.mulf %582, %539 : vector<128x128xf32>
    %584 = arith.subf %500, %583 : vector<128x128xf32>
    %c1_335 = arith.constant 1 : index
    %c0_336 = arith.constant 0 : index
    %c0_337 = arith.constant 0 : index
    %585 = vector.load %arg14[%c1_335, %c0_336, %c0_337] : memref<2x128x128xf32, #tpu.memory_space<vmem>>, vector<1x128x128xf32>
    %586 = vector.shape_cast %585 : vector<1x128x128xf32> to vector<128x128xf32>
    %587 = vector.shape_cast %584 : vector<128x128xf32> to vector<1x128x128xf32>
    tpu.vector_store %arg14[%c1_335, %c0_336, %c0_337], %587 {strides = array<i32>} : memref<2x128x128xf32, #tpu.memory_space<vmem>>, vector<1x128x128xf32>,
    %cst_338 = arith.constant 0.00999999977 : f32
    %588 = vector.broadcast %cst_338 : f32 to vector<1x128xf32>
    %589 = arith.mulf %588, %541 : vector<1x128xf32>
    %590 = arith.subf %502, %589 : vector<1x128xf32>
    %c1_339 = arith.constant 1 : index
    %c0_340 = arith.constant 0 : index
    %c0_341 = arith.constant 0 : index
    %591 = vector.load %arg15[%c1_339, %c0_340, %c0_341] : memref<2x1x128xf32, #tpu.memory_space<vmem>>, vector<1x1x128xf32>
    %592 = vector.shape_cast %591 : vector<1x1x128xf32> to vector<1x128xf32>
    %593 = vector.shape_cast %590 : vector<1x128xf32> to vector<1x1x128xf32>
    tpu.vector_store %arg15[%c1_339, %c0_340, %c0_341], %593 {strides = array<i32>} : memref<2x1x128xf32, #tpu.memory_space<vmem>>, vector<1x1x128xf32>,
    %c1_342 = arith.constant 1 : index
    %c0_343 = arith.constant 0 : index
    %c0_344 = arith.constant 0 : index
    %594 = vector.load %arg10[%c1_342, %c0_343, %c0_344] : memref<2x128x128xf32, #tpu.memory_space<vmem>>, vector<1x128x128xf32>
    %595 = vector.shape_cast %594 : vector<1x128x128xf32> to vector<128x128xf32>
    %c1_345 = arith.constant 1 : index
    %c0_346 = arith.constant 0 : index
    %c0_347 = arith.constant 0 : index
    %596 = vector.load %arg11[%c1_345, %c0_346, %c0_347] : memref<2x1x128xf32, #tpu.memory_space<vmem>>, vector<1x1x128xf32>
    %597 = vector.shape_cast %596 : vector<1x1x128xf32> to vector<1x128xf32>
    %c1_348 = arith.constant 1 : index
    %c0_349 = arith.constant 0 : index
    %c0_350 = arith.constant 0 : index
    %598 = vector.load %arg12[%c1_348, %c0_349, %c0_350] : memref<2x128x128xf32, #tpu.memory_space<vmem>>, vector<1x128x128xf32>
    %599 = vector.shape_cast %598 : vector<1x128x128xf32> to vector<128x128xf32>
    %c1_351 = arith.constant 1 : index
    %c0_352 = arith.constant 0 : index
    %c0_353 = arith.constant 0 : index
    %600 = vector.load %arg13[%c1_351, %c0_352, %c0_353] : memref<2x1x128xf32, #tpu.memory_space<vmem>>, vector<1x1x128xf32>
    %601 = vector.shape_cast %600 : vector<1x1x128xf32> to vector<1x128xf32>
    %c1_354 = arith.constant 1 : index
    %c0_355 = arith.constant 0 : index
    %c0_356 = arith.constant 0 : index
    %602 = vector.load %arg14[%c1_354, %c0_355, %c0_356] : memref<2x128x128xf32, #tpu.memory_space<vmem>>, vector<1x128x128xf32>
    %603 = vector.shape_cast %602 : vector<1x128x128xf32> to vector<128x128xf32>
    %c1_357 = arith.constant 1 : index
    %c0_358 = arith.constant 0 : index
    %c0_359 = arith.constant 0 : index
    %604 = vector.load %arg15[%c1_357, %c0_358, %c0_359] : memref<2x1x128xf32, #tpu.memory_space<vmem>>, vector<1x1x128xf32>
    %605 = vector.shape_cast %604 : vector<1x1x128xf32> to vector<1x128xf32>
    %cst_360 = arith.constant dense<0.000000e+00> : vector<16x128xf32>
    %606 = tpu.matmul %397, %595, %cst_360 {dimension_numbers = #tpu.dot_dimension_numbers<[1], [0], [0], [1], [0, 0, 1, 1], [], []>} : vector<16x128xf32>, vector<128x128xf32>, vector<16x128xf32> -> vector<16x128xf32>
    %607 = vector.broadcast %597 : vector<1x128xf32> to vector<16x128xf32>
    %608 = arith.addf %606, %607 : vector<16x128xf32>
    %cst_361 = arith.constant 0.000000e+00 : f32
    %609 = vector.broadcast %cst_361 : f32 to vector<16x128xf32>
    %610 = arith.maximumf %608, %609 : vector<16x128xf32>
    %cst_362 = arith.constant dense<0.000000e+00> : vector<16x128xf32>
    %611 = tpu.matmul %610, %599, %cst_362 {dimension_numbers = #tpu.dot_dimension_numbers<[1], [0], [0], [1], [0, 0, 1, 1], [], []>} : vector<16x128xf32>, vector<128x128xf32>, vector<16x128xf32> -> vector<16x128xf32>
    %612 = vector.broadcast %601 : vector<1x128xf32> to vector<16x128xf32>
    %613 = arith.addf %611, %612 : vector<16x128xf32>
    %cst_363 = arith.constant 0.000000e+00 : f32
    %614 = vector.broadcast %cst_363 : f32 to vector<16x128xf32>
    %615 = arith.maximumf %613, %614 : vector<16x128xf32>
    %cst_364 = arith.constant dense<0.000000e+00> : vector<16x128xf32>
    %616 = tpu.matmul %615, %603, %cst_364 {dimension_numbers = #tpu.dot_dimension_numbers<[1], [0], [0], [1], [0, 0, 1, 1], [], []>} : vector<16x128xf32>, vector<128x128xf32>, vector<16x128xf32> -> vector<16x128xf32>
    %617 = vector.broadcast %605 : vector<1x128xf32> to vector<16x128xf32>
    %618 = arith.addf %616, %617 : vector<16x128xf32>
    %cst_365 = arith.constant dense<0xFF800000> : vector<16xf32>
    %619 = vector.multi_reduction <maximumf>, %618, %cst_365 [1] : vector<16x128xf32> to vector<16xf32>
    %620 = vector.shape_cast %619 : vector<16xf32> to vector<16x1xf32>
    %621 = vector.broadcast %620 : vector<16x1xf32> to vector<16x128xf32>
    %622 = arith.subf %618, %621 : vector<16x128xf32>
    %623 = math.exp %622 : vector<16x128xf32>
    %cst_366 = arith.constant dense<0.000000e+00> : vector<16xf32>
    %624 = vector.multi_reduction <add>, %623, %cst_366 [1] : vector<16x128xf32> to vector<16xf32>
    %625 = vector.shape_cast %624 : vector<16xf32> to vector<16x1xf32>
    %626 = vector.broadcast %625 : vector<16x1xf32> to vector<16x128xf32>
    %627 = arith.divf %623, %626 : vector<16x128xf32>
    %628 = math.log %625 : vector<16x1xf32>
    %629 = vector.broadcast %628 : vector<16x1xf32> to vector<16x128xf32>
    %630 = arith.subf %622, %629 : vector<16x128xf32>
    %631 = arith.mulf %399, %630 : vector<16x128xf32>
    %632 = vector.broadcast %13 : vector<16x1xf32> to vector<16x128xf32>
    %633 = arith.mulf %631, %632 : vector<16x128xf32>
    %634 = vector.shape_cast %633 : vector<16x128xf32> to vector<1x16x128xf32>
    %cst_367 = arith.constant dense<0.000000e+00> : vector<1xf32>
    %635 = vector.multi_reduction <add>, %634, %cst_367 [1, 2] : vector<1x16x128xf32> to vector<1xf32>
    %636 = vector.shape_cast %635 : vector<1xf32> to vector<1x1x1xf32>
    %637 = vector.extract %636[0, 0, 0] : f32 from vector<1x1x1xf32>
    %cst_368 = arith.constant 0.000000e+00 : f32
    %638 = arith.subf %cst_368, %637 : f32
    %639 = arith.subf %627, %399 : vector<16x128xf32>
    %640 = vector.broadcast %5 : vector<16x1xf32> to vector<16x128xf32>
    %641 = arith.mulf %639, %640 : vector<16x128xf32>
    %cst_369 = arith.constant dense<0.000000e+00> : vector<128x128xf32>
    %642 = tpu.matmul %615, %641, %cst_369 {dimension_numbers = #tpu.dot_dimension_numbers<[0], [0], [1], [1], [0, 1, 1, 1], [], []>} : vector<16x128xf32>, vector<16x128xf32>, vector<128x128xf32> -> vector<128x128xf32>
    %cst_370 = arith.constant dense<0.000000e+00> : vector<128xf32>
    %643 = vector.multi_reduction <add>, %641, %cst_370 [0] : vector<16x128xf32> to vector<128xf32>
    %644 = vector.shape_cast %643 : vector<128xf32> to vector<1x128xf32>
    %cst_371 = arith.constant dense<0.000000e+00> : vector<16x128xf32>
    %645 = tpu.matmul %641, %603, %cst_371 {dimension_numbers = #tpu.dot_dimension_numbers<[1], [1], [0], [0], [0, 0, 1, 0], [], []>} : vector<16x128xf32>, vector<128x128xf32>, vector<16x128xf32> -> vector<16x128xf32>
    %cst_372 = arith.constant 0.000000e+00 : f32
    %646 = vector.broadcast %cst_372 : f32 to vector<16x128xf32>
    %647 = arith.cmpf ogt, %613, %646 : vector<16x128xf32>
    %cst_373 = arith.constant 0.000000e+00 : f32
    %648 = vector.broadcast %cst_373 : f32 to vector<16x128xf32>
    %649 = arith.select %647, %645, %648 : vector<16x128xi1>, vector<16x128xf32>
    %cst_374 = arith.constant dense<0.000000e+00> : vector<128x128xf32>
    %650 = tpu.matmul %610, %649, %cst_374 {dimension_numbers = #tpu.dot_dimension_numbers<[0], [0], [1], [1], [0, 1, 1, 1], [], []>} : vector<16x128xf32>, vector<16x128xf32>, vector<128x128xf32> -> vector<128x128xf32>
    %cst_375 = arith.constant dense<0.000000e+00> : vector<128xf32>
    %651 = vector.multi_reduction <add>, %649, %cst_375 [0] : vector<16x128xf32> to vector<128xf32>
    %652 = vector.shape_cast %651 : vector<128xf32> to vector<1x128xf32>
    %cst_376 = arith.constant dense<0.000000e+00> : vector<16x128xf32>
    %653 = tpu.matmul %649, %599, %cst_376 {dimension_numbers = #tpu.dot_dimension_numbers<[1], [1], [0], [0], [0, 0, 1, 0], [], []>} : vector<16x128xf32>, vector<128x128xf32>, vector<16x128xf32> -> vector<16x128xf32>
    %cst_377 = arith.constant 0.000000e+00 : f32
    %654 = vector.broadcast %cst_377 : f32 to vector<16x128xf32>
    %655 = arith.cmpf ogt, %608, %654 : vector<16x128xf32>
    %cst_378 = arith.constant 0.000000e+00 : f32
    %656 = vector.broadcast %cst_378 : f32 to vector<16x128xf32>
    %657 = arith.select %655, %653, %656 : vector<16x128xi1>, vector<16x128xf32>
    %cst_379 = arith.constant dense<0.000000e+00> : vector<128x128xf32>
    %658 = tpu.matmul %397, %657, %cst_379 {dimension_numbers = #tpu.dot_dimension_numbers<[0], [0], [1], [1], [0, 1, 1, 1], [], []>} : vector<16x128xf32>, vector<16x128xf32>, vector<128x128xf32> -> vector<128x128xf32>
    %cst_380 = arith.constant dense<0.000000e+00> : vector<128xf32>
    %659 = vector.multi_reduction <add>, %657, %cst_380 [0] : vector<16x128xf32> to vector<128xf32>
    %660 = vector.shape_cast %659 : vector<128xf32> to vector<1x128xf32>
    %cst_381 = arith.constant 0.00999999977 : f32
    %661 = vector.broadcast %cst_381 : f32 to vector<128x128xf32>
    %662 = arith.mulf %661, %658 : vector<128x128xf32>
    %663 = arith.subf %595, %662 : vector<128x128xf32>
    %c1_382 = arith.constant 1 : index
    %c0_383 = arith.constant 0 : index
    %c0_384 = arith.constant 0 : index
    %664 = vector.load %arg10[%c1_382, %c0_383, %c0_384] : memref<2x128x128xf32, #tpu.memory_space<vmem>>, vector<1x128x128xf32>
    %665 = vector.shape_cast %664 : vector<1x128x128xf32> to vector<128x128xf32>
    %666 = vector.shape_cast %663 : vector<128x128xf32> to vector<1x128x128xf32>
    tpu.vector_store %arg10[%c1_382, %c0_383, %c0_384], %666 {strides = array<i32>} : memref<2x128x128xf32, #tpu.memory_space<vmem>>, vector<1x128x128xf32>,
    %cst_385 = arith.constant 0.00999999977 : f32
    %667 = vector.broadcast %cst_385 : f32 to vector<1x128xf32>
    %668 = arith.mulf %667, %660 : vector<1x128xf32>
    %669 = arith.subf %597, %668 : vector<1x128xf32>
    %c1_386 = arith.constant 1 : index
    %c0_387 = arith.constant 0 : index
    %c0_388 = arith.constant 0 : index
    %670 = vector.load %arg11[%c1_386, %c0_387, %c0_388] : memref<2x1x128xf32, #tpu.memory_space<vmem>>, vector<1x1x128xf32>
    %671 = vector.shape_cast %670 : vector<1x1x128xf32> to vector<1x128xf32>
    %672 = vector.shape_cast %669 : vector<1x128xf32> to vector<1x1x128xf32>
    tpu.vector_store %arg11[%c1_386, %c0_387, %c0_388], %672 {strides = array<i32>} : memref<2x1x128xf32, #tpu.memory_space<vmem>>, vector<1x1x128xf32>,
    %cst_389 = arith.constant 0.00999999977 : f32
    %673 = vector.broadcast %cst_389 : f32 to vector<128x128xf32>
    %674 = arith.mulf %673, %650 : vector<128x128xf32>
    %675 = arith.subf %599, %674 : vector<128x128xf32>
    %c1_390 = arith.constant 1 : index
    %c0_391 = arith.constant 0 : index
    %c0_392 = arith.constant 0 : index
    %676 = vector.load %arg12[%c1_390, %c0_391, %c0_392] : memref<2x128x128xf32, #tpu.memory_space<vmem>>, vector<1x128x128xf32>
    %677 = vector.shape_cast %676 : vector<1x128x128xf32> to vector<128x128xf32>
    %678 = vector.shape_cast %675 : vector<128x128xf32> to vector<1x128x128xf32>
    tpu.vector_store %arg12[%c1_390, %c0_391, %c0_392], %678 {strides = array<i32>} : memref<2x128x128xf32, #tpu.memory_space<vmem>>, vector<1x128x128xf32>,
    %cst_393 = arith.constant 0.00999999977 : f32
    %679 = vector.broadcast %cst_393 : f32 to vector<1x128xf32>
    %680 = arith.mulf %679, %652 : vector<1x128xf32>
    %681 = arith.subf %601, %680 : vector<1x128xf32>
    %c1_394 = arith.constant 1 : index
    %c0_395 = arith.constant 0 : index
    %c0_396 = arith.constant 0 : index
    %682 = vector.load %arg13[%c1_394, %c0_395, %c0_396] : memref<2x1x128xf32, #tpu.memory_space<vmem>>, vector<1x1x128xf32>
    %683 = vector.shape_cast %682 : vector<1x1x128xf32> to vector<1x128xf32>
    %684 = vector.shape_cast %681 : vector<1x128xf32> to vector<1x1x128xf32>
    tpu.vector_store %arg13[%c1_394, %c0_395, %c0_396], %684 {strides = array<i32>} : memref<2x1x128xf32, #tpu.memory_space<vmem>>, vector<1x1x128xf32>,
    %cst_397 = arith.constant 0.00999999977 : f32
    %685 = vector.broadcast %cst_397 : f32 to vector<128x128xf32>
    %686 = arith.mulf %685, %642 : vector<128x128xf32>
    %687 = arith.subf %603, %686 : vector<128x128xf32>
    %c1_398 = arith.constant 1 : index
    %c0_399 = arith.constant 0 : index
    %c0_400 = arith.constant 0 : index
    %688 = vector.load %arg14[%c1_398, %c0_399, %c0_400] : memref<2x128x128xf32, #tpu.memory_space<vmem>>, vector<1x128x128xf32>
    %689 = vector.shape_cast %688 : vector<1x128x128xf32> to vector<128x128xf32>
    %690 = vector.shape_cast %687 : vector<128x128xf32> to vector<1x128x128xf32>
    tpu.vector_store %arg14[%c1_398, %c0_399, %c0_400], %690 {strides = array<i32>} : memref<2x128x128xf32, #tpu.memory_space<vmem>>, vector<1x128x128xf32>,
    %cst_401 = arith.constant 0.00999999977 : f32
    %691 = vector.broadcast %cst_401 : f32 to vector<1x128xf32>
    %692 = arith.mulf %691, %644 : vector<1x128xf32>
    %693 = arith.subf %605, %692 : vector<1x128xf32>
    %c1_402 = arith.constant 1 : index
    %c0_403 = arith.constant 0 : index
    %c0_404 = arith.constant 0 : index
    %694 = vector.load %arg15[%c1_402, %c0_403, %c0_404] : memref<2x1x128xf32, #tpu.memory_space<vmem>>, vector<1x1x128xf32>
    %695 = vector.shape_cast %694 : vector<1x1x128xf32> to vector<1x128xf32>
    %696 = vector.shape_cast %693 : vector<1x128xf32> to vector<1x1x128xf32>
    tpu.vector_store %arg15[%c1_402, %c0_403, %c0_404], %696 {strides = array<i32>} : memref<2x1x128xf32, #tpu.memory_space<vmem>>, vector<1x1x128xf32>,
    %c1_405 = arith.constant 1 : index
    %c0_406 = arith.constant 0 : index
    %c0_407 = arith.constant 0 : index
    %697 = vector.load %arg10[%c1_405, %c0_406, %c0_407] : memref<2x128x128xf32, #tpu.memory_space<vmem>>, vector<1x128x128xf32>
    %698 = vector.shape_cast %697 : vector<1x128x128xf32> to vector<128x128xf32>
    %c1_408 = arith.constant 1 : index
    %c0_409 = arith.constant 0 : index
    %c0_410 = arith.constant 0 : index
    %699 = vector.load %arg11[%c1_408, %c0_409, %c0_410] : memref<2x1x128xf32, #tpu.memory_space<vmem>>, vector<1x1x128xf32>
    %700 = vector.shape_cast %699 : vector<1x1x128xf32> to vector<1x128xf32>
    %c1_411 = arith.constant 1 : index
    %c0_412 = arith.constant 0 : index
    %c0_413 = arith.constant 0 : index
    %701 = vector.load %arg12[%c1_411, %c0_412, %c0_413] : memref<2x128x128xf32, #tpu.memory_space<vmem>>, vector<1x128x128xf32>
    %702 = vector.shape_cast %701 : vector<1x128x128xf32> to vector<128x128xf32>
    %c1_414 = arith.constant 1 : index
    %c0_415 = arith.constant 0 : index
    %c0_416 = arith.constant 0 : index
    %703 = vector.load %arg13[%c1_414, %c0_415, %c0_416] : memref<2x1x128xf32, #tpu.memory_space<vmem>>, vector<1x1x128xf32>
    %704 = vector.shape_cast %703 : vector<1x1x128xf32> to vector<1x128xf32>
    %c1_417 = arith.constant 1 : index
    %c0_418 = arith.constant 0 : index
    %c0_419 = arith.constant 0 : index
    %705 = vector.load %arg14[%c1_417, %c0_418, %c0_419] : memref<2x128x128xf32, #tpu.memory_space<vmem>>, vector<1x128x128xf32>
    %706 = vector.shape_cast %705 : vector<1x128x128xf32> to vector<128x128xf32>
    %c1_420 = arith.constant 1 : index
    %c0_421 = arith.constant 0 : index
    %c0_422 = arith.constant 0 : index
    %707 = vector.load %arg15[%c1_420, %c0_421, %c0_422] : memref<2x1x128xf32, #tpu.memory_space<vmem>>, vector<1x1x128xf32>
    %708 = vector.shape_cast %707 : vector<1x1x128xf32> to vector<1x128xf32>
    %cst_423 = arith.constant dense<0.000000e+00> : vector<16x128xf32>
    %709 = tpu.matmul %397, %698, %cst_423 {dimension_numbers = #tpu.dot_dimension_numbers<[1], [0], [0], [1], [0, 0, 1, 1], [], []>} : vector<16x128xf32>, vector<128x128xf32>, vector<16x128xf32> -> vector<16x128xf32>
    %710 = vector.broadcast %700 : vector<1x128xf32> to vector<16x128xf32>
    %711 = arith.addf %709, %710 : vector<16x128xf32>
    %cst_424 = arith.constant 0.000000e+00 : f32
    %712 = vector.broadcast %cst_424 : f32 to vector<16x128xf32>
    %713 = arith.maximumf %711, %712 : vector<16x128xf32>
    %cst_425 = arith.constant dense<0.000000e+00> : vector<16x128xf32>
    %714 = tpu.matmul %713, %702, %cst_425 {dimension_numbers = #tpu.dot_dimension_numbers<[1], [0], [0], [1], [0, 0, 1, 1], [], []>} : vector<16x128xf32>, vector<128x128xf32>, vector<16x128xf32> -> vector<16x128xf32>
    %715 = vector.broadcast %704 : vector<1x128xf32> to vector<16x128xf32>
    %716 = arith.addf %714, %715 : vector<16x128xf32>
    %cst_426 = arith.constant 0.000000e+00 : f32
    %717 = vector.broadcast %cst_426 : f32 to vector<16x128xf32>
    %718 = arith.maximumf %716, %717 : vector<16x128xf32>
    %cst_427 = arith.constant dense<0.000000e+00> : vector<16x128xf32>
    %719 = tpu.matmul %718, %706, %cst_427 {dimension_numbers = #tpu.dot_dimension_numbers<[1], [0], [0], [1], [0, 0, 1, 1], [], []>} : vector<16x128xf32>, vector<128x128xf32>, vector<16x128xf32> -> vector<16x128xf32>
    %720 = vector.broadcast %708 : vector<1x128xf32> to vector<16x128xf32>
    %721 = arith.addf %719, %720 : vector<16x128xf32>
    %cst_428 = arith.constant dense<0xFF800000> : vector<16xf32>
    %722 = vector.multi_reduction <maximumf>, %721, %cst_428 [1] : vector<16x128xf32> to vector<16xf32>
    %723 = vector.shape_cast %722 : vector<16xf32> to vector<16x1xf32>
    %724 = vector.broadcast %723 : vector<16x1xf32> to vector<16x128xf32>
    %725 = arith.subf %721, %724 : vector<16x128xf32>
    %726 = math.exp %725 : vector<16x128xf32>
    %cst_429 = arith.constant dense<0.000000e+00> : vector<16xf32>
    %727 = vector.multi_reduction <add>, %726, %cst_429 [1] : vector<16x128xf32> to vector<16xf32>
    %728 = vector.shape_cast %727 : vector<16xf32> to vector<16x1xf32>
    %729 = math.log %728 : vector<16x1xf32>
    %730 = vector.broadcast %729 : vector<16x1xf32> to vector<16x128xf32>
    %731 = arith.subf %725, %730 : vector<16x128xf32>
    %732 = arith.mulf %399, %731 : vector<16x128xf32>
    %733 = vector.broadcast %13 : vector<16x1xf32> to vector<16x128xf32>
    %734 = arith.mulf %732, %733 : vector<16x128xf32>
    %735 = vector.shape_cast %734 : vector<16x128xf32> to vector<1x16x128xf32>
    %cst_430 = arith.constant dense<0.000000e+00> : vector<1xf32>
    %736 = vector.multi_reduction <add>, %735, %cst_430 [1, 2] : vector<1x16x128xf32> to vector<1xf32>
    %737 = vector.shape_cast %736 : vector<1xf32> to vector<1x1x1xf32>
    %738 = vector.extract %737[0, 0, 0] : f32 from vector<1x1x1xf32>
    %cst_431 = arith.constant 0.000000e+00 : f32
    %739 = arith.subf %cst_431, %738 : f32
    %c1_432 = arith.constant 1 : index
    %c0_433 = arith.constant 0 : index
    %c0_434 = arith.constant 0 : index
    %740 = vector.load %arg8[%c1_432, %c0_433, %c0_434] : memref<2x16x128xf32, #tpu.memory_space<vmem>>, vector<1x16x128xf32>
    %741 = vector.shape_cast %740 : vector<1x16x128xf32> to vector<16x128xf32>
    %742 = vector.shape_cast %721 : vector<16x128xf32> to vector<1x16x128xf32>
    tpu.vector_store %arg8[%c1_432, %c0_433, %c0_434], %742 {strides = array<i32>} : memref<2x16x128xf32, #tpu.memory_space<vmem>>, vector<1x16x128xf32>,
    %cst_435 = arith.constant 0.000000e+00 : f32
    %743 = vector.broadcast %cst_435 : f32 to vector<1x128xf32>
    %c0_i32_436 = arith.constant 0 : i32
    %744 = vector.broadcast %c0_i32_436 : i32 to vector<1x128xi32>
    %745 = arith.cmpi eq, %14, %744 : vector<1x128xi32>
    %cst_437 = arith.constant 0.000000e+00 : f32
    %746 = vector.broadcast %432 : f32 to vector<1x128xf32>
    %747 = vector.broadcast %cst_437 : f32 to vector<1x128xf32>
    %748 = arith.select %745, %746, %747 : vector<1x128xi1>, vector<1x128xf32>
    %749 = arith.addf %743, %748 : vector<1x128xf32>
    %c1_i32_438 = arith.constant 1 : i32
    %750 = vector.broadcast %c1_i32_438 : i32 to vector<1x128xi32>
    %751 = arith.cmpi eq, %14, %750 : vector<1x128xi32>
    %cst_439 = arith.constant 0.000000e+00 : f32
    %752 = vector.broadcast %535 : f32 to vector<1x128xf32>
    %753 = vector.broadcast %cst_439 : f32 to vector<1x128xf32>
    %754 = arith.select %751, %752, %753 : vector<1x128xi1>, vector<1x128xf32>
    %755 = arith.addf %749, %754 : vector<1x128xf32>
    %c2_i32_440 = arith.constant 2 : i32
    %756 = vector.broadcast %c2_i32_440 : i32 to vector<1x128xi32>
    %757 = arith.cmpi eq, %14, %756 : vector<1x128xi32>
    %cst_441 = arith.constant 0.000000e+00 : f32
    %758 = vector.broadcast %638 : f32 to vector<1x128xf32>
    %759 = vector.broadcast %cst_441 : f32 to vector<1x128xf32>
    %760 = arith.select %757, %758, %759 : vector<1x128xi1>, vector<1x128xf32>
    %761 = arith.addf %755, %760 : vector<1x128xf32>
    %c3_i32_442 = arith.constant 3 : i32
    %762 = vector.broadcast %c3_i32_442 : i32 to vector<1x128xi32>
    %763 = arith.cmpi eq, %14, %762 : vector<1x128xi32>
    %cst_443 = arith.constant 0.000000e+00 : f32
    %764 = vector.broadcast %739 : f32 to vector<1x128xf32>
    %765 = vector.broadcast %cst_443 : f32 to vector<1x128xf32>
    %766 = arith.select %763, %764, %765 : vector<1x128xi1>, vector<1x128xf32>
    %767 = arith.addf %761, %766 : vector<1x128xf32>
    %c1_444 = arith.constant 1 : index
    %c0_445 = arith.constant 0 : index
    %c0_446 = arith.constant 0 : index
    %768 = vector.load %arg9[%c1_444, %c0_445, %c0_446] : memref<2x1x128xf32, #tpu.memory_space<vmem>>, vector<1x1x128xf32>
    %769 = vector.shape_cast %768 : vector<1x1x128xf32> to vector<1x128xf32>
    %770 = vector.shape_cast %767 : vector<1x128xf32> to vector<1x1x128xf32>
    tpu.vector_store %arg9[%c1_444, %c0_445, %c0_446], %770 {strides = array<i32>} : memref<2x1x128xf32, #tpu.memory_space<vmem>>, vector<1x1x128xf32>,
    return
  }
  func.func @transform_0(%arg0: i32) -> (i32, i32, i32) {
    %c0_i32 = arith.constant 0 : i32
    %c0_i32_0 = arith.constant 0 : i32
    %c0_i32_1 = arith.constant 0 : i32
    return %arg0, %c0_i32, %c0_i32_0 : i32, i32, i32
  }
  func.func @transform_1(%arg0: i32) -> (i32, i32) {
    %c0_i32 = arith.constant 0 : i32
    %c0_i32_0 = arith.constant 0 : i32
    %c0_i32_1 = arith.constant 0 : i32
    return %c0_i32, %c0_i32_0 : i32, i32
  }
  func.func @transform_2(%arg0: i32) -> (i32, i32) {
    %c0_i32 = arith.constant 0 : i32
    %c0_i32_0 = arith.constant 0 : i32
    %c0_i32_1 = arith.constant 0 : i32
    return %c0_i32, %c0_i32_0 : i32, i32
  }
  func.func @transform_3(%arg0: i32) -> (i32, i32) {
    %c0_i32 = arith.constant 0 : i32
    %c0_i32_0 = arith.constant 0 : i32
    %c0_i32_1 = arith.constant 0 : i32
    return %c0_i32, %c0_i32_0 : i32, i32
  }
  func.func @transform_4(%arg0: i32) -> (i32, i32) {
    %c0_i32 = arith.constant 0 : i32
    %c0_i32_0 = arith.constant 0 : i32
    %c0_i32_1 = arith.constant 0 : i32
    return %c0_i32, %c0_i32_0 : i32, i32
  }
  func.func @transform_5(%arg0: i32) -> (i32, i32) {
    %c0_i32 = arith.constant 0 : i32
    %c0_i32_0 = arith.constant 0 : i32
    %c0_i32_1 = arith.constant 0 : i32
    return %c0_i32, %c0_i32_0 : i32, i32
  }
  func.func @transform_6(%arg0: i32) -> (i32, i32) {
    %c0_i32 = arith.constant 0 : i32
    %c0_i32_0 = arith.constant 0 : i32
    %c0_i32_1 = arith.constant 0 : i32
    return %c0_i32, %c0_i32_0 : i32, i32
  }
  func.func @transform_7(%arg0: i32) -> (i32, i32, i32) {
    %c0_i32 = arith.constant 0 : i32
    %c0_i32_0 = arith.constant 0 : i32
    %c0_i32_1 = arith.constant 0 : i32
    return %arg0, %c0_i32, %c0_i32_0 : i32, i32, i32
  }
  func.func @transform_8(%arg0: i32) -> (i32, i32, i32) {
    %c0_i32 = arith.constant 0 : i32
    %c0_i32_0 = arith.constant 0 : i32
    %c0_i32_1 = arith.constant 0 : i32
    return %arg0, %c0_i32, %c0_i32_0 : i32, i32, i32
  }
}

</mosaic_0001>

<bundles_post_ra>
// kernel: meta_learner_forward.1
= control target key start
LH: loop header
LB: loop body
LE: loop exit
PB: predicated region body
PF: predicated region fallthrough
CT: control target
= control target key end

     0   :  { %14 = vsyncpa [#allocation9], 0  ;;  %s9531_s0 = inlined_call_operand.vmem [shape: f32[4,32,128], index: 0, kind: input, shape index: {}]   ;;  %s9532_s1 = inlined_call_operand.vmem [shape: f32[128,128], index: 1, kind: input, shape index: {}]   ;;  %s9533_s2 = inlined_call_operand.vmem [shape: f32[1,128], index: 2, kind: input, shape index: {}]   ;;  %s9534_s3 = inlined_call_operand.vmem [shape: f32[128,128], index: 3, kind: input, shape index: {}]   ;;  %s9535_s4 = inlined_call_operand.vmem [shape: f32[1,128], index: 4, kind: input, shape index: {}]   ;;  %s9536_s5 = inlined_call_operand.vmem [shape: f32[128,128], index: 5, kind: input, shape index: {}]   ;;  %s9537_s6 = inlined_call_operand.vmem [shape: f32[1,128], index: 6, kind: input, shape index: {}]   ;;  %s9538_s7 = inlined_call_operand.vmem [shape: f32[4,16,128], index: 7, kind: output, shape index: {0}]   ;;  %s9539_s8 = inlined_call_operand.hbm [shape: f32[4,1,128], index: 8, kind: output, shape index: {1}]  }
   0x1   :  { %16 = vsyncpa [#allocation9 + $0x1], 0  ;;  %s6417_s27 = smov 0   ;;  %s6419_s28 = smov 0  }
   0x2   :  { %s6421_s29 = smov 0   ;;  %s6423_s30 = smov 0  }
   0x3 LB: > { %s5653_s9 = sadd.s32 4294967295, %s6368_s30   ;;  %s5654_s10 = sadd.s32 4294967294, %s6368_s30   ;;  %s6368_s30 = sphi %s6423_s30, %s10227_s30   ;;  %s6364_s29 = sphi %s6421_s29, %s10226_s29   ;;  %s6360_s28 = sphi %s6419_s28, %s10225_s28   ;;  %s6356_s27 = sphi %s6417_s27, %s10224_s27  }
   0x4   : > { %s6440_s11 = sadd.s32 1, %s6368_s30   ;;  %s207_s12 = sadd.s32 1, %s6364_s29 }
   0x5   : > { %s204_s13 = ssub.s32 %s6368_s30, %s6440_s11  ;;  %p217_p0 = scmp.ne.s32.totalorder %s6364_s29, %s6360_s28 }
   0x6   : > { %p205_p1 = scmp.eq.s32.totalorder %s204_s13, 0  ;;  %p218_p2 = scmp.eq.s32.totalorder %s5653_s9, 1 }
   0x7   : > { %p223_p3 = scmp.ne.s32.totalorder %s6360_s28, %s6356_s27  ;;  %p224_p4 = scmp.eq.s32.totalorder %s5654_s10, 1 }
   0x8   : > { %s6450_s14 = scalar_select %p205_p1, %s6364_s29, %s207_s12  }
   0x9   : > { %p6452_p5 = por %p218_p2, %p217_p0  ;;  %p6456_p6 = por %p224_p4, %p223_p3 }
   0xa   : > { %p5657_p7 = scmp.ge.s32.totalorder %s6368_s30, 1  ;;  %p270_p8 = scmp.lt.s32.totalorder %s6368_s30, 3 }
   0xc   : > { %p271_p9 = pnand %p5657_p7, %p270_p8 }
   0xe   : > { %274 = sbr.rel (%p271_p9) target bundleno = 8421 (0x20e5), region = 48 }
  0x13   : > { %v6465_v0 = vld [vmem:[%s9532_s1 + $0x78] sm:$0xff]  ;;  %v6470_v1 = vld [vmem:[%s9532_s1 + $0x70] sm:$0xff]  ;;  %s6472_s21 = sshll.u32 %s5653_s9, 1  ;;  %v6479_v2 = vld [vmem:[%s9532_s1 + $0x68] sm:$0xff]  ;;  %vm581_vm10 = vcmask 130048   ;;  %s308_s20 = sand.u32 1, %s6360_s28  }
  0x14   : > { %401 = vmatpush.msra.mxu0 %v6465_v0  ;;  %p312_p10 = scmp.lt.s32.totalorder %s6472_s21, 3  ;;  %v6488_v3 = vld [vmem:[%s9532_s1 + $0x60] sm:$0xff]  ;;  %v6495_v4 = vld [vmem:[%s9532_s1 + $0x58] sm:$0xff]  ;;  %v6507_v6 = vld [vmem:[%s9532_s1 + $0x50] sm:$0xff]  ;;  %s5658_s22 = sshll.u32 %s308_s20, 1 }
  0x15   : > { %v6512_v7 = vld [vmem:[%s9534_s3 + $0x78] sm:$0xff]  ;;  %v6517_v8 = vld [vmem:[%s9534_s3 + $0x70] sm:$0xff]  ;;  %v6524_v9 = vld [vmem:[%s9532_s1 + $0x48] sm:$0xff] }
  0x16   : > { %402 = vmatpush.msra.mxu0 %v6470_v1  ;;  %s6483_s24 = scalar_select %p312_p10, %s6472_s21, 3  ;;  %429 = vmatpush.msra.mxu1 %v6512_v7  ;;  %v6529_v10 = vld [vmem:[%s9534_s3 + $0x68] sm:$0xff]  ;;  %v6536_v11 = vld [vmem:[%s9532_s1 + $0x40] sm:$0xff]  ;;  %v6548_v13 = vld [vmem:[%s9532_s1 + $0x38] sm:$0xff] }
  0x17   : > { %v6541_v12 = vld [vmem:[%s9534_s3 + $0x60] sm:$0xff]  ;;  %v6553_v14 = vld [vmem:[%s9534_s3 + $0x58] sm:$0xff]  ;;  %v6563_v16 = vld [vmem:[%s9532_s1 + $0x30] sm:$0xff] }
  0x18   : > { %403 = vmatpush.msra.mxu0 %v6479_v2  ;;  %s6000_s9 = sshll.u32 %s6483_s24, 5  ;;  %430 = vmatpush.msra.mxu1 %v6517_v8  ;;  %v6568_v17 = vld [vmem:[%s9534_s3 + $0x50] sm:$0xff]  ;;  %v6576_v18 = vld [vmem:[%s9532_s1 + $0x28] sm:$0xff]  ;;  %v6588_v20 = vld [vmem:[%s9532_s1 + $0x20] sm:$0xff]  ;;  %s6001_s19 = sshll.u32 %s6483_s24, 4 }
  0x19   : > { %s6500_s18 = scalar_lea.vmem %s9531_s0, %s6000_s9  ;;  %v6581_v19 = vld [vmem:[%s9534_s3 + $0x48] sm:$0xff]  ;;  %v6593_v21 = vld [vmem:[%s9534_s3 + $0x40] sm:$0xff]  ;;  %v6600_v22 = vld [vmem:[%s9532_s1 + $0x18] sm:$0xff]  ;;  %s8193_s23 = scalar_lea.vmem %s9538_s7, %s6001_s19 }
  0x1a   : > { %404 = vmatpush.msra.mxu0 %v6488_v3  ;;  %v394_v5 = vld [vmem:[%s6500_s18] sm:$0xff]  ;;  %431 = vmatpush.msra.mxu1 %v6529_v10  ;;  %v6557_v15 = vld [vmem:[%s6500_s18 + $0x8] sm:$0xff]  ;;  %v6605_v23 = vld [vmem:[%s9534_s3 + $0x38] sm:$0xff] }
  0x1b   : > { %908 = vxpose.xlu2.b32.start [1/2] (short) %v394_v5, 128  ;;  %v6612_v24 = vld [vmem:[%s9532_s1 + $0x10] sm:$0xff]  ;;  %v6624_v26 = vld [vmem:[%s9532_s1 + $0x8] sm:$0xff]  ;;  %v6636_v28 = vld [vmem:[%s9532_s1] sm:$0xff] }
  0x1c   : > { %405 = vmatpush.msra.mxu0 %v6495_v4  ;;  %432 = vmatpush.msra.mxu1 %v6541_v12  ;;  %v6617_v25 = vld [vmem:[%s9534_s3 + $0x30] sm:$0xff]  ;;  %v6629_v27 = vld [vmem:[%s9534_s3 + $0x28] sm:$0xff]  ;;  %v6641_v29 = vld [vmem:[%s9534_s3 + $0x20] sm:$0xff] }
  0x1d   : > { %v6648_v30 = vld [vmem:[%s9534_s3 + $0x18] sm:$0xff]  ;;  %v6657_v31 = vld [vmem:[%s9534_s3 + $0x10] sm:$0xff]  ;;  %v6663_v32 = vld [vmem:[%s9534_s3 + $0x8] sm:$0xff] }
  0x1e   : > { %406 = vmatpush.msra.mxu0 %v6507_v6  ;;  %433 = vmatpush.msra.mxu1 %v6553_v14  ;;  %v6669_v33 = vld [vmem:[%s9534_s3] sm:$0xff]  ;;  %v6675_v34 = vld [vmem:[%s9536_s5 + $0x78] sm:$0xff]  ;;  %v6680_v35 = vld [vmem:[%s9536_s5 + $0x70] sm:$0xff] }
  0x1f   : > { %457 = vmatpush.msra.mxu2 %v6675_v34  ;;  %v6687_v36 = vld [vmem:[%s9536_s5 + $0x68] sm:$0xff]  ;;  %v6693_v37 = vld [vmem:[%s9536_s5 + $0x60] sm:$0xff]  ;;  %v6700_v38 = vld [vmem:[%s9536_s5 + $0x58] sm:$0xff] }
  0x20   : > { %407 = vmatpush.msra.mxu0 %v6524_v9  ;;  %434 = vmatpush.msra.mxu1 %v6568_v17  ;;  %v6706_v39 = vld [vmem:[%s9536_s5 + $0x50] sm:$0xff]  ;;  %v6713_v40 = vld [vmem:[%s9536_s5 + $0x48] sm:$0xff]  ;;  %v6719_v41 = vld [vmem:[%s9536_s5 + $0x40] sm:$0xff] }
  0x21   : > { %458 = vmatpush.msra.mxu2 %v6680_v35  ;;  %9761 = vst [vmem:[#allocation11_spill] sm:$0xff] %v6706_v39  ;;  %v6726_v42 = vld [vmem:[%s9536_s5 + $0x38] sm:$0xff]  ;;  %v6076_v43 = vld [vmem:[%s9533_s2] ss:$0 sm:$0xff]  ;;  %v6735_v44 = vld [vmem:[%s9536_s5 + $0x30] sm:$0xff] }
  0x22   : > { %408 = vmatpush.msra.mxu0 %v6536_v11  ;;  %435 = vmatpush.msra.mxu1 %v6581_v19  ;;  %9762 = vst [vmem:[#allocation12_spill] sm:$0xff] %v6713_v40  ;;  %v6742_v45 = vld [vmem:[%s9536_s5 + $0x28] sm:$0xff]  ;;  %v6750_v48 = vld [vmem:[%s9536_s5 + $0x20] sm:$0xff]  ;;  %v6758_v50 = vld [vmem:[%s9536_s5 + $0x18] sm:$0xff] }
  0x23   : > { %909 = vxpose.xlu2.b32.end [2/2] (short) %v6557_v15, 128  ;;  %459 = vmatpush.msra.mxu2 %v6687_v36  ;;  %9763 = vst [vmem:[#allocation13_spill] sm:$0xff] %v6719_v41  ;;  %v6775_v54 = vld [vmem:[%s9536_s5 + $0x10] sm:$0xff]  ;;  %v6782_v55 = vld [vmem:[%s9536_s5 + $0x8] sm:$0xff]  ;;  %v6787_v56 = vld [vmem:[%s9536_s5] sm:$0xff] }
  0x24   : > { %409 = vmatpush.msra.mxu0 %v6548_v13  ;;  %436 = vmatpush.msra.mxu1 %v6593_v21  ;;  %9764 = vst [vmem:[#allocation14_spill] sm:$0xff] %v6726_v42  ;;  %v6077_v57 = vld [vmem:[%s9535_s4] ss:$0 sm:$0xff] }
  0x25   : > { %460 = vmatpush.msra.mxu2 %v6693_v37  ;;  %9765 = vst [vmem:[#allocation15_spill] sm:$0xff] %v6735_v44 }
  0x26   : > { %410 = vmatpush.msra.mxu0 %v6563_v16  ;;  %437 = vmatpush.msra.mxu1 %v6605_v23  ;;  %9766 = vst [vmem:[#allocation16_spill] sm:$0xff] %v6742_v45 }
  0x27   : > { %461 = vmatpush.msra.mxu2 %v6700_v38  ;;  %9767 = vst [vmem:[#allocation17_spill] sm:$0xff] %v6750_v48 }
  0x28   : > { %411 = vmatpush.msra.mxu0 %v6576_v18  ;;  %438 = vmatpush.msra.mxu1 %v6617_v25  ;;  %9768 = vst [vmem:[#allocation18_spill] sm:$0xff] %v6758_v50 }
  0x29   : > { %462 = vmatpush.msra.mxu2 %v6706_v39  ;;  %9769 = vst [vmem:[#allocation19_spill] sm:$0xff] %v6775_v54 }
  0x2a   : > { %412 = vmatpush.msra.mxu0 %v6588_v20  ;;  %439 = vmatpush.msra.mxu1 %v6629_v27  ;;  %9770 = vst [vmem:[#allocation20_spill] sm:$0xff] %v6782_v55 }
  0x2b   : > { %463 = vmatpush.msra.mxu2 %v6713_v40  ;;  %9771 = vst [vmem:[#allocation21_spill] sm:$0xff] %v6787_v56 }
  0x2c   : > { %413 = vmatpush.msra.mxu0 %v6600_v22  ;;  %440 = vmatpush.msra.mxu1 %v6641_v29 }
  0x2d   : > { %464 = vmatpush.msra.mxu2 %v6719_v41 }
  0x2e   : > { %414 = vmatpush.msra.mxu0 %v6612_v24  ;;  %441 = vmatpush.msra.mxu1 %v6648_v30 }
  0x2f   : > { %465 = vmatpush.msra.mxu2 %v6726_v42 }
  0x30   : > { %415 = vmatpush.msra.mxu0 %v6624_v26  ;;  %442 = vmatpush.msra.mxu1 %v6657_v31 }
  0x31   : > { %466 = vmatpush.msra.mxu2 %v6735_v44 }
  0x32   : > { %416 = vmatpush.msra.mxu0 %v6636_v28  ;;  %443 = vmatpush.msra.mxu1 %v6663_v32 }
  0x33   : > { %417 = vmatmul.f32.vlgmr.msra.gmra.mxu0 %v394_v5  ;;  %467 = vmatpush.msra.mxu2 %v6742_v45  ;;  %v6078_v5 = vld [vmem:[%s9537_s6] ss:$0 sm:$0xff] }
  0x34   : > { %444 = vmatpush.msra.mxu1 %v6669_v33  ;;  %702 = vmatpush.xpose.msrb.mxu0 %v6675_v34 }
  0x35   : > { %468 = vmatpush.msra.mxu2 %v6750_v48 }
  0x37   : > { %469 = vmatpush.msra.mxu2 %v6758_v50 }
  0x38   : > { %703 = vmatpush.xpose.msrb.mxu0 %v6680_v35 }
  0x39   : > { %470 = vmatpush.msra.mxu2 %v6775_v54 }
  0x3b   : > { %420 = vmatmul.f32.gmra.mxu0 %v6557_v15  ;;  %471 = vmatpush.msra.mxu2 %v6782_v55 }
  0x3c   : > { %704 = vmatpush.xpose.msrb.mxu0 %v6687_v36 }
  0x3d   : > { %472 = vmatpush.msra.mxu2 %v6787_v56 }
  0x3f   : > { %881 = vmatpush.xpose.msrb.mxu2 %v6512_v7 }
  0x40   : > { %705 = vmatpush.xpose.msrb.mxu0 %v6693_v37 }
  0x43   : > { %882 = vmatpush.xpose.msrb.mxu2 %v6517_v8 }
  0x44   : > { %706 = vmatpush.xpose.msrb.mxu0 %v6700_v38 }
  0x47   : > { %883 = vmatpush.xpose.msrb.mxu2 %v6529_v10 }
  0x48   : > { %707 = vmatpush.xpose.msrb.mxu0 %v6706_v39 }
  0x4b   : > { %884 = vmatpush.xpose.msrb.mxu2 %v6541_v12 }
  0x4c   : > { %708 = vmatpush.xpose.msrb.mxu0 %v6713_v40 }
  0x4f   : > { %885 = vmatpush.xpose.msrb.mxu2 %v6553_v14 }
  0x50   : > { %709 = vmatpush.xpose.msrb.mxu0 %v6719_v41 }
  0x53   : > { %886 = vmatpush.xpose.msrb.mxu2 %v6568_v17 }
  0x54   : > { %710 = vmatpush.xpose.msrb.mxu0 %v6726_v42 }
  0x57   : > { %887 = vmatpush.xpose.msrb.mxu2 %v6581_v19 }
  0x58   : > { %711 = vmatpush.xpose.msrb.mxu0 %v6735_v44 }
  0x5b   : > { %888 = vmatpush.xpose.msrb.mxu2 %v6593_v21 }
  0x5c   : > { %712 = vmatpush.xpose.msrb.mxu0 %v6742_v45 }
  0x5f   : > { %889 = vmatpush.xpose.msrb.mxu2 %v6605_v23 }
  0x60   : > { %713 = vmatpush.xpose.msrb.mxu0 %v6750_v48 }
  0x63   : > { %890 = vmatpush.xpose.msrb.mxu2 %v6617_v25 }
  0x64   : > { %714 = vmatpush.xpose.msrb.mxu0 %v6758_v50 }
  0x67   : > { %891 = vmatpush.xpose.msrb.mxu2 %v6629_v27 }
  0x68   : > { %715 = vmatpush.xpose.msrb.mxu0 %v6775_v54 }
  0x6b   : > { %892 = vmatpush.xpose.msrb.mxu2 %v6641_v29 }
  0x6c   : > { %716 = vmatpush.xpose.msrb.mxu0 %v6782_v55 }
  0x6f   : > { %893 = vmatpush.xpose.msrb.mxu2 %v6648_v30 }
  0x70   : > { %717 = vmatpush.xpose.msrb.mxu0 %v6787_v56 }
  0x73   : > { %894 = vmatpush.xpose.msrb.mxu2 %v6657_v31 }
  0x77   : > { %895 = vmatpush.xpose.msrb.mxu2 %v6663_v32 }
  0x7b   : > { %896 = vmatpush.xpose.msrb.mxu2 %v6669_v33 }
  0xb0   : > { %v418_v46 = vpop.f32.mrf.mxu0 }
  0xb1   : > { %v6745_v47 = vadd.f32 %v6076_v43, %v418_v46 }
  0xb3   : > { %v424_v49 = vmax.f32 %v6745_v47, 0.0  ;;  %vm904_vm11 = vcmp.gt.f32.partialorder %v6745_v47, 0.0 }
  0xb5   : > { %445 = vmatmul.f32.vlgmr.msra.gmra.mxu1 %v424_v49 }
  0xb8   : > { %v421_v51 = vpop.f32.mrf.mxu0 }
  0xb9   : > { %v6763_v52 = vadd.f32 %v6076_v43, %v421_v51 }
  0xbb   : > { %v425_v53 = vmax.f32 %v6763_v52, 0.0  ;;  %vm905_vm12 = vcmp.gt.f32.partialorder %v6763_v52, 0.0 }
  0xbd   : > { %448 = vmatmul.f32.gmra.mxu1 %v425_v53 }
 0x132   : > { %v446_v58 = vpop.f32.mrf.mxu1 }
 0x133   : > { %v6803_v59 = vadd.f32 %v6077_v57, %v446_v58 }
 0x135   : > { %v452_v60 = vmax.f32 %v6803_v59, 0.0  ;;  %vm725_vm8 = vcmp.gt.f32.partialorder %v6803_v59, 0.0 }
 0x137   : > { %473 = vmatmul.f32.vlgmr.msra.gmra.mxu2 %v452_v60 }
 0x13a   : > { %v449_v61 = vpop.f32.mrf.mxu1 }
 0x13b   : > { %v6808_v62 = vadd.f32 %v6077_v57, %v449_v61 }
 0x13d   : > { %v453_v63 = vmax.f32 %v6808_v62, 0.0  ;;  %vm726_vm9 = vcmp.gt.f32.partialorder %v6808_v62, 0.0  ;;  %v376_v62 = vld [vmem:[%s9535_s4] sm:$0x1] }
 0x13f   : > { %476 = vmatmul.f32.gmra.mxu2 %v453_v63 }
 0x1ba   : > { %v474_v43 = vpop.f32.mrf.mxu2 }
 0x1bb   : > { %v475_v46 = vadd.f32 %v6078_v5, %v474_v43 }
 0x1bd   : > { %480 = vmax.xlane.f32.xlu0 %v475_v46 }
 0x1c2   : > { %v477_v51 = vpop.f32.mrf.mxu2 }
 0x1c3   : > { %v478_v57 = vadd.f32 %v6078_v5, %v477_v51 }
 0x1c5   : > { %482 = vmax.xlane.f32.xlu0 %v478_v57 }
 0x1ee   : > { %729 = vxpose.xlu0.b32.start [1/2] (short) %v424_v49, 128 }
 0x1f6   : > { %730 = vxpose.xlu0.b32.end [2/2] (short) %v425_v53, 128 }
 0x230   : > { %v481_v58 = vpop.xlane.xlu0 %480 }
 0x231   : > { %v6821_v61 = vsub.f32 %v475_v46, %v481_v58 }
 0x233   : > { %9772 = vst [vmem:[#allocation22_spill] sm:$0xff] %v6821_v61  ;;  %v486_v55 = vmul.f32 1.442695, %v6821_v61 }
 0x235   : > { %6097 = vpow2.f32 %v486_v55 }
 0x238   : > { %v483_v56 = vpop.xlane.xlu0 %482 }
 0x239   : > { %v6824_v54 = vsub.f32 %v478_v57, %v483_v56 }
 0x23b   : > { %9773 = vst [vmem:[#allocation23_spill] sm:$0xff] %v6824_v54  ;;  %v6098_v50 = vpop.eup %6097  ;;  %v488_v48 = vmul.f32 1.442695, %v6824_v54 }
 0x23c   : > { %490 = vadd.xlane.f32.xlu1 %v6098_v50 }
 0x23d   : > { %6099 = vpow2.f32 %v488_v48 }
 0x243   : > { %v6100_v43 = vpop.eup %6099 }
 0x244   : > { %492 = vadd.xlane.f32.xlu1 %v6100_v43 }
 0x27e   : > { %549 = vxpose.xlu1.b32.start [1/2] (short) %v452_v60, 128 }
 0x286   : > { %550 = vxpose.xlu1.b32.end [2/2] (short) %v453_v63, 128 }
 0x2af   : > { %v6827_v49 = vpop.xlane.xlu1 %490 }
 0x2b0   : > { %9774 = vst [vmem:[#allocation24_spill] sm:$0xff] %v6827_v49  ;;  %6101 = vrcp.f32 %v6827_v49  ;;  %v505_v46 = vand.u32 2147483648, %v6827_v49  ;;  %v503_v60 = vand.u32 2147483647, %v6827_v49  ;;  %vm499_vm1 = vweird.f32 %v6827_v49 }
 0x2b2   : > { %v506_v57 = vor.u32 1.1754944e-38, %v505_v46  ;;  %vm504_vm3 = vcmp.eq.f32.partialorder %v503_v60, 8.507059e+37  ;;  %v6846_v60 = vld [vmem:[%s6500_s18 + $0x18] sm:$0xff] }
 0x2b3   : > { %9777 = vst [vmem:[#allocation27_spill] sm:$0xff] %v6846_v60 }
 0x2b6   : > { %v6102_v53 = vpop.eup %6101 }
 0x2b7   : > { %v495_v5 = vmul.f32 %v6102_v53, %v6827_v49  ;;  %v6831_v55 = vpop.xlane.xlu1 %492  ;;  %vm500_vm0 = vweird.f32 %v6102_v53 }
 0x2b8   : > { %9775 = vst [vmem:[#allocation25_spill] sm:$0xff] %v6831_v55  ;;  %6103 = vrcp.f32 %v6831_v55  ;;  %vm501_vm2 = vmor %vm499_vm1, %vm500_vm0  ;;  %v520_v44 = vand.u32 2147483648, %v6831_v55  ;;  %vm514_vm5 = vweird.f32 %v6831_v55 }
 0x2b9   : > { %v496_v56 = vsub.f32 1.0, %v495_v5 }
 0x2bb   : > { %v497_v48 = vmul.f32 %v6102_v53, %v496_v56  ;;  %v6840_v56 = vld [vmem:[%s6500_s18 + $0x10] sm:$0xff] }
 0x2bc   : > { %9776 = vst [vmem:[#allocation26_spill] sm:$0xff] %v6840_v56 }
 0x2bd   : > { %v498_v63 = vadd.f32 %v6102_v53, %v497_v48  ;;  %v518_v48 = vand.u32 2147483647, %v6831_v55 }
 0x2be   : > { %v6104_v51 = vpop.eup %6103 }
 0x2bf   : > { %v510_v58 = vmul.f32 %v6104_v51, %v6831_v55  ;;  %v502_v61 = vsel %vm501_vm2, %v6102_v53, %v498_v63  ;;  %vm515_vm4 = vweird.f32 %v6104_v51  ;;  %v521_v53 = vor.u32 1.1754944e-38, %v520_v44 }
 0x2c0   : > { %v507_v54 = vsel %vm504_vm3, %v506_v57, %v502_v61  ;;  %vm516_vm6 = vmor %vm514_vm5, %vm515_vm4  ;;  %vm519_vm7 = vcmp.eq.f32.partialorder %v518_v48, 8.507059e+37  ;;  %v745_v48 = vpop.trf.xlu0 }
 0x2c1   : > { %v511_v45 = vsub.f32 1.0, %v510_v58  ;;  %v508_v5 = vmul.f32 %v6098_v50, %v507_v54 }
 0x2c3   : > { %v512_v42 = vmul.f32 %v6104_v51, %v511_v45  ;;  %v545_v41 = vsub.f32 %v508_v5, %v6840_v56 }
 0x2c5   : > { %v547_v46 = vmul.f32 0.125, %v545_v41  ;;  %v513_v49 = vadd.f32 %v6104_v51, %v512_v42 }
 0x2c7   : > { %718 = vmatmul.f32.vlgmr.msrb.gmra.mxu0 %v547_v46  ;;  %v517_v61 = vsel %vm516_vm6, %v6104_v51, %v513_v49  ;;  %v393_v49 = vld [vmem:[%s9537_s6] sm:$0x1] }
 0x2c8   : > { %v522_v50 = vsel %vm519_vm7, %v521_v53, %v517_v61  ;;  %v746_v61 = vpop.trf.xlu0 }
 0x2c9   : > { %v523_v54 = vmul.f32 %v6100_v43, %v522_v50 }
 0x2cb   : > { %v546_v45 = vsub.f32 %v523_v54, %v6846_v60 }
 0x2cd   : > { %v548_v63 = vmul.f32 0.0, %v546_v45 }
 0x2cf   : > { %644 = vmatpush.msra.mxu3 %v548_v63  ;;  %v695_v57 = vadd.f32 %v548_v63, %v547_v46  ;;  %721 = vmatmul.f32.gmra.mxu0 %v548_v63 }
 0x2d0   : > { %v747_v63 = vpop.trf.xlu0 }
 0x2d1   : > { %v696_v58 = vrot.slane %v695_v57, 4  ;;  %645 = vmatpush.msra.mxu3 %v547_v46 }
 0x2d3   : > { %v697_v5 = vadd.f32 %v696_v58, %v695_v57 }
 0x2d5   : > { %v698_v41 = vrot.slane %v697_v5, 2 }
 0x2d7   : > { %v699_v42 = vadd.f32 %v698_v41, %v697_v5 }
 0x2d8   : > { %v748_v41 = vpop.trf.xlu0 }
 0x2d9   : > { %v700_v55 = vrot.slane %v699_v42, 1 }
 0x2db   : > { %v701_v44 = vadd.f32 %v700_v55, %v699_v42 }
 0x2dd   : > { %v1210_v43 = vmul.f32 0.01, %v701_v44 }
 0x2df   : > { %v1211_v51 = vsub.f32 %v393_v49, %v1210_v43 }
 0x2e0   : > { %v749_v43 = vpop.trf.xlu0 }
 0x2e1   : > { %1212 = vst [vmem:[#allocation7] sm:$0x1] %v1211_v51 }
 0x2e8   : > { %v750_v51 = vpop.trf.xlu0 }
 0x344   : > { %v719_v53 = vpop.f32.mrf.mxu0 }
 0x345   : > { %5699 = vmatmul.msk.f32.vlgmr.msrb.gmra.mxu2 %vm725_vm8, %v719_v53  ;;  %v727_v46 = vsel %vm725_vm8, %v719_v53, 0.0 }
 0x34c   : > { %v722_v50 = vpop.f32.mrf.mxu0 }
 0x34d   : > { %v728_v54 = vsel %vm726_vm9, %v722_v50, 0.0  ;;  %5681 = vmatpush.msk.msrb.mxu1 %vm726_vm9, %v722_v50  ;;  %5700 = vmatmul.msk.f32.gmra.mxu2 %vm726_vm9, %v722_v50 }
 0x34e   : > { %v874_v55 = vadd.f32 %v728_v54, %v727_v46 }
 0x34f   : > { %5682 = vmatpush.msk.msrb.mxu1 %vm725_vm8, %v719_v53 }
 0x350   : > { %v875_v45 = vrot.slane %v874_v55, 4  ;;  %5683 = vmatmul.msk.f32.vlgmr.msrb.gmra.mxu1 %vm581_vm10, %v745_v48  ;;  %v751_v48 = vpop.trf.xlu0 }
 0x352   : > { %v876_v57 = vadd.f32 %v875_v45, %v874_v55 }
 0x354   : > { %v877_v58 = vrot.slane %v876_v57, 2 }
 0x356   : > { %v878_v5 = vadd.f32 %v877_v58, %v876_v57 }
 0x358   : > { %v879_v59 = vrot.slane %v878_v5, 1  ;;  %5684 = vmatmul.msk.f32.gmra.mxu1 %vm581_vm10, %v746_v61  ;;  %v752_v53 = vpop.trf.xlu0 }
 0x35a   : > { %v880_v42 = vadd.f32 %v879_v59, %v878_v5 }
 0x35c   : > { %v1159_v44 = vmul.f32 0.01, %v880_v42 }
 0x35e   : > { %v1160_v49 = vsub.f32 %v376_v62, %v1159_v44 }
 0x360   : > { %1161 = vst [vmem:[#allocation5] sm:$0x1] %v1160_v49  ;;  %5685 = vmatmul.msk.f32.gmra.mxu1 %vm581_vm10, %v747_v63  ;;  %v753_v61 = vpop.trf.xlu0  ;;  %v6870_v63 = vpop.trf.xlu2 }
 0x361   : > { %9778 = vst [vmem:[#allocation28_spill] sm:$0xff] %v6870_v63 }
 0x368   : > { %5686 = vmatmul.msk.f32.gmra.mxu1 %vm581_vm10, %v748_v41  ;;  %v754_v50 = vpop.trf.xlu0  ;;  %v6873_v58 = vpop.trf.xlu2 }
 0x369   : > { %9779 = vst [vmem:[#allocation29_spill] sm:$0xff] %v6873_v58 }
 0x370   : > { %5687 = vmatmul.msk.f32.gmra.mxu1 %vm581_vm10, %v749_v43  ;;  %v755_v46 = vpop.trf.xlu0  ;;  %v6876_v59 = vpop.trf.xlu2 }
 0x371   : > { %9780 = vst [vmem:[#allocation30_spill] sm:$0xff] %v6876_v59 }
 0x378   : > { %5688 = vmatmul.msk.f32.gmra.mxu1 %vm581_vm10, %v750_v51  ;;  %v756_v54 = vpop.trf.xlu0  ;;  %v6883_v43 = vpop.trf.xlu2 }
 0x379   : > { %9781 = vst [vmem:[#allocation31_spill] sm:$0xff] %v6883_v43 }
 0x380   : > { %5689 = vmatmul.msk.f32.gmra.mxu1 %vm581_vm10, %v751_v48  ;;  %v757_v55 = vpop.trf.xlu0  ;;  %v6889_v47 = vpop.trf.xlu2 }
 0x381   : > { %9782 = vst [vmem:[#allocation32_spill] sm:$0xff] %v6889_v47 }
 0x388   : > { %5690 = vmatmul.msk.f32.gmra.mxu1 %vm581_vm10, %v752_v53  ;;  %v758_v45 = vpop.trf.xlu0 }
 0x390   : > { %5691 = vmatmul.msk.f32.gmra.mxu1 %vm581_vm10, %v753_v61  ;;  %v759_v57 = vpop.trf.xlu0 }
 0x398   : > { %5692 = vmatmul.msk.f32.gmra.mxu1 %vm581_vm10, %v754_v50  ;;  %v760_v5 = vpop.trf.xlu0 }
 0x3a0   : > { %5693 = vmatmul.msk.f32.gmra.mxu1 %vm581_vm10, %v755_v46 }
 0x3a8   : > { %5694 = vmatmul.msk.f32.gmra.mxu1 %vm581_vm10, %v756_v54 }
 0x3b0   : > { %5695 = vmatmul.msk.f32.gmra.mxu1 %vm581_vm10, %v757_v55 }
 0x3b8   : > { %5696 = vmatmul.msk.f32.gmra.mxu1 %vm581_vm10, %v758_v45  ;;  %v359_v45 = vld [vmem:[%s9533_s2] sm:$0x1] }
 0x3c0   : > { %5697 = vmatmul.msk.f32.gmra.mxu1 %vm581_vm10, %v759_v57 }
 0x3c8   : > { %v898_v41 = vpop.f32.mrf.mxu2  ;;  %5698 = vmatmul.msk.f32.gmra.mxu1 %vm581_vm10, %v760_v5 }
 0x3c9   : > { %v906_v44 = vsel %vm904_vm11, %v898_v41, 0.0 }
 0x3cd   : > { %v6879_v42 = vpop.f32.mrf.mxu1 }
 0x3d0   : > { %v901_v62 = vpop.f32.mrf.mxu2 }
 0x3d1   : > { %v907_v49 = vsel %vm905_vm12, %v901_v62, 0.0  ;;  %5701 = vmatpush.msk.msra.mxu0 %vm905_vm12, %v901_v62  ;;  %v6902_v62 = vpop.trf.xlu2 }
 0x3d2   : > { %v1053_v51 = vadd.f32 %v907_v49, %v906_v44  ;;  %9783 = vst [vmem:[#allocation33_spill] sm:$0xff] %v6902_v62 }
 0x3d3   : > { %5702 = vmatpush.msk.msra.mxu0 %vm904_vm11, %v898_v41 }
 0x3d4   : > { %v1054_v48 = vrot.slane %v1053_v51, 4  ;;  %5703 = vmatmul.msk.f32.vlgmr.msra.gmra.mxu0 %vm581_vm10, %v6870_v63 }
 0x3d5   : > { %v6887_v53 = vpop.f32.mrf.mxu1 }
 0x3d6   : > { %v1055_v61 = vadd.f32 %v1054_v48, %v1053_v51 }
 0x3d8   : > { %v1056_v50 = vrot.slane %v1055_v61, 2 }
 0x3d9   : > { %v6908_v49 = vpop.trf.xlu2 }
 0x3da   : > { %v1057_v46 = vadd.f32 %v1056_v50, %v1055_v61  ;;  %9784 = vst [vmem:[#allocation34_spill] sm:$0xff] %v6908_v49 }
 0x3dc   : > { %v1058_v52 = vrot.slane %v1057_v46, 1  ;;  %5704 = vmatmul.msk.f32.gmra.mxu0 %vm581_vm10, %v6873_v58 }
 0x3dd   : > { %v6893_v54 = vpop.f32.mrf.mxu1 }
 0x3de   : > { %v1059_v55 = vadd.f32 %v1058_v52, %v1057_v46  ;;  %v565_v46 = vpop.trf.xlu1 }
 0x3df   : > { %5665 = vmatmul.msk.f32.vlgmr.msra.gmra.mxu3 %vm581_vm10, %v565_v46 }
 0x3e0   : > { %v1108_v57 = vmul.f32 0.01, %v1059_v55 }
 0x3e1   : > { %v6914_v48 = vpop.trf.xlu2 }
 0x3e2   : > { %v1109_v5 = vsub.f32 %v359_v45, %v1108_v57  ;;  %9785 = vst [vmem:[#allocation35_spill] sm:$0xff] %v6914_v48 }
 0x3e4   : > { %1110 = vst [vmem:[#allocation3] sm:$0x1] %v1109_v5  ;;  %5705 = vmatmul.msk.f32.gmra.mxu0 %vm581_vm10, %v6876_v59 }
 0x3e5   : > { %v6900_v41 = vpop.f32.mrf.mxu1 }
 0x3e6   : > { %v566_v55 = vpop.trf.xlu1 }
 0x3e7   : > { %5666 = vmatmul.msk.f32.gmra.mxu3 %vm581_vm10, %v566_v55 }
 0x3e9   : > { %v6920_v50 = vpop.trf.xlu2 }
 0x3ea   : > { %9786 = vst [vmem:[#allocation36_spill] sm:$0xff] %v6920_v50 }
 0x3ec   : > { %5706 = vmatmul.msk.f32.gmra.mxu0 %vm581_vm10, %v6883_v43 }
 0x3ed   : > { %v6906_v44 = vpop.f32.mrf.mxu1 }
 0x3ee   : > { %v567_v5 = vpop.trf.xlu1 }
 0x3ef   : > { %5667 = vmatmul.msk.f32.gmra.mxu3 %vm581_vm10, %v567_v5 }
 0x3f1   : > { %v6929_v57 = vpop.trf.xlu2 }
 0x3f2   : > { %9787 = vst [vmem:[#allocation37_spill] sm:$0xff] %v6929_v57 }
 0x3f4   : > { %5707 = vmatmul.msk.f32.gmra.mxu0 %vm581_vm10, %v6889_v47 }
 0x3f5   : > { %v6912_v51 = vpop.f32.mrf.mxu1 }
 0x3f6   : > { %v568_v46 = vpop.trf.xlu1 }
 0x3f7   : > { %5668 = vmatmul.msk.f32.gmra.mxu3 %vm581_vm10, %v568_v46 }
 0x3fc   : > { %5708 = vmatmul.msk.f32.gmra.mxu0 %vm581_vm10, %v6902_v62 }
 0x3fd   : > { %v6918_v61 = vpop.f32.mrf.mxu1 }
 0x3fe   : > { %v569_v55 = vpop.trf.xlu1 }
 0x3ff   : > { %5669 = vmatmul.msk.f32.gmra.mxu3 %vm581_vm10, %v569_v55 }
 0x404   : > { %5709 = vmatmul.msk.f32.gmra.mxu0 %vm581_vm10, %v6908_v49  ;;  %v6935_v49 = vpop.trf.xlu2 }
 0x405   : > { %v6924_v52 = vpop.f32.mrf.mxu1  ;;  %9788 = vst [vmem:[#allocation38_spill] sm:$0xff] %v6935_v49 }
 0x40c   : > { %5710 = vmatmul.msk.f32.gmra.mxu0 %vm581_vm10, %v6914_v48  ;;  %v6940_v47 = vpop.trf.xlu2 }
 0x40d   : > { %v850_v45 = vpop.f32.mrf.mxu1  ;;  %9789 = vst [vmem:[#allocation39_spill] sm:$0xff] %v6940_v47 }
 0x414   : > { %5711 = vmatmul.msk.f32.gmra.mxu0 %vm581_vm10, %v6920_v50  ;;  %v6945_v43 = vpop.trf.xlu2 }
 0x415   : > { %v853_v62 = vpop.f32.mrf.mxu1  ;;  %9790 = vst [vmem:[#allocation40_spill] sm:$0xff] %v6945_v43 }
 0x41c   : > { %5712 = vmatmul.msk.f32.gmra.mxu0 %vm581_vm10, %v6929_v57  ;;  %v570_v57 = vpop.trf.xlu1  ;;  %v6952_v59 = vpop.trf.xlu2 }
 0x41d   : > { %v856_v48 = vpop.f32.mrf.mxu1  ;;  %5670 = vmatmul.msk.f32.gmra.mxu3 %vm581_vm10, %v570_v57  ;;  %9791 = vst [vmem:[#allocation41_spill] sm:$0xff] %v6952_v59 }
 0x424   : > { %5713 = vmatmul.msk.f32.gmra.mxu0 %vm581_vm10, %v6935_v49  ;;  %v571_v49 = vpop.trf.xlu1  ;;  %v6957_v58 = vpop.trf.xlu2 }
 0x425   : > { %v859_v50 = vpop.f32.mrf.mxu1  ;;  %5671 = vmatmul.msk.f32.gmra.mxu3 %vm581_vm10, %v571_v49  ;;  %9792 = vst [vmem:[#allocation42_spill] sm:$0xff] %v6957_v58 }
 0x42c   : > { %5714 = vmatmul.msk.f32.gmra.mxu0 %vm581_vm10, %v6940_v47  ;;  %v572_v47 = vpop.trf.xlu1  ;;  %v6965_v49 = vpop.trf.xlu2 }
 0x42d   : > { %v862_v5 = vpop.f32.mrf.mxu1  ;;  %5672 = vmatmul.msk.f32.gmra.mxu3 %vm581_vm10, %v572_v47  ;;  %9793 = vst [vmem:[#allocation43_spill] sm:$0xff] %v6965_v49  ;;  %v1122_v47 = vmul.f32 0.01, %v859_v50 }
 0x42e   : > { %v1123_v40 = vmul.f32 0.01, %v862_v5  ;;  %v1112_v5 = vmul.f32 0.01, %v6887_v53 }
 0x434   : > { %5715 = vmatmul.msk.f32.gmra.mxu0 %vm581_vm10, %v6945_v43  ;;  %v573_v39 = vpop.trf.xlu1 }
 0x435   : > { %v865_v46 = vpop.f32.mrf.mxu1  ;;  %5673 = vmatmul.msk.f32.gmra.mxu3 %vm581_vm10, %v573_v39  ;;  %v6985_v39 = vsub.f32 %v6553_v14, %v1122_v47 }
 0x436   : > { %v1124_v60 = vmul.f32 0.01, %v865_v46 }
 0x43c   : > { %5716 = vmatmul.msk.f32.gmra.mxu0 %vm581_vm10, %v6952_v59 }
 0x43d   : > { %v868_v55 = vpop.f32.mrf.mxu1 }
 0x43e   : > { %v1125_v43 = vmul.f32 0.01, %v868_v55  ;;  %v6974_v55 = vsub.f32 %v6529_v10, %v1124_v60  ;;  %v1119_v60 = vmul.f32 0.01, %v850_v45  ;;  %v1113_v45 = vmul.f32 0.01, %v6893_v54 }
 0x440   : > { %v6968_v59 = vsub.f32 %v6517_v8, %v1125_v43  ;;  %v6980_v8 = vsub.f32 %v6541_v12, %v1123_v40  ;;  %v574_v12 = vpop.trf.xlu1  ;;  %v1118_v40 = vmul.f32 0.01, %v6924_v52  ;;  %v1115_v52 = vmul.f32 0.01, %v6906_v44 }
 0x441   : > { %5674 = vmatmul.msk.f32.gmra.mxu3 %vm581_vm10, %v574_v12  ;;  %v7041_v54 = vsub.f32 %v6657_v31, %v1113_v45 }
 0x442   : > { %v7009_v50 = vsub.f32 %v6605_v23, %v1118_v40  ;;  %v7028_v44 = vsub.f32 %v6641_v29, %v1115_v52 }
 0x443   : > { %9800 = vst [vmem:[#allocation50_spill] sm:$0xff] %v7041_v54 }
 0x444   : > { %5717 = vmatmul.msk.f32.gmra.mxu0 %vm581_vm10, %v6957_v58  ;;  %9795 = vst [vmem:[#allocation45_spill] sm:$0xff] %v7009_v50 }
 0x445   : > { %v871_v57 = vpop.f32.mrf.mxu1  ;;  %9798 = vst [vmem:[#allocation48_spill] sm:$0xff] %v7028_v44 }
 0x446   : > { %v1126_v63 = vmul.f32 0.01, %v871_v57 }
 0x448   : > { %v6963_v56 = vsub.f32 %v6512_v7, %v1126_v63  ;;  %v1121_v7 = vmul.f32 0.01, %v856_v48  ;;  %v1120_v63 = vmul.f32 0.01, %v853_v62  ;;  %v1117_v62 = vmul.f32 0.01, %v6918_v61 }
 0x449   : > { %v7003_v48 = vsub.f32 %v6593_v21, %v1119_v60  ;;  %v575_v21 = vpop.trf.xlu1 }
 0x44a   : > { %1746 = vmatpush.xpose.msrb.mxu0 %v6963_v56  ;;  %1295 = vmatpush.msrb.mxu3 %v6963_v56  ;;  %v6991_v43 = vsub.f32 %v6568_v17, %v1121_v7  ;;  %v6998_v14 = vsub.f32 %v6581_v19, %v1120_v63  ;;  %v1116_v17 = vmul.f32 0.01, %v6912_v51  ;;  %v7016_v61 = vsub.f32 %v6617_v25, %v1117_v62 }
 0x44b   : > { %9794 = vst [vmem:[#allocation44_spill] sm:$0xff] %v7003_v48  ;;  %5675 = vmatmul.msk.f32.gmra.mxu3 %vm581_vm10, %v575_v21  ;;  %v1114_v51 = vmul.f32 0.01, %v6900_v41  ;;  %v1111_v25 = vmul.f32 0.01, %v6879_v42 }
 0x44c   : > { %5718 = vmatmul.msk.f32.gmra.mxu0 %vm581_vm10, %v6965_v49  ;;  %1296 = vmatpush.msrb.mxu3 %v6968_v59  ;;  %9796 = vst [vmem:[#allocation46_spill] sm:$0xff] %v7016_v61  ;;  %v7023_v23 = vsub.f32 %v6629_v27, %v1116_v17 }
 0x44d   : > { %v7035_v41 = vsub.f32 %v6648_v30, %v1114_v51  ;;  %v7047_v42 = vsub.f32 %v6669_v33, %v1111_v25  ;;  %v7050_v30 = vsub.f32 %v6663_v32, %v1112_v5 }
 0x44e   : > { %1747 = vmatpush.xpose.msrb.mxu0 %v6968_v59  ;;  %1297 = vmatpush.msrb.mxu3 %v6974_v55  ;;  %9797 = vst [vmem:[#allocation47_spill] sm:$0xff] %v7023_v23 }
 0x44f   : > { %9799 = vst [vmem:[#allocation49_spill] sm:$0xff] %v7035_v41 }
 0x450   : > { %1298 = vmatpush.msrb.mxu3 %v6980_v8  ;;  %9801 = vst [vmem:[#allocation51_spill] sm:$0xff] %v7047_v42 }
 0x451   : > { %v6988_v10 = vpop.f32.mrf.mxu0  ;;  %v576_v29 = vpop.trf.xlu1  ;;  %9802 = vst [vmem:[#allocation52_spill] sm:$0xff] %v7050_v30 }
 0x452   : > { %1748 = vmatpush.xpose.msrb.mxu0 %v6974_v55  ;;  %1299 = vmatpush.msrb.mxu3 %v6985_v39 }
 0x453   : > { %5676 = vmatmul.msk.f32.gmra.mxu3 %vm581_vm10, %v576_v29 }
 0x454   : > { %1300 = vmatpush.msrb.mxu3 %v6991_v43 }
 0x456   : > { %1749 = vmatpush.xpose.msrb.mxu0 %v6980_v8  ;;  %1301 = vmatpush.msrb.mxu3 %v6998_v14 }
 0x458   : > { %1302 = vmatpush.msrb.mxu3 %v7003_v48 }
 0x459   : > { %v7012_v19 = vpop.f32.mrf.mxu0  ;;  %v577_v53 = vpop.trf.xlu1 }
 0x45a   : > { %1750 = vmatpush.xpose.msrb.mxu0 %v6985_v39  ;;  %1303 = vmatpush.msrb.mxu3 %v7009_v50 }
 0x45b   : > { %5677 = vmatmul.msk.f32.gmra.mxu3 %vm581_vm10, %v577_v53 }
 0x45c   : > { %1304 = vmatpush.msrb.mxu3 %v7016_v61 }
 0x45e   : > { %1751 = vmatpush.xpose.msrb.mxu0 %v6991_v43  ;;  %1305 = vmatpush.msrb.mxu3 %v7023_v23 }
 0x460   : > { %1306 = vmatpush.msrb.mxu3 %v7028_v44 }
 0x461   : > { %v7038_v27 = vpop.f32.mrf.mxu0  ;;  %v578_v32 = vpop.trf.xlu1 }
 0x462   : > { %1752 = vmatpush.xpose.msrb.mxu0 %v6998_v14  ;;  %1307 = vmatpush.msrb.mxu3 %v7035_v41  ;;  %v7070_v60 = vpop.f32.mrf.mxu3 }
 0x463   : > { %5678 = vmatmul.msk.f32.gmra.mxu3 %vm581_vm10, %v578_v32 }
 0x464   : > { %1308 = vmatpush.msrb.mxu3 %v7041_v54 }
 0x466   : > { %1753 = vmatpush.xpose.msrb.mxu0 %v7003_v48  ;;  %1309 = vmatpush.msrb.mxu3 %v7050_v30 }
 0x468   : > { %1310 = vmatpush.msrb.mxu3 %v7047_v42 }
 0x469   : > { %v7056_v31 = vpop.f32.mrf.mxu0  ;;  %v579_v57 = vpop.trf.xlu1 }
 0x46a   : > { %1754 = vmatpush.xpose.msrb.mxu0 %v7009_v50  ;;  %v7072_v40 = vpop.f32.mrf.mxu3 }
 0x46b   : > { %5679 = vmatmul.msk.f32.gmra.mxu3 %vm581_vm10, %v579_v57 }
 0x46e   : > { %1755 = vmatpush.xpose.msrb.mxu0 %v7016_v61 }
 0x471   : > { %v1017_v33 = vpop.f32.mrf.mxu0  ;;  %v580_v7 = vpop.trf.xlu1 }
 0x472   : > { %1756 = vmatpush.xpose.msrb.mxu0 %v7023_v23  ;;  %v7074_v17 = vpop.f32.mrf.mxu3 }
 0x473   : > { %5680 = vmatmul.msk.f32.gmra.mxu3 %vm581_vm10, %v580_v7 }
 0x476   : > { %1757 = vmatpush.xpose.msrb.mxu0 %v7028_v44 }
 0x479   : > { %v1020_v46 = vpop.f32.mrf.mxu0 }
 0x47a   : > { %1758 = vmatpush.xpose.msrb.mxu0 %v7035_v41  ;;  %v7076_v21 = vpop.f32.mrf.mxu3 }
 0x47e   : > { %1759 = vmatpush.xpose.msrb.mxu0 %v7041_v54 }
 0x481   : > { %v1023_v47 = vpop.f32.mrf.mxu0 }
 0x482   : > { %1760 = vmatpush.xpose.msrb.mxu0 %v7050_v30  ;;  %v7078_v45 = vpop.f32.mrf.mxu3 }
 0x486   : > { %1761 = vmatpush.xpose.msrb.mxu0 %v7047_v42 }
 0x489   : > { %v1026_v63 = vpop.f32.mrf.mxu0 }
 0x491   : > { %v1029_v12 = vpop.f32.mrf.mxu0 }
 0x499   : > { %v1032_v62 = vpop.f32.mrf.mxu0 }
 0x4a0   : > { %v7080_v5 = vpop.f32.mrf.mxu3 }
 0x4a1   : > { %v1035_v52 = vpop.f32.mrf.mxu0 }
 0x4a8   : > { %v7082_v53 = vpop.f32.mrf.mxu3 }
 0x4a9   : > { %v1038_v51 = vpop.f32.mrf.mxu0 }
 0x4aa   : > { %v1071_v50 = vmul.f32 0.01, %v1038_v51 }
 0x4b0   : > { %v7084_v57 = vpop.f32.mrf.mxu3 }
 0x4b1   : > { %v1041_v25 = vpop.f32.mrf.mxu0 }
 0x4b2   : > { %v1072_v44 = vmul.f32 0.01, %v1041_v25 }
 0x4b8   : > { %v7093_v61 = vpop.f32.mrf.mxu3 }
 0x4b9   : > { %v1044_v29 = vpop.f32.mrf.mxu0 }
 0x4ba   : > { %v1073_v54 = vmul.f32 0.01, %v1044_v29  ;;  %v7100_v29 = vsub.f32 %v6488_v3, %v1072_v44  ;;  %v1066_v3 = vmul.f32 0.01, %v1023_v47  ;;  %v1063_v47 = vmul.f32 0.01, %v7056_v31 }
 0x4bc   : > { %v7096_v48 = vsub.f32 %v6479_v2, %v1073_v54  ;;  %v1067_v54 = vmul.f32 0.01, %v1026_v63  ;;  %v7124_v63 = vsub.f32 %v6563_v16, %v1066_v3  ;;  %v1061_v16 = vmul.f32 0.01, %v7012_v19 }
 0x4bd   : > { %v1170_v3 = vmul.f32 0.01, %v7093_v61  ;;  %v1167_v61 = vmul.f32 0.01, %v7080_v5  ;;  %v1164_v5 = vmul.f32 0.01, %v7074_v17 }
 0x4be   : > { %9803 = vst [vmem:[#allocation53_spill] sm:$0xff] %v7124_v63  ;;  %v9820_v17 = vld [vmem:[#allocation21_spill] sm:$0xff] }
 0x4c1   : > { %v1047_v32 = vpop.f32.mrf.mxu0 }
 0x4c2   : > { %v1074_v42 = vmul.f32 0.01, %v1047_v32  ;;  %v1070_v32 = vmul.f32 0.01, %v1035_v52 }
 0x4c4   : > { %v7090_v23 = vsub.f32 %v6470_v1, %v1074_v42  ;;  %v7104_v1 = vsub.f32 %v6495_v4, %v1071_v50  ;;  %v1068_v42 = vmul.f32 0.01, %v1029_v12  ;;  %v674_v2 = vpop.f32.mrf.mxu3  ;;  %v1065_v4 = vmul.f32 0.01, %v1020_v46 }
 0x4c5   : > { %v7120_v50 = vsub.f32 %v6548_v13, %v1067_v54  ;;  %v1062_v13 = vmul.f32 0.01, %v7038_v27 }
 0x4c6   : > { %v7116_v44 = vsub.f32 %v6536_v11, %v1068_v42  ;;  %v7129_v11 = vsub.f32 %v6576_v18, %v1065_v4  ;;  %v1060_v18 = vmul.f32 0.01, %v6988_v10 }
 0x4c7   : > { %v7144_v31 = vsub.f32 %v6612_v24, %v1062_v13  ;;  %v9814_v13 = vld [vmem:[#allocation14_spill] sm:$0xff] }
 0x4c8   : > { %9804 = vst [vmem:[#allocation54_spill] sm:$0xff] %v7129_v11  ;;  %v7152_v19 = vsub.f32 %v6636_v28, %v1060_v18  ;;  %v9815_v18 = vld [vmem:[#allocation15_spill] sm:$0xff] }
 0x4c9   : > { %v1050_v7 = vpop.f32.mrf.mxu0  ;;  %9807 = vst [vmem:[#allocation57_spill] sm:$0xff] %v7144_v31 }
 0x4ca   : > { %v1075_v30 = vmul.f32 0.01, %v1050_v7  ;;  %9809 = vst [vmem:[#allocation59_spill] sm:$0xff] %v7152_v19 }
 0x4cc   : > { %v7087_v41 = vsub.f32 %v6465_v0, %v1075_v30  ;;  %v1069_v0 = vmul.f32 0.01, %v1032_v62  ;;  %v7108_v30 = vsub.f32 %v6507_v6, %v1070_v32  ;;  %v1064_v6 = vmul.f32 0.01, %v1017_v33 }
 0x4cd   : > { %v7139_v33 = vsub.f32 %v6600_v22, %v1063_v47  ;;  %v7157_v22 = vld [vmem:[%s6500_s18] sm:$0xff] }
 0x4ce   : > { %1267 = vmatpush.msra.mxu2 %v7087_v41  ;;  %v7112_v52 = vsub.f32 %v6524_v9, %v1069_v0  ;;  %v677_v9 = vpop.f32.mrf.mxu3  ;;  %v7134_v46 = vsub.f32 %v6588_v20, %v1064_v6  ;;  %v7148_v20 = vsub.f32 %v6624_v26, %v1061_v16  ;;  %9810 = vst [vmem:[#allocation60_spill] sm:$0xff] %v7157_v22  ;;  %v9812_v6 = vld [vmem:[#allocation12_spill] sm:$0xff] }
 0x4cf   : > { %9806 = vst [vmem:[#allocation56_spill] sm:$0xff] %v7139_v33  ;;  %v1172_v42 = vmul.f32 0.01, %v677_v9 }
 0x4d0   : > { %1268 = vmatpush.msra.mxu2 %v7090_v23  ;;  %9805 = vst [vmem:[#allocation55_spill] sm:$0xff] %v7134_v46 }
 0x4d1   : > { %9808 = vst [vmem:[#allocation58_spill] sm:$0xff] %v7148_v20 }
 0x4d2   : > { %1269 = vmatpush.msra.mxu2 %v7096_v48 }
 0x4d4   : > { %1270 = vmatpush.msra.mxu2 %v7100_v29 }
 0x4d6   : > { %1271 = vmatpush.msra.mxu2 %v7104_v1  ;;  %v680_v27 = vpop.f32.mrf.mxu3 }
 0x4d7   : > { %v1173_v0 = vmul.f32 0.01, %v680_v27 }
 0x4d8   : > { %1272 = vmatpush.msra.mxu2 %v7108_v30 }
 0x4da   : > { %1273 = vmatpush.msra.mxu2 %v7112_v52 }
 0x4dc   : > { %1274 = vmatpush.msra.mxu2 %v7116_v44 }
 0x4de   : > { %1275 = vmatpush.msra.mxu2 %v7120_v50  ;;  %v683_v24 = vpop.f32.mrf.mxu3 }
 0x4df   : > { %v1174_v7 = vmul.f32 0.01, %v683_v24  ;;  %v9816_v24 = vld [vmem:[#allocation16_spill] sm:$0xff] }
 0x4e0   : > { %1276 = vmatpush.msra.mxu2 %v7124_v63 }
 0x4e1   : > { %v7174_v54 = vsub.f32 %v6693_v37, %v1174_v7  ;;  %v1169_v37 = vmul.f32 0.01, %v7084_v57  ;;  %v1166_v57 = vmul.f32 0.01, %v7078_v45  ;;  %v1162_v45 = vmul.f32 0.01, %v7070_v60 }
 0x4e2   : > { %1277 = vmatpush.msra.mxu2 %v7129_v11  ;;  %v6079_v60 = vld [vmem:[#allocation3] ss:$0 sm:$0xff] }
 0x4e3   : > { %v7201_v16 = vsub.f32 %v9814_v13, %v1169_v37 }
 0x4e4   : > { %1278 = vmatpush.msra.mxu2 %v7134_v46  ;;  %v9828_v46 = vld [vmem:[#allocation28_spill] sm:$0xff] }
 0x4e6   : > { %1279 = vmatpush.msra.mxu2 %v7139_v33  ;;  %v686_v10 = vpop.f32.mrf.mxu3 }
 0x4e7   : > { %v1175_v25 = vmul.f32 0.01, %v686_v10  ;;  %v7212_v10 = vsub.f32 %v9816_v24, %v1167_v61 }
 0x4e8   : > { %1280 = vmatpush.msra.mxu2 %v7144_v31  ;;  %v9826_v31 = vld [vmem:[#allocation26_spill] sm:$0xff] }
 0x4ea   : > { %1281 = vmatpush.msra.mxu2 %v7148_v20 }
 0x4ec   : > { %1282 = vmatpush.msra.mxu2 %v7152_v19 }
 0x4ed   : > { %1283 = vmatmul.f32.vlgmr.msra.gmra.mxu2 %v7157_v22 }
 0x4ee   : > { %v689_v12 = vpop.f32.mrf.mxu3 }
 0x4ef   : > { %v1176_v62 = vmul.f32 0.01, %v689_v12  ;;  %v9817_v12 = vld [vmem:[#allocation17_spill] sm:$0xff] }
 0x4f1   : > { %v7165_v32 = vsub.f32 %v6680_v35, %v1176_v62  ;;  %v7179_v35 = vsub.f32 %v6700_v38, %v1173_v0  ;;  %v1168_v38 = vmul.f32 0.01, %v7082_v53  ;;  %v1165_v53 = vmul.f32 0.01, %v7076_v21 }
 0x4f2   : > { %v1163_v62 = vmul.f32 0.01, %v7072_v40  ;;  %v7233_v0 = vsub.f32 %v9820_v17, %v1162_v45 }
 0x4f3   : > { %v7206_v27 = vsub.f32 %v9815_v18, %v1168_v38 }
 0x4f5   : > { %1286 = vmatmul.f32.gmra.mxu2 %v6557_v15  ;;  %v7170_v15 = vsub.f32 %v6687_v36, %v1175_v25  ;;  %v9811_v36 = vld [vmem:[#allocation11_spill] sm:$0xff] }
 0x4f6   : > { %v692_v26 = vpop.f32.mrf.mxu3  ;;  %v7184_v4 = vsub.f32 %v9811_v36, %v1172_v42  ;;  %v9819_v25 = vld [vmem:[#allocation19_spill] sm:$0xff]  ;;  %v9821_v42 = vld [vmem:[#allocation20_spill] sm:$0xff] }
 0x4f7   : > { %v1177_v51 = vmul.f32 0.01, %v692_v26  ;;  %v7217_v26 = vsub.f32 %v9817_v12, %v1166_v57  ;;  %v7228_v7 = vsub.f32 %v9819_v25, %v1164_v5  ;;  %v6081_v5 = vld [vmem:[#allocation7] ss:$0 sm:$0xff] }
 0x4f9   : > { %v7162_v28 = vsub.f32 %v6675_v34, %v1177_v51  ;;  %v1171_v34 = vmul.f32 0.01, %v674_v2  ;;  %v9813_v2 = vld [vmem:[#allocation13_spill] sm:$0xff]  ;;  %v9818_v51 = vld [vmem:[#allocation18_spill] sm:$0xff] }
 0x4fa   : > { %v7195_v47 = vsub.f32 %v9813_v2, %v1170_v3  ;;  %v7224_v21 = vsub.f32 %v9818_v51, %v1165_v53  ;;  %v6080_v2 = vld [vmem:[#allocation5] ss:$0 sm:$0xff] }
 0x4fb   : > { %1567 = vmatpush.xpose.msra.mxu1 %v7162_v28  ;;  %1323 = vmatpush.msrb.mxu2 %v7162_v28  ;;  %v7190_v9 = vsub.f32 %v9812_v6, %v1171_v34  ;;  %v7236_v34 = vsub.f32 %v9821_v42, %v1163_v62 }
 0x4fd   : > { %1324 = vmatpush.msrb.mxu2 %v7165_v32 }
 0x4ff   : > { %1568 = vmatpush.xpose.msra.mxu1 %v7165_v32  ;;  %1325 = vmatpush.msrb.mxu2 %v7170_v15 }
 0x501   : > { %1326 = vmatpush.msrb.mxu2 %v7174_v54 }
 0x503   : > { %1569 = vmatpush.xpose.msra.mxu1 %v7170_v15  ;;  %1327 = vmatpush.msrb.mxu2 %v7179_v35 }
 0x505   : > { %1328 = vmatpush.msrb.mxu2 %v7184_v4 }
 0x507   : > { %1570 = vmatpush.xpose.msra.mxu1 %v7174_v54  ;;  %1329 = vmatpush.msrb.mxu2 %v7190_v9 }
 0x509   : > { %1330 = vmatpush.msrb.mxu2 %v7195_v47 }
 0x50b   : > { %1571 = vmatpush.xpose.msra.mxu1 %v7179_v35  ;;  %1331 = vmatpush.msrb.mxu2 %v7201_v16 }
 0x50d   : > { %1332 = vmatpush.msrb.mxu2 %v7206_v27 }
 0x50f   : > { %1572 = vmatpush.xpose.msra.mxu1 %v7184_v4  ;;  %1333 = vmatpush.msrb.mxu2 %v7212_v10 }
 0x511   : > { %1334 = vmatpush.msrb.mxu2 %v7217_v26 }
 0x513   : > { %1573 = vmatpush.xpose.msra.mxu1 %v7190_v9  ;;  %1335 = vmatpush.msrb.mxu2 %v7224_v21 }
 0x515   : > { %1336 = vmatpush.msrb.mxu2 %v7228_v7 }
 0x517   : > { %1574 = vmatpush.xpose.msra.mxu1 %v7195_v47  ;;  %1337 = vmatpush.msrb.mxu2 %v7236_v34 }
 0x519   : > { %1338 = vmatpush.msrb.mxu2 %v7233_v0 }
 0x51b   : > { %1575 = vmatpush.xpose.msra.mxu1 %v7201_v16 }
 0x51f   : > { %1576 = vmatpush.xpose.msra.mxu1 %v7206_v27 }
 0x523   : > { %1577 = vmatpush.xpose.msra.mxu1 %v7212_v10 }
 0x527   : > { %1578 = vmatpush.xpose.msra.mxu1 %v7217_v26 }
 0x52b   : > { %1579 = vmatpush.xpose.msra.mxu1 %v7224_v21 }
 0x52f   : > { %1580 = vmatpush.xpose.msra.mxu1 %v7228_v7 }
 0x533   : > { %1581 = vmatpush.xpose.msra.mxu1 %v7236_v34 }
 0x537   : > { %1582 = vmatpush.xpose.msra.mxu1 %v7233_v0 }
 0x570   : > { %v1284_v40 = vpop.f32.mrf.mxu2 }
 0x571   : > { %v7250_v3 = vadd.f32 %v6079_v60, %v1284_v40 }
 0x573   : > { %v1290_v36 = vmax.f32 %v7250_v3, 0.0  ;;  %vm1769_vm7 = vcmp.gt.f32.partialorder %v7250_v3, 0.0 }
 0x575   : > { %1311 = vmatmul.f32.vlgmr.msrb.gmra.mxu3 %v1290_v36 }
 0x578   : > { %v1287_v37 = vpop.f32.mrf.mxu2 }
 0x579   : > { %v7253_v6 = vadd.f32 %v6079_v60, %v1287_v37 }
 0x57b   : > { %v1291_v38 = vmax.f32 %v7253_v6, 0.0  ;;  %vm1770_vm8 = vcmp.gt.f32.partialorder %v7253_v6, 0.0 }
 0x57d   : > { %1314 = vmatmul.f32.gmra.mxu3 %v1291_v38 }
 0x5f8   : > { %v1312_v61 = vpop.f32.mrf.mxu3 }
 0x5f9   : > { %v7256_v13 = vadd.f32 %v6080_v2, %v1312_v61 }
 0x5fb   : > { %v1318_v57 = vmax.f32 %v7256_v13, 0.0  ;;  %vm1590_vm5 = vcmp.gt.f32.partialorder %v7256_v13, 0.0 }
 0x5fd   : > { %1339 = vmatmul.f32.vlgmr.msrb.gmra.mxu2 %v1318_v57 }
 0x600   : > { %v1315_v18 = vpop.f32.mrf.mxu3 }
 0x601   : > { %v7259_v53 = vadd.f32 %v6080_v2, %v1315_v18 }
 0x603   : > { %v1319_v24 = vmax.f32 %v7259_v53, 0.0  ;;  %vm1591_vm6 = vcmp.gt.f32.partialorder %v7259_v53, 0.0 }
 0x605   : > { %1342 = vmatmul.f32.gmra.mxu2 %v1319_v24 }
 0x680   : > { %v1340_v12 = vpop.f32.mrf.mxu2 }
 0x681   : > { %v1341_v45 = vadd.f32 %v6081_v5, %v1340_v12 }
 0x683   : > { %1346 = vmax.xlane.f32.xlu2 %v1341_v45 }
 0x688   : > { %v1343_v62 = vpop.f32.mrf.mxu2 }
 0x689   : > { %v1344_v51 = vadd.f32 %v6081_v5, %v1343_v62 }
 0x68b   : > { %1348 = vmax.xlane.f32.xlu0 %v1344_v51 }
 0x6b4   : > { %1415 = vxpose.xlu0.b32.start [1/2] (short) %v1318_v57, 128 }
 0x6bc   : > { %1416 = vxpose.xlu0.b32.end [2/2] (short) %v1319_v24, 128 }
 0x6f6   : > { %v1347_v25 = vpop.xlane.xlu2 %1346 }
 0x6f7   : > { %v7262_v17 = vsub.f32 %v1341_v45, %v1347_v25 }
 0x6f9   : > { %9822 = vst [vmem:[#allocation11_spill] sm:$0xff] %v7262_v17  ;;  %v1352_v42 = vmul.f32 1.442695, %v7262_v17 }
 0x6fb   : > { %6105 = vpow2.f32 %v1352_v42 }
 0x6fe   : > { %v1349_v60 = vpop.xlane.xlu0 %1348 }
 0x6ff   : > { %v7265_v40 = vsub.f32 %v1344_v51, %v1349_v60 }
 0x701   : > { %9823 = vst [vmem:[#allocation12_spill] sm:$0xff] %v7265_v40  ;;  %v6106_v37 = vpop.eup %6105  ;;  %v1354_v2 = vmul.f32 1.442695, %v7265_v40 }
 0x702   : > { %1356 = vadd.xlane.f32.xlu1 %v6106_v37 }
 0x703   : > { %6107 = vpow2.f32 %v1354_v2 }
 0x709   : > { %v6108_v61 = vpop.eup %6107 }
 0x70a   : > { %1358 = vadd.xlane.f32.xlu2 %v6108_v61 }
 0x733   : > { %1594 = vxpose.xlu2.b32.start [1/2] (short) %v1290_v36, 128 }
 0x73b   : > { %1595 = vxpose.xlu2.b32.end [2/2] (short) %v1291_v38, 128 }
 0x758   : > { %v1431_v18 = vpop.trf.xlu0 }
 0x760   : > { %v1432_v38 = vpop.trf.xlu0 }
 0x775   : > { %v7268_v57 = vpop.xlane.xlu1 %1356 }
 0x776   : > { %9824 = vst [vmem:[#allocation13_spill] sm:$0xff] %v7268_v57  ;;  %6109 = vrcp.f32 %v7268_v57  ;;  %v1371_v62 = vand.u32 2147483648, %v7268_v57  ;;  %v1369_v36 = vand.u32 2147483647, %v7268_v57  ;;  %vm1365_vm14 = vweird.f32 %v7268_v57 }
 0x778   : > { %v1372_v60 = vor.u32 1.1754944e-38, %v1371_v62  ;;  %vm1370_vm0 = vcmp.eq.f32.partialorder %v1369_v36, 8.507059e+37  ;;  %v1433_v62 = vpop.trf.xlu0 }
 0x77c   : > { %v6110_v24 = vpop.eup %6109 }
 0x77d   : > { %v1361_v5 = vmul.f32 %v6110_v24, %v7268_v57  ;;  %v7272_v12 = vpop.xlane.xlu2 %1358  ;;  %vm1366_vm13 = vweird.f32 %v6110_v24 }
 0x77e   : > { %9825 = vst [vmem:[#allocation14_spill] sm:$0xff] %v7272_v12  ;;  %6111 = vrcp.f32 %v7272_v12  ;;  %vm1367_vm15 = vmor %vm1365_vm14, %vm1366_vm13  ;;  %v1386_v19 = vand.u32 2147483648, %v7272_v12  ;;  %v1384_v20 = vand.u32 2147483647, %v7272_v12  ;;  %vm1380_vm2 = vweird.f32 %v7272_v12 }
 0x77f   : > { %v1362_v45 = vsub.f32 1.0, %v1361_v5 }
 0x780   : > { %v1387_v36 = vor.u32 1.1754944e-38, %v1386_v19  ;;  %vm1385_vm4 = vcmp.eq.f32.partialorder %v1384_v20, 8.507059e+37 }
 0x781   : > { %v1363_v51 = vmul.f32 %v6110_v24, %v1362_v45 }
 0x783   : > { %v1364_v25 = vadd.f32 %v6110_v24, %v1363_v51 }
 0x784   : > { %v6112_v42 = vpop.eup %6111 }
 0x785   : > { %v1376_v2 = vmul.f32 %v6112_v42, %v7272_v12  ;;  %v1368_v17 = vsel %vm1367_vm15, %v6110_v24, %v1364_v25  ;;  %vm1381_vm1 = vweird.f32 %v6112_v42 }
 0x786   : > { %v1373_v40 = vsel %vm1370_vm0, %v1372_v60, %v1368_v17  ;;  %vm1382_vm3 = vmor %vm1380_vm2, %vm1381_vm1 }
 0x787   : > { %v1377_v22 = vsub.f32 1.0, %v1376_v2  ;;  %v1374_v5 = vmul.f32 %v6106_v37, %v1373_v40  ;;  %v9827_v37 = vld [vmem:[#allocation27_spill] sm:$0xff]  ;;  %v1434_v2 = vpop.trf.xlu0 }
 0x789   : > { %v1378_v45 = vmul.f32 %v6112_v42, %v1377_v22  ;;  %v1411_v51 = vsub.f32 %v1374_v5, %v9826_v31 }
 0x78b   : > { %v1379_v33 = vadd.f32 %v6112_v42, %v1378_v45  ;;  %v1413_v57 = vmul.f32 0.125, %v1411_v51 }
 0x78d   : > { %1583 = vmatmul.f32.vlgmr.msra.gmra.mxu1 %v1413_v57  ;;  %v1383_v17 = vsel %vm1382_vm3, %v6112_v42, %v1379_v33  ;;  %v1263_v42 = vld [vmem:[#allocation7] sm:$0x1] }
 0x78e   : > { %v1388_v24 = vsel %vm1385_vm4, %v1387_v36, %v1383_v17 }
 0x78f   : > { %v1389_v40 = vmul.f32 %v6108_v61, %v1388_v24  ;;  %v1435_v20 = vpop.trf.xlu0 }
 0x791   : > { %v1412_v25 = vsub.f32 %v1389_v40, %v9827_v37 }
 0x793   : > { %v1414_v22 = vmul.f32 0.0, %v1412_v25 }
 0x795   : > { %1509 = vmatpush.msra.mxu3 %v1414_v22  ;;  %v1560_v60 = vadd.f32 %v1414_v22, %v1413_v57  ;;  %1586 = vmatmul.f32.gmra.mxu1 %v1414_v22 }
 0x797   : > { %v1561_v31 = vrot.slane %v1560_v60, 4  ;;  %1510 = vmatpush.msra.mxu3 %v1413_v57  ;;  %v1436_v17 = vpop.trf.xlu0 }
 0x798   : > { %5719 = vmatmul.msk.f32.vlgmr.msra.gmra.mxu3 %vm581_vm10, %v1431_v18 }
 0x799   : > { %v1562_v5 = vadd.f32 %v1561_v31, %v1560_v60 }
 0x79b   : > { %v1563_v45 = vrot.slane %v1562_v5, 2 }
 0x79d   : > { %v1564_v51 = vadd.f32 %v1563_v45, %v1562_v5 }
 0x79f   : > { %v1565_v19 = vrot.slane %v1564_v51, 1  ;;  %v1437_v57 = vpop.trf.xlu0 }
 0x7a0   : > { %5720 = vmatmul.msk.f32.gmra.mxu3 %vm581_vm10, %v1432_v38 }
 0x7a1   : > { %v1566_v33 = vadd.f32 %v1565_v19, %v1564_v51 }
 0x7a3   : > { %v1995_v61 = vmul.f32 0.01, %v1566_v33 }
 0x7a5   : > { %v1996_v36 = vsub.f32 %v1263_v42, %v1995_v61 }
 0x7a7   : > { %1997 = vst [vmem:[#allocation7] sm:$0x1] %v1996_v36  ;;  %v1438_v18 = vpop.trf.xlu0 }
 0x7a8   : > { %5721 = vmatmul.msk.f32.gmra.mxu3 %vm581_vm10, %v1433_v62 }
 0x7af   : > { %v1439_v24 = vpop.trf.xlu0 }
 0x7b0   : > { %5722 = vmatmul.msk.f32.gmra.mxu3 %vm581_vm10, %v1434_v2 }
 0x7b7   : > { %v1440_v38 = vpop.trf.xlu0 }
 0x7b8   : > { %5723 = vmatmul.msk.f32.gmra.mxu3 %vm581_vm10, %v1435_v20 }
 0x7bf   : > { %v1441_v40 = vpop.trf.xlu0 }
 0x7c0   : > { %5724 = vmatmul.msk.f32.gmra.mxu3 %vm581_vm10, %v1436_v17 }
 0x7c7   : > { %v1442_v62 = vpop.trf.xlu0 }
 0x7c8   : > { %5725 = vmatmul.msk.f32.gmra.mxu3 %vm581_vm10, %v1437_v57 }
 0x7cc   : > { %v1610_v25 = vpop.trf.xlu2 }
 0x7cf   : > { %v1443_v37 = vpop.trf.xlu0 }
 0x7d0   : > { %5726 = vmatmul.msk.f32.gmra.mxu3 %vm581_vm10, %v1438_v18 }
 0x7d4   : > { %v1611_v60 = vpop.trf.xlu2 }
 0x7d7   : > { %v1444_v22 = vpop.trf.xlu0 }
 0x7d8   : > { %5727 = vmatmul.msk.f32.gmra.mxu3 %vm581_vm10, %v1439_v24 }
 0x7dc   : > { %v1612_v31 = vpop.trf.xlu2 }
 0x7df   : > { %v1445_v2 = vpop.trf.xlu0 }
 0x7e0   : > { %5728 = vmatmul.msk.f32.gmra.mxu3 %vm581_vm10, %v1440_v38 }
 0x7e4   : > { %v1613_v33 = vpop.trf.xlu2 }
 0x7e7   : > { %v1446_v45 = vpop.trf.xlu0 }
 0x7e8   : > { %5729 = vmatmul.msk.f32.gmra.mxu3 %vm581_vm10, %v1441_v40  ;;  %v1246_v40 = vld [vmem:[#allocation5] sm:$0x1] }
 0x7ec   : > { %v1614_v18 = vpop.trf.xlu2 }
 0x7f0   : > { %5730 = vmatmul.msk.f32.gmra.mxu3 %vm581_vm10, %v1442_v62 }
 0x7f8   : > { %5731 = vmatmul.msk.f32.gmra.mxu3 %vm581_vm10, %v1443_v37 }
 0x800   : > { %5732 = vmatmul.msk.f32.gmra.mxu3 %vm581_vm10, %v1444_v22  ;;  %v1615_v22 = vpop.trf.xlu2 }
 0x808   : > { %5733 = vmatmul.msk.f32.gmra.mxu3 %vm581_vm10, %v1445_v2  ;;  %v1616_v2 = vpop.trf.xlu2 }
 0x80a   : > { %v1584_v5 = vpop.f32.mrf.mxu1 }
 0x80b   : > { %5753 = vmatmul.msk.f32.vlgmr.msrb.gmra.mxu0 %vm1590_vm5, %v1584_v5  ;;  %v1592_v19 = vsel %vm1590_vm5, %v1584_v5, 0.0 }
 0x810   : > { %5734 = vmatmul.msk.f32.gmra.mxu3 %vm581_vm10, %v1446_v45  ;;  %v1617_v45 = vpop.trf.xlu2 }
 0x812   : > { %v1587_v51 = vpop.f32.mrf.mxu1 }
 0x813   : > { %v1593_v20 = vsel %vm1591_vm6, %v1587_v51, 0.0  ;;  %5735 = vmatpush.msk.msra.mxu2 %vm1591_vm6, %v1587_v51  ;;  %5754 = vmatmul.msk.f32.gmra.mxu0 %vm1591_vm6, %v1587_v51 }
 0x814   : > { %v1739_v61 = vadd.f32 %v1593_v20, %v1592_v19 }
 0x815   : > { %5736 = vmatpush.msk.msra.mxu2 %vm1590_vm5, %v1584_v5 }
 0x816   : > { %v1740_v42 = vrot.slane %v1739_v61, 4  ;;  %5737 = vmatmul.msk.f32.vlgmr.msra.gmra.mxu2 %vm581_vm10, %v1610_v25 }
 0x818   : > { %v1741_v36 = vadd.f32 %v1740_v42, %v1739_v61  ;;  %v1618_v19 = vpop.trf.xlu2 }
 0x81a   : > { %v1742_v13 = vrot.slane %v1741_v36, 2 }
 0x81b   : > { %v7303_v17 = vpop.f32.mrf.mxu3 }
 0x81c   : > { %v1743_v57 = vadd.f32 %v1742_v13, %v1741_v36 }
 0x81e   : > { %v1744_v24 = vrot.slane %v1743_v57, 1  ;;  %5738 = vmatmul.msk.f32.gmra.mxu2 %vm581_vm10, %v1611_v60 }
 0x820   : > { %v1745_v53 = vadd.f32 %v1744_v24, %v1743_v57  ;;  %v1619_v20 = vpop.trf.xlu2 }
 0x822   : > { %v1944_v38 = vmul.f32 0.01, %v1745_v53 }
 0x823   : > { %v7306_v62 = vpop.f32.mrf.mxu3 }
 0x824   : > { %v1945_v37 = vsub.f32 %v1246_v40, %v1944_v38 }
 0x826   : > { %1946 = vst [vmem:[#allocation5] sm:$0x1] %v1945_v37  ;;  %5739 = vmatmul.msk.f32.gmra.mxu2 %vm581_vm10, %v1612_v31 }
 0x828   : > { %v1620_v61 = vpop.trf.xlu2 }
 0x82b   : > { %v7309_v25 = vpop.f32.mrf.mxu3 }
 0x82e   : > { %5740 = vmatmul.msk.f32.gmra.mxu2 %vm581_vm10, %v1613_v33 }
 0x830   : > { %v1621_v13 = vpop.trf.xlu2 }
 0x833   : > { %v7312_v5 = vpop.f32.mrf.mxu3 }
 0x836   : > { %5741 = vmatmul.msk.f32.gmra.mxu2 %vm581_vm10, %v1614_v18 }
 0x838   : > { %v1622_v18 = vpop.trf.xlu2 }
 0x83b   : > { %v7315_v60 = vpop.f32.mrf.mxu3 }
 0x83e   : > { %5742 = vmatmul.msk.f32.gmra.mxu2 %vm581_vm10, %v1615_v22 }
 0x840   : > { %v1623_v53 = vpop.trf.xlu2 }
 0x843   : > { %v7318_v51 = vpop.f32.mrf.mxu3 }
 0x846   : > { %5743 = vmatmul.msk.f32.gmra.mxu2 %vm581_vm10, %v1616_v2 }
 0x848   : > { %v1624_v40 = vpop.trf.xlu2 }
 0x84b   : > { %v7321_v31 = vpop.f32.mrf.mxu3 }
 0x84e   : > { %5744 = vmatmul.msk.f32.gmra.mxu2 %vm581_vm10, %v1617_v45 }
 0x850   : > { %v1625_v45 = vpop.trf.xlu2 }
 0x853   : > { %v7324_v33 = vpop.f32.mrf.mxu3 }
 0x856   : > { %5745 = vmatmul.msk.f32.gmra.mxu2 %vm581_vm10, %v1618_v19 }
 0x85b   : > { %v7327_v42 = vpop.f32.mrf.mxu3 }
 0x85e   : > { %5746 = vmatmul.msk.f32.gmra.mxu2 %vm581_vm10, %v1619_v20 }
 0x863   : > { %v1539_v36 = vpop.f32.mrf.mxu3 }
 0x866   : > { %5747 = vmatmul.msk.f32.gmra.mxu2 %vm581_vm10, %v1620_v61 }
 0x86b   : > { %v1542_v57 = vpop.f32.mrf.mxu3 }
 0x86e   : > { %5748 = vmatmul.msk.f32.gmra.mxu2 %vm581_vm10, %v1621_v13 }
 0x873   : > { %v1545_v24 = vpop.f32.mrf.mxu3 }
 0x876   : > { %5749 = vmatmul.msk.f32.gmra.mxu2 %vm581_vm10, %v1622_v18 }
 0x87b   : > { %v1548_v38 = vpop.f32.mrf.mxu3 }
 0x87e   : > { %5750 = vmatmul.msk.f32.gmra.mxu2 %vm581_vm10, %v1623_v53 }
 0x883   : > { %v1551_v37 = vpop.f32.mrf.mxu3 }
 0x884   : > { %v1960_v63 = vmul.f32 0.01, %v1551_v37 }
 0x886   : > { %5751 = vmatmul.msk.f32.gmra.mxu2 %vm581_vm10, %v1624_v40 }
 0x888   : > { %v1763_v22 = vpop.f32.mrf.mxu0 }
 0x889   : > { %v1771_v20 = vsel %vm1769_vm7, %v1763_v22, 0.0 }
 0x88b   : > { %v1554_v2 = vpop.f32.mrf.mxu3 }
 0x88c   : > { %v1961_v40 = vmul.f32 0.01, %v1554_v2  ;;  %v1959_v2 = vmul.f32 0.01, %v1548_v38 }
 0x88e   : > { %5752 = vmatmul.msk.f32.gmra.mxu2 %vm581_vm10, %v1625_v45 }
 0x890   : > { %v1766_v19 = vpop.f32.mrf.mxu0 }
 0x891   : > { %v1772_v61 = vsel %vm1770_vm8, %v1766_v19, 0.0  ;;  %5755 = vmatpush.msk.msrb.mxu1 %vm1770_vm8, %v1766_v19  ;;  %v7347_v19 = vsub.f32 %v7165_v32, %v1961_v40  ;;  %v1958_v32 = vmul.f32 0.01, %v1545_v24  ;;  %v9834_v40 = vld [vmem:[#allocation30_spill] sm:$0xff] }
 0x892   : > { %v1838_v13 = vadd.f32 %v1772_v61, %v1771_v20  ;;  %v9831_v61 = vld [vmem:[#allocation29_spill] sm:$0xff] }
 0x893   : > { %v1557_v18 = vpop.f32.mrf.mxu3  ;;  %5756 = vmatpush.msk.msrb.mxu1 %vm1769_vm7, %v1763_v22  ;;  %9830 = vst [vmem:[#allocation16_spill] sm:$0xff] %v7347_v19 }
 0x894   : > { %v1839_v53 = vrot.slane %v1838_v13, 4  ;;  %v1962_v12 = vmul.f32 0.01, %v1557_v18  ;;  %5757 = vmatmul.msk.f32.vlgmr.msrb.gmra.mxu1 %vm581_vm10, %v9828_v46  ;;  %v1229_v18 = vld [vmem:[#allocation3] sm:$0x1] }
 0x896   : > { %v1840_v11 = vadd.f32 %v1839_v53, %v1838_v13  ;;  %v7341_v45 = vsub.f32 %v7162_v28, %v1962_v12  ;;  %v7353_v28 = vsub.f32 %v7170_v15, %v1960_v63  ;;  %v1957_v63 = vmul.f32 0.01, %v1542_v57 }
 0x897   : > { %v7365_v15 = vsub.f32 %v7179_v35, %v1958_v32  ;;  %v1949_v32 = vmul.f32 0.01, %v7309_v25 }
 0x898   : > { %9829 = vst [vmem:[#allocation15_spill] sm:$0xff] %v7341_v45  ;;  %v1841_v3 = vrot.slane %v1840_v11, 2  ;;  %2352 = vmatpush.xpose.msrb.mxu2 %v7341_v45  ;;  %v7371_v24 = vsub.f32 %v7184_v4, %v1957_v63  ;;  %v9840_v4 = vld [vmem:[#allocation32_spill] sm:$0xff]  ;;  %v1947_v63 = vmul.f32 0.01, %v7303_v17  ;;  %v9854_v17 = vld [vmem:[#allocation38_spill] sm:$0xff] }
 0x899   : > { %v7344_v6 = vpop.f32.mrf.mxu2  ;;  %9832 = vst [vmem:[#allocation17_spill] sm:$0xff] %v7353_v28 }
 0x89a   : > { %v1842_v22 = vadd.f32 %v1841_v3, %v1840_v11  ;;  %v7359_v11 = vsub.f32 %v7174_v54, %v1959_v2  ;;  %9835 = vst [vmem:[#allocation19_spill] sm:$0xff] %v7365_v15  ;;  %v1956_v3 = vmul.f32 0.01, %v1539_v36  ;;  %v9837_v54 = vld [vmem:[#allocation31_spill] sm:$0xff]  ;;  %v1953_v2 = vmul.f32 0.01, %v7321_v31 }
 0x89b   : > { %9836 = vst [vmem:[#allocation21_spill] sm:$0xff] %v7371_v24 }
 0x89c   : > { %v1843_v20 = vrot.slane %v1842_v22, 1  ;;  %5758 = vmatmul.msk.f32.gmra.mxu1 %vm581_vm10, %v9831_v61  ;;  %2353 = vmatpush.xpose.msrb.mxu2 %v7347_v19  ;;  %9833 = vst [vmem:[#allocation18_spill] sm:$0xff] %v7359_v11  ;;  %v7378_v57 = vsub.f32 %v7190_v9, %v1956_v3  ;;  %v7436_v3 = vsub.f32 %v7233_v0, %v1947_v63  ;;  %v9856_v0 = vld [vmem:[#allocation40_spill] sm:$0xff] }
 0x89e   : > { %v1844_v12 = vadd.f32 %v1843_v20, %v1842_v22  ;;  %v1955_v22 = vmul.f32 0.01, %v7327_v42  ;;  %9838 = vst [vmem:[#allocation20_spill] sm:$0xff] %v7378_v57  ;;  %v1954_v20 = vmul.f32 0.01, %v7324_v33  ;;  %v7399_v33 = vsub.f32 %v7206_v27, %v1953_v2  ;;  %v9846_v27 = vld [vmem:[#allocation34_spill] sm:$0xff] }
 0x89f   : > { %9851 = vst [vmem:[#allocation34_spill] sm:$0xff] %v7436_v3  ;;  %v9855_v2 = vld [vmem:[#allocation39_spill] sm:$0xff] }
 0x8a0   : > { %v1893_v13 = vmul.f32 0.01, %v1844_v12  ;;  %2354 = vmatpush.xpose.msrb.mxu2 %v7353_v28  ;;  %v7385_v36 = vsub.f32 %v7195_v47, %v1955_v22  ;;  %v7392_v42 = vsub.f32 %v7201_v16, %v1954_v20  ;;  %v1952_v12 = vmul.f32 0.01, %v7318_v51  ;;  %9842 = vst [vmem:[#allocation28_spill] sm:$0xff] %v7399_v33  ;;  %v9843_v47 = vld [vmem:[#allocation33_spill] sm:$0xff] }
 0x8a1   : > { %v7356_v37 = vpop.f32.mrf.mxu2  ;;  %v9853_v22 = vld [vmem:[#allocation37_spill] sm:$0xff] }
 0x8a2   : > { %v1894_v53 = vsub.f32 %v1229_v18, %v1893_v13  ;;  %9839 = vst [vmem:[#allocation26_spill] sm:$0xff] %v7385_v36  ;;  %v1951_v13 = vmul.f32 0.01, %v7315_v60  ;;  %v7406_v31 = vsub.f32 %v7212_v10, %v1952_v12  ;;  %v1950_v18 = vmul.f32 0.01, %v7312_v5 }
 0x8a3   : > { %9841 = vst [vmem:[#allocation27_spill] sm:$0xff] %v7392_v42  ;;  %v7425_v5 = vsub.f32 %v7228_v7, %v1949_v32 }
 0x8a4   : > { %1895 = vst [vmem:[#allocation3] sm:$0x1] %v1894_v53  ;;  %5759 = vmatmul.msk.f32.gmra.mxu1 %vm581_vm10, %v9834_v40  ;;  %2355 = vmatpush.xpose.msrb.mxu2 %v7359_v11  ;;  %v7413_v51 = vsub.f32 %v7217_v26, %v1951_v13  ;;  %v7420_v60 = vsub.f32 %v7224_v21, %v1950_v18  ;;  %v1948_v53 = vmul.f32 0.01, %v7306_v62  ;;  %v9849_v26 = vld [vmem:[#allocation35_spill] sm:$0xff]  ;;  %v9852_v62 = vld [vmem:[#allocation36_spill] sm:$0xff] }
 0x8a5   : > { %9844 = vst [vmem:[#allocation29_spill] sm:$0xff] %v7406_v31  ;;  %v9857_v18 = vld [vmem:[#allocation41_spill] sm:$0xff] }
 0x8a6   : > { %9845 = vst [vmem:[#allocation30_spill] sm:$0xff] %v7413_v51  ;;  %v7432_v25 = vsub.f32 %v7236_v34, %v1948_v53 }
 0x8a7   : > { %9847 = vst [vmem:[#allocation31_spill] sm:$0xff] %v7420_v60 }
 0x8a8   : > { %2356 = vmatpush.xpose.msrb.mxu2 %v7365_v15  ;;  %9848 = vst [vmem:[#allocation32_spill] sm:$0xff] %v7425_v5 }
 0x8a9   : > { %v7368_v38 = vpop.f32.mrf.mxu2  ;;  %9850 = vst [vmem:[#allocation33_spill] sm:$0xff] %v7432_v25 }
 0x8ac   : > { %5760 = vmatmul.msk.f32.gmra.mxu1 %vm581_vm10, %v9837_v54  ;;  %2357 = vmatpush.xpose.msrb.mxu2 %v7371_v24 }
 0x8b0   : > { %2358 = vmatpush.xpose.msrb.mxu2 %v7378_v57 }
 0x8b1   : > { %v7381_v35 = vpop.f32.mrf.mxu2 }
 0x8b4   : > { %5761 = vmatmul.msk.f32.gmra.mxu1 %vm581_vm10, %v9840_v4  ;;  %2359 = vmatpush.xpose.msrb.mxu2 %v7385_v36 }
 0x8b8   : > { %2360 = vmatpush.xpose.msrb.mxu2 %v7392_v42 }
 0x8b9   : > { %v7395_v9 = vpop.f32.mrf.mxu2 }
 0x8bc   : > { %5762 = vmatmul.msk.f32.gmra.mxu1 %vm581_vm10, %v9843_v47  ;;  %2361 = vmatpush.xpose.msrb.mxu2 %v7399_v33 }
 0x8c0   : > { %2362 = vmatpush.xpose.msrb.mxu2 %v7406_v31 }
 0x8c1   : > { %v7409_v16 = vpop.f32.mrf.mxu2 }
 0x8c4   : > { %5763 = vmatmul.msk.f32.gmra.mxu1 %vm581_vm10, %v9846_v27  ;;  %2363 = vmatpush.xpose.msrb.mxu2 %v7413_v51 }
 0x8c8   : > { %2364 = vmatpush.xpose.msrb.mxu2 %v7420_v60 }
 0x8c9   : > { %v1709_v10 = vpop.f32.mrf.mxu2 }
 0x8cc   : > { %5764 = vmatmul.msk.f32.gmra.mxu1 %vm581_vm10, %v9849_v26  ;;  %2365 = vmatpush.xpose.msrb.mxu2 %v7425_v5 }
 0x8d0   : > { %2366 = vmatpush.xpose.msrb.mxu2 %v7432_v25 }
 0x8d1   : > { %v1712_v21 = vpop.f32.mrf.mxu2 }
 0x8d4   : > { %5765 = vmatmul.msk.f32.gmra.mxu1 %vm581_vm10, %v9852_v62  ;;  %2367 = vmatpush.xpose.msrb.mxu2 %v7436_v3 }
 0x8d9   : > { %v1715_v7 = vpop.f32.mrf.mxu2 }
 0x8dc   : > { %5766 = vmatmul.msk.f32.gmra.mxu1 %vm581_vm10, %v9853_v22 }
 0x8e1   : > { %v1718_v20 = vpop.f32.mrf.mxu2 }
 0x8e4   : > { %5767 = vmatmul.msk.f32.gmra.mxu1 %vm581_vm10, %v9854_v17 }
 0x8e9   : > { %v1721_v34 = vpop.f32.mrf.mxu2 }
 0x8ec   : > { %5768 = vmatmul.msk.f32.gmra.mxu1 %vm581_vm10, %v9855_v2 }
 0x8f1   : > { %v1724_v12 = vpop.f32.mrf.mxu2 }
 0x8f4   : > { %5769 = vmatmul.msk.f32.gmra.mxu1 %vm581_vm10, %v9856_v0 }
 0x8f9   : > { %v1727_v13 = vpop.f32.mrf.mxu2 }
 0x8fa   : > { %v1908_v26 = vmul.f32 0.01, %v1727_v13  ;;  %v9864_v13 = vld [vmem:[#allocation47_spill] sm:$0xff] }
 0x8fc   : > { %5770 = vmatmul.msk.f32.gmra.mxu1 %vm581_vm10, %v9857_v18 }
 0x901   : > { %v1730_v32 = vpop.f32.mrf.mxu2 }
 0x902   : > { %v1909_v62 = vmul.f32 0.01, %v1730_v32  ;;  %v1906_v32 = vmul.f32 0.01, %v1721_v34 }
 0x904   : > { %5771 = vmatmul.msk.f32.gmra.mxu1 %vm581_vm10, %v6957_v58  ;;  %v1907_v58 = vmul.f32 0.01, %v1724_v12 }
 0x909   : > { %v1733_v53 = vpop.f32.mrf.mxu2 }
 0x90a   : > { %v1910_v2 = vmul.f32 0.01, %v1733_v53 }
 0x90c   : > { %5772 = vmatmul.msk.f32.gmra.mxu1 %vm581_vm10, %v6965_v49  ;;  %v7461_v18 = vsub.f32 %v6968_v59, %v1910_v2  ;;  %v7466_v49 = vsub.f32 %v6974_v55, %v1909_v62  ;;  %v1905_v59 = vmul.f32 0.01, %v1718_v20  ;;  %v1904_v55 = vmul.f32 0.01, %v1715_v7  ;;  %v9860_v7 = vld [vmem:[#allocation45_spill] sm:$0xff] }
 0x90d   : > { %v7481_v62 = vsub.f32 %v6991_v43, %v1906_v32  ;;  %v1901_v43 = vmul.f32 0.01, %v7409_v16  ;;  %v1898_v32 = vmul.f32 0.01, %v7368_v38  ;;  %v9872_v38 = vld [vmem:[#allocation52_spill] sm:$0xff] }
 0x911   : > { %v1736_v63 = vpop.f32.mrf.mxu2  ;;  %v7455_v17 = vpop.f32.mrf.mxu1 }
 0x912   : > { %v1911_v22 = vmul.f32 0.01, %v1736_v63  ;;  %v7509_v63 = vsub.f32 %v9864_v13, %v1901_v43 }
 0x914   : > { %v7458_v0 = vsub.f32 %v6963_v56, %v1911_v22  ;;  %v7472_v56 = vsub.f32 %v6980_v8, %v1908_v26  ;;  %v7477_v22 = vsub.f32 %v6985_v39, %v1907_v58  ;;  %v1903_v8 = vmul.f32 0.01, %v1712_v21  ;;  %v9858_v39 = vld [vmem:[#allocation44_spill] sm:$0xff]  ;;  %v9862_v21 = vld [vmem:[#allocation46_spill] sm:$0xff]  ;;  %9865 = vst [vmem:[#allocation47_spill] sm:$0xff] %v7509_v63 }
 0x915   : > { %v7486_v26 = vsub.f32 %v6998_v14, %v1905_v59  ;;  %v1902_v58 = vmul.f32 0.01, %v1709_v10  ;;  %v7492_v34 = vsub.f32 %v9858_v39, %v1904_v55  ;;  %v1900_v14 = vmul.f32 0.01, %v7395_v9  ;;  %v9866_v59 = vld [vmem:[#allocation48_spill] sm:$0xff]  ;;  %v9870_v39 = vld [vmem:[#allocation50_spill] sm:$0xff] }
 0x916   : > { %2080 = vmatpush.msrb.mxu3 %v7458_v0  ;;  %2531 = vmatpush.xpose.msra.mxu1 %v7458_v0  ;;  %v7498_v2 = vsub.f32 %v9860_v7, %v1903_v8  ;;  %v1899_v10 = vmul.f32 0.01, %v7381_v35  ;;  %v1897_v55 = vmul.f32 0.01, %v7356_v37  ;;  %v9868_v8 = vld [vmem:[#allocation49_spill] sm:$0xff]  ;;  %v7527_v43 = vsub.f32 %v9870_v39, %v1898_v32 }
 0x917   : > { %9859 = vst [vmem:[#allocation44_spill] sm:$0xff] %v7492_v34  ;;  %v7503_v12 = vsub.f32 %v9862_v21, %v1902_v58  ;;  %v7516_v9 = vsub.f32 %v9866_v59, %v1900_v14  ;;  %v1896_v58 = vmul.f32 0.01, %v7344_v6  ;;  %v9874_v14 = vld [vmem:[#allocation51_spill] sm:$0xff] }
 0x918   : > { %2081 = vmatpush.msrb.mxu3 %v7461_v18  ;;  %9861 = vst [vmem:[#allocation45_spill] sm:$0xff] %v7498_v2  ;;  %v7522_v35 = vsub.f32 %v9868_v8, %v1899_v10  ;;  %v7532_v7 = vsub.f32 %v9872_v38, %v1897_v55 }
 0x919   : > { %v7469_v53 = vpop.f32.mrf.mxu1  ;;  %9863 = vst [vmem:[#allocation46_spill] sm:$0xff] %v7503_v12  ;;  %v7536_v21 = vsub.f32 %v9874_v14, %v1896_v58 }
 0x91a   : > { %2082 = vmatpush.msrb.mxu3 %v7466_v49  ;;  %2532 = vmatpush.xpose.msra.mxu1 %v7461_v18  ;;  %9867 = vst [vmem:[#allocation48_spill] sm:$0xff] %v7516_v9 }
 0x91b   : > { %9869 = vst [vmem:[#allocation49_spill] sm:$0xff] %v7522_v35 }
 0x91c   : > { %2083 = vmatpush.msrb.mxu3 %v7472_v56  ;;  %9871 = vst [vmem:[#allocation50_spill] sm:$0xff] %v7527_v43 }
 0x91d   : > { %9873 = vst [vmem:[#allocation52_spill] sm:$0xff] %v7532_v7 }
 0x91e   : > { %2084 = vmatpush.msrb.mxu3 %v7477_v22  ;;  %2533 = vmatpush.xpose.msra.mxu1 %v7466_v49  ;;  %9875 = vst [vmem:[#allocation51_spill] sm:$0xff] %v7536_v21 }
 0x920   : > { %2085 = vmatpush.msrb.mxu3 %v7481_v62 }
 0x921   : > { %v7489_v20 = vpop.f32.mrf.mxu1 }
 0x922   : > { %2086 = vmatpush.msrb.mxu3 %v7486_v26  ;;  %2534 = vmatpush.xpose.msra.mxu1 %v7472_v56 }
 0x924   : > { %2087 = vmatpush.msrb.mxu3 %v7492_v34 }
 0x926   : > { %2088 = vmatpush.msrb.mxu3 %v7498_v2  ;;  %2535 = vmatpush.xpose.msra.mxu1 %v7477_v22 }
 0x928   : > { %2089 = vmatpush.msrb.mxu3 %v7503_v12 }
 0x929   : > { %v7512_v16 = vpop.f32.mrf.mxu1 }
 0x92a   : > { %2090 = vmatpush.msrb.mxu3 %v7509_v63  ;;  %2536 = vmatpush.xpose.msra.mxu1 %v7481_v62 }
 0x92c   : > { %2091 = vmatpush.msrb.mxu3 %v7516_v9 }
 0x92e   : > { %2092 = vmatpush.msrb.mxu3 %v7522_v35  ;;  %2537 = vmatpush.xpose.msra.mxu1 %v7486_v26 }
 0x930   : > { %2093 = vmatpush.msrb.mxu3 %v7527_v43 }
 0x931   : > { %v1802_v37 = vpop.f32.mrf.mxu1 }
 0x932   : > { %2094 = vmatpush.msrb.mxu3 %v7532_v7  ;;  %2538 = vmatpush.xpose.msra.mxu1 %v7492_v34 }
 0x934   : > { %2095 = vmatpush.msrb.mxu3 %v7536_v21 }
 0x936   : > { %2539 = vmatpush.xpose.msra.mxu1 %v7498_v2 }
 0x939   : > { %v1805_v6 = vpop.f32.mrf.mxu1 }
 0x93a   : > { %2540 = vmatpush.xpose.msra.mxu1 %v7503_v12 }
 0x93e   : > { %2541 = vmatpush.xpose.msra.mxu1 %v7509_v63 }
 0x941   : > { %v1808_v10 = vpop.f32.mrf.mxu1 }
 0x942   : > { %2542 = vmatpush.xpose.msra.mxu1 %v7516_v9 }
 0x946   : > { %2543 = vmatpush.xpose.msra.mxu1 %v7522_v35 }
 0x949   : > { %v1811_v13 = vpop.f32.mrf.mxu1 }
 0x94a   : > { %2544 = vmatpush.xpose.msra.mxu1 %v7527_v43 }
 0x94e   : > { %2545 = vmatpush.xpose.msra.mxu1 %v7532_v7 }
 0x951   : > { %v1814_v32 = vpop.f32.mrf.mxu1 }
 0x952   : > { %2546 = vmatpush.xpose.msra.mxu1 %v7536_v21 }
 0x959   : > { %v1817_v59 = vpop.f32.mrf.mxu1 }
 0x961   : > { %v1820_v55 = vpop.f32.mrf.mxu1 }
 0x962   : > { %v1855_v34 = vmul.f32 0.01, %v1820_v55 }
 0x969   : > { %v1823_v8 = vpop.f32.mrf.mxu1 }
 0x96a   : > { %v1856_v21 = vmul.f32 0.01, %v1823_v8  ;;  %v9880_v8 = vld [vmem:[#allocation57_spill] sm:$0xff] }
 0x971   : > { %v1826_v58 = vpop.f32.mrf.mxu1 }
 0x972   : > { %v1857_v2 = vmul.f32 0.01, %v1826_v58 }
 0x979   : > { %v1829_v39 = vpop.f32.mrf.mxu1 }
 0x97a   : > { %v1858_v9 = vmul.f32 0.01, %v1829_v39 }
 0x97c   : > { %v7557_v7 = vsub.f32 %v7096_v48, %v1858_v9  ;;  %v1852_v48 = vmul.f32 0.01, %v1811_v13 }
 0x981   : > { %v1832_v38 = vpop.f32.mrf.mxu1 }
 0x982   : > { %v1859_v63 = vmul.f32 0.01, %v1832_v38  ;;  %v7561_v38 = vsub.f32 %v7100_v29, %v1857_v2  ;;  %v1851_v29 = vmul.f32 0.01, %v1808_v10  ;;  %v9877_v10 = vld [vmem:[#allocation54_spill] sm:$0xff] }
 0x984   : > { %v7553_v43 = vsub.f32 %v7090_v23, %v1859_v63  ;;  %v1853_v23 = vmul.f32 0.01, %v1814_v32  ;;  %v7569_v63 = vsub.f32 %v7108_v30, %v1855_v34  ;;  %v1849_v30 = vmul.f32 0.01, %v1802_v37  ;;  %v9876_v34 = vld [vmem:[#allocation53_spill] sm:$0xff] }
 0x985   : > { %v7585_v13 = vsub.f32 %v9876_v34, %v1851_v29  ;;  %v1846_v37 = vmul.f32 0.01, %v7469_v53 }
 0x986   : > { %v7577_v2 = vsub.f32 %v7116_v44, %v1853_v23  ;;  %v1847_v44 = vmul.f32 0.01, %v7489_v20  ;;  %v9881_v20 = vld [vmem:[#allocation58_spill] sm:$0xff]  ;;  %v6082_v23 = vld [vmem:[#allocation3] ss:$0 sm:$0xff] }
 0x987   : > { %v7609_v39 = vsub.f32 %v9881_v20, %v1846_v37  ;;  %v6084_v20 = vld [vmem:[#allocation7] ss:$0 sm:$0xff] }
 0x988   : > { %v7605_v58 = vsub.f32 %v9880_v8, %v1847_v44 }
 0x989   : > { %v1835_v14 = vpop.f32.mrf.mxu1 }
 0x98a   : > { %v1860_v12 = vmul.f32 0.01, %v1835_v14  ;;  %v9882_v14 = vld [vmem:[#allocation59_spill] sm:$0xff] }
 0x98c   : > { %v7550_v35 = vsub.f32 %v7087_v41, %v1860_v12  ;;  %v1854_v41 = vmul.f32 0.01, %v1817_v59  ;;  %v7565_v12 = vsub.f32 %v7104_v1, %v1856_v21  ;;  %v1850_v1 = vmul.f32 0.01, %v1805_v6  ;;  %v9878_v6 = vld [vmem:[#allocation55_spill] sm:$0xff]  ;;  %v9879_v59 = vld [vmem:[#allocation56_spill] sm:$0xff] }
 0x98d   : > { %v7581_v21 = vsub.f32 %v7120_v50, %v1852_v48  ;;  %v7595_v50 = vsub.f32 %v9878_v6, %v1849_v30 }
 0x98e   : > { %2052 = vmatpush.msra.mxu0 %v7550_v35  ;;  %v7573_v9 = vsub.f32 %v7112_v52, %v1854_v41  ;;  %v1848_v52 = vmul.f32 0.01, %v7512_v16  ;;  %v7590_v32 = vsub.f32 %v9877_v10, %v1850_v1  ;;  %v1845_v16 = vmul.f32 0.01, %v7455_v17  ;;  %v9883_v41 = vld [vmem:[#allocation60_spill] sm:$0xff]  ;;  %v7623_v17 = vld [vmem:[%s6500_s18 + $0x8] sm:$0xff] }
 0x98f   : > { %v6083_v10 = vld [vmem:[#allocation5] ss:$0 sm:$0xff] }
 0x990   : > { %2053 = vmatpush.msra.mxu0 %v7553_v43  ;;  %v7600_v55 = vsub.f32 %v9879_v59, %v1848_v52  ;;  %v7613_v53 = vsub.f32 %v9882_v14, %v1845_v16 }
 0x992   : > { %2054 = vmatpush.msra.mxu0 %v7557_v7 }
 0x994   : > { %2055 = vmatpush.msra.mxu0 %v7561_v38 }
 0x996   : > { %2056 = vmatpush.msra.mxu0 %v7565_v12 }
 0x998   : > { %2057 = vmatpush.msra.mxu0 %v7569_v63 }
 0x99a   : > { %2058 = vmatpush.msra.mxu0 %v7573_v9 }
 0x99c   : > { %2059 = vmatpush.msra.mxu0 %v7577_v2 }
 0x99e   : > { %2060 = vmatpush.msra.mxu0 %v7581_v21 }
 0x9a0   : > { %2061 = vmatpush.msra.mxu0 %v7585_v13 }
 0x9a2   : > { %2062 = vmatpush.msra.mxu0 %v7590_v32 }
 0x9a4   : > { %2063 = vmatpush.msra.mxu0 %v7595_v50 }
 0x9a6   : > { %2064 = vmatpush.msra.mxu0 %v7600_v55 }
 0x9a8   : > { %2065 = vmatpush.msra.mxu0 %v7605_v58 }
 0x9aa   : > { %2066 = vmatpush.msra.mxu0 %v7609_v39 }
 0x9ac   : > { %2067 = vmatpush.msra.mxu0 %v7613_v53 }
 0x9ad   : > { %2068 = vmatmul.f32.vlgmr.msra.gmra.mxu0 %v9883_v41 }
 0x9ae   : > { %2108 = vmatpush.msrb.mxu0 %v7341_v45 }
 0x9b0   : > { %2109 = vmatpush.msrb.mxu0 %v7347_v19 }
 0x9b2   : > { %2110 = vmatpush.msrb.mxu0 %v7353_v28 }
 0x9b4   : > { %2111 = vmatpush.msrb.mxu0 %v7359_v11 }
 0x9b5   : > { %2071 = vmatmul.f32.gmra.mxu0 %v7623_v17 }
 0x9b6   : > { %2112 = vmatpush.msrb.mxu0 %v7365_v15 }
 0x9b8   : > { %2113 = vmatpush.msrb.mxu0 %v7371_v24 }
 0x9ba   : > { %2114 = vmatpush.msrb.mxu0 %v7378_v57 }
 0x9bc   : > { %2115 = vmatpush.msrb.mxu0 %v7385_v36 }
 0x9be   : > { %2116 = vmatpush.msrb.mxu0 %v7392_v42 }
 0x9c0   : > { %2117 = vmatpush.msrb.mxu0 %v7399_v33 }
 0x9c2   : > { %2118 = vmatpush.msrb.mxu0 %v7406_v31 }
 0x9c4   : > { %2119 = vmatpush.msrb.mxu0 %v7413_v51 }
 0x9c6   : > { %2120 = vmatpush.msrb.mxu0 %v7420_v60 }
 0x9c8   : > { %2121 = vmatpush.msrb.mxu0 %v7425_v5 }
 0x9ca   : > { %2122 = vmatpush.msrb.mxu0 %v7432_v25 }
 0x9cc   : > { %2123 = vmatpush.msrb.mxu0 %v7436_v3 }
 0xa2a   : > { %v2069_v48 = vpop.f32.mrf.mxu0 }
 0xa2b   : > { %v7638_v29 = vadd.f32 %v6082_v23, %v2069_v48 }
 0xa2d   : > { %v2075_v1 = vmax.f32 %v7638_v29, 0.0  ;;  %vm2554_vm4 = vcmp.gt.f32.partialorder %v7638_v29, 0.0 }
 0xa2f   : > { %2096 = vmatmul.f32.vlgmr.msrb.gmra.mxu3 %v2075_v1 }
 0xa32   : > { %v2072_v30 = vpop.f32.mrf.mxu0 }
 0xa33   : > { %v7641_v34 = vadd.f32 %v6082_v23, %v2072_v30 }
 0xa35   : > { %v2076_v52 = vmax.f32 %v7641_v34, 0.0  ;;  %vm2555_vm5 = vcmp.gt.f32.partialorder %v7641_v34, 0.0  ;;  %v7863_v34 = vld [vmem:[%s9536_s5 + $0x70] sm:$0xff] }
 0xa36   : > { %9905 = vst [vmem:[#allocation74_spill] sm:$0xff] %v7863_v34 }
 0xa37   : > { %2099 = vmatmul.f32.gmra.mxu3 %v2076_v52 }
 0xab2   : > { %v2097_v44 = vpop.f32.mrf.mxu3 }
 0xab3   : > { %v7644_v6 = vadd.f32 %v6083_v10, %v2097_v44 }
 0xab5   : > { %v2103_v37 = vmax.f32 %v7644_v6, 0.0  ;;  %vm2375_vm2 = vcmp.gt.f32.partialorder %v7644_v6, 0.0  ;;  %v7742_v6 = vld [vmem:[%s9534_s3 + $0x78] sm:$0xff] }
 0xab6   : > { %9888 = vst [vmem:[#allocation57_spill] sm:$0xff] %v7742_v6 }
 0xab7   : > { %2200 = vxpose.xlu0.b32.start [1/2] (short) %v2103_v37, 128  ;;  %2124 = vmatmul.f32.vlgmr.msrb.gmra.mxu0 %v2103_v37 }
 0xaba   : > { %v2100_v59 = vpop.f32.mrf.mxu3 }
 0xabb   : > { %v7647_v16 = vadd.f32 %v6083_v10, %v2100_v59 }
 0xabd   : > { %v2104_v8 = vmax.f32 %v7647_v16, 0.0  ;;  %vm2376_vm3 = vcmp.gt.f32.partialorder %v7647_v16, 0.0  ;;  %v7748_v16 = vld [vmem:[%s9534_s3 + $0x70] sm:$0xff] }
 0xabe   : > { %9889 = vst [vmem:[#allocation58_spill] sm:$0xff] %v7748_v16 }
 0xabf   : > { %2201 = vxpose.xlu0.b32.end [2/2] (short) %v2104_v8, 128  ;;  %2127 = vmatmul.f32.gmra.mxu0 %v2104_v8 }
 0xb34   : > { %v2125_v14 = vpop.f32.mrf.mxu0 }
 0xb35   : > { %v2126_v41 = vadd.f32 %v6084_v20, %v2125_v14 }
 0xb37   : > { %2131 = vmax.xlane.f32.xlu1 %v2126_v41 }
 0xb3c   : > { %v2128_v23 = vpop.f32.mrf.mxu0 }
 0xb3d   : > { %v2129_v48 = vadd.f32 %v6084_v20, %v2128_v23 }
 0xb3f   : > { %2133 = vmax.xlane.f32.xlu1 %v2129_v48 }
 0xb5b   : > { %v2216_v14 = vpop.trf.xlu0 }
 0xbaa   : > { %v2132_v30 = vpop.xlane.xlu1 %2131 }
 0xbab   : > { %v7650_v44 = vsub.f32 %v2126_v41, %v2132_v30 }
 0xbad   : > { %9884 = vst [vmem:[#allocation53_spill] sm:$0xff] %v7650_v44  ;;  %v2137_v3 = vmul.f32 1.442695, %v7650_v44 }
 0xbaf   : > { %6113 = vpow2.f32 %v2137_v3 }
 0xbb2   : > { %v2134_v37 = vpop.xlane.xlu1 %2133 }
 0xbb3   : > { %v7653_v10 = vsub.f32 %v2129_v48, %v2134_v37 }
 0xbb5   : > { %9885 = vst [vmem:[#allocation54_spill] sm:$0xff] %v7653_v10  ;;  %v6114_v59 = vpop.eup %6113  ;;  %v2139_v25 = vmul.f32 1.442695, %v7653_v10 }
 0xbb6   : > { %2141 = vadd.xlane.f32.xlu2 %v6114_v59 }
 0xbb7   : > { %6115 = vpow2.f32 %v2139_v25 }
 0xbbd   : > { %v6116_v8 = vpop.eup %6115 }
 0xbbe   : > { %2143 = vadd.xlane.f32.xlu1 %v6116_v8 }
 0xbf8   : > { %2379 = vxpose.xlu1.b32.start [1/2] (short) %v2075_v1, 128 }
 0xc00   : > { %2380 = vxpose.xlu1.b32.end [2/2] (short) %v2076_v52, 128  ;;  %v2217_v52 = vpop.trf.xlu0 }
 0xc29   : > { %v7656_v20 = vpop.xlane.xlu2 %2141 }
 0xc2a   : > { %9886 = vst [vmem:[#allocation55_spill] sm:$0xff] %v7656_v20  ;;  %6117 = vrcp.f32 %v7656_v20  ;;  %v2156_v30 = vand.u32 2147483648, %v7656_v20  ;;  %v2154_v1 = vand.u32 2147483647, %v7656_v20  ;;  %vm2150_vm11 = vweird.f32 %v7656_v20 }
 0xc2c   : > { %v2157_v10 = vor.u32 1.1754944e-38, %v2156_v30  ;;  %vm2155_vm13 = vcmp.eq.f32.partialorder %v2154_v1, 8.507059e+37 }
 0xc30   : > { %v6118_v41 = vpop.eup %6117 }
 0xc31   : > { %v2146_v3 = vmul.f32 %v6118_v41, %v7656_v20  ;;  %v7660_v23 = vpop.xlane.xlu1 %2143  ;;  %vm2151_vm9 = vweird.f32 %v6118_v41 }
 0xc32   : > { %9887 = vst [vmem:[#allocation56_spill] sm:$0xff] %v7660_v23  ;;  %6119 = vrcp.f32 %v7660_v23  ;;  %vm2152_vm12 = vmor %vm2150_vm11, %vm2151_vm9  ;;  %v2169_v42 = vand.u32 2147483647, %v7660_v23  ;;  %vm2165_vm15 = vweird.f32 %v7660_v23 }
 0xc33   : > { %v2147_v48 = vsub.f32 1.0, %v2146_v3 }
 0xc34   : > { %vm2170_vm1 = vcmp.eq.f32.partialorder %v2169_v42, 8.507059e+37  ;;  %v6189_v42 = vld [vmem:[%s9532_s1 + $0x78] sm:$0xff] }
 0xc35   : > { %v2148_v25 = vmul.f32 %v6118_v41, %v2147_v48  ;;  %v2171_v48 = vand.u32 2147483648, %v7660_v23 }
 0xc37   : > { %v2149_v37 = vadd.f32 %v6118_v41, %v2148_v25  ;;  %v6187_v25 = vld [vmem:[%s6500_s18 + $0x10] sm:$0xff]  ;;  %v2172_v1 = vor.u32 1.1754944e-38, %v2171_v48 }
 0xc38   : > { %v6120_v44 = vpop.eup %6119 }
 0xc39   : > { %v2153_v5 = vsel %vm2152_vm12, %v6118_v41, %v2149_v37  ;;  %v2161_v60 = vmul.f32 %v6120_v44, %v7660_v23  ;;  %vm2166_vm14 = vweird.f32 %v6120_v44  ;;  %v2218_v41 = vpop.trf.xlu0 }
 0xc3a   : > { %v2158_v51 = vsel %vm2155_vm13, %v2157_v10, %v2153_v5  ;;  %vm2167_vm0 = vmor %vm2165_vm15, %vm2166_vm14  ;;  %v6188_v10 = vld [vmem:[%s6500_s18 + $0x18] sm:$0xff] }
 0xc3b   : > { %v2162_v3 = vsub.f32 1.0, %v2161_v60  ;;  %v2159_v31 = vmul.f32 %v6114_v59, %v2158_v51 }
 0xc3d   : > { %v2163_v33 = vmul.f32 %v6120_v44, %v2162_v3  ;;  %v2196_v36 = vsub.f32 %v2159_v31, %v6187_v25  ;;  %v6192_v25 = vld [vmem:[%s9532_s1 + $0x60] sm:$0xff] }
 0xc3f   : > { %v2164_v20 = vadd.f32 %v6120_v44, %v2163_v33  ;;  %v2198_v30 = vmul.f32 0.125, %v2196_v36 }
 0xc41   : > { %2368 = vmatmul.f32.vlgmr.msrb.gmra.mxu2 %v2198_v30  ;;  %v2168_v60 = vsel %vm2167_vm0, %v6120_v44, %v2164_v20  ;;  %v2219_v57 = vpop.trf.xlu0  ;;  %v6190_v44 = vld [vmem:[%s9532_s1 + $0x70] sm:$0xff]  ;;  %v6191_v20 = vld [vmem:[%s9532_s1 + $0x68] sm:$0xff] }
 0xc42   : > { %v2173_v51 = vsel %vm2170_vm1, %v2172_v1, %v2168_v60  ;;  %v6193_v1 = vld [vmem:[%s9532_s1 + $0x58] sm:$0xff] }
 0xc43   : > { %v2174_v5 = vmul.f32 %v6116_v8, %v2173_v51  ;;  %v6194_v51 = vld [vmem:[%s9532_s1 + $0x50] sm:$0xff] }
 0xc45   : > { %v2197_v59 = vsub.f32 %v2174_v5, %v6188_v10  ;;  %v2048_v5 = vld [vmem:[#allocation7] sm:$0x1] }
 0xc47   : > { %v2199_v37 = vmul.f32 0.0, %v2197_v59  ;;  %v6195_v59 = vld [vmem:[%s9532_s1 + $0x48] sm:$0xff] }
 0xc49   : > { %2294 = vmatpush.msra.mxu3 %v2199_v37  ;;  %v2345_v3 = vadd.f32 %v2199_v37, %v2198_v30  ;;  %2371 = vmatmul.f32.gmra.mxu2 %v2199_v37 }
 0xc4b   : > { %v2346_v31 = vrot.slane %v2345_v3, 4  ;;  %2295 = vmatpush.msra.mxu3 %v2198_v30 }
 0xc4c   : > { %5773 = vmatmul.msk.f32.vlgmr.msra.gmra.mxu3 %vm581_vm10, %v2216_v14  ;;  %v2220_v14 = vpop.trf.xlu0 }
 0xc4d   : > { %v2347_v36 = vadd.f32 %v2346_v31, %v2345_v3  ;;  %2975 = vmatpush.msrb.mxu3 %v6189_v42  ;;  %v6197_v3 = vld [vmem:[%s9532_s1 + $0x38] sm:$0xff]  ;;  %v6198_v31 = vld [vmem:[%s9532_s1 + $0x30] sm:$0xff] }
 0xc4e   : > { %v6201_v42 = vld [vmem:[%s9532_s1 + $0x18] sm:$0xff] }
 0xc4f   : > { %v2348_v33 = vrot.slane %v2347_v36, 2  ;;  %2976 = vmatpush.msrb.mxu3 %v6190_v44  ;;  %v6202_v44 = vld [vmem:[%s9532_s1 + $0x10] sm:$0xff] }
 0xc51   : > { %v2349_v8 = vadd.f32 %v2348_v33, %v2347_v36  ;;  %2977 = vmatpush.msrb.mxu3 %v6191_v20  ;;  %v6199_v36 = vld [vmem:[%s9532_s1 + $0x28] sm:$0xff] }
 0xc53   : > { %v2350_v48 = vrot.slane %v2349_v8, 1  ;;  %2978 = vmatpush.msrb.mxu3 %v6192_v25 }
 0xc54   : > { %5774 = vmatmul.msk.f32.gmra.mxu3 %vm581_vm10, %v2217_v52  ;;  %v6196_v52 = vld [vmem:[%s9532_s1 + $0x40] sm:$0xff]  ;;  %v2221_v37 = vpop.trf.xlu0 }
 0xc55   : > { %v2351_v30 = vadd.f32 %v2350_v48, %v2349_v8  ;;  %2979 = vmatpush.msrb.mxu3 %v6193_v1  ;;  %v6203_v8 = vld [vmem:[%s9532_s1 + $0x8] sm:$0xff] }
 0xc57   : > { %v2780_v60 = vmul.f32 0.01, %v2351_v30  ;;  %2980 = vmatpush.msrb.mxu3 %v6194_v51 }
 0xc59   : > { %v2781_v10 = vsub.f32 %v2048_v5, %v2780_v60  ;;  %2981 = vmatpush.msrb.mxu3 %v6195_v59 }
 0xc5b   : > { %2782 = vst [vmem:[#allocation7] sm:$0x1] %v2781_v10  ;;  %2982 = vmatpush.msrb.mxu3 %v6196_v52 }
 0xc5c   : > { %5775 = vmatmul.msk.f32.gmra.mxu3 %vm581_vm10, %v2218_v41  ;;  %v6200_v41 = vld [vmem:[%s9532_s1 + $0x20] sm:$0xff]  ;;  %v2222_v33 = vpop.trf.xlu0 }
 0xc5d   : > { %2983 = vmatpush.msrb.mxu3 %v6197_v3 }
 0xc5f   : > { %2984 = vmatpush.msrb.mxu3 %v6198_v31 }
 0xc61   : > { %2985 = vmatpush.msrb.mxu3 %v6199_v36 }
 0xc63   : > { %2986 = vmatpush.msrb.mxu3 %v6200_v41 }
 0xc64   : > { %5776 = vmatmul.msk.f32.gmra.mxu3 %vm581_vm10, %v2219_v57  ;;  %v6204_v57 = vld [vmem:[%s9532_s1] sm:$0xff]  ;;  %v2223_v20 = vpop.trf.xlu0 }
 0xc65   : > { %2987 = vmatpush.msrb.mxu3 %v6201_v42 }
 0xc67   : > { %2988 = vmatpush.msrb.mxu3 %v6202_v44 }
 0xc69   : > { %2989 = vmatpush.msrb.mxu3 %v6203_v8 }
 0xc6b   : > { %2990 = vmatpush.msrb.mxu3 %v6204_v57  ;;  %v7754_v57 = vld [vmem:[%s9534_s3 + $0x68] sm:$0xff] }
 0xc6c   : > { %5777 = vmatmul.msk.f32.gmra.mxu3 %vm581_vm10, %v2220_v14  ;;  %v2224_v48 = vpop.trf.xlu0  ;;  %9890 = vst [vmem:[#allocation59_spill] sm:$0xff] %v7754_v57 }
 0xc74   : > { %5778 = vmatmul.msk.f32.gmra.mxu3 %vm581_vm10, %v2221_v37  ;;  %v2225_v25 = vpop.trf.xlu0 }
 0xc7c   : > { %5779 = vmatmul.msk.f32.gmra.mxu3 %vm581_vm10, %v2222_v33  ;;  %v2226_v30 = vpop.trf.xlu0 }
 0xc84   : > { %5780 = vmatmul.msk.f32.gmra.mxu3 %vm581_vm10, %v2223_v20  ;;  %v2227_v1 = vpop.trf.xlu0 }
 0xc8c   : > { %5781 = vmatmul.msk.f32.gmra.mxu3 %vm581_vm10, %v2224_v48  ;;  %v2228_v60 = vpop.trf.xlu0 }
 0xc94   : > { %5782 = vmatmul.msk.f32.gmra.mxu3 %vm581_vm10, %v2225_v25  ;;  %v2229_v14 = vpop.trf.xlu0  ;;  %v7760_v25 = vld [vmem:[%s9534_s3 + $0x60] sm:$0xff] }
 0xc95   : > { %9891 = vst [vmem:[#allocation60_spill] sm:$0xff] %v7760_v25 }
 0xc9c   : > { %5783 = vmatmul.msk.f32.gmra.mxu3 %vm581_vm10, %v2226_v30  ;;  %v2395_v51 = vpop.trf.xlu1  ;;  %v2230_v5 = vpop.trf.xlu0 }
 0xca4   : > { %5784 = vmatmul.msk.f32.gmra.mxu3 %vm581_vm10, %v2227_v1  ;;  %v2396_v10 = vpop.trf.xlu1  ;;  %v2231_v59 = vpop.trf.xlu0  ;;  %v7767_v1 = vld [vmem:[%s9534_s3 + $0x58] sm:$0xff] }
 0xca5   : > { %9892 = vst [vmem:[#allocation61_spill] sm:$0xff] %v7767_v1 }
 0xcac   : > { %5785 = vmatmul.msk.f32.gmra.mxu3 %vm581_vm10, %v2228_v60  ;;  %v2397_v52 = vpop.trf.xlu1 }
 0xcb4   : > { %5786 = vmatmul.msk.f32.gmra.mxu3 %vm581_vm10, %v2229_v14  ;;  %v2398_v41 = vpop.trf.xlu1  ;;  %v7773_v14 = vld [vmem:[%s9534_s3 + $0x50] sm:$0xff] }
 0xcb5   : > { %9893 = vst [vmem:[#allocation62_spill] sm:$0xff] %v7773_v14 }
 0xcbc   : > { %5787 = vmatmul.msk.f32.gmra.mxu3 %vm581_vm10, %v2230_v5  ;;  %v2399_v48 = vpop.trf.xlu1  ;;  %v2031_v5 = vld [vmem:[#allocation5] sm:$0x1] }
 0xcc4   : > { %5788 = vmatmul.msk.f32.gmra.mxu3 %vm581_vm10, %v2231_v59  ;;  %v2369_v37 = vpop.f32.mrf.mxu2 }
 0xcc5   : > { %5807 = vmatmul.msk.f32.vlgmr.msra.gmra.mxu1 %vm2375_vm2, %v2369_v37  ;;  %v2377_v31 = vsel %vm2375_vm2, %v2369_v37, 0.0 }
 0xccc   : > { %v2372_v3 = vpop.f32.mrf.mxu2 }
 0xccd   : > { %v2378_v36 = vsel %vm2376_vm3, %v2372_v3, 0.0  ;;  %5789 = vmatpush.msk.msra.mxu0 %vm2376_vm3, %v2372_v3  ;;  %5808 = vmatmul.msk.f32.gmra.mxu1 %vm2376_vm3, %v2372_v3  ;;  %v2400_v3 = vpop.trf.xlu1 }
 0xcce   : > { %v2524_v42 = vadd.f32 %v2378_v36, %v2377_v31  ;;  %v7792_v31 = vld [vmem:[%s9534_s3 + $0x38] sm:$0xff]  ;;  %v7798_v36 = vld [vmem:[%s9534_s3 + $0x30] sm:$0xff] }
 0xccf   : > { %5790 = vmatpush.msk.msra.mxu0 %vm2375_vm2, %v2369_v37  ;;  %v7785_v37 = vld [vmem:[%s9534_s3 + $0x40] sm:$0xff]  ;;  %9896 = vst [vmem:[#allocation65_spill] sm:$0xff] %v7792_v31 }
 0xcd0   : > { %v2525_v33 = vrot.slane %v2524_v42, 4  ;;  %5791 = vmatmul.msk.f32.vlgmr.msra.gmra.mxu0 %vm581_vm10, %v2395_v51  ;;  %9895 = vst [vmem:[#allocation64_spill] sm:$0xff] %v7785_v37 }
 0xcd1   : > { %3000 = vmatpush.msrb.mxu0 %v7742_v6  ;;  %9897 = vst [vmem:[#allocation66_spill] sm:$0xff] %v7798_v36 }
 0xcd2   : > { %v2526_v44 = vadd.f32 %v2525_v33, %v2524_v42  ;;  %v7804_v42 = vld [vmem:[%s9534_s3 + $0x28] sm:$0xff]  ;;  %v7817_v33 = vld [vmem:[%s9534_s3 + $0x18] sm:$0xff] }
 0xcd3   : > { %3001 = vmatpush.msrb.mxu0 %v7748_v16  ;;  %9898 = vst [vmem:[#allocation67_spill] sm:$0xff] %v7804_v42 }
 0xcd4   : > { %v2527_v8 = vrot.slane %v2526_v44, 2  ;;  %9900 = vst [vmem:[#allocation69_spill] sm:$0xff] %v7817_v33 }
 0xcd5   : > { %3002 = vmatpush.msrb.mxu0 %v7754_v57 }
 0xcd6   : > { %v2528_v20 = vadd.f32 %v2527_v8, %v2526_v44  ;;  %v2401_v44 = vpop.trf.xlu1  ;;  %v7823_v8 = vld [vmem:[%s9534_s3 + $0x10] sm:$0xff] }
 0xcd7   : > { %3003 = vmatpush.msrb.mxu0 %v7760_v25  ;;  %9901 = vst [vmem:[#allocation70_spill] sm:$0xff] %v7823_v8 }
 0xcd8   : > { %v2529_v30 = vrot.slane %v2528_v20, 1  ;;  %5792 = vmatmul.msk.f32.gmra.mxu0 %vm581_vm10, %v2396_v10  ;;  %v7779_v10 = vld [vmem:[%s9534_s3 + $0x48] sm:$0xff] }
 0xcd9   : > { %3004 = vmatpush.msrb.mxu0 %v7767_v1  ;;  %9894 = vst [vmem:[#allocation63_spill] sm:$0xff] %v7779_v10 }
 0xcda   : > { %v2530_v60 = vadd.f32 %v2529_v30, %v2528_v20  ;;  %v7829_v20 = vld [vmem:[%s9534_s3 + $0x8] sm:$0xff] }
 0xcdb   : > { %3005 = vmatpush.msrb.mxu0 %v7773_v14  ;;  %9902 = vst [vmem:[#allocation71_spill] sm:$0xff] %v7829_v20 }
 0xcdc   : > { %v2729_v51 = vmul.f32 0.01, %v2530_v60 }
 0xcdd   : > { %3006 = vmatpush.msrb.mxu0 %v7779_v10 }
 0xcde   : > { %v2730_v59 = vsub.f32 %v2031_v5, %v2729_v51  ;;  %v2402_v30 = vpop.trf.xlu1 }
 0xcdf   : > { %3007 = vmatpush.msrb.mxu0 %v7785_v37 }
 0xce0   : > { %2731 = vst [vmem:[#allocation5] sm:$0x1] %v2730_v59  ;;  %5793 = vmatmul.msk.f32.gmra.mxu0 %vm581_vm10, %v2397_v52  ;;  %v7810_v52 = vld [vmem:[%s9534_s3 + $0x20] sm:$0xff] }
 0xce1   : > { %3008 = vmatpush.msrb.mxu0 %v7792_v31  ;;  %9899 = vst [vmem:[#allocation68_spill] sm:$0xff] %v7810_v52 }
 0xce3   : > { %3009 = vmatpush.msrb.mxu0 %v7798_v36 }
 0xce5   : > { %3010 = vmatpush.msrb.mxu0 %v7804_v42  ;;  %v9928_v42 = vld [vmem:[#allocation43_spill] sm:$0xff] }
 0xce6   : > { %v2403_v60 = vpop.trf.xlu1 }
 0xce7   : > { %3011 = vmatpush.msrb.mxu0 %v7810_v52  ;;  %v9927_v52 = vld [vmem:[#allocation42_spill] sm:$0xff] }
 0xce8   : > { %5794 = vmatmul.msk.f32.gmra.mxu0 %vm581_vm10, %v2398_v41  ;;  %v7835_v41 = vld [vmem:[%s9534_s3] sm:$0xff] }
 0xce9   : > { %3012 = vmatpush.msrb.mxu0 %v7817_v33  ;;  %9903 = vst [vmem:[#allocation72_spill] sm:$0xff] %v7835_v41  ;;  %v9926_v33 = vld [vmem:[#allocation41_spill] sm:$0xff] }
 0xceb   : > { %3013 = vmatpush.msrb.mxu0 %v7823_v8  ;;  %v9925_v8 = vld [vmem:[#allocation40_spill] sm:$0xff] }
 0xced   : > { %3014 = vmatpush.msrb.mxu0 %v7829_v20  ;;  %v9924_v20 = vld [vmem:[#allocation39_spill] sm:$0xff] }
 0xcee   : > { %v2404_v51 = vpop.trf.xlu1 }
 0xcef   : > { %3015 = vmatpush.msrb.mxu0 %v7835_v41  ;;  %v9922_v41 = vld [vmem:[#allocation37_spill] sm:$0xff] }
 0xcf0   : > { %5795 = vmatmul.msk.f32.gmra.mxu0 %vm581_vm10, %v2399_v48 }
 0xcf6   : > { %v2405_v5 = vpop.trf.xlu1 }
 0xcf8   : > { %5796 = vmatmul.msk.f32.gmra.mxu0 %vm581_vm10, %v2400_v3 }
 0xcfe   : > { %v2406_v59 = vpop.trf.xlu1 }
 0xd00   : > { %5797 = vmatmul.msk.f32.gmra.mxu0 %vm581_vm10, %v2401_v44 }
 0xd06   : > { %v2407_v23 = vpop.trf.xlu1 }
 0xd08   : > { %5798 = vmatmul.msk.f32.gmra.mxu0 %vm581_vm10, %v2402_v30 }
 0xd0e   : > { %v2408_v48 = vpop.trf.xlu1 }
 0xd10   : > { %5799 = vmatmul.msk.f32.gmra.mxu0 %vm581_vm10, %v2403_v60 }
 0xd16   : > { %v2409_v3 = vpop.trf.xlu1 }
 0xd18   : > { %5800 = vmatmul.msk.f32.gmra.mxu0 %vm581_vm10, %v2404_v51 }
 0xd1e   : > { %v2410_v30 = vpop.trf.xlu1 }
 0xd20   : > { %5801 = vmatmul.msk.f32.gmra.mxu0 %vm581_vm10, %v2405_v5 }
 0xd28   : > { %5802 = vmatmul.msk.f32.gmra.mxu0 %vm581_vm10, %v2406_v59 }
 0xd30   : > { %5803 = vmatmul.msk.f32.gmra.mxu0 %vm581_vm10, %v2407_v23 }
 0xd38   : > { %5804 = vmatmul.msk.f32.gmra.mxu0 %vm581_vm10, %v2408_v48  ;;  %v7857_v48 = vld [vmem:[%s9536_s5 + $0x78] sm:$0xff] }
 0xd39   : > { %9904 = vst [vmem:[#allocation73_spill] sm:$0xff] %v7857_v48 }
 0xd40   : > { %5805 = vmatmul.msk.f32.gmra.mxu0 %vm581_vm10, %v2409_v3 }
 0xd42   : > { %v2548_v44 = vpop.f32.mrf.mxu1 }
 0xd43   : > { %v2556_v51 = vsel %vm2554_vm4, %v2548_v44, 0.0 }
 0xd48   : > { %5806 = vmatmul.msk.f32.gmra.mxu0 %vm581_vm10, %v2410_v30 }
 0xd4a   : > { %v2551_v60 = vpop.f32.mrf.mxu1 }
 0xd4b   : > { %v2557_v5 = vsel %vm2555_vm5, %v2551_v60, 0.0  ;;  %5809 = vmatpush.msk.msra.mxu2 %vm2555_vm5, %v2551_v60 }
 0xd4c   : > { %v2623_v59 = vadd.f32 %v2557_v5, %v2556_v51  ;;  %v2014_v5 = vld [vmem:[#allocation3] sm:$0x1] }
 0xd4d   : > { %5810 = vmatpush.msk.msra.mxu2 %vm2554_vm4, %v2548_v44 }
 0xd4e   : > { %v2624_v23 = vrot.slane %v2623_v59, 4  ;;  %5811 = vmatmul.msk.f32.vlgmr.msra.gmra.mxu2 %vm581_vm10, %v9828_v46  ;;  %v7871_v46 = vld [vmem:[%s9536_s5 + $0x68] sm:$0xff] }
 0xd4f   : > { %3269 = vmatpush.xpose.msrb.mxu2 %v7857_v48  ;;  %9906 = vst [vmem:[#allocation75_spill] sm:$0xff] %v7871_v46 }
 0xd50   : > { %v2625_v29 = vadd.f32 %v2624_v23, %v2623_v59  ;;  %v7877_v59 = vld [vmem:[%s9536_s5 + $0x60] sm:$0xff] }
 0xd51   : > { %9907 = vst [vmem:[#allocation76_spill] sm:$0xff] %v7877_v59 }
 0xd52   : > { %v2626_v3 = vrot.slane %v2625_v29, 2 }
 0xd53   : > { %3270 = vmatpush.xpose.msrb.mxu2 %v7863_v34 }
 0xd54   : > { %v2627_v44 = vadd.f32 %v2626_v3, %v2625_v29  ;;  %v7891_v29 = vld [vmem:[%s9536_s5 + $0x50] sm:$0xff]  ;;  %v7905_v3 = vld [vmem:[%s9536_s5 + $0x40] sm:$0xff] }
 0xd55   : > { %9909 = vst [vmem:[#allocation78_spill] sm:$0xff] %v7891_v29 }
 0xd56   : > { %v2628_v30 = vrot.slane %v2627_v44, 1  ;;  %5812 = vmatmul.msk.f32.gmra.mxu2 %vm581_vm10, %v9831_v61  ;;  %v7885_v61 = vld [vmem:[%s9536_s5 + $0x58] sm:$0xff]  ;;  %9911 = vst [vmem:[#allocation80_spill] sm:$0xff] %v7905_v3 }
 0xd57   : > { %3271 = vmatpush.xpose.msrb.mxu2 %v7871_v46  ;;  %9908 = vst [vmem:[#allocation77_spill] sm:$0xff] %v7885_v61 }
 0xd58   : > { %v2629_v60 = vadd.f32 %v2628_v30, %v2627_v44  ;;  %v7919_v44 = vld [vmem:[%s9536_s5 + $0x30] sm:$0xff]  ;;  %v7933_v30 = vld [vmem:[%s9536_s5 + $0x20] sm:$0xff] }
 0xd59   : > { %9913 = vst [vmem:[#allocation82_spill] sm:$0xff] %v7919_v44 }
 0xd5a   : > { %v2678_v51 = vmul.f32 0.01, %v2629_v60  ;;  %9915 = vst [vmem:[#allocation84_spill] sm:$0xff] %v7933_v30  ;;  %v7947_v60 = vld [vmem:[%s9536_s5 + $0x10] sm:$0xff] }
 0xd5b   : > { %3272 = vmatpush.xpose.msrb.mxu2 %v7877_v59  ;;  %9917 = vst [vmem:[#allocation86_spill] sm:$0xff] %v7947_v60 }
 0xd5c   : > { %v2679_v23 = vsub.f32 %v2014_v5, %v2678_v51  ;;  %v9918_v51 = vld [vmem:[#allocation35_spill] sm:$0xff]  ;;  %v7961_v5 = vld [vmem:[%s9536_s5] sm:$0xff] }
 0xd5d   : > { %9920 = vst [vmem:[#allocation87_spill] sm:$0xff] %v7961_v5 }
 0xd5e   : > { %2680 = vst [vmem:[#allocation3] sm:$0x1] %v2679_v23  ;;  %5813 = vmatmul.msk.f32.gmra.mxu2 %vm581_vm10, %v9834_v40  ;;  %v7899_v40 = vld [vmem:[%s9536_s5 + $0x48] sm:$0xff]  ;;  %v9921_v23 = vld [vmem:[#allocation36_spill] sm:$0xff] }
 0xd5f   : > { %3273 = vmatpush.xpose.msrb.mxu2 %v7885_v61  ;;  %9910 = vst [vmem:[#allocation79_spill] sm:$0xff] %v7899_v40 }
 0xd63   : > { %3274 = vmatpush.xpose.msrb.mxu2 %v7891_v29 }
 0xd66   : > { %5814 = vmatmul.msk.f32.gmra.mxu2 %vm581_vm10, %v9837_v54  ;;  %v7913_v54 = vld [vmem:[%s9536_s5 + $0x38] sm:$0xff] }
 0xd67   : > { %3275 = vmatpush.xpose.msrb.mxu2 %v7899_v40  ;;  %9912 = vst [vmem:[#allocation81_spill] sm:$0xff] %v7913_v54 }
 0xd6b   : > { %3276 = vmatpush.xpose.msrb.mxu2 %v7905_v3 }
 0xd6e   : > { %5815 = vmatmul.msk.f32.gmra.mxu2 %vm581_vm10, %v9840_v4  ;;  %v7927_v4 = vld [vmem:[%s9536_s5 + $0x28] sm:$0xff] }
 0xd6f   : > { %3277 = vmatpush.xpose.msrb.mxu2 %v7913_v54  ;;  %9914 = vst [vmem:[#allocation83_spill] sm:$0xff] %v7927_v4 }
 0xd73   : > { %3278 = vmatpush.xpose.msrb.mxu2 %v7919_v44 }
 0xd76   : > { %5816 = vmatmul.msk.f32.gmra.mxu2 %vm581_vm10, %v9843_v47  ;;  %v7941_v47 = vld [vmem:[%s9536_s5 + $0x18] sm:$0xff] }
 0xd77   : > { %3279 = vmatpush.xpose.msrb.mxu2 %v7927_v4  ;;  %9916 = vst [vmem:[#allocation85_spill] sm:$0xff] %v7941_v47 }
 0xd7b   : > { %3280 = vmatpush.xpose.msrb.mxu2 %v7933_v30 }
 0xd7e   : > { %5817 = vmatmul.msk.f32.gmra.mxu2 %vm581_vm10, %v9846_v27  ;;  %v7955_v27 = vld [vmem:[%s9536_s5 + $0x8] sm:$0xff] }
 0xd7f   : > { %3281 = vmatpush.xpose.msrb.mxu2 %v7941_v47  ;;  %9919 = vst [vmem:[#allocation35_spill] sm:$0xff] %v7955_v27 }
 0xd83   : > { %3282 = vmatpush.xpose.msrb.mxu2 %v7947_v60 }
 0xd86   : > { %5818 = vmatmul.msk.f32.gmra.mxu2 %vm581_vm10, %v9918_v51  ;;  %v9923_v51 = vld [vmem:[#allocation38_spill] sm:$0xff] }
 0xd87   : > { %3283 = vmatpush.xpose.msrb.mxu2 %v7955_v27 }
 0xd8b   : > { %3284 = vmatpush.xpose.msrb.mxu2 %v7961_v5 }
 0xd8e   : > { %5819 = vmatmul.msk.f32.gmra.mxu2 %vm581_vm10, %v9921_v23  ;;  %v7980_v23 = vpop.f32.mrf.mxu0 }
 0xd8f   : > { %9929 = vst [vmem:[#allocation36_spill] sm:$0xff] %v7980_v23 }
 0xd96   : > { %5820 = vmatmul.msk.f32.gmra.mxu2 %vm581_vm10, %v9922_v41 }
 0xd9e   : > { %5821 = vmatmul.msk.f32.gmra.mxu2 %vm581_vm10, %v9923_v51  ;;  %v7984_v51 = vpop.f32.mrf.mxu0 }
 0xda6   : > { %5822 = vmatmul.msk.f32.gmra.mxu2 %vm581_vm10, %v9924_v20 }
 0xdae   : > { %5823 = vmatmul.msk.f32.gmra.mxu2 %vm581_vm10, %v9925_v8  ;;  %v7990_v8 = vpop.f32.mrf.mxu0 }
 0xdb6   : > { %5824 = vmatmul.msk.f32.gmra.mxu2 %vm581_vm10, %v9926_v33  ;;  %v7994_v33 = vpop.f32.mrf.mxu0 }
 0xdbe   : > { %5825 = vmatmul.msk.f32.gmra.mxu2 %vm581_vm10, %v9927_v52  ;;  %v7996_v52 = vpop.f32.mrf.mxu3 }
 0xdbf   : > { %9930 = vst [vmem:[#allocation37_spill] sm:$0xff] %v7996_v52 }
 0xdc6   : > { %5826 = vmatmul.msk.f32.gmra.mxu2 %vm581_vm10, %v9928_v42  ;;  %v8000_v42 = vpop.f32.mrf.mxu0  ;;  %v8002_v10 = vpop.f32.mrf.mxu3 }
 0xdc7   : > { %9931 = vst [vmem:[#allocation38_spill] sm:$0xff] %v8002_v10 }
 0xdce   : > { %v8004_v1 = vpop.f32.mrf.mxu0  ;;  %v8006_v57 = vpop.f32.mrf.mxu3 }
 0xdcf   : > { %9932 = vst [vmem:[#allocation39_spill] sm:$0xff] %v8006_v57 }
 0xdd1   : > { %v7982_v41 = vpop.f32.mrf.mxu2 }
 0xdd6   : > { %v8008_v6 = vpop.f32.mrf.mxu0  ;;  %v8010_v5 = vpop.f32.mrf.mxu3 }
 0xdd7   : > { %9933 = vst [vmem:[#allocation40_spill] sm:$0xff] %v8010_v5 }
 0xdd9   : > { %v7986_v36 = vpop.f32.mrf.mxu2 }
 0xdde   : > { %v8012_v60 = vpop.f32.mrf.mxu0  ;;  %v8014_v47 = vpop.f32.mrf.mxu3 }
 0xddf   : > { %9934 = vst [vmem:[#allocation41_spill] sm:$0xff] %v8014_v47 }
 0xde1   : > { %v7988_v20 = vpop.f32.mrf.mxu2 }
 0xde6   : > { %v8016_v4 = vpop.f32.mrf.mxu0  ;;  %v8018_v44 = vpop.f32.mrf.mxu3 }
 0xde7   : > { %9935 = vst [vmem:[#allocation42_spill] sm:$0xff] %v8018_v44 }
 0xde9   : > { %v7992_v31 = vpop.f32.mrf.mxu2 }
 0xdee   : > { %v8020_v3 = vpop.f32.mrf.mxu0  ;;  %v8022_v29 = vpop.f32.mrf.mxu3 }
 0xdef   : > { %9936 = vst [vmem:[#allocation43_spill] sm:$0xff] %v8022_v29 }
 0xdf1   : > { %v7998_v37 = vpop.f32.mrf.mxu2 }
 0xdf6   : > { %v8024_v59 = vpop.f32.mrf.mxu0  ;;  %v8026_v46 = vpop.f32.mrf.mxu3 }
 0xdf7   : > { %9937 = vst [vmem:[#allocation88_spill] sm:$0xff] %v8026_v46 }
 0xdf9   : > { %v2590_v14 = vpop.f32.mrf.mxu2 }
 0xdfe   : > { %v8028_v48 = vpop.f32.mrf.mxu0  ;;  %v8030_v52 = vpop.f32.mrf.mxu3 }
 0xdff   : > { %9938 = vst [vmem:[#allocation89_spill] sm:$0xff] %v8030_v52 }
 0xe01   : > { %v2593_v25 = vpop.f32.mrf.mxu2 }
 0xe06   : > { %v8032_v57 = vpop.f32.mrf.mxu0  ;;  %v8034_v5 = vpop.f32.mrf.mxu3 }
 0xe07   : > { %9939 = vst [vmem:[#allocation90_spill] sm:$0xff] %v8034_v5 }
 0xe09   : > { %v2596_v16 = vpop.f32.mrf.mxu2 }
 0xe0e   : > { %v2515_v52 = vpop.f32.mrf.mxu0  ;;  %v8039_v45 = vpop.f32.mrf.mxu3 }
 0xe11   : > { %v2599_v27 = vpop.f32.mrf.mxu2 }
 0xe19   : > { %v2602_v30 = vpop.f32.mrf.mxu2 }
 0xe21   : > { %v2605_v54 = vpop.f32.mrf.mxu2 }
 0xe22   : > { %v2640_v23 = vmul.f32 0.01, %v2605_v54 }
 0xe29   : > { %v2608_v40 = vpop.f32.mrf.mxu2 }
 0xe2a   : > { %v2641_v46 = vmul.f32 0.01, %v2608_v40 }
 0xe31   : > { %v2611_v61 = vpop.f32.mrf.mxu2 }
 0xe32   : > { %v2642_v11 = vmul.f32 0.01, %v2611_v61  ;;  %v2633_v61 = vmul.f32 0.01, %v7992_v31  ;;  %v2630_v31 = vmul.f32 0.01, %v7982_v41 }
 0xe34   : > { %v2658_v5 = vsub.f32 %v7561_v38, %v2642_v11  ;;  %v2518_v11 = vpop.f32.mrf.mxu0  ;;  %v8050_v38 = vpop.f32.mrf.mxu3 }
 0xe39   : > { %v2614_v34 = vpop.f32.mrf.mxu2 }
 0xe3a   : > { %v2643_v15 = vmul.f32 0.01, %v2614_v34  ;;  %v2657_v34 = vsub.f32 %v7565_v12, %v2641_v46  ;;  %v2635_v12 = vmul.f32 0.01, %v2590_v14  ;;  %v2634_v46 = vmul.f32 0.01, %v7998_v37 }
 0xe3b   : > { %v2649_v37 = vsub.f32 %v7600_v55, %v2633_v61 }
 0xe3c   : > { %v2659_v19 = vsub.f32 %v7557_v7, %v2643_v15  ;;  %v2637_v15 = vmul.f32 0.01, %v2596_v16  ;;  %v2636_v7 = vmul.f32 0.01, %v2593_v25  ;;  %v2651_v25 = vsub.f32 %v7590_v32, %v2635_v12 }
 0xe3d   : > { %v2650_v14 = vsub.f32 %v7595_v50, %v2634_v46  ;;  %v2695_v50 = vmul.f32 0.01, %v2518_v11  ;;  %v9947_v11 = vld [vmem:[#allocation50_spill] sm:$0xff] }
 0xe3e   : > { %v2652_v16 = vsub.f32 %v7585_v13, %v2636_v7  ;;  %v2521_v13 = vpop.f32.mrf.mxu0 }
 0xe3f   : > { %v2696_v40 = vmul.f32 0.01, %v2521_v13  ;;  %v2743_v13 = vmul.f32 0.01, %v8050_v38 }
 0xe41   : > { %v2617_v10 = vpop.f32.mrf.mxu2  ;;  %v2712_v55 = vsub.f32 %v7458_v0, %v2696_v40  ;;  %v2690_v0 = vmul.f32 0.01, %v8020_v3  ;;  %v2742_v40 = vmul.f32 0.01, %v8039_v45 }
 0xe42   : > { %v2644_v44 = vmul.f32 0.01, %v2617_v10  ;;  %v2639_v10 = vmul.f32 0.01, %v2602_v30  ;;  %v6237_v30 = vld [vmem:[%s6500_s18] sm:$0xff] }
 0xe44   : > { %v2660_v28 = vsub.f32 %v7553_v43, %v2644_v44  ;;  %v8045_v43 = vld [vmem:[%s6500_s18 + $0x20] sm:$0xff]  ;;  %v2646_v44 = vsub.f32 %v7613_v53, %v2630_v31  ;;  %v2691_v53 = vmul.f32 0.01, %v8024_v59 }
 0xe45   : > { %2991 = vmatmul.f32.vlgmr.msrb.gmra.mxu3 %v8045_v43  ;;  %v9952_v31 = vld [vmem:[#allocation17_spill] sm:$0xff] }
 0xe49   : > { %v2620_v47 = vpop.f32.mrf.mxu2 }
 0xe4a   : > { %v2645_v24 = vmul.f32 0.01, %v2620_v47  ;;  %v2693_v47 = vmul.f32 0.01, %v8032_v57  ;;  %v2707_v57 = vsub.f32 %v7481_v62, %v2691_v53  ;;  %v9942_v62 = vld [vmem:[#allocation46_spill] sm:$0xff] }
 0xe4c   : > { %v2661_v29 = vsub.f32 %v7550_v35, %v2645_v24  ;;  %v2638_v24 = vmul.f32 0.01, %v2599_v27  ;;  %v2656_v35 = vsub.f32 %v7569_v63, %v2640_v23  ;;  %v2653_v63 = vsub.f32 %v7581_v21, %v2637_v15 }
 0xe4d   : > { %v2631_v21 = vmul.f32 0.01, %v7986_v36  ;;  %v2694_v36 = vmul.f32 0.01, %v2515_v52  ;;  %v2711_v27 = vsub.f32 %v7461_v18, %v2695_v50  ;;  %v2709_v23 = vsub.f32 %v7472_v56, %v2693_v47  ;;  %v9941_v52 = vld [vmem:[#allocation45_spill] sm:$0xff] }
 0xe4e   : > { %2837 = vmatpush.msrb.mxu1 %v2661_v29  ;;  %v8065_v29 = vpop.f32.mrf.mxu3  ;;  %v2689_v18 = vmul.f32 0.01, %v8016_v4  ;;  %v2687_v56 = vmul.f32 0.01, %v8008_v6  ;;  %v2685_v4 = vmul.f32 0.01, %v8000_v42 }
 0xe4f   : > { %v2647_v54 = vsub.f32 %v7609_v39, %v2631_v21  ;;  %v2710_v39 = vsub.f32 %v7466_v49, %v2694_v36  ;;  %v2688_v49 = vmul.f32 0.01, %v8012_v60  ;;  %v2684_v60 = vmul.f32 0.01, %v7994_v33  ;;  %v9946_v42 = vld [vmem:[#allocation36_spill] sm:$0xff]  ;;  %v9956_v47 = vld [vmem:[#allocation89_spill] sm:$0xff] }
 0xe50   : > { %2838 = vmatpush.msrb.mxu1 %v2660_v28  ;;  %v2655_v28 = vsub.f32 %v7573_v9, %v2639_v10  ;;  %v8056_v9 = vld [vmem:[%s6500_s18 + $0x28] sm:$0xff]  ;;  %v2703_v10 = vsub.f32 %v9942_v62, %v2687_v56  ;;  %v2683_v6 = vmul.f32 0.01, %v7990_v8  ;;  %v9951_v21 = vld [vmem:[#allocation16_spill] sm:$0xff] }
 0xe51   : > { %2994 = vmatmul.f32.gmra.mxu3 %v8056_v9  ;;  %v9949_v8 = vld [vmem:[#allocation51_spill] sm:$0xff] }
 0xe52   : > { %2839 = vmatpush.msrb.mxu1 %v2659_v19  ;;  %v2654_v19 = vsub.f32 %v7577_v2, %v2638_v24  ;;  %v2632_v2 = vmul.f32 0.01, %v7988_v20  ;;  %v9940_v20 = vld [vmem:[#allocation44_spill] sm:$0xff]  ;;  %v2699_v12 = vsub.f32 %v9947_v11, %v2683_v6  ;;  %v9968_v62 = vld [vmem:[#allocation39_spill] sm:$0xff]  ;;  %v9975_v11 = vld [vmem:[#allocation34_spill] sm:$0xff] }
 0xe53   : > { %v2705_v3 = vsub.f32 %v9940_v20, %v2689_v18  ;;  %v9944_v24 = vld [vmem:[#allocation48_spill] sm:$0xff]  ;;  %v9962_v18 = vld [vmem:[#allocation42_spill] sm:$0xff] }
 0xe54   : > { %2840 = vmatpush.msrb.mxu1 %v2658_v5  ;;  %v2648_v32 = vsub.f32 %v7605_v58, %v2632_v2  ;;  %v2692_v5 = vmul.f32 0.01, %v8028_v48  ;;  %v2706_v48 = vsub.f32 %v7486_v26, %v2690_v0  ;;  %v9943_v26 = vld [vmem:[#allocation47_spill] sm:$0xff]  ;;  %v9961_v0 = vld [vmem:[#allocation26_spill] sm:$0xff]  ;;  %v9965_v20 = vld [vmem:[#allocation28_spill] sm:$0xff] }
 0xe55   : > { %v9950_v2 = vld [vmem:[#allocation15_spill] sm:$0xff] }
 0xe56   : > { %2841 = vmatpush.msrb.mxu1 %v2657_v34  ;;  %v2336_v58 = vpop.f32.mrf.mxu3  ;;  %v2708_v41 = vsub.f32 %v7477_v22, %v2692_v5  ;;  %v2686_v22 = vmul.f32 0.01, %v8004_v1  ;;  %v2682_v1 = vmul.f32 0.01, %v7984_v51  ;;  %v2744_v51 = vmul.f32 0.01, %v8065_v29 }
 0xe57   : > { %v2740_v29 = vmul.f32 0.01, %v9956_v47  ;;  %v9958_v5 = vld [vmem:[#allocation88_spill] sm:$0xff]  ;;  %v9984_v47 = vld [vmem:[#allocation81_spill] sm:$0xff] }
 0xe58   : > { %2842 = vmatpush.msrb.mxu1 %v2656_v35  ;;  %v2702_v34 = vsub.f32 %v9943_v26, %v2686_v22  ;;  %v2701_v35 = vsub.f32 %v9944_v24, %v2685_v4  ;;  %v2739_v38 = vmul.f32 0.01, %v9958_v5  ;;  %v9966_v22 = vld [vmem:[#allocation40_spill] sm:$0xff]  ;;  %v9971_v24 = vld [vmem:[#allocation31_spill] sm:$0xff]  ;;  %v9988_v5 = vld [vmem:[#allocation85_spill] sm:$0xff] }
 0xe5a   : > { %2843 = vmatpush.msrb.mxu1 %v2655_v28  ;;  %v9945_v28 = vld [vmem:[#allocation49_spill] sm:$0xff] }
 0xe5b   : > { %v2700_v7 = vsub.f32 %v9945_v28, %v2684_v60  ;;  %v9969_v60 = vld [vmem:[#allocation30_spill] sm:$0xff]  ;;  %v9973_v28 = vld [vmem:[#allocation32_spill] sm:$0xff] }
 0xe5c   : > { %2844 = vmatpush.msrb.mxu1 %v2654_v19  ;;  %v2681_v19 = vmul.f32 0.01, %v9946_v42  ;;  %v9974_v42 = vld [vmem:[#allocation33_spill] sm:$0xff] }
 0xe5e   : > { %2845 = vmatpush.msrb.mxu1 %v2653_v63  ;;  %v2339_v59 = vpop.f32.mrf.mxu3  ;;  %v9948_v63 = vld [vmem:[#allocation52_spill] sm:$0xff]  ;;  %v2697_v61 = vsub.f32 %v9949_v8, %v2681_v19 }
 0xe5f   : > { %v2698_v46 = vsub.f32 %v9948_v63, %v2682_v1  ;;  %v6238_v63 = vld [vmem:[%s9533_s2] ss:$0 sm:$0xff] }
 0xe60   : > { %2846 = vmatpush.msrb.mxu1 %v2652_v16  ;;  %v2746_v16 = vmul.f32 0.01, %v2339_v59  ;;  %v9964_v59 = vld [vmem:[#allocation41_spill] sm:$0xff] }
 0xe61   : > { %v2736_v56 = vmul.f32 0.01, %v9964_v59  ;;  %v9993_v59 = vld [vmem:[#allocation58_spill] sm:$0xff] }
 0xe62   : > { %2847 = vmatpush.msrb.mxu1 %v2651_v25  ;;  %v2745_v25 = vmul.f32 0.01, %v2336_v58 }
 0xe63   : > { %v2752_v26 = vsub.f32 %v9969_v60, %v2736_v56 }
 0xe64   : > { %2848 = vmatpush.msrb.mxu1 %v2650_v14 }
 0xe66   : > { %2849 = vmatpush.msrb.mxu1 %v2649_v37  ;;  %v2342_v15 = vpop.f32.mrf.mxu3  ;;  %v2762_v37 = vsub.f32 %v9951_v21, %v2746_v16 }
 0xe67   : > { %v2747_v33 = vmul.f32 0.01, %v2342_v15  ;;  %v9972_v15 = vld [vmem:[#allocation37_spill] sm:$0xff] }
 0xe68   : > { %2850 = vmatpush.msrb.mxu1 %v2648_v32  ;;  %v2761_v32 = vsub.f32 %v9952_v31, %v2745_v25  ;;  %v2732_v1 = vmul.f32 0.01, %v9972_v15  ;;  %v9977_v31 = vld [vmem:[#allocation74_spill] sm:$0xff]  ;;  %v10002_v15 = vld [vmem:[#allocation67_spill] sm:$0xff] }
 0xe69   : > { %v2763_v14 = vsub.f32 %v9950_v2, %v2747_v33  ;;  %v6085_v2 = vld [vmem:[#allocation3] ss:$0 sm:$0xff] }
 0xe6a   : > { %2851 = vmatpush.msrb.mxu1 %v2647_v54  ;;  %v9953_v54 = vld [vmem:[#allocation18_spill] sm:$0xff] }
 0xe6b   : > { %v2760_v50 = vsub.f32 %v9953_v54, %v2744_v51 }
 0xe6c   : > { %2852 = vmatpush.msrb.mxu1 %v2646_v44  ;;  %v9954_v44 = vld [vmem:[#allocation90_spill] sm:$0xff] }
 0xe6d   : > { %2853 = vmatmul.f32.vlgmr.msrb.gmra.mxu1 %v6237_v30  ;;  %v2741_v36 = vmul.f32 0.01, %v9954_v44  ;;  %v9980_v44 = vld [vmem:[#allocation77_spill] sm:$0xff] }
 0xe6e   : > { %2865 = vmatpush.msra.mxu1 %v2712_v55  ;;  %v9955_v55 = vld [vmem:[#allocation19_spill] sm:$0xff] }
 0xe6f   : > { %v2759_v30 = vsub.f32 %v9955_v55, %v2743_v13  ;;  %v9982_v55 = vld [vmem:[#allocation79_spill] sm:$0xff] }
 0xe70   : > { %2866 = vmatpush.msra.mxu1 %v2711_v27  ;;  %v9957_v27 = vld [vmem:[#allocation21_spill] sm:$0xff] }
 0xe71   : > { %v2758_v58 = vsub.f32 %v9957_v27, %v2742_v40  ;;  %v9978_v40 = vld [vmem:[#allocation75_spill] sm:$0xff] }
 0xe72   : > { %2867 = vmatpush.msra.mxu1 %v2710_v39  ;;  %v9959_v39 = vld [vmem:[#allocation20_spill] sm:$0xff]  ;;  %v9986_v27 = vld [vmem:[#allocation83_spill] sm:$0xff] }
 0xe73   : > { %v2757_v53 = vsub.f32 %v9959_v39, %v2741_v36  ;;  %v9981_v36 = vld [vmem:[#allocation78_spill] sm:$0xff]  ;;  %v9990_v39 = vld [vmem:[#allocation35_spill] sm:$0xff] }
 0xe74   : > { %2868 = vmatpush.msra.mxu1 %v2709_v23  ;;  %v9960_v23 = vld [vmem:[#allocation43_spill] sm:$0xff] }
 0xe75   : > { %2856 = vmatmul.f32.gmra.mxu1 %v7623_v17  ;;  %v2704_v17 = vsub.f32 %v9941_v52, %v2688_v49  ;;  %v2738_v45 = vmul.f32 0.01, %v9960_v23  ;;  %v9963_v49 = vld [vmem:[#allocation27_spill] sm:$0xff]  ;;  %v2735_v52 = vmul.f32 0.01, %v9966_v22 }
 0xe76   : > { %2869 = vmatpush.msra.mxu1 %v2708_v41  ;;  %v2756_v41 = vsub.f32 %v9961_v0, %v2740_v29  ;;  %v9985_v29 = vld [vmem:[#allocation82_spill] sm:$0xff]  ;;  %v9994_v22 = vld [vmem:[#allocation59_spill] sm:$0xff] }
 0xe77   : > { %v6086_v23 = vld [vmem:[#allocation5] ss:$0 sm:$0xff] }
 0xe78   : > { %2870 = vmatpush.msra.mxu1 %v2707_v57  ;;  %v2737_v57 = vmul.f32 0.01, %v9962_v18  ;;  %v9992_v18 = vld [vmem:[#allocation57_spill] sm:$0xff] }
 0xe7a   : > { %2871 = vmatpush.msra.mxu1 %v2706_v48  ;;  %v2755_v48 = vsub.f32 %v9963_v49, %v2739_v38  ;;  %v9989_v38 = vld [vmem:[#allocation86_spill] sm:$0xff] }
 0xe7c   : > { %2872 = vmatpush.msra.mxu1 %v2705_v3  ;;  %v2754_v3 = vsub.f32 %v9965_v20, %v2738_v45  ;;  %v6239_v20 = vld [vmem:[%s9535_s4] ss:$0 sm:$0xff] }
 0xe7e   : > { %2873 = vmatpush.msra.mxu1 %v2704_v17  ;;  %v9967_v17 = vld [vmem:[#allocation29_spill] sm:$0xff] }
 0xe7f   : > { %v2753_v4 = vsub.f32 %v9967_v17, %v2737_v57 }
 0xe80   : > { %2874 = vmatpush.msra.mxu1 %v2703_v10  ;;  %v2734_v10 = vmul.f32 0.01, %v9968_v62 }
 0xe82   : > { %2875 = vmatpush.msra.mxu1 %v2702_v34  ;;  %v9970_v34 = vld [vmem:[#allocation38_spill] sm:$0xff] }
 0xe83   : > { %v2733_v6 = vmul.f32 0.01, %v9970_v34  ;;  %v9998_v34 = vld [vmem:[#allocation63_spill] sm:$0xff] }
 0xe84   : > { %2876 = vmatpush.msra.mxu1 %v2701_v35  ;;  %v2751_v35 = vsub.f32 %v9971_v24, %v2735_v52  ;;  %v10000_v24 = vld [vmem:[#allocation65_spill] sm:$0xff] }
 0xe85   : > { %v2749_v19 = vsub.f32 %v9974_v42, %v2733_v6  ;;  %v9999_v6 = vld [vmem:[#allocation64_spill] sm:$0xff]  ;;  %v10006_v42 = vld [vmem:[#allocation71_spill] sm:$0xff] }
 0xe86   : > { %2877 = vmatpush.msra.mxu1 %v2700_v7  ;;  %v2750_v7 = vsub.f32 %v9973_v28, %v2734_v10  ;;  %v9996_v10 = vld [vmem:[#allocation61_spill] sm:$0xff] }
 0xe87   : > { %v10004_v28 = vld [vmem:[#allocation69_spill] sm:$0xff] }
 0xe88   : > { %2878 = vmatpush.msra.mxu1 %v2699_v12  ;;  %v2748_v12 = vsub.f32 %v9975_v11, %v2732_v1  ;;  %v10003_v1 = vld [vmem:[#allocation68_spill] sm:$0xff]  ;;  %v6087_v11 = vld [vmem:[#allocation7] ss:$0 sm:$0xff] }
 0xe8a   : > { %2879 = vmatpush.msra.mxu1 %v2698_v46 }
 0xe8c   : > { %2880 = vmatpush.msra.mxu1 %v2697_v61 }
 0xe8e   : > { %2893 = vmatpush.msrb.mxu1 %v2763_v14 }
 0xe90   : > { %2894 = vmatpush.msrb.mxu1 %v2762_v37  ;;  %v9976_v37 = vld [vmem:[#allocation73_spill] sm:$0xff] }
 0xe92   : > { %2895 = vmatpush.msrb.mxu1 %v2761_v32 }
 0xe94   : > { %2896 = vmatpush.msrb.mxu1 %v2760_v50  ;;  %v9979_v50 = vld [vmem:[#allocation76_spill] sm:$0xff] }
 0xe96   : > { %2897 = vmatpush.msrb.mxu1 %v2759_v30  ;;  %v9983_v30 = vld [vmem:[#allocation80_spill] sm:$0xff] }
 0xe98   : > { %2898 = vmatpush.msrb.mxu1 %v2758_v58  ;;  %v9987_v58 = vld [vmem:[#allocation84_spill] sm:$0xff] }
 0xe9a   : > { %2899 = vmatpush.msrb.mxu1 %v2757_v53  ;;  %v9991_v53 = vld [vmem:[#allocation87_spill] sm:$0xff] }
 0xe9c   : > { %2900 = vmatpush.msrb.mxu1 %v2756_v41 }
 0xe9e   : > { %2901 = vmatpush.msrb.mxu1 %v2755_v48 }
 0xea0   : > { %2902 = vmatpush.msrb.mxu1 %v2754_v3 }
 0xea2   : > { %2903 = vmatpush.msrb.mxu1 %v2753_v4  ;;  %v9995_v4 = vld [vmem:[#allocation60_spill] sm:$0xff] }
 0xea4   : > { %2904 = vmatpush.msrb.mxu1 %v2752_v26  ;;  %v9997_v26 = vld [vmem:[#allocation62_spill] sm:$0xff] }
 0xea6   : > { %2905 = vmatpush.msrb.mxu1 %v2751_v35  ;;  %v10001_v35 = vld [vmem:[#allocation66_spill] sm:$0xff] }
 0xea8   : > { %2906 = vmatpush.msrb.mxu1 %v2750_v7  ;;  %v10005_v7 = vld [vmem:[#allocation70_spill] sm:$0xff] }
 0xeaa   : > { %2907 = vmatpush.msrb.mxu1 %v2749_v19  ;;  %v10007_v19 = vld [vmem:[#allocation72_spill] sm:$0xff] }
 0xeac   : > { %2908 = vmatpush.msrb.mxu1 %v2748_v12 }
 0xec8   : > { %v2992_v33 = vpop.f32.mrf.mxu3 }
 0xec9   : > { %v8134_v46 = vadd.f32 %v6238_v63, %v2992_v33 }
 0xecb   : > { %v2998_v16 = vmax.f32 %v8134_v46, 0.0  ;;  %vm3471_vm1 = vcmp.gt.f32.partialorder %v8134_v46, 0.0 }
 0xecd   : > { %3016 = vmatmul.f32.vlgmr.msrb.gmra.mxu0 %v2998_v16 }
 0xed4   : > { %v2995_v8 = vpop.f32.mrf.mxu3 }
 0xed5   : > { %v8139_v61 = vadd.f32 %v6238_v63, %v2995_v8 }
 0xed7   : > { %v2999_v25 = vmax.f32 %v8139_v61, 0.0  ;;  %vm3472_vm2 = vcmp.gt.f32.partialorder %v8139_v61, 0.0 }
 0xed9   : > { %3019 = vmatmul.f32.gmra.mxu0 %v2999_v25 }
 0xeea   : > { %v2854_v14 = vpop.f32.mrf.mxu1 }
 0xeeb   : > { %v2855_v51 = vadd.f32 %v6085_v2, %v2854_v14  ;;  %v6240_v14 = vld [vmem:[%s9537_s6] ss:$0 sm:$0xff] }
 0xeed   : > { %v2860_v21 = vmax.f32 %v2855_v51, 0.0 }
 0xeef   : > { %2881 = vmatmul.f32.vlgmr.msra.gmra.mxu1 %v2860_v21 }
 0xef0   : > { %3025 = vmatpush.msra.mxu1 %v9976_v37 }
 0xef2   : > { %v2857_v13 = vpop.f32.mrf.mxu1  ;;  %3026 = vmatpush.msra.mxu1 %v9977_v31 }
 0xef3   : > { %v2858_v32 = vadd.f32 %v6085_v2, %v2857_v13 }
 0xef4   : > { %3027 = vmatpush.msra.mxu1 %v9978_v40 }
 0xef5   : > { %v2861_v54 = vmax.f32 %v2858_v32, 0.0 }
 0xef6   : > { %3028 = vmatpush.msra.mxu1 %v9979_v50 }
 0xef7   : > { %2884 = vmatmul.f32.gmra.mxu1 %v2861_v54 }
 0xef8   : > { %3029 = vmatpush.msra.mxu1 %v9980_v44 }
 0xefa   : > { %3030 = vmatpush.msra.mxu1 %v9981_v36 }
 0xefc   : > { %3031 = vmatpush.msra.mxu1 %v9982_v55 }
 0xefe   : > { %3032 = vmatpush.msra.mxu1 %v9983_v30 }
 0xf00   : > { %3033 = vmatpush.msra.mxu1 %v9984_v47 }
 0xf02   : > { %3034 = vmatpush.msra.mxu1 %v9985_v29 }
 0xf04   : > { %3035 = vmatpush.msra.mxu1 %v9986_v27 }
 0xf06   : > { %3036 = vmatpush.msra.mxu1 %v9987_v58 }
 0xf08   : > { %3037 = vmatpush.msra.mxu1 %v9988_v5 }
 0xf0a   : > { %3038 = vmatpush.msra.mxu1 %v9989_v38 }
 0xf0c   : > { %3039 = vmatpush.msra.mxu1 %v9990_v39 }
 0xf0e   : > { %3040 = vmatpush.msra.mxu1 %v9991_v53 }
 0xf4a   : > { %v3017_v49 = vpop.f32.mrf.mxu0 }
 0xf4b   : > { %v8165_v3 = vadd.f32 %v6239_v20, %v3017_v49 }
 0xf4d   : > { %v3023_v52 = vmax.f32 %v8165_v3, 0.0  ;;  %vm3292_vm15 = vcmp.gt.f32.partialorder %v8165_v3, 0.0 }
 0xf56   : > { %v3020_v17 = vpop.f32.mrf.mxu0 }
 0xf57   : > { %v8172_v62 = vadd.f32 %v6239_v20, %v3020_v17 }
 0xf59   : > { %v3024_v60 = vmax.f32 %v8172_v62, 0.0  ;;  %vm3293_vm0 = vcmp.gt.f32.partialorder %v8172_v62, 0.0 }
 0xf6c   : > { %v2882_v45 = vpop.f32.mrf.mxu1 }
 0xf6d   : > { %v2883_v0 = vadd.f32 %v6086_v23, %v2882_v45 }
 0xf6f   : > { %v2888_v41 = vmax.f32 %v2883_v0, 0.0 }
 0xf71   : > { %2909 = vmatmul.f32.vlgmr.msrb.gmra.mxu1 %v2888_v41  ;;  %v8225_v41 = vld [vmem:[%s6500_s18 + $0x30] sm:$0xff] }
 0xf72   : > { %3448 = vmatpush.xpose.msrb.mxu1 %v9992_v18 }
 0xf74   : > { %v2885_v57 = vpop.f32.mrf.mxu1 }
 0xf75   : > { %v2886_v48 = vadd.f32 %v6086_v23, %v2885_v57 }
 0xf76   : > { %3449 = vmatpush.xpose.msrb.mxu1 %v9993_v59 }
 0xf77   : > { %v2889_v56 = vmax.f32 %v2886_v48, 0.0 }
 0xf79   : > { %2912 = vmatmul.f32.gmra.mxu1 %v2889_v56 }
 0xf7a   : > { %3450 = vmatpush.xpose.msrb.mxu1 %v9994_v22 }
 0xf7e   : > { %3451 = vmatpush.xpose.msrb.mxu1 %v9995_v4  ;;  %v8231_v4 = vld [vmem:[%s6500_s18 + $0x38] sm:$0xff] }
 0xf81   : > { %3041 = vmatmul.f32.vlgmr.msra.gmra.mxu1 %v3023_v52 }
 0xf82   : > { %3452 = vmatpush.xpose.msrb.mxu1 %v9996_v10 }
 0xf86   : > { %3453 = vmatpush.xpose.msrb.mxu1 %v9997_v26 }
 0xf89   : > { %3044 = vmatmul.f32.gmra.mxu1 %v3024_v60 }
 0xf8a   : > { %3454 = vmatpush.xpose.msrb.mxu1 %v9998_v34 }
 0xf8e   : > { %3455 = vmatpush.xpose.msrb.mxu1 %v9999_v6 }
 0xf92   : > { %3456 = vmatpush.xpose.msrb.mxu1 %v10000_v24 }
 0xf96   : > { %3457 = vmatpush.xpose.msrb.mxu1 %v10001_v35 }
 0xf9a   : > { %3458 = vmatpush.xpose.msrb.mxu1 %v10002_v15 }
 0xf9e   : > { %3459 = vmatpush.xpose.msrb.mxu1 %v10003_v1 }
 0xfa2   : > { %3460 = vmatpush.xpose.msrb.mxu1 %v10004_v28 }
 0xfa6   : > { %3461 = vmatpush.xpose.msrb.mxu1 %v10005_v7 }
 0xfaa   : > { %3462 = vmatpush.xpose.msrb.mxu1 %v10006_v42  ;;  %v6241_v42 = vld [vmem:[%s9537_s6] sm:$0x1] }
 0xfae   : > { %3463 = vmatpush.xpose.msrb.mxu1 %v10007_v19 }
 0xfee   : > { %v2910_v12 = vpop.f32.mrf.mxu1 }
 0xfef   : > { %v2911_v33 = vadd.f32 %v6087_v11, %v2910_v12 }
 0xff1   : > { %2951 = vst [vmem:[%s8193_s23] sm:$0xff] %v2911_v33 }
 0xff6   : > { %v2913_v63 = vpop.f32.mrf.mxu1 }
 0xff7   : > { %v2914_v8 = vadd.f32 %v6087_v11, %v2913_v63 }
 0xff9   : > { %2952 = vst [vmem:[%s8193_s23 + $0x8] sm:$0xff] %v2914_v8 }
 0xffe   : > { %v3042_v2 = vpop.f32.mrf.mxu1 }
 0xfff   : > { %v3043_v51 = vadd.f32 %v6240_v14, %v3042_v2 }
0x1001   : > { %3048 = vmax.xlane.f32.xlu1 %v3043_v51 }
0x1006   : > { %v3045_v21 = vpop.f32.mrf.mxu1 }
0x1007   : > { %v3046_v37 = vadd.f32 %v6240_v14, %v3045_v21 }
0x1009   : > { %3050 = vmax.xlane.f32.xlu0 %v3046_v37 }
0x103b   : > { %3296 = vxpose.xlu1.b32.start [1/2] (short) %v2998_v16, 128 }
0x1043   : > { %3297 = vxpose.xlu1.b32.end [2/2] (short) %v2999_v25, 128 }
0x1074   : > { %v3049_v13 = vpop.xlane.xlu1 %3048 }
0x1075   : > { %v8204_v31 = vsub.f32 %v3043_v51, %v3049_v13 }
0x1077   : > { %10008 = vst [vmem:[#allocation44_spill] sm:$0xff] %v8204_v31  ;;  %v3054_v32 = vmul.f32 1.442695, %v8204_v31 }
0x1079   : > { %6121 = vpow2.f32 %v3054_v32 }
0x107c   : > { %v3051_v40 = vpop.xlane.xlu0 %3050 }
0x107d   : > { %v8207_v54 = vsub.f32 %v3046_v37, %v3051_v40  ;;  %v6242_v40 = vld [vmem:[%s9535_s4] sm:$0x1] }
0x107f   : > { %10009 = vst [vmem:[#allocation45_spill] sm:$0xff] %v8207_v54  ;;  %v6122_v50 = vpop.eup %6121  ;;  %v3056_v44 = vmul.f32 1.442695, %v8207_v54 }
0x1080   : > { %3058 = vadd.xlane.f32.xlu2 %v6122_v50 }
0x1081   : > { %6123 = vpow2.f32 %v3056_v44 }
0x1087   : > { %v6124_v36 = vpop.eup %6123 }
0x1088   : > { %3060 = vadd.xlane.f32.xlu2 %v6124_v36 }
0x10b1   : > { %3475 = vxpose.xlu2.b32.start [1/2] (short) %v8045_v43, 128 }
0x10b9   : > { %3476 = vxpose.xlu2.b32.end [2/2] (short) %v8056_v9, 128 }
0x10df   : > { %v3312_v11 = vpop.trf.xlu1 }
0x10e7   : > { %v3313_v33 = vpop.trf.xlu1 }
0x10f3   : > { %v8212_v16 = vpop.xlane.xlu2 %3058 }
0x10f4   : > { %10010 = vst [vmem:[#allocation46_spill] sm:$0xff] %v8212_v16  ;;  %6125 = vrcp.f32 %v8212_v16  ;;  %v3073_v29 = vand.u32 2147483648, %v8212_v16  ;;  %v3071_v43 = vand.u32 2147483647, %v8212_v16  ;;  %vm3067_vm7 = vweird.f32 %v8212_v16 }
0x10f6   : > { %v3074_v5 = vor.u32 1.1754944e-38, %v3073_v29  ;;  %vm3072_vm9 = vcmp.eq.f32.partialorder %v3071_v43, 8.507059e+37 }
0x10fa   : > { %v6126_v25 = vpop.eup %6125 }
0x10fb   : > { %v3063_v55 = vmul.f32 %v6126_v25, %v8212_v16  ;;  %v8216_v30 = vpop.xlane.xlu2 %3060  ;;  %vm3068_vm6 = vweird.f32 %v6126_v25  ;;  %v6260_v16 = vld [vmem:[%s9532_s1 + $0x78] sm:$0xff] }
0x10fc   : > { %10011 = vst [vmem:[#allocation47_spill] sm:$0xff] %v8216_v30  ;;  %6127 = vrcp.f32 %v8216_v30  ;;  %vm3069_vm8 = vmor %vm3067_vm7, %vm3068_vm6  ;;  %v3088_v0 = vand.u32 2147483648, %v8216_v30  ;;  %v3086_v49 = vand.u32 2147483647, %v8216_v30  ;;  %vm3082_vm12 = vweird.f32 %v8216_v30 }
0x10fd   : > { %v3064_v47 = vsub.f32 1.0, %v3063_v55 }
0x10fe   : > { %v3089_v56 = vor.u32 1.1754944e-38, %v3088_v0  ;;  %vm3087_vm14 = vcmp.eq.f32.partialorder %v3086_v49, 8.507059e+37 }
0x10ff   : > { %v3065_v27 = vmul.f32 %v6126_v25, %v3064_v47 }
0x1101   : > { %v3066_v9 = vadd.f32 %v6126_v25, %v3065_v27 }
0x1102   : > { %v6128_v58 = vpop.eup %6127 }
0x1103   : > { %v3078_v38 = vmul.f32 %v6128_v58, %v8216_v30  ;;  %v3070_v39 = vsel %vm3069_vm8, %v6126_v25, %v3066_v9  ;;  %vm3083_vm11 = vweird.f32 %v6128_v58 }
0x1104   : > { %v3075_v53 = vsel %vm3072_vm9, %v3074_v5, %v3070_v39  ;;  %vm3084_vm13 = vmor %vm3082_vm12, %vm3083_vm11 }
0x1105   : > { %v3079_v23 = vsub.f32 1.0, %v3078_v38  ;;  %v3076_v45 = vmul.f32 %v6122_v50, %v3075_v53 }
0x1107   : > { %v3080_v18 = vmul.f32 %v6128_v58, %v3079_v23  ;;  %v3113_v57 = vsub.f32 %v3076_v45, %v8225_v41 }
0x1109   : > { %v3115_v48 = vmul.f32 0.125, %v3113_v57  ;;  %v3081_v59 = vadd.f32 %v6128_v58, %v3080_v18 }
0x110b   : > { %3285 = vmatmul.f32.vlgmr.msrb.gmra.mxu2 %v3115_v48  ;;  %v3085_v20 = vsel %vm3084_vm13, %v6128_v58, %v3081_v59 }
0x110c   : > { %v3090_v22 = vsel %vm3087_vm14, %v3089_v56, %v3085_v20 }
0x110d   : > { %v3091_v17 = vmul.f32 %v6124_v36, %v3090_v22 }
0x110f   : > { %v3114_v10 = vsub.f32 %v3091_v17, %v8231_v4 }
0x1111   : > { %v3116_v26 = vmul.f32 0.0, %v3114_v10 }
0x1113   : > { %3211 = vmatpush.msra.mxu3 %v3116_v26  ;;  %v3262_v34 = vadd.f32 %v3116_v26, %v3115_v48  ;;  %3288 = vmatmul.f32.gmra.mxu2 %v3116_v26 }
0x1115   : > { %v3263_v6 = vrot.slane %v3262_v34, 4  ;;  %3212 = vmatpush.msra.mxu3 %v3115_v48 }
0x1117   : > { %v3264_v24 = vadd.f32 %v3263_v6, %v3262_v34 }
0x1119   : > { %v3265_v35 = vrot.slane %v3264_v24, 2 }
0x111b   : > { %v3266_v15 = vadd.f32 %v3265_v35, %v3264_v24 }
0x111d   : > { %v3267_v1 = vrot.slane %v3266_v15, 1 }
0x111f   : > { %v3268_v28 = vadd.f32 %v3267_v1, %v3266_v15 }
0x1121   : > { %v3782_v7 = vmul.f32 0.01, %v3268_v28 }
0x1123   : > { %v3783_v19 = vsub.f32 %v6241_v42, %v3782_v7  ;;  %v6243_v7 = vld [vmem:[%s9533_s2] sm:$0x1] }
0x1125   : > { %3785 = vst [vmem:[#allocation7 + $0x1] sm:$0x1] %v3783_v19 }
0x1131   : > { %3117 = vxpose.xlu2.b32.start [1/2] (short) %v3023_v52, 128  ;;  %v3314_v52 = vpop.trf.xlu1 }
0x1139   : > { %3118 = vxpose.xlu2.b32.end [2/2] (short) %v3024_v60, 128  ;;  %v3315_v13 = vpop.trf.xlu1 }
0x1141   : > { %v3316_v44 = vpop.trf.xlu1 }
0x1149   : > { %v3317_v36 = vpop.trf.xlu1 }
0x114a   : > { %v8253_v29 = vpop.trf.xlu2 }
0x1151   : > { %v3318_v25 = vpop.trf.xlu1 }
0x1152   : > { %v8256_v27 = vpop.trf.xlu2 }
0x1159   : > { %v3319_v55 = vpop.trf.xlu1 }
0x115a   : > { %v8259_v9 = vpop.trf.xlu2 }
0x1161   : > { %v3320_v47 = vpop.trf.xlu1 }
0x1162   : > { %v8262_v5 = vpop.trf.xlu2 }
0x1163   : > { %10012 = vst [vmem:[#allocation48_spill] sm:$0xff] %v8262_v5 }
0x1169   : > { %v3321_v43 = vpop.trf.xlu1 }
0x116a   : > { %v8265_v39 = vpop.trf.xlu2 }
0x116b   : > { %10013 = vst [vmem:[#allocation49_spill] sm:$0xff] %v8265_v39 }
0x1171   : > { %v3322_v58 = vpop.trf.xlu1 }
0x1172   : > { %v8268_v23 = vpop.trf.xlu2 }
0x1173   : > { %10014 = vst [vmem:[#allocation36_spill] sm:$0xff] %v8268_v23 }
0x1179   : > { %v3323_v38 = vpop.trf.xlu1 }
0x117a   : > { %v8271_v0 = vpop.trf.xlu2 }
0x117b   : > { %10015 = vst [vmem:[#allocation50_spill] sm:$0xff] %v8271_v0 }
0x1181   : > { %v3324_v53 = vpop.trf.xlu1 }
0x1182   : > { %v8274_v57 = vpop.trf.xlu2 }
0x1183   : > { %10016 = vst [vmem:[#allocation52_spill] sm:$0xff] %v8274_v57 }
0x1189   : > { %v3325_v45 = vpop.trf.xlu1 }
0x118a   : > { %v8277_v48 = vpop.trf.xlu2 }
0x118b   : > { %10017 = vst [vmem:[#allocation51_spill] sm:$0xff] %v8277_v48 }
0x118e   : > { %v3286_v12 = vpop.f32.mrf.mxu2 }
0x118f   : > { %5865 = vmatmul.msk.f32.vlgmr.msrb.gmra.mxu1 %vm3292_vm15, %v3286_v12  ;;  %v3294_v8 = vsel %vm3292_vm15, %v3286_v12, 0.0 }
0x1191   : > { %v3326_v18 = vpop.trf.xlu1 }
0x1192   : > { %v8282_v10 = vpop.trf.xlu2 }
0x1193   : > { %10018 = vst [vmem:[#allocation15_spill] sm:$0xff] %v8282_v10 }
0x1196   : > { %v3289_v63 = vpop.f32.mrf.mxu2 }
0x1197   : > { %v3295_v2 = vsel %vm3293_vm0, %v3289_v63, 0.0  ;;  %5847 = vmatpush.msk.msra.mxu0 %vm3293_vm0, %v3289_v63  ;;  %5866 = vmatmul.msk.f32.gmra.mxu1 %vm3293_vm0, %v3289_v63 }
0x1198   : > { %v3441_v14 = vadd.f32 %v3295_v2, %v3294_v8 }
0x1199   : > { %5848 = vmatpush.msk.msra.mxu0 %vm3292_vm15, %v3286_v12  ;;  %v3327_v59 = vpop.trf.xlu1 }
0x119a   : > { %v3442_v51 = vrot.slane %v3441_v14, 4  ;;  %5849 = vmatmul.msk.f32.vlgmr.msra.gmra.mxu0 %vm581_vm10, %v3312_v11  ;;  %v8288_v46 = vpop.trf.xlu2 }
0x119b   : > { %10019 = vst [vmem:[#allocation16_spill] sm:$0xff] %v8288_v46 }
0x119c   : > { %v3443_v60 = vadd.f32 %v3442_v51, %v3441_v14 }
0x119e   : > { %v3444_v21 = vrot.slane %v3443_v60, 2 }
0x11a0   : > { %v3445_v37 = vadd.f32 %v3444_v21, %v3443_v60 }
0x11a2   : > { %v3446_v3 = vrot.slane %v3445_v37, 1  ;;  %5850 = vmatmul.msk.f32.gmra.mxu0 %vm581_vm10, %v3313_v33  ;;  %v8297_v19 = vpop.trf.xlu2 }
0x11a3   : > { %10020 = vst [vmem:[#allocation17_spill] sm:$0xff] %v8297_v19 }
0x11a4   : > { %v3447_v32 = vadd.f32 %v3446_v3, %v3445_v37 }
0x11a6   : > { %v3729_v62 = vmul.f32 0.01, %v3447_v32 }
0x11a8   : > { %v3730_v50 = vsub.f32 %v6242_v40, %v3729_v62 }
0x11aa   : > { %3732 = vst [vmem:[#allocation5 + $0x1] sm:$0x1] %v3730_v50  ;;  %5851 = vmatmul.msk.f32.gmra.mxu0 %vm581_vm10, %v3314_v52  ;;  %v8303_v12 = vpop.trf.xlu2 }
0x11ab   : > { %10021 = vst [vmem:[#allocation18_spill] sm:$0xff] %v8303_v12 }
0x11b2   : > { %5852 = vmatmul.msk.f32.gmra.mxu0 %vm581_vm10, %v3315_v13  ;;  %v8309_v63 = vpop.trf.xlu2 }
0x11b3   : > { %10022 = vst [vmem:[#allocation90_spill] sm:$0xff] %v8309_v63 }
0x11ba   : > { %5853 = vmatmul.msk.f32.gmra.mxu0 %vm581_vm10, %v3316_v44  ;;  %v8315_v2 = vpop.trf.xlu2 }
0x11bb   : > { %10023 = vst [vmem:[#allocation19_spill] sm:$0xff] %v8315_v2 }
0x11c2   : > { %5854 = vmatmul.msk.f32.gmra.mxu0 %vm581_vm10, %v3317_v36  ;;  %v8321_v51 = vpop.trf.xlu2 }
0x11c3   : > { %10024 = vst [vmem:[#allocation89_spill] sm:$0xff] %v8321_v51 }
0x11ca   : > { %5855 = vmatmul.msk.f32.gmra.mxu0 %vm581_vm10, %v3318_v25  ;;  %v3133_v60 = vpop.trf.xlu2 }
0x11cb   : > { %5831 = vmatmul.msk.f32.vlgmr.msra.gmra.mxu3 %vm581_vm10, %v3133_v60 }
0x11d2   : > { %5856 = vmatmul.msk.f32.gmra.mxu0 %vm581_vm10, %v3319_v55  ;;  %v3134_v37 = vpop.trf.xlu2 }
0x11d3   : > { %5832 = vmatmul.msk.f32.gmra.mxu3 %vm581_vm10, %v3134_v37 }
0x11da   : > { %5857 = vmatmul.msk.f32.gmra.mxu0 %vm581_vm10, %v3320_v47  ;;  %v3135_v13 = vpop.trf.xlu2 }
0x11db   : > { %5833 = vmatmul.msk.f32.gmra.mxu3 %vm581_vm10, %v3135_v13 }
0x11e2   : > { %5858 = vmatmul.msk.f32.gmra.mxu0 %vm581_vm10, %v3321_v43  ;;  %v3136_v62 = vpop.trf.xlu2 }
0x11e3   : > { %5834 = vmatmul.msk.f32.gmra.mxu3 %vm581_vm10, %v3136_v62  ;;  %v6249_v62 = vld [vmem:[%s9534_s3 + $0x50] sm:$0xff] }
0x11ea   : > { %5859 = vmatmul.msk.f32.gmra.mxu0 %vm581_vm10, %v3322_v58  ;;  %v3137_v50 = vpop.trf.xlu2 }
0x11eb   : > { %5835 = vmatmul.msk.f32.gmra.mxu3 %vm581_vm10, %v3137_v50  ;;  %v6250_v50 = vld [vmem:[%s9534_s3 + $0x48] sm:$0xff] }
0x11f2   : > { %5860 = vmatmul.msk.f32.gmra.mxu0 %vm581_vm10, %v3323_v38  ;;  %v3138_v36 = vpop.trf.xlu2 }
0x11f3   : > { %5836 = vmatmul.msk.f32.gmra.mxu3 %vm581_vm10, %v3138_v36 }
0x11fa   : > { %5861 = vmatmul.msk.f32.gmra.mxu0 %vm581_vm10, %v3324_v53  ;;  %v3139_v55 = vpop.trf.xlu2 }
0x11fb   : > { %5837 = vmatmul.msk.f32.gmra.mxu3 %vm581_vm10, %v3139_v55 }
0x1202   : > { %5862 = vmatmul.msk.f32.gmra.mxu0 %vm581_vm10, %v3325_v45  ;;  %v3140_v43 = vpop.trf.xlu2 }
0x1203   : > { %5838 = vmatmul.msk.f32.gmra.mxu3 %vm581_vm10, %v3140_v43 }
0x120a   : > { %5863 = vmatmul.msk.f32.gmra.mxu0 %vm581_vm10, %v3326_v18  ;;  %v3141_v38 = vpop.trf.xlu2 }
0x120b   : > { %5839 = vmatmul.msk.f32.gmra.mxu3 %vm581_vm10, %v3141_v38  ;;  %v6253_v38 = vld [vmem:[%s9534_s3 + $0x30] sm:$0xff] }
0x120c   : > { %v3465_v49 = vpop.f32.mrf.mxu1 }
0x120d   : > { %v3473_v20 = vsel %vm3471_vm1, %v3465_v49, 0.0 }
0x1212   : > { %5864 = vmatmul.msk.f32.gmra.mxu0 %vm581_vm10, %v3327_v59  ;;  %v6244_v59 = vld [vmem:[%s9534_s3 + $0x78] sm:$0xff] }
0x1214   : > { %v3468_v56 = vpop.f32.mrf.mxu1 }
0x1215   : > { %v3474_v22 = vsel %vm3472_vm2, %v3468_v56, 0.0  ;;  %5867 = vmatpush.msk.msra.mxu2 %vm3472_vm2, %v3468_v56 }
0x1216   : > { %v3620_v17 = vadd.f32 %v3474_v22, %v3473_v20  ;;  %v6245_v22 = vld [vmem:[%s9534_s3 + $0x70] sm:$0xff] }
0x1217   : > { %v8284_v26 = vpop.f32.mrf.mxu0  ;;  %5868 = vmatpush.msk.msra.mxu2 %vm3471_vm1, %v3465_v49 }
0x1218   : > { %v3621_v34 = vrot.slane %v3620_v17, 4  ;;  %5869 = vmatmul.msk.f32.vlgmr.msra.gmra.mxu2 %vm581_vm10, %v8253_v29 }
0x121a   : > { %v3622_v6 = vadd.f32 %v3621_v34, %v3620_v17 }
0x121c   : > { %v3623_v24 = vrot.slane %v3622_v6, 2 }
0x121e   : > { %v3624_v35 = vadd.f32 %v3623_v24, %v3622_v6  ;;  %v6246_v6 = vld [vmem:[%s9534_s3 + $0x68] sm:$0xff] }
0x121f   : > { %v8290_v61 = vpop.f32.mrf.mxu0 }
0x1220   : > { %v3625_v15 = vrot.slane %v3624_v35, 1  ;;  %5870 = vmatmul.msk.f32.gmra.mxu2 %vm581_vm10, %v8256_v27 }
0x1222   : > { %v3626_v1 = vadd.f32 %v3625_v15, %v3624_v35  ;;  %v3142_v35 = vpop.trf.xlu2 }
0x1223   : > { %5840 = vmatmul.msk.f32.gmra.mxu3 %vm581_vm10, %v3142_v35  ;;  %v6257_v35 = vld [vmem:[%s9534_s3 + $0x10] sm:$0xff] }
0x1224   : > { %v3676_v28 = vmul.f32 0.01, %v3626_v1  ;;  %v6247_v1 = vld [vmem:[%s9534_s3 + $0x60] sm:$0xff] }
0x1226   : > { %v3677_v42 = vsub.f32 %v6243_v7, %v3676_v28 }
0x1227   : > { %v8299_v11 = vpop.f32.mrf.mxu0 }
0x1228   : > { %3679 = vst [vmem:[#allocation3 + $0x1] sm:$0x1] %v3677_v42  ;;  %5871 = vmatmul.msk.f32.gmra.mxu2 %vm581_vm10, %v8259_v9  ;;  %v6248_v42 = vld [vmem:[%s9534_s3 + $0x58] sm:$0xff] }
0x122f   : > { %v8305_v33 = vpop.f32.mrf.mxu0 }
0x1230   : > { %5872 = vmatmul.msk.f32.gmra.mxu2 %vm581_vm10, %v8262_v5 }
0x1237   : > { %v8311_v8 = vpop.f32.mrf.mxu0 }
0x1238   : > { %5873 = vmatmul.msk.f32.gmra.mxu2 %vm581_vm10, %v8265_v39 }
0x123f   : > { %v8317_v14 = vpop.f32.mrf.mxu0 }
0x1240   : > { %5874 = vmatmul.msk.f32.gmra.mxu2 %vm581_vm10, %v8268_v23 }
0x1247   : > { %v8323_v52 = vpop.f32.mrf.mxu0 }
0x1248   : > { %5875 = vmatmul.msk.f32.gmra.mxu2 %vm581_vm10, %v8271_v0  ;;  %v3686_v36 = vmul.f32 0.01, %v8323_v52 }
0x124f   : > { %v8327_v21 = vpop.f32.mrf.mxu0 }
0x1250   : > { %5876 = vmatmul.msk.f32.gmra.mxu2 %vm581_vm10, %v8274_v57 }
0x1257   : > { %v3417_v3 = vpop.f32.mrf.mxu0 }
0x1258   : > { %5877 = vmatmul.msk.f32.gmra.mxu2 %vm581_vm10, %v8277_v48  ;;  %v3688_v13 = vmul.f32 0.01, %v3417_v3  ;;  %v3143_v3 = vpop.trf.xlu2 }
0x1259   : > { %5841 = vmatmul.msk.f32.gmra.mxu3 %vm581_vm10, %v3143_v3 }
0x125f   : > { %v3420_v32 = vpop.f32.mrf.mxu0 }
0x1260   : > { %5878 = vmatmul.msk.f32.gmra.mxu2 %vm581_vm10, %v8282_v10  ;;  %v3689_v7 = vmul.f32 0.01, %v3420_v32  ;;  %v3687_v32 = vmul.f32 0.01, %v8327_v21  ;;  %v3685_v21 = vmul.f32 0.01, %v8317_v14 }
0x1261   : > { %v3683_v14 = vmul.f32 0.01, %v8305_v33  ;;  %v3680_v33 = vmul.f32 0.01, %v8284_v26  ;;  %v6258_v26 = vld [vmem:[%s9534_s3] sm:$0xff] }
0x1267   : > { %v3423_v40 = vpop.f32.mrf.mxu0 }
0x1268   : > { %5879 = vmatmul.msk.f32.gmra.mxu2 %vm581_vm10, %v8288_v46  ;;  %v3690_v15 = vmul.f32 0.01, %v3423_v40 }
0x126a   : > { %v8393_v40 = vsub.f32 %v6249_v62, %v3690_v15 }
0x126c   : > { %10026 = vst [vmem:[#allocation88_spill] sm:$0xff] %v8393_v40 }
0x126f   : > { %v3426_v44 = vpop.f32.mrf.mxu0 }
0x1270   : > { %5880 = vmatmul.msk.f32.gmra.mxu2 %vm581_vm10, %v8297_v19  ;;  %v3691_v34 = vmul.f32 0.01, %v3426_v44  ;;  %v8401_v44 = vsub.f32 %v6250_v50, %v3689_v7 }
0x1272   : > { %v8385_v60 = vsub.f32 %v6248_v42, %v3691_v34  ;;  %10027 = vst [vmem:[#allocation20_spill] sm:$0xff] %v8401_v44  ;;  %v6256_v34 = vld [vmem:[%s9534_s3 + $0x18] sm:$0xff] }
0x1274   : > { %10025 = vst [vmem:[#allocation21_spill] sm:$0xff] %v8385_v60 }
0x1277   : > { %v3429_v25 = vpop.f32.mrf.mxu0 }
0x1278   : > { %5881 = vmatmul.msk.f32.gmra.mxu2 %vm581_vm10, %v8303_v12  ;;  %v3692_v20 = vmul.f32 0.01, %v3429_v25  ;;  %v6251_v25 = vld [vmem:[%s9534_s3 + $0x40] sm:$0xff] }
0x1279   : > { %v8409_v55 = vsub.f32 %v6251_v25, %v3688_v13 }
0x127a   : > { %v8378_v28 = vsub.f32 %v6247_v1, %v3692_v20  ;;  %v6259_v1 = vld [vmem:[%s9534_s3 + $0x8] sm:$0xff] }
0x127b   : > { %10028 = vst [vmem:[#allocation43_spill] sm:$0xff] %v8409_v55 }
0x127f   : > { %v3432_v47 = vpop.f32.mrf.mxu0 }
0x1280   : > { %5882 = vmatmul.msk.f32.gmra.mxu2 %vm581_vm10, %v8309_v63  ;;  %v3693_v49 = vmul.f32 0.01, %v3432_v47  ;;  %v6252_v47 = vld [vmem:[%s9534_s3 + $0x38] sm:$0xff] }
0x1281   : > { %v8417_v43 = vsub.f32 %v6252_v47, %v3687_v32 }
0x1282   : > { %v8371_v24 = vsub.f32 %v6246_v6, %v3693_v49  ;;  %v3682_v49 = vmul.f32 0.01, %v8299_v11  ;;  %v8451_v6 = vsub.f32 %v6256_v34, %v3683_v14 }
0x1283   : > { %10029 = vst [vmem:[#allocation26_spill] sm:$0xff] %v8417_v43 }
0x1284   : > { %10033 = vst [vmem:[#allocation28_spill] sm:$0xff] %v8451_v6  ;;  %v8459_v15 = vsub.f32 %v6257_v35, %v3682_v49 }
0x1286   : > { %10034 = vst [vmem:[#allocation40_spill] sm:$0xff] %v8459_v15 }
0x1287   : > { %v3435_v58 = vpop.f32.mrf.mxu0 }
0x1288   : > { %5883 = vmatmul.msk.f32.gmra.mxu2 %vm581_vm10, %v8315_v2  ;;  %v3694_v45 = vmul.f32 0.01, %v3435_v58  ;;  %v3684_v58 = vmul.f32 0.01, %v8311_v8  ;;  %v3144_v8 = vpop.trf.xlu2 }
0x1289   : > { %5842 = vmatmul.msk.f32.gmra.mxu3 %vm581_vm10, %v3144_v8 }
0x128a   : > { %v8364_v17 = vsub.f32 %v6245_v22, %v3694_v45  ;;  %v6254_v45 = vld [vmem:[%s9534_s3 + $0x28] sm:$0xff]  ;;  %v3681_v22 = vmul.f32 0.01, %v8290_v61  ;;  %v8466_v61 = vsub.f32 %v6258_v26, %v3680_v33 }
0x128c   : > { %10035 = vst [vmem:[#allocation29_spill] sm:$0xff] %v8466_v61  ;;  %v8471_v7 = vsub.f32 %v6259_v1, %v3681_v22 }
0x128e   : > { %10036 = vst [vmem:[#allocation39_spill] sm:$0xff] %v8471_v7 }
0x128f   : > { %v3438_v53 = vpop.f32.mrf.mxu0 }
0x1290   : > { %v3695_v18 = vmul.f32 0.01, %v3438_v53  ;;  %5884 = vmatmul.msk.f32.gmra.mxu2 %vm581_vm10, %v8321_v51  ;;  %v8426_v53 = vsub.f32 %v6253_v38, %v3686_v36  ;;  %v3145_v42 = vpop.trf.xlu2 }
0x1291   : > { %5843 = vmatmul.msk.f32.gmra.mxu3 %vm581_vm10, %v3145_v42 }
0x1292   : > { %v8359_v56 = vsub.f32 %v6244_v59, %v3695_v18  ;;  %10030 = vst [vmem:[#allocation42_spill] sm:$0xff] %v8426_v53  ;;  %v8434_v18 = vsub.f32 %v6254_v45, %v3685_v21  ;;  %v6255_v59 = vld [vmem:[%s9534_s3 + $0x20] sm:$0xff]  ;;  %v8493_v21 = vpop.f32.mrf.mxu3 }
0x1293   : > { %v8442_v20 = vsub.f32 %v6255_v59, %v3684_v58 }
0x1294   : > { %4319 = vmatpush.xpose.msrb.mxu2 %v8359_v56  ;;  %3868 = vmatpush.msrb.mxu3 %v8359_v56  ;;  %10031 = vst [vmem:[#allocation27_spill] sm:$0xff] %v8434_v18 }
0x1295   : > { %10032 = vst [vmem:[#allocation41_spill] sm:$0xff] %v8442_v20 }
0x1296   : > { %3869 = vmatpush.msrb.mxu3 %v8364_v17 }
0x1298   : > { %4320 = vmatpush.xpose.msrb.mxu2 %v8364_v17  ;;  %3870 = vmatpush.msrb.mxu3 %v8371_v24  ;;  %v3146_v62 = vpop.trf.xlu2 }
0x1299   : > { %5844 = vmatmul.msk.f32.gmra.mxu3 %vm581_vm10, %v3146_v62 }
0x129a   : > { %3871 = vmatpush.msrb.mxu3 %v8378_v28  ;;  %v8495_v58 = vpop.f32.mrf.mxu3 }
0x129b   : > { %v8388_v37 = vpop.f32.mrf.mxu2 }
0x129c   : > { %4321 = vmatpush.xpose.msrb.mxu2 %v8371_v24  ;;  %3872 = vmatpush.msrb.mxu3 %v8385_v60 }
0x129e   : > { %3873 = vmatpush.msrb.mxu3 %v8393_v40 }
0x12a0   : > { %4322 = vmatpush.xpose.msrb.mxu2 %v8378_v28  ;;  %3874 = vmatpush.msrb.mxu3 %v8401_v44  ;;  %v3147_v50 = vpop.trf.xlu2 }
0x12a1   : > { %5845 = vmatmul.msk.f32.gmra.mxu3 %vm581_vm10, %v3147_v50 }
0x12a2   : > { %3875 = vmatpush.msrb.mxu3 %v8409_v55  ;;  %v8497_v14 = vpop.f32.mrf.mxu3 }
0x12a3   : > { %v8420_v52 = vpop.f32.mrf.mxu2 }
0x12a4   : > { %4323 = vmatpush.xpose.msrb.mxu2 %v8385_v60  ;;  %3876 = vmatpush.msrb.mxu3 %v8417_v43 }
0x12a6   : > { %3877 = vmatpush.msrb.mxu3 %v8426_v53 }
0x12a8   : > { %4324 = vmatpush.xpose.msrb.mxu2 %v8393_v40  ;;  %3878 = vmatpush.msrb.mxu3 %v8434_v18  ;;  %v3148_v36 = vpop.trf.xlu2 }
0x12a9   : > { %5846 = vmatmul.msk.f32.gmra.mxu3 %vm581_vm10, %v3148_v36 }
0x12aa   : > { %3879 = vmatpush.msrb.mxu3 %v8442_v20  ;;  %v8499_v8 = vpop.f32.mrf.mxu3 }
0x12ab   : > { %v8454_v11 = vpop.f32.mrf.mxu2 }
0x12ac   : > { %4325 = vmatpush.xpose.msrb.mxu2 %v8401_v44  ;;  %3880 = vmatpush.msrb.mxu3 %v8451_v6 }
0x12ae   : > { %3881 = vmatpush.msrb.mxu3 %v8459_v15 }
0x12b0   : > { %4326 = vmatpush.xpose.msrb.mxu2 %v8409_v55  ;;  %3882 = vmatpush.msrb.mxu3 %v8471_v7 }
0x12b2   : > { %3883 = vmatpush.msrb.mxu3 %v8466_v61  ;;  %v8501_v59 = vpop.f32.mrf.mxu3 }
0x12b3   : > { %v8478_v13 = vpop.f32.mrf.mxu2 }
0x12b4   : > { %4327 = vmatpush.xpose.msrb.mxu2 %v8417_v43 }
0x12b8   : > { %4328 = vmatpush.xpose.msrb.mxu2 %v8426_v53 }
0x12ba   : > { %v8503_v22 = vpop.f32.mrf.mxu3 }
0x12bb   : > { %v8483_v32 = vpop.f32.mrf.mxu2 }
0x12bc   : > { %4329 = vmatpush.xpose.msrb.mxu2 %v8434_v18 }
0x12c0   : > { %4330 = vmatpush.xpose.msrb.mxu2 %v8442_v20 }
0x12c2   : > { %v8505_v35 = vpop.f32.mrf.mxu3 }
0x12c3   : > { %v3587_v3 = vpop.f32.mrf.mxu2 }
0x12c4   : > { %4331 = vmatpush.xpose.msrb.mxu2 %v8451_v6 }
0x12c8   : > { %4332 = vmatpush.xpose.msrb.mxu2 %v8459_v15 }
0x12ca   : > { %v8507_v1 = vpop.f32.mrf.mxu3 }
0x12cb   : > { %v3590_v25 = vpop.f32.mrf.mxu2 }
0x12cc   : > { %4333 = vmatpush.xpose.msrb.mxu2 %v8471_v7  ;;  %v6261_v7 = vld [vmem:[%s9532_s1 + $0x70] sm:$0xff] }
0x12d0   : > { %4334 = vmatpush.xpose.msrb.mxu2 %v8466_v61 }
0x12d2   : > { %v8509_v62 = vpop.f32.mrf.mxu3 }
0x12d3   : > { %v3593_v47 = vpop.f32.mrf.mxu2 }
0x12db   : > { %v3596_v38 = vpop.f32.mrf.mxu2 }
0x12e3   : > { %v3599_v45 = vpop.f32.mrf.mxu2 }
0x12eb   : > { %v3602_v49 = vpop.f32.mrf.mxu2 }
0x12f3   : > { %v3605_v33 = vpop.f32.mrf.mxu2 }
0x12f4   : > { %v3638_v6 = vmul.f32 0.01, %v3605_v33  ;;  %v3636_v33 = vmul.f32 0.01, %v3599_v45  ;;  %v6266_v45 = vld [vmem:[%s9532_s1 + $0x48] sm:$0xff] }
0x12fb   : > { %v3608_v34 = vpop.f32.mrf.mxu2 }
0x12fc   : > { %v3639_v61 = vmul.f32 0.01, %v3608_v34  ;;  %v6263_v34 = vld [vmem:[%s9532_s1 + $0x60] sm:$0xff] }
0x1303   : > { %v3611_v26 = vpop.f32.mrf.mxu2 }
0x1304   : > { %v3640_v54 = vmul.f32 0.01, %v3611_v26  ;;  %v6262_v26 = vld [vmem:[%s9532_s1 + $0x68] sm:$0xff] }
0x130b   : > { %v3614_v42 = vpop.f32.mrf.mxu2 }
0x130c   : > { %v3641_v36 = vmul.f32 0.01, %v3614_v42  ;;  %v8525_v42 = vsub.f32 %v6262_v26, %v3640_v54 }
0x130e   : > { %v8519_v15 = vsub.f32 %v6261_v7, %v3641_v36  ;;  %10039 = vst [vmem:[#allocation31_spill] sm:$0xff] %v8525_v42  ;;  %v8533_v7 = vsub.f32 %v6263_v34, %v3639_v61  ;;  %v3635_v36 = vmul.f32 0.01, %v3596_v38  ;;  %v3634_v61 = vmul.f32 0.01, %v3593_v47  ;;  %v6267_v38 = vld [vmem:[%s9532_s1 + $0x40] sm:$0xff] }
0x130f   : > { %v8551_v34 = vsub.f32 %v6266_v45, %v3636_v33  ;;  %v6268_v47 = vld [vmem:[%s9532_s1 + $0x38] sm:$0xff]  ;;  %v3631_v33 = vmul.f32 0.01, %v8483_v32  ;;  %v3629_v32 = vmul.f32 0.01, %v8454_v11 }
0x1310   : > { %10038 = vst [vmem:[#allocation38_spill] sm:$0xff] %v8519_v15  ;;  %v3627_v11 = vmul.f32 0.01, %v8388_v37  ;;  %v6275_v37 = vld [vmem:[%s9532_s1] sm:$0xff] }
0x1311   : > { %10040 = vst [vmem:[#allocation37_spill] sm:$0xff] %v8533_v7 }
0x1312   : > { %10043 = vst [vmem:[#allocation34_spill] sm:$0xff] %v8551_v34 }
0x1313   : > { %v3617_v50 = vpop.f32.mrf.mxu2 }
0x1314   : > { %v3642_v31 = vmul.f32 0.01, %v3617_v50  ;;  %v6264_v50 = vld [vmem:[%s9532_s1 + $0x58] sm:$0xff] }
0x1315   : > { %v8539_v54 = vsub.f32 %v6264_v50, %v3638_v6  ;;  %v3633_v50 = vmul.f32 0.01, %v3590_v25  ;;  %v6269_v25 = vld [vmem:[%s9532_s1 + $0x30] sm:$0xff] }
0x1316   : > { %v8514_v30 = vsub.f32 %v6260_v16, %v3642_v31  ;;  %v8528_v31 = vpop.f32.mrf.mxu3  ;;  %v3637_v16 = vmul.f32 0.01, %v3602_v49  ;;  %v6265_v49 = vld [vmem:[%s9532_s1 + $0x50] sm:$0xff] }
0x1317   : > { %10041 = vst [vmem:[#allocation32_spill] sm:$0xff] %v8539_v54  ;;  %v8570_v45 = vsub.f32 %v6269_v25, %v3633_v50  ;;  %v6271_v50 = vld [vmem:[%s9532_s1 + $0x20] sm:$0xff] }
0x1318   : > { %10037 = vst [vmem:[#allocation30_spill] sm:$0xff] %v8514_v30  ;;  %3840 = vmatpush.msra.mxu1 %v8514_v30  ;;  %v8545_v26 = vsub.f32 %v6265_v49, %v3637_v16  ;;  %v3632_v16 = vmul.f32 0.01, %v3587_v3  ;;  %v8563_v49 = vsub.f32 %v6268_v47, %v3634_v61  ;;  %v3630_v3 = vmul.f32 0.01, %v8478_v13 }
0x1319   : > { %10046 = vst [vmem:[#allocation75_spill] sm:$0xff] %v8570_v45  ;;  %v8584_v47 = vsub.f32 %v6271_v50, %v3631_v33  ;;  %v3628_v13 = vmul.f32 0.01, %v8420_v52  ;;  %v6273_v33 = vld [vmem:[%s9532_s1 + $0x10] sm:$0xff]  ;;  %v6274_v52 = vld [vmem:[%s9532_s1 + $0x8] sm:$0xff] }
0x131a   : > { %3841 = vmatpush.msra.mxu1 %v8519_v15  ;;  %10042 = vst [vmem:[#allocation33_spill] sm:$0xff] %v8545_v26 }
0x131b   : > { %10045 = vst [vmem:[#allocation74_spill] sm:$0xff] %v8563_v49  ;;  %v8604_v50 = vsub.f32 %v6274_v52, %v3628_v13  ;;  %v8619_v13 = vld [vmem:[%s6500_s18 + $0x28] sm:$0xff] }
0x131c   : > { %3842 = vmatpush.msra.mxu1 %v8525_v42  ;;  %10048 = vst [vmem:[#allocation77_spill] sm:$0xff] %v8584_v47 }
0x131d   : > { %10051 = vst [vmem:[#allocation80_spill] sm:$0xff] %v8604_v50 }
0x131e   : > { %3843 = vmatpush.msra.mxu1 %v8533_v7  ;;  %v3244_v6 = vpop.f32.mrf.mxu3  ;;  %v8557_v7 = vsub.f32 %v6267_v38, %v3635_v36  ;;  %v6270_v36 = vld [vmem:[%s9532_s1 + $0x28] sm:$0xff]  ;;  %10054 = vst [vmem:[#allocation83_spill] sm:$0xff] %v8619_v13 }
0x131f   : > { %v8577_v61 = vsub.f32 %v6270_v36, %v3632_v16  ;;  %v6272_v16 = vld [vmem:[%s9532_s1 + $0x18] sm:$0xff]  ;;  %v8598_v36 = vsub.f32 %v6273_v33, %v3629_v32  ;;  %v8615_v32 = vld [vmem:[%s6500_s18 + $0x20] sm:$0xff] }
0x1320   : > { %3844 = vmatpush.msra.mxu1 %v8539_v54  ;;  %10044 = vst [vmem:[#allocation73_spill] sm:$0xff] %v8557_v7  ;;  %v8591_v25 = vsub.f32 %v6272_v16, %v3630_v3  ;;  %v8610_v16 = vsub.f32 %v6275_v37, %v3627_v11  ;;  %v6278_v11 = vld [vmem:[%s9536_s5 + $0x78] sm:$0xff] }
0x1321   : > { %10047 = vst [vmem:[#allocation76_spill] sm:$0xff] %v8577_v61 }
0x1322   : > { %3845 = vmatpush.msra.mxu1 %v8545_v26  ;;  %10049 = vst [vmem:[#allocation78_spill] sm:$0xff] %v8591_v25 }
0x1323   : > { %10050 = vst [vmem:[#allocation79_spill] sm:$0xff] %v8598_v36 }
0x1324   : > { %3846 = vmatpush.msra.mxu1 %v8551_v34  ;;  %10052 = vst [vmem:[#allocation81_spill] sm:$0xff] %v8610_v16 }
0x1325   : > { %10053 = vst [vmem:[#allocation82_spill] sm:$0xff] %v8615_v32 }
0x1326   : > { %3847 = vmatpush.msra.mxu1 %v8557_v7  ;;  %v3247_v38 = vpop.f32.mrf.mxu3 }
0x1328   : > { %3848 = vmatpush.msra.mxu1 %v8563_v49 }
0x132a   : > { %3849 = vmatpush.msra.mxu1 %v8570_v45 }
0x132c   : > { %3850 = vmatpush.msra.mxu1 %v8577_v61 }
0x132e   : > { %3851 = vmatpush.msra.mxu1 %v8584_v47  ;;  %v3250_v3 = vpop.f32.mrf.mxu3 }
0x1330   : > { %3852 = vmatpush.msra.mxu1 %v8591_v25 }
0x1332   : > { %3853 = vmatpush.msra.mxu1 %v8598_v36 }
0x1334   : > { %3854 = vmatpush.msra.mxu1 %v8604_v50 }
0x1336   : > { %3855 = vmatpush.msra.mxu1 %v8610_v16  ;;  %v3253_v33 = vpop.f32.mrf.mxu3  ;;  %v3745_v16 = vmul.f32 0.01, %v3250_v3  ;;  %v6281_v3 = vld [vmem:[%s9536_s5 + $0x60] sm:$0xff] }
0x1337   : > { %3856 = vmatmul.f32.vlgmr.msra.gmra.mxu1 %v8615_v32  ;;  %v3746_v61 = vmul.f32 0.01, %v3253_v33  ;;  %v6279_v32 = vld [vmem:[%s9536_s5 + $0x70] sm:$0xff] }
0x133e   : > { %v3256_v52 = vpop.f32.mrf.mxu3 }
0x133f   : > { %3859 = vmatmul.f32.gmra.mxu1 %v8619_v13  ;;  %v3747_v25 = vmul.f32 0.01, %v3256_v52  ;;  %v3744_v52 = vmul.f32 0.01, %v3247_v38  ;;  %v3742_v38 = vmul.f32 0.01, %v8528_v31 }
0x1340   : > { %v3740_v31 = vmul.f32 0.01, %v8507_v1  ;;  %v3738_v1 = vmul.f32 0.01, %v8503_v22  ;;  %v3736_v22 = vmul.f32 0.01, %v8499_v8 }
0x1341   : > { %v8630_v50 = vsub.f32 %v6279_v32, %v3747_v25  ;;  %v8643_v25 = vsub.f32 %v6281_v3, %v3745_v16  ;;  %v6283_v16 = vld [vmem:[%s9536_s5 + $0x50] sm:$0xff]  ;;  %v3733_v8 = vmul.f32 0.01, %v8493_v21  ;;  %v6292_v21 = vld [vmem:[%s9536_s5] sm:$0xff] }
0x1346   : > { %v3259_v36 = vpop.f32.mrf.mxu3 }
0x1347   : > { %v3748_v47 = vmul.f32 0.01, %v3259_v36  ;;  %v6280_v36 = vld [vmem:[%s9536_s5 + $0x68] sm:$0xff] }
0x1348   : > { %v8637_v33 = vsub.f32 %v6280_v36, %v3746_v61  ;;  %v6282_v61 = vld [vmem:[%s9536_s5 + $0x58] sm:$0xff] }
0x1349   : > { %v8625_v37 = vsub.f32 %v6278_v11, %v3748_v47  ;;  %v3743_v47 = vmul.f32 0.01, %v3244_v6  ;;  %v8651_v32 = vsub.f32 %v6282_v61, %v3744_v52  ;;  %v3741_v6 = vmul.f32 0.01, %v8509_v62  ;;  %v6284_v52 = vld [vmem:[%s9536_s5 + $0x48] sm:$0xff] }
0x134a   : > { %v8666_v36 = vsub.f32 %v6284_v52, %v3742_v38  ;;  %v3739_v62 = vmul.f32 0.01, %v8505_v35  ;;  %v6286_v38 = vld [vmem:[%s9536_s5 + $0x38] sm:$0xff]  ;;  %v3737_v35 = vmul.f32 0.01, %v8501_v59 }
0x134b   : > { %4140 = vmatpush.xpose.msrb.mxu0 %v8625_v37  ;;  %3896 = vmatpush.msrb.mxu1 %v8625_v37  ;;  %v8658_v11 = vsub.f32 %v6283_v16, %v3743_v47  ;;  %v6285_v47 = vld [vmem:[%s9536_s5 + $0x40] sm:$0xff]  ;;  %v8681_v61 = vsub.f32 %v6286_v38, %v3740_v31  ;;  %v6288_v31 = vld [vmem:[%s9536_s5 + $0x28] sm:$0xff]  ;;  %v3735_v59 = vmul.f32 0.01, %v8497_v14  ;;  %v3734_v38 = vmul.f32 0.01, %v8495_v58 }
0x134c   : > { %v8673_v3 = vsub.f32 %v6285_v47, %v3741_v6  ;;  %v6287_v6 = vld [vmem:[%s9536_s5 + $0x30] sm:$0xff]  ;;  %v8696_v52 = vsub.f32 %v6288_v31, %v3738_v1  ;;  %v6290_v1 = vld [vmem:[%s9536_s5 + $0x18] sm:$0xff]  ;;  %v8725_v58 = vsub.f32 %v6292_v21, %v3733_v8 }
0x134d   : > { %3897 = vmatpush.msrb.mxu1 %v8630_v50  ;;  %v8688_v16 = vsub.f32 %v6287_v6, %v3739_v62  ;;  %v6289_v62 = vld [vmem:[%s9536_s5 + $0x20] sm:$0xff]  ;;  %v8712_v6 = vsub.f32 %v6290_v1, %v3736_v22  ;;  %v6291_v14 = vld [vmem:[%s9536_s5 + $0x10] sm:$0xff]  ;;  %v6293_v22 = vld [vmem:[%s9536_s5 + $0x8] sm:$0xff] }
0x134e   : > { %v8703_v47 = vsub.f32 %v6289_v62, %v3737_v35  ;;  %v8718_v35 = vsub.f32 %v6291_v14, %v3735_v59  ;;  %v8730_v31 = vsub.f32 %v6293_v22, %v3734_v38  ;;  %v6088_v59 = vld [vmem:[#allocation3 + $0x1] ss:$0 sm:$0xff]  ;;  %v6089_v22 = vld [vmem:[#allocation5 + $0x1] ss:$0 sm:$0xff] }
0x134f   : > { %4141 = vmatpush.xpose.msrb.mxu0 %v8630_v50  ;;  %3898 = vmatpush.msrb.mxu1 %v8637_v33 }
0x1351   : > { %3899 = vmatpush.msrb.mxu1 %v8643_v25 }
0x1353   : > { %4142 = vmatpush.xpose.msrb.mxu0 %v8637_v33  ;;  %3900 = vmatpush.msrb.mxu1 %v8651_v32 }
0x1355   : > { %3901 = vmatpush.msrb.mxu1 %v8658_v11 }
0x1357   : > { %4143 = vmatpush.xpose.msrb.mxu0 %v8643_v25  ;;  %3902 = vmatpush.msrb.mxu1 %v8666_v36 }
0x1359   : > { %3903 = vmatpush.msrb.mxu1 %v8673_v3 }
0x135b   : > { %4144 = vmatpush.xpose.msrb.mxu0 %v8651_v32  ;;  %3904 = vmatpush.msrb.mxu1 %v8681_v61 }
0x135d   : > { %3905 = vmatpush.msrb.mxu1 %v8688_v16 }
0x135f   : > { %4145 = vmatpush.xpose.msrb.mxu0 %v8658_v11  ;;  %3906 = vmatpush.msrb.mxu1 %v8696_v52 }
0x1361   : > { %3907 = vmatpush.msrb.mxu1 %v8703_v47 }
0x1363   : > { %4146 = vmatpush.xpose.msrb.mxu0 %v8666_v36  ;;  %3908 = vmatpush.msrb.mxu1 %v8712_v6 }
0x1365   : > { %3909 = vmatpush.msrb.mxu1 %v8718_v35 }
0x1367   : > { %4147 = vmatpush.xpose.msrb.mxu0 %v8673_v3  ;;  %3910 = vmatpush.msrb.mxu1 %v8730_v31 }
0x1369   : > { %3911 = vmatpush.msrb.mxu1 %v8725_v58 }
0x136b   : > { %4148 = vmatpush.xpose.msrb.mxu0 %v8681_v61 }
0x136f   : > { %4149 = vmatpush.xpose.msrb.mxu0 %v8688_v16 }
0x1373   : > { %4150 = vmatpush.xpose.msrb.mxu0 %v8696_v52 }
0x1377   : > { %4151 = vmatpush.xpose.msrb.mxu0 %v8703_v47 }
0x137b   : > { %4152 = vmatpush.xpose.msrb.mxu0 %v8712_v6 }
0x137f   : > { %4153 = vmatpush.xpose.msrb.mxu0 %v8718_v35 }
0x1383   : > { %4154 = vmatpush.xpose.msrb.mxu0 %v8730_v31 }
0x1387   : > { %4155 = vmatpush.xpose.msrb.mxu0 %v8725_v58 }
0x13b4   : > { %v3857_v62 = vpop.f32.mrf.mxu1 }
0x13b5   : > { %v8744_v8 = vadd.f32 %v6088_v59, %v3857_v62 }
0x13b7   : > { %v3863_v38 = vmax.f32 %v8744_v8, 0.0  ;;  %vm4342_vm14 = vcmp.gt.f32.partialorder %v8744_v8, 0.0 }
0x13b9   : > { %3884 = vmatmul.f32.vlgmr.msrb.gmra.mxu3 %v3863_v38 }
0x13bc   : > { %v3860_v1 = vpop.f32.mrf.mxu1 }
0x13bd   : > { %v8747_v14 = vadd.f32 %v6088_v59, %v3860_v1  ;;  %v6090_v59 = vld [vmem:[#allocation7 + $0x1] ss:$0 sm:$0xff] }
0x13bf   : > { %v3864_v21 = vmax.f32 %v8747_v14, 0.0  ;;  %vm4343_vm15 = vcmp.gt.f32.partialorder %v8747_v14, 0.0 }
0x13c1   : > { %3887 = vmatmul.f32.gmra.mxu3 %v3864_v21 }
0x143c   : > { %v3885_v13 = vpop.f32.mrf.mxu3 }
0x143d   : > { %v8750_v45 = vadd.f32 %v6089_v22, %v3885_v13 }
0x143f   : > { %v3891_v49 = vmax.f32 %v8750_v45, 0.0  ;;  %vm4163_vm12 = vcmp.gt.f32.partialorder %v8750_v45, 0.0 }
0x1441   : > { %3988 = vxpose.xlu2.b32.start [1/2] (short) %v3891_v49, 128  ;;  %3912 = vmatmul.f32.vlgmr.msrb.gmra.mxu1 %v3891_v49 }
0x1444   : > { %v3888_v7 = vpop.f32.mrf.mxu3 }
0x1445   : > { %v8753_v62 = vadd.f32 %v6089_v22, %v3888_v7 }
0x1447   : > { %v3892_v34 = vmax.f32 %v8753_v62, 0.0  ;;  %vm4164_vm13 = vcmp.gt.f32.partialorder %v8753_v62, 0.0 }
0x1449   : > { %3989 = vxpose.xlu2.b32.end [2/2] (short) %v3892_v34, 128  ;;  %3915 = vmatmul.f32.gmra.mxu1 %v3892_v34 }
0x14be   : > { %v3913_v1 = vpop.f32.mrf.mxu1 }
0x14bf   : > { %v3914_v26 = vadd.f32 %v6090_v59, %v3913_v1 }
0x14c1   : > { %3919 = vmax.xlane.f32.xlu1 %v3914_v26 }
0x14c6   : > { %v3916_v54 = vpop.f32.mrf.mxu1 }
0x14c7   : > { %v3917_v42 = vadd.f32 %v6090_v59, %v3916_v54 }
0x14c9   : > { %3921 = vmax.xlane.f32.xlu0 %v3917_v42 }
0x1534   : > { %v3920_v13 = vpop.xlane.xlu1 %3919 }
0x1535   : > { %v8756_v15 = vsub.f32 %v3914_v26, %v3920_v13  ;;  %v4004_v26 = vpop.trf.xlu2 }
0x1537   : > { %10055 = vst [vmem:[#allocation84_spill] sm:$0xff] %v8756_v15  ;;  %v3925_v30 = vmul.f32 1.442695, %v8756_v15 }
0x1539   : > { %6129 = vpow2.f32 %v3925_v30 }
0x153c   : > { %v3922_v49 = vpop.xlane.xlu0 %3921 }
0x153d   : > { %v8759_v7 = vsub.f32 %v3917_v42, %v3922_v49 }
0x153f   : > { %10056 = vst [vmem:[#allocation85_spill] sm:$0xff] %v8759_v7  ;;  %v6130_v22 = vpop.eup %6129  ;;  %v3927_v20 = vmul.f32 1.442695, %v8759_v7 }
0x1540   : > { %3929 = vadd.xlane.f32.xlu0 %v6130_v22 }
0x1541   : > { %6131 = vpow2.f32 %v3927_v20 }
0x1547   : > { %v6132_v34 = vpop.eup %6131 }
0x1548   : > { %3931 = vadd.xlane.f32.xlu0 %v6132_v34 }
0x1571   : > { %4167 = vxpose.xlu0.b32.start [1/2] (short) %v3863_v38, 128 }
0x1579   : > { %4168 = vxpose.xlu0.b32.end [2/2] (short) %v3864_v21, 128  ;;  %v4005_v21 = vpop.trf.xlu2 }
0x15b3   : > { %v8762_v54 = vpop.xlane.xlu0 %3929 }
0x15b4   : > { %10057 = vst [vmem:[#allocation86_spill] sm:$0xff] %v8762_v54  ;;  %6133 = vrcp.f32 %v8762_v54  ;;  %v3944_v13 = vand.u32 2147483648, %v8762_v54  ;;  %v3942_v38 = vand.u32 2147483647, %v8762_v54  ;;  %vm3938_vm4 = vweird.f32 %v8762_v54 }
0x15b6   : > { %v3945_v7 = vor.u32 1.1754944e-38, %v3944_v13  ;;  %vm3943_vm6 = vcmp.eq.f32.partialorder %v3942_v38, 8.507059e+37  ;;  %v4006_v13 = vpop.trf.xlu2 }
0x15ba   : > { %v6134_v59 = vpop.eup %6133 }
0x15bb   : > { %v3934_v30 = vmul.f32 %v6134_v59, %v8762_v54  ;;  %v8766_v1 = vpop.xlane.xlu0 %3931  ;;  %vm3939_vm3 = vweird.f32 %v6134_v59 }
0x15bc   : > { %10058 = vst [vmem:[#allocation35_spill] sm:$0xff] %v8766_v1  ;;  %6135 = vrcp.f32 %v8766_v1  ;;  %vm3940_vm5 = vmor %vm3938_vm4, %vm3939_vm3  ;;  %v3959_v44 = vand.u32 2147483648, %v8766_v1  ;;  %v3957_v40 = vand.u32 2147483647, %v8766_v1  ;;  %vm3953_vm8 = vweird.f32 %v8766_v1 }
0x15bd   : > { %v3935_v42 = vsub.f32 1.0, %v3934_v30 }
0x15be   : > { %vm3958_vm11 = vcmp.eq.f32.partialorder %v3957_v40, 8.507059e+37  ;;  %v4007_v38 = vpop.trf.xlu2 }
0x15bf   : > { %v3936_v20 = vmul.f32 %v6134_v59, %v3935_v42 }
0x15c1   : > { %v3937_v49 = vadd.f32 %v6134_v59, %v3936_v20 }
0x15c2   : > { %v6136_v15 = vpop.eup %6135 }
0x15c3   : > { %v3941_v18 = vsel %vm3940_vm5, %v6134_v59, %v3937_v49  ;;  %v3949_v53 = vmul.f32 %v6136_v15, %v8766_v1  ;;  %vm3954_vm7 = vweird.f32 %v6136_v15  ;;  %v3960_v59 = vor.u32 1.1754944e-38, %v3959_v44 }
0x15c4   : > { %v3946_v43 = vsel %vm3943_vm6, %v3945_v7, %v3941_v18  ;;  %vm3955_vm9 = vmor %vm3953_vm8, %vm3954_vm7 }
0x15c5   : > { %v3950_v55 = vsub.f32 1.0, %v3949_v53  ;;  %v3947_v30 = vmul.f32 %v6130_v22, %v3946_v43 }
0x15c6   : > { %v4008_v40 = vpop.trf.xlu2 }
0x15c7   : > { %v3951_v42 = vmul.f32 %v6136_v15, %v3950_v55  ;;  %v3984_v20 = vsub.f32 %v3947_v30, %v8225_v41 }
0x15c9   : > { %v3952_v60 = vadd.f32 %v6136_v15, %v3951_v42  ;;  %v3986_v54 = vmul.f32 0.125, %v3984_v20 }
0x15cb   : > { %4156 = vmatmul.f32.vlgmr.msrb.gmra.mxu0 %v3986_v54  ;;  %v3956_v18 = vsel %vm3955_vm9, %v6136_v15, %v3952_v60 }
0x15cc   : > { %v3961_v53 = vsel %vm3958_vm11, %v3960_v59, %v3956_v18 }
0x15cd   : > { %v3962_v43 = vmul.f32 %v6132_v34, %v3961_v53  ;;  %v3836_v34 = vld [vmem:[#allocation7 + $0x1] sm:$0x1] }
0x15ce   : > { %v4009_v20 = vpop.trf.xlu2 }
0x15cf   : > { %v3985_v7 = vsub.f32 %v3962_v43, %v8231_v4 }
0x15d1   : > { %v3987_v55 = vmul.f32 0.0, %v3985_v7 }
0x15d3   : > { %4082 = vmatpush.msra.mxu3 %v3987_v55  ;;  %v4133_v22 = vadd.f32 %v3987_v55, %v3986_v54  ;;  %4159 = vmatmul.f32.gmra.mxu0 %v3987_v55 }
0x15d5   : > { %v4134_v41 = vrot.slane %v4133_v22, 4  ;;  %4083 = vmatpush.msra.mxu3 %v3986_v54 }
0x15d6   : > { %5885 = vmatmul.msk.f32.vlgmr.msra.gmra.mxu3 %vm581_vm10, %v4004_v26  ;;  %v4010_v54 = vpop.trf.xlu2 }
0x15d7   : > { %v4135_v49 = vadd.f32 %v4134_v41, %v4133_v22 }
0x15d9   : > { %v4136_v30 = vrot.slane %v4135_v49, 2 }
0x15db   : > { %v4137_v42 = vadd.f32 %v4136_v30, %v4135_v49 }
0x15dd   : > { %v4138_v44 = vrot.slane %v4137_v42, 1 }
0x15de   : > { %5886 = vmatmul.msk.f32.gmra.mxu3 %vm581_vm10, %v4005_v21  ;;  %v4011_v26 = vpop.trf.xlu2 }
0x15df   : > { %v4139_v60 = vadd.f32 %v4138_v44, %v4137_v42 }
0x15e1   : > { %v4568_v15 = vmul.f32 0.01, %v4139_v60 }
0x15e3   : > { %v4569_v4 = vsub.f32 %v3836_v34, %v4568_v15 }
0x15e5   : > { %4570 = vst [vmem:[#allocation7 + $0x1] sm:$0x1] %v4569_v4 }
0x15e6   : > { %5887 = vmatmul.msk.f32.gmra.mxu3 %vm581_vm10, %v4006_v13  ;;  %v4012_v59 = vpop.trf.xlu2 }
0x15ee   : > { %5888 = vmatmul.msk.f32.gmra.mxu3 %vm581_vm10, %v4007_v38  ;;  %v4013_v21 = vpop.trf.xlu2 }
0x15f6   : > { %5889 = vmatmul.msk.f32.gmra.mxu3 %vm581_vm10, %v4008_v40  ;;  %v4014_v18 = vpop.trf.xlu2 }
0x15fe   : > { %5890 = vmatmul.msk.f32.gmra.mxu3 %vm581_vm10, %v4009_v20  ;;  %v4015_v13 = vpop.trf.xlu2 }
0x1606   : > { %5891 = vmatmul.msk.f32.gmra.mxu3 %vm581_vm10, %v4010_v54  ;;  %v4016_v53 = vpop.trf.xlu2 }
0x160e   : > { %5892 = vmatmul.msk.f32.gmra.mxu3 %vm581_vm10, %v4011_v26  ;;  %v4017_v7 = vpop.trf.xlu2 }
0x1615   : > { %v4183_v43 = vpop.trf.xlu0 }
0x1616   : > { %5893 = vmatmul.msk.f32.gmra.mxu3 %vm581_vm10, %v4012_v59  ;;  %v4018_v22 = vpop.trf.xlu2 }
0x161d   : > { %v4184_v55 = vpop.trf.xlu0 }
0x161e   : > { %5894 = vmatmul.msk.f32.gmra.mxu3 %vm581_vm10, %v4013_v21  ;;  %v4019_v49 = vpop.trf.xlu2  ;;  %v3819_v21 = vld [vmem:[#allocation5 + $0x1] sm:$0x1] }
0x1625   : > { %v4185_v38 = vpop.trf.xlu0 }
0x1626   : > { %5895 = vmatmul.msk.f32.gmra.mxu3 %vm581_vm10, %v4014_v18 }
0x162d   : > { %v4186_v40 = vpop.trf.xlu0 }
0x162e   : > { %5896 = vmatmul.msk.f32.gmra.mxu3 %vm581_vm10, %v4015_v13 }
0x1635   : > { %v4187_v54 = vpop.trf.xlu0 }
0x1636   : > { %5897 = vmatmul.msk.f32.gmra.mxu3 %vm581_vm10, %v4016_v53 }
0x163d   : > { %v4188_v53 = vpop.trf.xlu0 }
0x163e   : > { %5898 = vmatmul.msk.f32.gmra.mxu3 %vm581_vm10, %v4017_v7 }
0x1645   : > { %v4189_v7 = vpop.trf.xlu0 }
0x1646   : > { %5899 = vmatmul.msk.f32.gmra.mxu3 %vm581_vm10, %v4018_v22 }
0x1648   : > { %v4157_v41 = vpop.f32.mrf.mxu0 }
0x1649   : > { %5919 = vmatmul.msk.f32.vlgmr.msrb.gmra.mxu2 %vm4163_vm12, %v4157_v41  ;;  %v4165_v42 = vsel %vm4163_vm12, %v4157_v41, 0.0 }
0x164e   : > { %5900 = vmatmul.msk.f32.gmra.mxu3 %vm581_vm10, %v4019_v49 }
0x1650   : > { %v4160_v30 = vpop.f32.mrf.mxu0 }
0x1651   : > { %v4166_v44 = vsel %vm4164_vm13, %v4160_v30, 0.0  ;;  %5901 = vmatpush.msk.msra.mxu1 %vm4164_vm13, %v4160_v30  ;;  %5920 = vmatmul.msk.f32.gmra.mxu2 %vm4164_vm13, %v4160_v30 }
0x1652   : > { %v4312_v60 = vadd.f32 %v4166_v44, %v4165_v42 }
0x1653   : > { %5902 = vmatpush.msk.msra.mxu1 %vm4163_vm12, %v4157_v41  ;;  %v4190_v41 = vpop.trf.xlu0 }
0x1654   : > { %v4313_v15 = vrot.slane %v4312_v60, 4  ;;  %5903 = vmatmul.msk.f32.vlgmr.msra.gmra.mxu1 %vm581_vm10, %v4183_v43 }
0x1656   : > { %v4314_v34 = vadd.f32 %v4313_v15, %v4312_v60 }
0x1658   : > { %v4315_v45 = vrot.slane %v4314_v34, 2 }
0x1659   : > { %v8797_v4 = vpop.f32.mrf.mxu3 }
0x165a   : > { %v4316_v20 = vadd.f32 %v4315_v45, %v4314_v34 }
0x165b   : > { %v4191_v30 = vpop.trf.xlu0 }
0x165c   : > { %v4317_v26 = vrot.slane %v4316_v20, 1  ;;  %5904 = vmatmul.msk.f32.gmra.mxu1 %vm581_vm10, %v4184_v55 }
0x165e   : > { %v4318_v62 = vadd.f32 %v4317_v26, %v4316_v20 }
0x1660   : > { %v4517_v59 = vmul.f32 0.01, %v4318_v62 }
0x1661   : > { %v8800_v18 = vpop.f32.mrf.mxu3 }
0x1662   : > { %v4518_v13 = vsub.f32 %v3819_v21, %v4517_v59 }
0x1663   : > { %v4192_v42 = vpop.trf.xlu0 }
0x1664   : > { %4519 = vst [vmem:[#allocation5 + $0x1] sm:$0x1] %v4518_v13  ;;  %5905 = vmatmul.msk.f32.gmra.mxu1 %vm581_vm10, %v4185_v38 }
0x1669   : > { %v8803_v43 = vpop.f32.mrf.mxu3 }
0x166c   : > { %5906 = vmatmul.msk.f32.gmra.mxu1 %vm581_vm10, %v4186_v40  ;;  %v4193_v40 = vpop.trf.xlu0 }
0x1671   : > { %v8806_v22 = vpop.f32.mrf.mxu3 }
0x1674   : > { %5907 = vmatmul.msk.f32.gmra.mxu1 %vm581_vm10, %v4187_v54  ;;  %v4194_v34 = vpop.trf.xlu0 }
0x1679   : > { %v8809_v55 = vpop.f32.mrf.mxu3 }
0x167c   : > { %5908 = vmatmul.msk.f32.gmra.mxu1 %vm581_vm10, %v4188_v53  ;;  %v4195_v20 = vpop.trf.xlu0 }
0x1681   : > { %v8812_v49 = vpop.f32.mrf.mxu3 }
0x1684   : > { %5909 = vmatmul.msk.f32.gmra.mxu1 %vm581_vm10, %v4189_v7  ;;  %v4196_v26 = vpop.trf.xlu0 }
0x1689   : > { %v8815_v38 = vpop.f32.mrf.mxu3 }
0x168c   : > { %5910 = vmatmul.msk.f32.gmra.mxu1 %vm581_vm10, %v4190_v41  ;;  %v4197_v59 = vpop.trf.xlu0 }
0x1691   : > { %v8818_v44 = vpop.f32.mrf.mxu3 }
0x1694   : > { %5911 = vmatmul.msk.f32.gmra.mxu1 %vm581_vm10, %v4191_v30  ;;  %v4198_v53 = vpop.trf.xlu0 }
0x1699   : > { %v8821_v60 = vpop.f32.mrf.mxu3 }
0x169c   : > { %5912 = vmatmul.msk.f32.gmra.mxu1 %vm581_vm10, %v4192_v42 }
0x16a1   : > { %v4112_v15 = vpop.f32.mrf.mxu3 }
0x16a4   : > { %5913 = vmatmul.msk.f32.gmra.mxu1 %vm581_vm10, %v4193_v40 }
0x16a9   : > { %v4115_v45 = vpop.f32.mrf.mxu3 }
0x16ac   : > { %5914 = vmatmul.msk.f32.gmra.mxu1 %vm581_vm10, %v4194_v34 }
0x16b1   : > { %v4118_v54 = vpop.f32.mrf.mxu3 }
0x16b4   : > { %5915 = vmatmul.msk.f32.gmra.mxu1 %vm581_vm10, %v4195_v20 }
0x16b9   : > { %v4121_v62 = vpop.f32.mrf.mxu3 }
0x16ba   : > { %v4532_v14 = vmul.f32 0.01, %v4121_v62  ;;  %v4530_v62 = vmul.f32 0.01, %v4115_v45 }
0x16bc   : > { %5916 = vmatmul.msk.f32.gmra.mxu1 %vm581_vm10, %v4196_v26 }
0x16c1   : > { %v4124_v21 = vpop.f32.mrf.mxu3 }
0x16c4   : > { %5917 = vmatmul.msk.f32.gmra.mxu1 %vm581_vm10, %v4197_v59 }
0x16c9   : > { %v4127_v13 = vpop.f32.mrf.mxu3 }
0x16ca   : > { %v4534_v40 = vmul.f32 0.01, %v4127_v13 }
0x16cc   : > { %5918 = vmatmul.msk.f32.gmra.mxu1 %vm581_vm10, %v4198_v53  ;;  %v4336_v7 = vpop.f32.mrf.mxu2  ;;  %v4533_v53 = vmul.f32 0.01, %v4124_v21  ;;  %v4531_v21 = vmul.f32 0.01, %v4118_v54  ;;  %v8863_v54 = vsub.f32 %v8658_v11, %v4530_v62 }
0x16cd   : > { %v4344_v26 = vsel %vm4342_vm14, %v4336_v7, 0.0 }
0x16ce   : > { %v8847_v13 = vsub.f32 %v8637_v33, %v4533_v53  ;;  %v8859_v33 = vsub.f32 %v8651_v32, %v4531_v21  ;;  %10064 = vst [vmem:[#allocation61_spill] sm:$0xff] %v8863_v54  ;;  %v4528_v32 = vmul.f32 0.01, %v8821_v60  ;;  %v4520_v21 = vmul.f32 0.01, %v8797_v4 }
0x16d0   : > { %10061 = vst [vmem:[#allocation58_spill] sm:$0xff] %v8847_v13  ;;  %v8877_v11 = vsub.f32 %v8673_v3, %v4528_v32 }
0x16d1   : > { %v4130_v41 = vpop.f32.mrf.mxu3  ;;  %v8830_v30 = vpop.f32.mrf.mxu1  ;;  %10063 = vst [vmem:[#allocation60_spill] sm:$0xff] %v8859_v33 }
0x16d2   : > { %10059 = vst [vmem:[#allocation87_spill] sm:$0xff] %v8830_v30  ;;  %v4535_v42 = vmul.f32 0.01, %v4130_v41  ;;  %v8839_v30 = vsub.f32 %v8630_v50, %v4534_v40  ;;  %v8851_v50 = vsub.f32 %v8643_v25, %v4532_v14  ;;  %v4529_v25 = vmul.f32 0.01, %v4112_v15 }
0x16d3   : > { %v4527_v15 = vmul.f32 0.01, %v8818_v44  ;;  %10066 = vst [vmem:[#allocation63_spill] sm:$0xff] %v8877_v11  ;;  %v4526_v14 = vmul.f32 0.01, %v8815_v38 }
0x16d4   : > { %v8834_v34 = vsub.f32 %v8625_v37, %v4535_v42  ;;  %v4339_v20 = vpop.f32.mrf.mxu2  ;;  %10060 = vst [vmem:[#allocation57_spill] sm:$0xff] %v8839_v30  ;;  %v8872_v45 = vsub.f32 %v8666_v36, %v4529_v25  ;;  %v4525_v36 = vmul.f32 0.01, %v8812_v49 }
0x16d5   : > { %v4345_v59 = vsel %vm4343_vm15, %v4339_v20, 0.0  ;;  %5921 = vmatpush.msk.msra.mxu0 %vm4343_vm15, %v4339_v20  ;;  %10062 = vst [vmem:[#allocation59_spill] sm:$0xff] %v8851_v50  ;;  %v8886_v60 = vsub.f32 %v8681_v61, %v4527_v15  ;;  %v8891_v44 = vsub.f32 %v8688_v16, %v4526_v14  ;;  %v4523_v61 = vmul.f32 0.01, %v8806_v22 }
0x16d6   : > { %v4411_v1 = vadd.f32 %v4345_v59, %v4344_v26  ;;  %6002 = vmatpush.xpose.msrb.mxu3 %v8834_v34  ;;  %v3802_v59 = vld [vmem:[#allocation3 + $0x1] sm:$0x1]  ;;  %10065 = vst [vmem:[#allocation62_spill] sm:$0xff] %v8872_v45  ;;  %v8900_v38 = vsub.f32 %v8696_v52, %v4525_v36  ;;  %v4521_v52 = vmul.f32 0.01, %v8800_v18 }
0x16d7   : > { %5922 = vmatpush.msk.msra.mxu0 %vm4342_vm14, %v4336_v7  ;;  %10067 = vst [vmem:[#allocation64_spill] sm:$0xff] %v8886_v60 }
0x16d8   : > { %v4412_v41 = vrot.slane %v4411_v1, 4  ;;  %5923 = vmatmul.msk.f32.vlgmr.msra.gmra.mxu0 %vm581_vm10, %v8253_v29  ;;  %10068 = vst [vmem:[#allocation65_spill] sm:$0xff] %v8891_v44 }
0x16d9   : > { %v8843_v37 = vpop.f32.mrf.mxu1  ;;  %10069 = vst [vmem:[#allocation66_spill] sm:$0xff] %v8900_v38 }
0x16da   : > { %v4413_v8 = vadd.f32 %v4412_v41, %v4411_v1  ;;  %6003 = vmatpush.xpose.msrb.mxu3 %v8839_v30 }
0x16dc   : > { %v4414_v42 = vrot.slane %v4413_v8, 2 }
0x16de   : > { %v4415_v20 = vadd.f32 %v4414_v42, %v4413_v8  ;;  %6004 = vmatpush.xpose.msrb.mxu3 %v8847_v13  ;;  %v4524_v42 = vmul.f32 0.01, %v8809_v55  ;;  %v8912_v55 = vsub.f32 %v8712_v6, %v4523_v61  ;;  %v8928_v6 = vsub.f32 %v8725_v58, %v4520_v21  ;;  %v10077_v61 = vld [vmem:[#allocation21_spill] sm:$0xff]  ;;  %v10079_v21 = vld [vmem:[#allocation88_spill] sm:$0xff] }
0x16e0   : > { %v4416_v7 = vrot.slane %v4415_v20, 1  ;;  %5924 = vmatmul.msk.f32.gmra.mxu0 %vm581_vm10, %v8256_v27  ;;  %v8905_v49 = vsub.f32 %v8703_v47, %v4524_v42  ;;  %10071 = vst [vmem:[#allocation68_spill] sm:$0xff] %v8912_v55 }
0x16e1   : > { %v8855_v40 = vpop.f32.mrf.mxu1  ;;  %10074 = vst [vmem:[#allocation71_spill] sm:$0xff] %v8928_v6 }
0x16e2   : > { %v4417_v1 = vadd.f32 %v4416_v7, %v4415_v20  ;;  %6005 = vmatpush.xpose.msrb.mxu3 %v8851_v50  ;;  %10070 = vst [vmem:[#allocation67_spill] sm:$0xff] %v8905_v49  ;;  %v4522_v20 = vmul.f32 0.01, %v8803_v43  ;;  %v8924_v43 = vsub.f32 %v8730_v31, %v4521_v52 }
0x16e4   : > { %v4466_v26 = vmul.f32 0.01, %v4417_v1  ;;  %v8917_v22 = vsub.f32 %v8718_v35, %v4522_v20  ;;  %10073 = vst [vmem:[#allocation70_spill] sm:$0xff] %v8924_v43 }
0x16e6   : > { %v4467_v53 = vsub.f32 %v3802_v59, %v4466_v26  ;;  %6006 = vmatpush.xpose.msrb.mxu3 %v8859_v33  ;;  %10072 = vst [vmem:[#allocation69_spill] sm:$0xff] %v8917_v22 }
0x16e8   : > { %4468 = vst [vmem:[#allocation3 + $0x1] sm:$0x1] %v4467_v53  ;;  %5925 = vmatmul.msk.f32.gmra.mxu0 %vm581_vm10, %v8259_v9 }
0x16e9   : > { %v8867_v41 = vpop.f32.mrf.mxu1 }
0x16ea   : > { %6007 = vmatpush.xpose.msrb.mxu3 %v8863_v54 }
0x16ee   : > { %6008 = vmatpush.xpose.msrb.mxu3 %v8872_v45 }
0x16f0   : > { %5926 = vmatmul.msk.f32.gmra.mxu0 %vm581_vm10, %v8262_v5  ;;  %v10105_v5 = vld [vmem:[#allocation37_spill] sm:$0xff] }
0x16f1   : > { %v8881_v8 = vpop.f32.mrf.mxu1 }
0x16f2   : > { %6009 = vmatpush.xpose.msrb.mxu3 %v8877_v11 }
0x16f6   : > { %6010 = vmatpush.xpose.msrb.mxu3 %v8886_v60 }
0x16f8   : > { %5927 = vmatmul.msk.f32.gmra.mxu0 %vm581_vm10, %v8265_v39 }
0x16f9   : > { %v8895_v3 = vpop.f32.mrf.mxu1 }
0x16fa   : > { %6011 = vmatpush.xpose.msrb.mxu3 %v8891_v44 }
0x16fe   : > { %6012 = vmatpush.xpose.msrb.mxu3 %v8900_v38 }
0x1700   : > { %5928 = vmatmul.msk.f32.gmra.mxu0 %vm581_vm10, %v8268_v23 }
0x1701   : > { %v4282_v16 = vpop.f32.mrf.mxu1 }
0x1702   : > { %6013 = vmatpush.xpose.msrb.mxu3 %v8905_v49 }
0x1706   : > { %6014 = vmatpush.xpose.msrb.mxu3 %v8912_v55 }
0x1708   : > { %5929 = vmatmul.msk.f32.gmra.mxu0 %vm581_vm10, %v8271_v0  ;;  %v10104_v0 = vld [vmem:[#allocation31_spill] sm:$0xff] }
0x1709   : > { %v4285_v47 = vpop.f32.mrf.mxu1 }
0x170a   : > { %6015 = vmatpush.xpose.msrb.mxu3 %v8917_v22 }
0x170e   : > { %6016 = vmatpush.xpose.msrb.mxu3 %v8924_v43 }
0x1710   : > { %5930 = vmatmul.msk.f32.gmra.mxu0 %vm581_vm10, %v8274_v57 }
0x1711   : > { %v4288_v35 = vpop.f32.mrf.mxu1 }
0x1712   : > { %6017 = vmatpush.xpose.msrb.mxu3 %v8928_v6 }
0x1718   : > { %5931 = vmatmul.msk.f32.gmra.mxu0 %vm581_vm10, %v8277_v48 }
0x1719   : > { %v4291_v18 = vpop.f32.mrf.mxu1 }
0x1720   : > { %5932 = vmatmul.msk.f32.gmra.mxu0 %vm581_vm10, %v8282_v10 }
0x1721   : > { %v4294_v31 = vpop.f32.mrf.mxu1 }
0x1728   : > { %5933 = vmatmul.msk.f32.gmra.mxu0 %vm581_vm10, %v8288_v46  ;;  %v10102_v46 = vld [vmem:[#allocation30_spill] sm:$0xff] }
0x1729   : > { %v4297_v4 = vpop.f32.mrf.mxu1 }
0x1730   : > { %5934 = vmatmul.msk.f32.gmra.mxu0 %vm581_vm10, %v8297_v19 }
0x1731   : > { %v4300_v58 = vpop.f32.mrf.mxu1 }
0x1732   : > { %v4481_v15 = vmul.f32 0.01, %v4300_v58 }
0x1734   : > { %v8964_v42 = vsub.f32 %v8378_v28, %v4481_v15 }
0x1736   : > { %10076 = vst [vmem:[#allocation91_spill] sm:$0xff] %v8964_v42 }
0x1738   : > { %5935 = vmatmul.msk.f32.gmra.mxu0 %vm581_vm10, %v8303_v12 }
0x1739   : > { %v4303_v7 = vpop.f32.mrf.mxu1 }
0x173a   : > { %v4482_v25 = vmul.f32 0.01, %v4303_v7  ;;  %v10081_v7 = vld [vmem:[#allocation20_spill] sm:$0xff] }
0x173c   : > { %v8958_v14 = vsub.f32 %v8371_v24, %v4482_v25  ;;  %v4478_v24 = vmul.f32 0.01, %v4291_v18  ;;  %v4475_v18 = vmul.f32 0.01, %v4282_v16 }
0x173e   : > { %10075 = vst [vmem:[#allocation72_spill] sm:$0xff] %v8958_v14  ;;  %v8978_v28 = vsub.f32 %v10081_v7, %v4478_v24 }
0x1740   : > { %5936 = vmatmul.msk.f32.gmra.mxu0 %vm581_vm10, %v8309_v63  ;;  %10082 = vst [vmem:[#allocation20_spill] sm:$0xff] %v8978_v28 }
0x1741   : > { %v4306_v1 = vpop.f32.mrf.mxu1 }
0x1742   : > { %v4483_v59 = vmul.f32 0.01, %v4306_v1 }
0x1744   : > { %v8952_v32 = vsub.f32 %v8364_v17, %v4483_v59  ;;  %v4479_v17 = vmul.f32 0.01, %v4294_v31  ;;  %v4476_v31 = vmul.f32 0.01, %v4285_v47  ;;  %v10085_v59 = vld [vmem:[#allocation26_spill] sm:$0xff] }
0x1745   : > { %v4473_v47 = vmul.f32 0.01, %v8881_v8  ;;  %v4470_v8 = vmul.f32 0.01, %v8843_v37 }
0x1746   : > { %v8974_v58 = vsub.f32 %v10079_v21, %v4479_v17  ;;  %v8988_v25 = vsub.f32 %v10085_v59, %v4476_v31  ;;  %v4472_v21 = vmul.f32 0.01, %v8867_v41  ;;  %v10093_v31 = vld [vmem:[#allocation28_spill] sm:$0xff]  ;;  %v10097_v41 = vld [vmem:[#allocation87_spill] sm:$0xff] }
0x1747   : > { %v10095_v59 = vld [vmem:[#allocation40_spill] sm:$0xff] }
0x1748   : > { %5937 = vmatmul.msk.f32.gmra.mxu0 %vm581_vm10, %v8315_v2  ;;  %10080 = vst [vmem:[#allocation88_spill] sm:$0xff] %v8974_v58 }
0x1749   : > { %v4309_v62 = vpop.f32.mrf.mxu1  ;;  %10086 = vst [vmem:[#allocation26_spill] sm:$0xff] %v8988_v25 }
0x174a   : > { %v4484_v26 = vmul.f32 0.01, %v4309_v62  ;;  %v10083_v62 = vld [vmem:[#allocation43_spill] sm:$0xff] }
0x174c   : > { %v8948_v53 = vsub.f32 %v8359_v56, %v4484_v26  ;;  %v4480_v56 = vmul.f32 0.01, %v4297_v4  ;;  %v4477_v4 = vmul.f32 0.01, %v4288_v35  ;;  %v4474_v35 = vmul.f32 0.01, %v8895_v3 }
0x174d   : > { %v4471_v3 = vmul.f32 0.01, %v8855_v40  ;;  %v10100_v40 = vld [vmem:[#allocation29_spill] sm:$0xff] }
0x174e   : > { %5104 = vmatpush.xpose.msrb.mxu0 %v8948_v53  ;;  %v8968_v20 = vsub.f32 %v10077_v61, %v4480_v56  ;;  %v8984_v26 = vsub.f32 %v10083_v62, %v4477_v4  ;;  %v10087_v56 = vld [vmem:[#allocation42_spill] sm:$0xff]  ;;  %v10089_v61 = vld [vmem:[#allocation27_spill] sm:$0xff]  ;;  %v10091_v4 = vld [vmem:[#allocation41_spill] sm:$0xff]  ;;  %v9010_v62 = vsub.f32 %v10093_v31, %v4472_v21 }
0x174f   : > { %v8995_v17 = vsub.f32 %v10087_v56, %v4475_v18  ;;  %v9000_v24 = vsub.f32 %v10089_v61, %v4474_v35  ;;  %v9005_v7 = vsub.f32 %v10091_v4, %v4473_v47  ;;  %v9015_v35 = vsub.f32 %v10095_v59, %v4471_v3  ;;  %v10098_v47 = vld [vmem:[#allocation39_spill] sm:$0xff] }
0x1750   : > { %5938 = vmatmul.msk.f32.gmra.mxu0 %vm581_vm10, %v8321_v51  ;;  %10078 = vst [vmem:[#allocation21_spill] sm:$0xff] %v8968_v20  ;;  %v4469_v56 = vmul.f32 0.01, %v10097_v41  ;;  %v9020_v61 = vsub.f32 %v10098_v47, %v4470_v8 }
0x1751   : > { %10084 = vst [vmem:[#allocation43_spill] sm:$0xff] %v8984_v26 }
0x1752   : > { %5105 = vmatpush.xpose.msrb.mxu0 %v8952_v32  ;;  %10088 = vst [vmem:[#allocation42_spill] sm:$0xff] %v8995_v17  ;;  %v9024_v21 = vsub.f32 %v10100_v40, %v4469_v56  ;;  %v10103_v56 = vld [vmem:[#allocation38_spill] sm:$0xff] }
0x1753   : > { %10090 = vst [vmem:[#allocation27_spill] sm:$0xff] %v9000_v24 }
0x1754   : > { %10092 = vst [vmem:[#allocation41_spill] sm:$0xff] %v9005_v7 }
0x1755   : > { %v8960_v36 = vpop.f32.mrf.mxu0  ;;  %10094 = vst [vmem:[#allocation28_spill] sm:$0xff] %v9010_v62 }
0x1756   : > { %5106 = vmatpush.xpose.msrb.mxu0 %v8958_v14  ;;  %10096 = vst [vmem:[#allocation40_spill] sm:$0xff] %v9015_v35 }
0x1757   : > { %10099 = vst [vmem:[#allocation87_spill] sm:$0xff] %v9020_v61 }
0x1758   : > { %10101 = vst [vmem:[#allocation39_spill] sm:$0xff] %v9024_v21 }
0x175a   : > { %5107 = vmatpush.xpose.msrb.mxu0 %v8964_v42 }
0x175d   : > { %v8970_v52 = vpop.f32.mrf.mxu0 }
0x175e   : > { %5108 = vmatpush.xpose.msrb.mxu0 %v8968_v20 }
0x1762   : > { %5109 = vmatpush.xpose.msrb.mxu0 %v8974_v58 }
0x1765   : > { %v8980_v1 = vpop.f32.mrf.mxu0 }
0x1766   : > { %5110 = vmatpush.xpose.msrb.mxu0 %v8978_v28 }
0x176a   : > { %5111 = vmatpush.xpose.msrb.mxu0 %v8984_v26 }
0x176d   : > { %v8990_v15 = vpop.f32.mrf.mxu0 }
0x176e   : > { %5112 = vmatpush.xpose.msrb.mxu0 %v8988_v25 }
0x1772   : > { %5113 = vmatpush.xpose.msrb.mxu0 %v8995_v17 }
0x1775   : > { %v4375_v16 = vpop.f32.mrf.mxu0 }
0x1776   : > { %5114 = vmatpush.xpose.msrb.mxu0 %v9000_v24 }
0x177a   : > { %5115 = vmatpush.xpose.msrb.mxu0 %v9005_v7 }
0x177d   : > { %v4378_v18 = vpop.f32.mrf.mxu0 }
0x177e   : > { %5116 = vmatpush.xpose.msrb.mxu0 %v9010_v62 }
0x1782   : > { %5117 = vmatpush.xpose.msrb.mxu0 %v9015_v35 }
0x1785   : > { %v4381_v4 = vpop.f32.mrf.mxu0 }
0x1786   : > { %5118 = vmatpush.xpose.msrb.mxu0 %v9020_v61 }
0x178a   : > { %5119 = vmatpush.xpose.msrb.mxu0 %v9024_v21 }
0x178d   : > { %v4384_v31 = vpop.f32.mrf.mxu0 }
0x1795   : > { %v4387_v37 = vpop.f32.mrf.mxu0 }
0x179d   : > { %v4390_v51 = vpop.f32.mrf.mxu0 }
0x17a5   : > { %v4393_v3 = vpop.f32.mrf.mxu0 }
0x17a6   : > { %v4428_v39 = vmul.f32 0.01, %v4393_v3 }
0x17ad   : > { %v4396_v59 = vpop.f32.mrf.mxu0 }
0x17ae   : > { %v4429_v57 = vmul.f32 0.01, %v4396_v59 }
0x17b5   : > { %v4399_v2 = vpop.f32.mrf.mxu0 }
0x17b6   : > { %v4430_v48 = vmul.f32 0.01, %v4399_v2 }
0x17bd   : > { %v4402_v63 = vpop.f32.mrf.mxu0 }
0x17be   : > { %v4431_v47 = vmul.f32 0.01, %v4402_v63  ;;  %v10106_v63 = vld [vmem:[#allocation32_spill] sm:$0xff] }
0x17bf   : > { %v9043_v2 = vsub.f32 %v10106_v63, %v4429_v57  ;;  %v4423_v57 = vmul.f32 0.01, %v4378_v18  ;;  %v4420_v18 = vmul.f32 0.01, %v8980_v1  ;;  %v10116_v1 = vld [vmem:[#allocation80_spill] sm:$0xff] }
0x17c0   : > { %v9035_v23 = vsub.f32 %v10104_v0, %v4431_v47  ;;  %v4425_v0 = vmul.f32 0.01, %v4384_v31  ;;  %v10110_v47 = vld [vmem:[#allocation74_spill] sm:$0xff] }
0x17c5   : > { %v4405_v12 = vpop.f32.mrf.mxu0 }
0x17c6   : > { %v4432_v19 = vmul.f32 0.01, %v4405_v12  ;;  %v9039_v12 = vsub.f32 %v10105_v5, %v4430_v48  ;;  %v4424_v5 = vmul.f32 0.01, %v4381_v4  ;;  %v10109_v48 = vld [vmem:[#allocation73_spill] sm:$0xff]  ;;  %v10112_v4 = vld [vmem:[#allocation76_spill] sm:$0xff] }
0x17c7   : > { %v9068_v63 = vsub.f32 %v10112_v4, %v4423_v57 }
0x17c8   : > { %v9031_v40 = vsub.f32 %v10103_v56, %v4432_v19  ;;  %v4426_v19 = vmul.f32 0.01, %v4387_v37  ;;  %v9059_v37 = vsub.f32 %v10110_v47, %v4425_v0  ;;  %v10111_v56 = vld [vmem:[#allocation75_spill] sm:$0xff]  ;;  %v10114_v0 = vld [vmem:[#allocation78_spill] sm:$0xff]  ;;  %v10117_v47 = vld [vmem:[#allocation81_spill] sm:$0xff] }
0x17c9   : > { %v9063_v31 = vsub.f32 %v10111_v56, %v4424_v5  ;;  %v10115_v5 = vld [vmem:[#allocation79_spill] sm:$0xff]  ;;  %v6091_v56 = vld [vmem:[#allocation3 + $0x1] ss:$0 sm:$0xff] }
0x17cd   : > { %v4408_v41 = vpop.f32.mrf.mxu0 }
0x17ce   : > { %v4433_v8 = vmul.f32 0.01, %v4408_v41  ;;  %v10107_v41 = vld [vmem:[#allocation33_spill] sm:$0xff] }
0x17cf   : > { %v9047_v59 = vsub.f32 %v10107_v41, %v4428_v39  ;;  %v4422_v39 = vmul.f32 0.01, %v4375_v16  ;;  %v4419_v16 = vmul.f32 0.01, %v8970_v52  ;;  %v10118_v52 = vld [vmem:[#allocation82_spill] sm:$0xff] }
0x17d0   : > { %v9028_v10 = vsub.f32 %v10102_v46, %v4433_v8  ;;  %v4427_v46 = vmul.f32 0.01, %v4390_v51  ;;  %v10108_v8 = vld [vmem:[#allocation34_spill] sm:$0xff]  ;;  %v9055_v51 = vsub.f32 %v10109_v48, %v4426_v19  ;;  %v10113_v19 = vld [vmem:[#allocation77_spill] sm:$0xff]  ;;  %v9083_v48 = vsub.f32 %v10115_v5, %v4420_v18 }
0x17d1   : > { %v9073_v41 = vsub.f32 %v10113_v19, %v4422_v39  ;;  %v9087_v57 = vsub.f32 %v10116_v1, %v4419_v16 }
0x17d2   : > { %4625 = vmatpush.msra.mxu2 %v9028_v10  ;;  %v9051_v3 = vsub.f32 %v10108_v8, %v4427_v46  ;;  %v4421_v46 = vmul.f32 0.01, %v8990_v15  ;;  %v4418_v15 = vmul.f32 0.01, %v8960_v36  ;;  %v10119_v36 = vld [vmem:[#allocation83_spill] sm:$0xff] }
0x17d4   : > { %4626 = vmatpush.msra.mxu2 %v9031_v40  ;;  %v9078_v8 = vsub.f32 %v10114_v0, %v4421_v46  ;;  %v9091_v39 = vsub.f32 %v10117_v47, %v4418_v15  ;;  %v6092_v15 = vld [vmem:[#allocation5 + $0x1] ss:$0 sm:$0xff] }
0x17d6   : > { %4627 = vmatpush.msra.mxu2 %v9035_v23 }
0x17d8   : > { %4628 = vmatpush.msra.mxu2 %v9039_v12 }
0x17da   : > { %4629 = vmatpush.msra.mxu2 %v9043_v2 }
0x17dc   : > { %4630 = vmatpush.msra.mxu2 %v9047_v59 }
0x17de   : > { %4631 = vmatpush.msra.mxu2 %v9051_v3 }
0x17e0   : > { %4632 = vmatpush.msra.mxu2 %v9055_v51 }
0x17e2   : > { %4633 = vmatpush.msra.mxu2 %v9059_v37 }
0x17e4   : > { %4634 = vmatpush.msra.mxu2 %v9063_v31 }
0x17e6   : > { %4635 = vmatpush.msra.mxu2 %v9068_v63 }
0x17e8   : > { %4636 = vmatpush.msra.mxu2 %v9073_v41 }
0x17ea   : > { %4637 = vmatpush.msra.mxu2 %v9078_v8 }
0x17ec   : > { %4638 = vmatpush.msra.mxu2 %v9083_v48 }
0x17ee   : > { %4639 = vmatpush.msra.mxu2 %v9087_v57 }
0x17f0   : > { %4640 = vmatpush.msra.mxu2 %v9091_v39 }
0x17f1   : > { %4641 = vmatmul.f32.vlgmr.msra.gmra.mxu2 %v10118_v52 }
0x17f2   : > { %4653 = vmatpush.msrb.mxu2 %v8948_v53 }
0x17f4   : > { %4654 = vmatpush.msrb.mxu2 %v8952_v32 }
0x17f6   : > { %4655 = vmatpush.msrb.mxu2 %v8958_v14 }
0x17f8   : > { %4656 = vmatpush.msrb.mxu2 %v8964_v42 }
0x17f9   : > { %4644 = vmatmul.f32.gmra.mxu2 %v10119_v36 }
0x17fa   : > { %4657 = vmatpush.msrb.mxu2 %v8968_v20 }
0x17fc   : > { %4658 = vmatpush.msrb.mxu2 %v8974_v58 }
0x17fe   : > { %4659 = vmatpush.msrb.mxu2 %v8978_v28 }
0x1800   : > { %4660 = vmatpush.msrb.mxu2 %v8984_v26 }
0x1802   : > { %4661 = vmatpush.msrb.mxu2 %v8988_v25 }
0x1804   : > { %4662 = vmatpush.msrb.mxu2 %v8995_v17 }
0x1806   : > { %4663 = vmatpush.msrb.mxu2 %v9000_v24  ;;  %v10125_v24 = vld [vmem:[#allocation53_spill] sm:$0xff] }
0x1808   : > { %4664 = vmatpush.msrb.mxu2 %v9005_v7  ;;  %v6093_v7 = vld [vmem:[#allocation7 + $0x1] ss:$0 sm:$0xff] }
0x180a   : > { %4665 = vmatpush.msrb.mxu2 %v9010_v62  ;;  %v10124_v62 = vld [vmem:[#allocation54_spill] sm:$0xff] }
0x180c   : > { %4666 = vmatpush.msrb.mxu2 %v9015_v35 }
0x180e   : > { %4667 = vmatpush.msrb.mxu2 %v9020_v61  ;;  %v10123_v61 = vld [vmem:[#allocation86_spill] sm:$0xff] }
0x1810   : > { %4668 = vmatpush.msrb.mxu2 %v9024_v21  ;;  %v10122_v21 = vld [vmem:[#allocation35_spill] sm:$0xff] }
0x1812   : > { %4681 = vmatpush.msra.mxu2 %v8834_v34 }
0x1814   : > { %4682 = vmatpush.msra.mxu2 %v8839_v30 }
0x1816   : > { %4683 = vmatpush.msra.mxu2 %v8847_v13 }
0x1818   : > { %4684 = vmatpush.msra.mxu2 %v8851_v50 }
0x181a   : > { %4685 = vmatpush.msra.mxu2 %v8859_v33 }
0x181c   : > { %4686 = vmatpush.msra.mxu2 %v8863_v54 }
0x181e   : > { %4687 = vmatpush.msra.mxu2 %v8872_v45 }
0x1820   : > { %4688 = vmatpush.msra.mxu2 %v8877_v11 }
0x1822   : > { %4689 = vmatpush.msra.mxu2 %v8886_v60 }
0x1824   : > { %4690 = vmatpush.msra.mxu2 %v8891_v44 }
0x1826   : > { %4691 = vmatpush.msra.mxu2 %v8900_v38 }
0x1828   : > { %4692 = vmatpush.msra.mxu2 %v8905_v49 }
0x182a   : > { %4693 = vmatpush.msra.mxu2 %v8912_v55 }
0x182c   : > { %4694 = vmatpush.msra.mxu2 %v8917_v22 }
0x182e   : > { %4695 = vmatpush.msra.mxu2 %v8924_v43 }
0x1830   : > { %4696 = vmatpush.msra.mxu2 %v8928_v6 }
0x1874   : > { %v4642_v46 = vpop.f32.mrf.mxu2 }
0x1875   : > { %v9129_v4 = vadd.f32 %v6091_v56, %v4642_v46 }
0x1877   : > { %v9720_v18 = vmax.f32 %v9129_v4, 0.0  ;;  %vm5127_vm11 = vcmp.gt.f32.partialorder %v9129_v4, 0.0 }
0x1879   : > { %4669 = vmatmul.f32.vlgmr.msrb.gmra.mxu2 %v9720_v18 }
0x187c   : > { %v4645_v19 = vpop.f32.mrf.mxu2 }
0x187d   : > { %v9134_v16 = vadd.f32 %v6091_v56, %v4645_v19  ;;  %v10120_v56 = vld [vmem:[#allocation56_spill] sm:$0xff]  ;;  %v10121_v19 = vld [vmem:[#allocation55_spill] sm:$0xff] }
0x187e   : > { %6137 = vlog2.f32 %v10120_v56 }
0x187f   : > { %v9721_v0 = vmax.f32 %v9134_v16, 0.0  ;;  %6139 = vlog2.f32 %v10121_v19  ;;  %v9152_v19 = vld [vmem:[%s6500_s18 + $0x18] sm:$0xff]  ;;  %vm5128_vm12 = vcmp.gt.f32.partialorder %v9134_v16, 0.0 }
0x1880   : > { %6141 = vlog2.f32 %v10122_v21  ;;  %10126 = vst [vmem:[#allocation29_spill] sm:$0xff] %v9152_v19  ;;  %v9156_v21 = vld [vmem:[%s6500_s18 + $0x10] sm:$0xff] }
0x1881   : > { %4672 = vmatmul.f32.gmra.mxu2 %v9721_v0  ;;  %6143 = vlog2.f32 %v10123_v61  ;;  %10127 = vst [vmem:[#allocation30_spill] sm:$0xff] %v9156_v21 }
0x1884   : > { %v6138_v18 = vpop.eup %6137 }
0x1885   : > { %v6140_v0 = vpop.eup %6139 }
0x1886   : > { %v2176_v35 = vmul.f32 0.6931472, %v6140_v0  ;;  %v10128_v0 = vld [vmem:[#allocation85_spill] sm:$0xff] }
0x1888   : > { %v2179_v17 = vsub.f32 %v10125_v24, %v2176_v35  ;;  %v10129_v35 = vld [vmem:[#allocation84_spill] sm:$0xff] }
0x188a   : > { %v2181_v61 = vmul.f32 %v9156_v21, %v2179_v17 }
0x188c   : > { %v2183_v24 = vmul.f32 0.0, %v2181_v61  ;;  %v9170_v61 = vld [vmem:[%s8193_s23] sm:$0xff] }
0x188d   : > { %10130 = vst [vmem:[#allocation38_spill] sm:$0xff] %v9170_v61 }
0x18fc   : > { %v4670_v5 = vpop.f32.mrf.mxu2 }
0x18fd   : > { %v9139_v1 = vadd.f32 %v6092_v15, %v4670_v5  ;;  %v2178_v5 = vmul.f32 0.6931472, %v6138_v18 }
0x18ff   : > { %v4676_v47 = vmax.f32 %v9139_v1, 0.0  ;;  %vm4948_vm9 = vcmp.gt.f32.partialorder %v9139_v1, 0.0 }
0x1901   : > { %4697 = vmatmul.f32.vlgmr.msra.gmra.mxu2 %v4676_v47 }
0x1904   : > { %v4673_v52 = vpop.f32.mrf.mxu2 }
0x1905   : > { %v9142_v36 = vadd.f32 %v6092_v15, %v4673_v52  ;;  %v2180_v15 = vsub.f32 %v10124_v62, %v2178_v5  ;;  %v6142_v52 = vpop.eup %6141 }
0x1906   : > { %v6144_v25 = vpop.eup %6143  ;;  %v3966_v58 = vmul.f32 0.6931472, %v6142_v52 }
0x1907   : > { %v4677_v46 = vmax.f32 %v9142_v36, 0.0  ;;  %v2182_v28 = vmul.f32 %v9152_v19, %v2180_v15  ;;  %v3964_v62 = vmul.f32 0.6931472, %v6144_v25  ;;  %v9162_v15 = vld [vmem:[%s6500_s18 + $0x38] sm:$0xff]  ;;  %v9166_v19 = vld [vmem:[%s6500_s18 + $0x30] sm:$0xff]  ;;  %vm4949_vm8 = vcmp.gt.f32.partialorder %v9142_v36, 0.0 }
0x1908   : > { %v3968_v5 = vsub.f32 %v10128_v0, %v3966_v58 }
0x1909   : > { %4700 = vmatmul.f32.gmra.mxu2 %v4677_v46  ;;  %v2184_v18 = vmul.f32 0.125, %v2182_v28  ;;  %v3967_v20 = vsub.f32 %v10129_v35, %v3964_v62 }
0x190a   : > { %v3970_v52 = vmul.f32 %v9162_v15, %v3968_v5 }
0x190b   : > { %v2185_v14 = vadd.f32 %v2184_v18, %v2183_v24  ;;  %v3969_v28 = vmul.f32 %v9166_v19, %v3967_v20 }
0x190c   : > { %v3972_v25 = vmul.f32 0.125, %v3970_v52 }
0x190d   : > { %v3971_v58 = vmul.f32 0.0, %v3969_v28 }
0x190f   : > { %v3973_v17 = vadd.f32 %v3972_v25, %v3971_v58 }
0x1984   : > { %v4698_v26 = vpop.f32.mrf.mxu2 }
0x1985   : > { %v4699_v56 = vadd.f32 %v6093_v7, %v4698_v26 }
0x1987   : > { %4704 = vmax.xlane.f32.xlu2 %v4699_v56 }
0x198c   : > { %v4701_v26 = vpop.f32.mrf.mxu2 }
0x198d   : > { %v4702_v42 = vadd.f32 %v6093_v7, %v4701_v26  ;;  %v9174_v7 = vld [vmem:[%s8193_s23 + $0x8] sm:$0xff] }
0x198e   : > { %10131 = vst [vmem:[#allocation31_spill] sm:$0xff] %v9174_v7 }
0x198f   : > { %4706 = vmax.xlane.f32.xlu0 %v4702_v42  ;;  %2186 = vadd.xlane.f32.xlu2 %v2185_v14 }
0x1997   : > { %3974 = vadd.xlane.f32.xlu2 %v3973_v17  ;;  %2916 = vmax.xlane.f32.xlu0 %v9170_v61 }
0x199f   : > { %2918 = vmax.xlane.f32.xlu0 %v9174_v7 }
0x19fa   : > { %v4705_v62 = vpop.xlane.xlu2 %4704 }
0x19fb   : > { %v9177_v18 = vsub.f32 %v4699_v56, %v4705_v62 }
0x19fd   : > { %10132 = vst [vmem:[#allocation37_spill] sm:$0xff] %v9177_v18  ;;  %v4710_v14 = vmul.f32 1.442695, %v9177_v18 }
0x19ff   : > { %6145 = vpow2.f32 %v4710_v14 }
0x1a02   : > { %v4707_v0 = vpop.xlane.xlu0 %4706 }
0x1a03   : > { %v9180_v20 = vsub.f32 %v4702_v42, %v4707_v0 }
0x1a05   : > { %10133 = vst [vmem:[#allocation32_spill] sm:$0xff] %v9180_v20  ;;  %v6146_v5 = vpop.eup %6145  ;;  %v4712_v24 = vmul.f32 1.442695, %v9180_v20 }
0x1a06   : > { %4714 = vadd.xlane.f32.xlu1 %v6146_v5 }
0x1a07   : > { %6147 = vpow2.f32 %v4712_v24 }
0x1a0d   : > { %v6148_v35 = vpop.eup %6147 }
0x1a0e   : > { %4716 = vadd.xlane.f32.xlu1 %v6148_v35 }
0x1a48   : > { %4773 = vxpose.xlu1.b32.start [1/2] (short) %v4676_v47, 128 }
0x1a50   : > { %4774 = vxpose.xlu1.b32.end [2/2] (short) %v4677_v46, 128 }
0x1a79   : > { %v9183_v26 = vpop.xlane.xlu1 %4714 }
0x1a7a   : > { %10134 = vst [vmem:[#allocation33_spill] sm:$0xff] %v9183_v26  ;;  %6149 = vrcp.f32 %v9183_v26  ;;  %v4729_v58 = vand.u32 2147483648, %v9183_v26  ;;  %vm4723_vm1 = vweird.f32 %v9183_v26  ;;  %v4727_v46 = vand.u32 2147483647, %v9183_v26 }
0x1a7c   : > { %v4730_v0 = vor.u32 1.1754944e-38, %v4729_v58  ;;  %vm4728_vm3 = vcmp.eq.f32.partialorder %v4727_v46, 8.507059e+37 }
0x1a80   : > { %v6150_v56 = vpop.eup %6149 }
0x1a81   : > { %v4719_v52 = vmul.f32 %v6150_v56, %v9183_v26  ;;  %v9187_v28 = vpop.xlane.xlu1 %4716  ;;  %vm4724_vm0 = vweird.f32 %v6150_v56 }
0x1a82   : > { %10135 = vst [vmem:[#allocation34_spill] sm:$0xff] %v9187_v28  ;;  %6151 = vrcp.f32 %v9187_v28  ;;  %vm4725_vm2 = vmor %vm4723_vm1, %vm4724_vm0  ;;  %v4744_v18 = vand.u32 2147483648, %v9187_v28  ;;  %v4742_v20 = vand.u32 2147483647, %v9187_v28  ;;  %vm4738_vm5 = vweird.f32 %v9187_v28 }
0x1a83   : > { %v4720_v42 = vsub.f32 1.0, %v4719_v52 }
0x1a84   : > { %v4745_v26 = vor.u32 1.1754944e-38, %v4744_v18  ;;  %vm4743_vm7 = vcmp.eq.f32.partialorder %v4742_v20, 8.507059e+37 }
0x1a85   : > { %v4721_v25 = vmul.f32 %v6150_v56, %v4720_v42 }
0x1a87   : > { %v4722_v47 = vadd.f32 %v6150_v56, %v4721_v25 }
0x1a88   : > { %v6152_v17 = vpop.eup %6151 }
0x1a89   : > { %v4734_v62 = vmul.f32 %v6152_v17, %v9187_v28  ;;  %v4726_v14 = vsel %vm4725_vm2, %v6150_v56, %v4722_v47  ;;  %vm4739_vm4 = vweird.f32 %v6152_v17 }
0x1a8a   : > { %v4731_v52 = vsel %vm4728_vm3, %v4730_v0, %v4726_v14  ;;  %vm4740_vm6 = vmor %vm4738_vm5, %vm4739_vm4  ;;  %v10136_v0 = vmax.f32 %v9129_v4, 0.0 }
0x1a8b   : > { %v4735_v24 = vsub.f32 1.0, %v4734_v62  ;;  %v4732_v25 = vmul.f32 %v6146_v5, %v4731_v52 }
0x1a8d   : > { %v4736_v42 = vmul.f32 %v6152_v17, %v4735_v24  ;;  %v4769_v58 = vsub.f32 %v4732_v25, %v9166_v19  ;;  %v10137_v24 = vmax.f32 %v9134_v16, 0.0  ;;  %v4587_v16 = vld [vmem:[#allocation3 + $0x1] sm:$0x1] }
0x1a8f   : > { %v4737_v21 = vadd.f32 %v6152_v17, %v4736_v42  ;;  %v9199_v62 = vmul.f32 0.125, %v4769_v58 }
0x1a91   : > { %v4741_v7 = vsel %vm4740_vm6, %v6152_v17, %v4737_v21 }
0x1a92   : > { %v4746_v61 = vsel %vm4743_vm7, %v4745_v26, %v4741_v7  ;;  %v4621_v26 = vld [vmem:[#allocation7 + $0x1] sm:$0x1] }
0x1a93   : > { %v4747_v56 = vmul.f32 %v6148_v35, %v4746_v61 }
0x1a95   : > { %v4770_v47 = vsub.f32 %v4747_v56, %v9162_v15 }
0x1a97   : > { %v4772_v46 = vmul.f32 0.0, %v4770_v47 }
0x1a99   : > { %4867 = vmatpush.msrb.mxu2 %v4772_v46  ;;  %4944 = vmatmul.f32.vlgmr.msrb.gmra.mxu3 %v4772_v46  ;;  %v4918_v14 = vadd.f32 %v4772_v46, %v9199_v62 }
0x1a9b   : > { %4868 = vmatpush.msrb.mxu2 %v9199_v62  ;;  %v4919_v5 = vrot.slane %v4918_v14, 4 }
0x1a9d   : > { %4925 = vmatpush.xpose.msra.mxu2 %v8834_v34  ;;  %v4920_v18 = vadd.f32 %v4919_v5, %v4918_v14 }
0x1a9f   : > { %v4921_v21 = vrot.slane %v4920_v18, 2 }
0x1aa1   : > { %4926 = vmatpush.xpose.msra.mxu2 %v8839_v30  ;;  %v4922_v61 = vadd.f32 %v4921_v21, %v4920_v18 }
0x1aa3   : > { %v4923_v7 = vrot.slane %v4922_v61, 1 }
0x1aa5   : > { %4927 = vmatpush.xpose.msra.mxu2 %v8847_v13  ;;  %v4924_v20 = vadd.f32 %v4923_v7, %v4922_v61 }
0x1aa7   : > { %v5353_v35 = vmul.f32 0.01, %v4924_v20 }
0x1aa9   : > { %4928 = vmatpush.xpose.msra.mxu2 %v8851_v50  ;;  %v5354_v17 = vsub.f32 %v4621_v26, %v5353_v35 }
0x1aab   : > { %5355 = vst [vmem:[#allocation7 + $0x1] sm:$0x1] %v5354_v17 }
0x1aad   : > { %4929 = vmatpush.xpose.msra.mxu2 %v8859_v33 }
0x1ab1   : > { %4930 = vmatpush.xpose.msra.mxu2 %v8863_v54 }
0x1ab5   : > { %4931 = vmatpush.xpose.msra.mxu2 %v8872_v45 }
0x1ab9   : > { %4932 = vmatpush.xpose.msra.mxu2 %v8877_v11 }
0x1abd   : > { %4933 = vmatpush.xpose.msra.mxu2 %v8886_v60 }
0x1ac1   : > { %4934 = vmatpush.xpose.msra.mxu2 %v8891_v44 }
0x1ac5   : > { %4935 = vmatpush.xpose.msra.mxu2 %v8900_v38 }
0x1ac8   : > { %4952 = vxpose.xlu1.b32.start [1/2] (short) %v10136_v0, 128 }
0x1ac9   : > { %4936 = vmatpush.xpose.msra.mxu2 %v8905_v49 }
0x1acd   : > { %4937 = vmatpush.xpose.msra.mxu2 %v8912_v55 }
0x1ad0   : > { %4953 = vxpose.xlu1.b32.end [2/2] (short) %v10137_v24, 128 }
0x1ad1   : > { %4938 = vmatpush.xpose.msra.mxu2 %v8917_v22 }
0x1ad5   : > { %4939 = vmatpush.xpose.msra.mxu2 %v8924_v43 }
0x1ad9   : > { %4940 = vmatpush.xpose.msra.mxu2 %v8928_v6 }
0x1aec   : > { %v4789_v52 = vpop.trf.xlu1 }
0x1aed   : > { %5939 = vmatmul.msk.f32.vlgmr.msrb.gmra.mxu2 %vm581_vm10, %v4789_v52 }
0x1af4   : > { %v4790_v42 = vpop.trf.xlu1 }
0x1af5   : > { %5940 = vmatmul.msk.f32.gmra.mxu2 %vm581_vm10, %v4790_v42  ;;  %v10141_v42 = vld [vmem:[#allocation47_spill] sm:$0xff] }
0x1af6   : > { %6153 = vlog2.f32 %v10141_v42 }
0x1afc   : > { %v4791_v25 = vpop.trf.xlu1 }
0x1afd   : > { %5941 = vmatmul.msk.f32.gmra.mxu2 %vm581_vm10, %v4791_v25  ;;  %v10142_v25 = vld [vmem:[#allocation46_spill] sm:$0xff] }
0x1afe   : > { %6155 = vlog2.f32 %v10142_v25 }
0x1b04   : > { %v4792_v56 = vpop.trf.xlu1 }
0x1b05   : > { %5942 = vmatmul.msk.f32.gmra.mxu2 %vm581_vm10, %v4792_v56 }
0x1b0c   : > { %v4793_v58 = vpop.trf.xlu1 }
0x1b0d   : > { %5943 = vmatmul.msk.f32.gmra.mxu2 %vm581_vm10, %v4793_v58  ;;  %v6154_v58 = vpop.eup %6153 }
0x1b14   : > { %v4794_v47 = vpop.trf.xlu1 }
0x1b15   : > { %5944 = vmatmul.msk.f32.gmra.mxu2 %vm581_vm10, %v4794_v47  ;;  %v6156_v47 = vpop.eup %6155 }
0x1b1c   : > { %v9230_v46 = vpop.f32.mrf.mxu3  ;;  %v4795_v14 = vpop.trf.xlu1 }
0x1b1d   : > { %5945 = vmatmul.msk.f32.gmra.mxu2 %vm581_vm10, %v4795_v14  ;;  %5955 = vmatpush.msk.msrb.mxu1 %vm4949_vm8, %v9230_v46  ;;  %v3095_v14 = vmul.f32 0.6931472, %v6154_v58 }
0x1b24   : > { %v4796_v5 = vpop.trf.xlu1 }
0x1b25   : > { %5946 = vmatmul.msk.f32.gmra.mxu2 %vm581_vm10, %v4796_v5 }
0x1b2c   : > { %v4797_v18 = vpop.trf.xlu1 }
0x1b2d   : > { %5947 = vmatmul.msk.f32.gmra.mxu2 %vm581_vm10, %v4797_v18  ;;  %v3093_v18 = vmul.f32 0.6931472, %v6156_v47 }
0x1b34   : > { %v4798_v21 = vpop.trf.xlu1 }
0x1b35   : > { %5948 = vmatmul.msk.f32.gmra.mxu2 %vm581_vm10, %v4798_v21  ;;  %v10145_v21 = vld [vmem:[#allocation45_spill] sm:$0xff] }
0x1b3c   : > { %v4799_v61 = vpop.trf.xlu1 }
0x1b3d   : > { %5949 = vmatmul.msk.f32.gmra.mxu2 %vm581_vm10, %v4799_v61  ;;  %v10146_v61 = vld [vmem:[#allocation44_spill] sm:$0xff] }
0x1b44   : > { %v4800_v7 = vpop.trf.xlu1 }
0x1b45   : > { %5950 = vmatmul.msk.f32.gmra.mxu2 %vm581_vm10, %v4800_v7  ;;  %v3096_v7 = vsub.f32 %v10146_v61, %v3093_v18 }
0x1b4c   : > { %v4801_v20 = vpop.trf.xlu1 }
0x1b4d   : > { %5951 = vmatmul.msk.f32.gmra.mxu2 %vm581_vm10, %v4801_v20 }
0x1b54   : > { %v4802_v35 = vpop.trf.xlu1 }
0x1b55   : > { %5952 = vmatmul.msk.f32.gmra.mxu2 %vm581_vm10, %v4802_v35 }
0x1b5c   : > { %v4803_v26 = vpop.trf.xlu1 }
0x1b5d   : > { %5953 = vmatmul.msk.f32.gmra.mxu2 %vm581_vm10, %v4803_v26  ;;  %v3098_v26 = vmul.f32 %v9166_v19, %v3096_v7 }
0x1b5f   : > { %v3100_v42 = vmul.f32 0.0, %v3098_v26 }
0x1b64   : > { %v4804_v17 = vpop.trf.xlu1 }
0x1b65   : > { %5954 = vmatmul.msk.f32.gmra.mxu2 %vm581_vm10, %v4804_v17 }
0x1b6d   : > { %4941 = vmatmul.f32.vlgmr.msra.gmra.mxu2 %v9199_v62  ;;  %v3097_v62 = vsub.f32 %v10145_v21, %v3095_v14  ;;  %v4968_v21 = vpop.trf.xlu1 }
0x1b6f   : > { %v3099_v20 = vmul.f32 %v9162_v15, %v3097_v62 }
0x1b70   : > { %v9246_v0 = vpop.f32.mrf.mxu2 }
0x1b71   : > { %10138 = vst [vmem:[#allocation73_spill] sm:$0xff] %v9246_v0  ;;  %v3101_v17 = vmul.f32 0.125, %v3099_v20 }
0x1b73   : > { %v3102_v25 = vadd.f32 %v3101_v17, %v3100_v42  ;;  %v4951_v17 = vsel %vm4949_vm8, %v9230_v46, 0.0 }
0x1b75   : > { %v4969_v62 = vpop.trf.xlu1 }
0x1b78   : > { %v9248_v24 = vpop.f32.mrf.mxu2 }
0x1b79   : > { %10139 = vst [vmem:[#allocation74_spill] sm:$0xff] %v9248_v24 }
0x1b7d   : > { %v4970_v7 = vpop.trf.xlu1 }
0x1b80   : > { %v9250_v52 = vpop.f32.mrf.mxu2 }
0x1b81   : > { %10140 = vst [vmem:[#allocation75_spill] sm:$0xff] %v9250_v52 }
0x1b85   : > { %v4971_v42 = vpop.trf.xlu1 }
0x1b88   : > { %v9254_v56 = vpop.f32.mrf.mxu2 }
0x1b89   : > { %10143 = vst [vmem:[#allocation76_spill] sm:$0xff] %v9254_v56  ;;  %v4604_v56 = vld [vmem:[#allocation5 + $0x1] sm:$0x1] }
0x1b8d   : > { %v4972_v24 = vpop.trf.xlu1 }
0x1b90   : > { %v9256_v5 = vpop.f32.mrf.mxu2 }
0x1b91   : > { %10144 = vst [vmem:[#allocation77_spill] sm:$0xff] %v9256_v5 }
0x1b98   : > { %v9261_v35 = vpop.f32.mrf.mxu2 }
0x1b99   : > { %10147 = vst [vmem:[#allocation78_spill] sm:$0xff] %v9261_v35 }
0x1ba0   : > { %3103 = vadd.xlane.f32.xlu1 %v3102_v25  ;;  %v9264_v28 = vpop.f32.mrf.mxu2 }
0x1ba1   : > { %10148 = vst [vmem:[#allocation79_spill] sm:$0xff] %v9264_v28 }
0x1ba8   : > { %v9266_v58 = vpop.f32.mrf.mxu2 }
0x1ba9   : > { %10149 = vst [vmem:[#allocation80_spill] sm:$0xff] %v9266_v58 }
0x1bb0   : > { %v9268_v6 = vpop.f32.mrf.mxu2 }
0x1bb1   : > { %10150 = vst [vmem:[#allocation81_spill] sm:$0xff] %v9268_v6 }
0x1bb8   : > { %v9270_v47 = vpop.f32.mrf.mxu2 }
0x1bb9   : > { %10151 = vst [vmem:[#allocation82_spill] sm:$0xff] %v9270_v47 }
0x1bc0   : > { %v9272_v14 = vpop.f32.mrf.mxu2 }
0x1bc1   : > { %10152 = vst [vmem:[#allocation83_spill] sm:$0xff] %v9272_v14 }
0x1bc8   : > { %v9274_v18 = vpop.f32.mrf.mxu2 }
0x1bc9   : > { %10153 = vst [vmem:[#allocation56_spill] sm:$0xff] %v9274_v18 }
0x1bd0   : > { %v9276_v15 = vpop.f32.mrf.mxu2 }
0x1bd8   : > { %v9278_v19 = vpop.f32.mrf.mxu2 }
0x1be0   : > { %v9280_v61 = vpop.f32.mrf.mxu2 }
0x1be8   : > { %v9282_v20 = vpop.f32.mrf.mxu2 }
0x1bf0   : > { %v4942_v26 = vpop.f32.mrf.mxu2 }
0x1bf1   : > { %v4950_v25 = vsel %vm4948_vm9, %v4942_v26, 0.0  ;;  %5956 = vmatpush.msk.msrb.mxu1 %vm4948_vm9, %v4942_v26  ;;  %5973 = vmatmul.msk.f32.vlgmr.msrb.gmra.mxu0 %vm4948_vm9, %v4942_v26 }
0x1bf2   : > { %v5097_v43 = vadd.f32 %v4951_v17, %v4950_v25  ;;  %5957 = vmatmul.msk.f32.vlgmr.msrb.gmra.mxu1 %vm581_vm10, %v4968_v21  ;;  %v4973_v21 = vpop.trf.xlu1 }
0x1bf4   : > { %v5098_v22 = vrot.slane %v5097_v43, 4 }
0x1bf6   : > { %v5099_v0 = vadd.f32 %v5098_v22, %v5097_v43 }
0x1bf8   : > { %v5100_v55 = vrot.slane %v5099_v0, 2 }
0x1bf9   : > { %5974 = vmatmul.msk.f32.gmra.mxu0 %vm4949_vm8, %v9230_v46 }
0x1bfa   : > { %v5101_v1 = vadd.f32 %v5100_v55, %v5099_v0  ;;  %5958 = vmatmul.msk.f32.gmra.mxu1 %vm581_vm10, %v4969_v62  ;;  %v4974_v22 = vpop.trf.xlu1 }
0x1bfc   : > { %v5102_v49 = vrot.slane %v5101_v1, 1 }
0x1bfe   : > { %v5103_v52 = vadd.f32 %v5102_v49, %v5101_v1 }
0x1c00   : > { %v5302_v38 = vmul.f32 0.01, %v5103_v52 }
0x1c02   : > { %v5303_v44 = vsub.f32 %v4604_v56, %v5302_v38  ;;  %5959 = vmatmul.msk.f32.gmra.mxu1 %vm581_vm10, %v4970_v7  ;;  %v4975_v43 = vpop.trf.xlu1 }
0x1c04   : > { %5304 = vst [vmem:[#allocation5 + $0x1] sm:$0x1] %v5303_v44 }
0x1c0a   : > { %5960 = vmatmul.msk.f32.gmra.mxu1 %vm581_vm10, %v4971_v42  ;;  %v4976_v55 = vpop.trf.xlu1 }
0x1c12   : > { %5961 = vmatmul.msk.f32.gmra.mxu1 %vm581_vm10, %v4972_v24  ;;  %v4977_v49 = vpop.trf.xlu1 }
0x1c1a   : > { %5962 = vmatmul.msk.f32.gmra.mxu1 %vm581_vm10, %v4973_v21  ;;  %v4978_v38 = vpop.trf.xlu1 }
0x1c22   : > { %5963 = vmatmul.msk.f32.gmra.mxu1 %vm581_vm10, %v4974_v22  ;;  %v4979_v44 = vpop.trf.xlu1 }
0x1c2a   : > { %5964 = vmatmul.msk.f32.gmra.mxu1 %vm581_vm10, %v4975_v43  ;;  %v4980_v36 = vpop.trf.xlu1 }
0x1c32   : > { %5965 = vmatmul.msk.f32.gmra.mxu1 %vm581_vm10, %v4976_v55  ;;  %v4981_v46 = vpop.trf.xlu1  ;;  %v10154_v55 = vld [vmem:[#allocation48_spill] sm:$0xff] }
0x1c3a   : > { %5966 = vmatmul.msk.f32.gmra.mxu1 %vm581_vm10, %v4977_v49  ;;  %v4982_v0 = vpop.trf.xlu1  ;;  %v10155_v49 = vld [vmem:[#allocation49_spill] sm:$0xff] }
0x1c42   : > { %5967 = vmatmul.msk.f32.gmra.mxu1 %vm581_vm10, %v4978_v38  ;;  %v4983_v24 = vpop.trf.xlu1  ;;  %v10157_v38 = vld [vmem:[#allocation50_spill] sm:$0xff] }
0x1c4a   : > { %5968 = vmatmul.msk.f32.gmra.mxu1 %vm581_vm10, %v4979_v44  ;;  %v10159_v44 = vld [vmem:[#allocation51_spill] sm:$0xff] }
0x1c52   : > { %5969 = vmatmul.msk.f32.gmra.mxu1 %vm581_vm10, %v4980_v36  ;;  %v10160_v36 = vld [vmem:[#allocation15_spill] sm:$0xff] }
0x1c5a   : > { %5970 = vmatmul.msk.f32.gmra.mxu1 %vm581_vm10, %v4981_v46  ;;  %v10162_v46 = vld [vmem:[#allocation17_spill] sm:$0xff] }
0x1c62   : > { %5971 = vmatmul.msk.f32.gmra.mxu1 %vm581_vm10, %v4982_v0  ;;  %v10163_v0 = vld [vmem:[#allocation18_spill] sm:$0xff] }
0x1c6a   : > { %5972 = vmatmul.msk.f32.gmra.mxu1 %vm581_vm10, %v4983_v24  ;;  %v10164_v24 = vld [vmem:[#allocation90_spill] sm:$0xff] }
0x1c6e   : > { %v5121_v52 = vpop.f32.mrf.mxu0 }
0x1c6f   : > { %v5129_v62 = vsel %vm5127_vm11, %v5121_v52, 0.0 }
0x1c76   : > { %v5124_v56 = vpop.f32.mrf.mxu0 }
0x1c77   : > { %v5130_v7 = vsel %vm5128_vm12, %v5124_v56, 0.0  ;;  %5975 = vmatpush.msk.msra.mxu3 %vm5128_vm12, %v5124_v56  ;;  %v10166_v56 = vld [vmem:[#allocation89_spill] sm:$0xff] }
0x1c78   : > { %v5196_v26 = vadd.f32 %v5130_v7, %v5129_v62  ;;  %v9341_v62 = vpop.f32.mrf.mxu1 }
0x1c79   : > { %5976 = vmatpush.msk.msra.mxu3 %vm5127_vm11, %v5121_v52  ;;  %v10165_v52 = vld [vmem:[#allocation19_spill] sm:$0xff] }
0x1c7a   : > { %v5197_v17 = vrot.slane %v5196_v26, 4  ;;  %5977 = vmatmul.msk.f32.vlgmr.msra.gmra.mxu3 %vm581_vm10, %v8253_v29  ;;  %v10156_v29 = vld [vmem:[#allocation36_spill] sm:$0xff] }
0x1c7c   : > { %v5198_v42 = vadd.f32 %v5197_v17, %v5196_v26 }
0x1c7e   : > { %v5199_v25 = vrot.slane %v5198_v42, 2 }
0x1c80   : > { %v5200_v1 = vadd.f32 %v5199_v25, %v5198_v42  ;;  %v9345_v26 = vpop.f32.mrf.mxu1 }
0x1c82   : > { %v5201_v21 = vrot.slane %v5200_v1, 1  ;;  %5978 = vmatmul.msk.f32.gmra.mxu3 %vm581_vm10, %v8256_v27  ;;  %v10158_v27 = vld [vmem:[#allocation52_spill] sm:$0xff] }
0x1c84   : > { %v5202_v4 = vadd.f32 %v5201_v21, %v5200_v1 }
0x1c86   : > { %v5251_v22 = vmul.f32 0.01, %v5202_v4 }
0x1c88   : > { %v5252_v43 = vsub.f32 %v4587_v16, %v5251_v22  ;;  %v9349_v25 = vpop.f32.mrf.mxu1 }
0x1c8a   : > { %5253 = vst [vmem:[#allocation3 + $0x1] sm:$0x1] %v5252_v43  ;;  %5979 = vmatmul.msk.f32.gmra.mxu3 %vm581_vm10, %v8259_v9  ;;  %v10161_v9 = vld [vmem:[#allocation16_spill] sm:$0xff] }
0x1c90   : > { %v9351_v21 = vpop.f32.mrf.mxu1 }
0x1c92   : > { %5980 = vmatmul.msk.f32.gmra.mxu3 %vm581_vm10, %v10154_v55 }
0x1c98   : > { %v9353_v22 = vpop.f32.mrf.mxu1 }
0x1c9a   : > { %5981 = vmatmul.msk.f32.gmra.mxu3 %vm581_vm10, %v10155_v49 }
0x1ca0   : > { %v9355_v43 = vpop.f32.mrf.mxu1 }
0x1ca2   : > { %5982 = vmatmul.msk.f32.gmra.mxu3 %vm581_vm10, %v10156_v29 }
0x1ca8   : > { %v9357_v29 = vpop.f32.mrf.mxu1 }
0x1caa   : > { %5983 = vmatmul.msk.f32.gmra.mxu3 %vm581_vm10, %v10157_v38 }
0x1cb2   : > { %5984 = vmatmul.msk.f32.gmra.mxu3 %vm581_vm10, %v10158_v27  ;;  %v9359_v27 = vpop.f32.mrf.mxu1 }
0x1cba   : > { %5985 = vmatmul.msk.f32.gmra.mxu3 %vm581_vm10, %v10159_v44 }
0x1cc2   : > { %5986 = vmatmul.msk.f32.gmra.mxu3 %vm581_vm10, %v10160_v36  ;;  %v9361_v36 = vpop.f32.mrf.mxu1 }
0x1cca   : > { %5987 = vmatmul.msk.f32.gmra.mxu3 %vm581_vm10, %v10161_v9 }
0x1cd2   : > { %5988 = vmatmul.msk.f32.gmra.mxu3 %vm581_vm10, %v10162_v46  ;;  %v9363_v46 = vpop.f32.mrf.mxu1 }
0x1cda   : > { %5989 = vmatmul.msk.f32.gmra.mxu3 %vm581_vm10, %v10163_v0 }
0x1ce2   : > { %5990 = vmatmul.msk.f32.gmra.mxu3 %vm581_vm10, %v10164_v24 }
0x1cea   : > { %5991 = vmatmul.msk.f32.gmra.mxu3 %vm581_vm10, %v10165_v52  ;;  %v9365_v52 = vpop.f32.mrf.mxu1 }
0x1cf2   : > { %5992 = vmatmul.msk.f32.gmra.mxu3 %vm581_vm10, %v10166_v56  ;;  %v9367_v5 = vpop.f32.mrf.mxu1 }
0x1cfa   : > { %v5085_v35 = vpop.f32.mrf.mxu1 }
0x1cfd   : > { %v9343_v7 = vpop.f32.mrf.mxu3 }
0x1d02   : > { %v5088_v14 = vpop.f32.mrf.mxu1 }
0x1d05   : > { %v9347_v17 = vpop.f32.mrf.mxu3 }
0x1d0d   : > { %v5154_v42 = vpop.f32.mrf.mxu3 }
0x1d15   : > { %v5157_v1 = vpop.f32.mrf.mxu3 }
0x1d1d   : > { %v5160_v4 = vpop.f32.mrf.mxu3 }
0x1d25   : > { %v5163_v16 = vpop.f32.mrf.mxu3 }
0x1d2d   : > { %v5166_v55 = vpop.f32.mrf.mxu3 }
0x1d35   : > { %v5169_v49 = vpop.f32.mrf.mxu3 }
0x1d3d   : > { %v5172_v38 = vpop.f32.mrf.mxu3 }
0x1d45   : > { %v5175_v44 = vpop.f32.mrf.mxu3 }
0x1d46   : > { %v5212_v30 = vmul.f32 0.01, %v5175_v44 }
0x1d4d   : > { %v5178_v9 = vpop.f32.mrf.mxu3 }
0x1d4e   : > { %v5213_v13 = vmul.f32 0.01, %v5178_v9  ;;  %v10171_v9 = vld [vmem:[#allocation20_spill] sm:$0xff] }
0x1d55   : > { %v5181_v0 = vpop.f32.mrf.mxu3 }
0x1d56   : > { %v5214_v47 = vmul.f32 0.01, %v5181_v0 }
0x1d5d   : > { %v5184_v24 = vpop.f32.mrf.mxu3 }
0x1d5e   : > { %v5215_v6 = vmul.f32 0.01, %v5184_v24  ;;  %v5260_v24 = vmul.f32 0.01, %v9357_v29  ;;  %v5256_v29 = vmul.f32 0.01, %v9349_v25 }
0x1d5f   : > { %v5319_v25 = vmul.f32 0.01, %v9280_v61 }
0x1d60   : > { %v5231_v18 = vsub.f32 %v9039_v12, %v5215_v6  ;;  %v5207_v6 = vmul.f32 0.01, %v5160_v4  ;;  %v10167_v4 = vld [vmem:[#allocation72_spill] sm:$0xff] }
0x1d65   : > { %v5187_v56 = vpop.f32.mrf.mxu3 }
0x1d66   : > { %v5216_v58 = vmul.f32 0.01, %v5187_v56 }
0x1d68   : > { %v5232_v50 = vsub.f32 %v9035_v23, %v5216_v58  ;;  %v5203_v58 = vmul.f32 0.01, %v9343_v7 }
0x1d6d   : > { %v5190_v60 = vpop.f32.mrf.mxu3 }
0x1d6e   : > { %v5217_v28 = vmul.f32 0.01, %v5190_v60  ;;  %v5230_v60 = vsub.f32 %v9043_v2, %v5214_v47  ;;  %v5206_v2 = vmul.f32 0.01, %v5157_v1  ;;  %v5266_v1 = vmul.f32 0.01, %v5085_v35 }
0x1d6f   : > { %v10170_v35 = vld [vmem:[#allocation88_spill] sm:$0xff] }
0x1d70   : > { %v5233_v33 = vsub.f32 %v9031_v40, %v5217_v28  ;;  %v5209_v40 = vmul.f32 0.01, %v5166_v55  ;;  %v5208_v28 = vmul.f32 0.01, %v5163_v16  ;;  %v5264_v16 = vmul.f32 0.01, %v9365_v52 }
0x1d71   : > { %v10172_v52 = vld [vmem:[#allocation43_spill] sm:$0xff] }
0x1d72   : > { %v5225_v12 = vsub.f32 %v9063_v31, %v5209_v40  ;;  %v5280_v44 = vsub.f32 %v10170_v35, %v5264_v16 }
0x1d75   : > { %v5193_v11 = vpop.f32.mrf.mxu3 }
0x1d76   : > { %v5218_v45 = vmul.f32 0.01, %v5193_v11  ;;  %v5211_v11 = vmul.f32 0.01, %v5172_v38  ;;  %v6301_v38 = vld [vmem:[%s6500_s18 + $0x28] sm:$0xff] }
0x1d78   : > { %v5234_v54 = vsub.f32 %v9028_v10, %v5218_v45  ;;  %v5229_v10 = vsub.f32 %v9047_v59, %v5213_v13  ;;  %v5210_v45 = vmul.f32 0.01, %v5169_v49  ;;  %v5227_v23 = vsub.f32 %v9055_v51, %v5211_v11 }
0x1d79   : > { %v5224_v13 = vsub.f32 %v9068_v63, %v5208_v28  ;;  %v5205_v59 = vmul.f32 0.01, %v5154_v42  ;;  %v5222_v51 = vsub.f32 %v9078_v8, %v5206_v2  ;;  %v5267_v42 = vmul.f32 0.01, %v5088_v14  ;;  %v6300_v8 = vld [vmem:[%s6500_s18 + $0x20] sm:$0xff]  ;;  %v10177_v28 = vld [vmem:[#allocation28_spill] sm:$0xff] }
0x1d7a   : > { %5410 = vmatpush.msra.mxu0 %v5234_v54  ;;  %v5228_v54 = vsub.f32 %v9051_v3, %v5212_v30  ;;  %v5223_v30 = vsub.f32 %v9073_v41, %v5207_v6  ;;  %v5204_v3 = vmul.f32 0.01, %v9347_v17  ;;  %v5219_v41 = vsub.f32 %v9091_v39, %v5203_v58  ;;  %v10168_v39 = vld [vmem:[#allocation91_spill] sm:$0xff]  ;;  %v10169_v14 = vld [vmem:[#allocation21_spill] sm:$0xff]  ;;  %v10178_v6 = vld [vmem:[#allocation40_spill] sm:$0xff] }
0x1d7b   : > { %v5221_v31 = vsub.f32 %v9083_v48, %v5205_v59  ;;  %v5265_v48 = vmul.f32 0.01, %v9367_v5  ;;  %v5282_v55 = vsub.f32 %v10168_v39, %v5266_v1  ;;  %v5261_v5 = vmul.f32 0.01, %v9359_v27  ;;  %v10179_v2 = vld [vmem:[#allocation87_spill] sm:$0xff]  ;;  %v10182_v58 = vld [vmem:[#allocation56_spill] sm:$0xff] }
0x1d7c   : > { %5411 = vmatpush.msra.mxu0 %v5233_v33  ;;  %v5091_v33 = vpop.f32.mrf.mxu1  ;;  %v5220_v63 = vsub.f32 %v9087_v57, %v5204_v3  ;;  %v5283_v57 = vsub.f32 %v10167_v4, %v5267_v42  ;;  %v5257_v27 = vmul.f32 0.01, %v9351_v21  ;;  %v5320_v21 = vmul.f32 0.01, %v9282_v20  ;;  %v10180_v59 = vld [vmem:[#allocation39_spill] sm:$0xff]  ;;  %v10186_v42 = vld [vmem:[#allocation82_spill] sm:$0xff] }
0x1d7d   : > { %v5281_v49 = vsub.f32 %v10169_v14, %v5265_v48  ;;  %v5316_v20 = vmul.f32 0.01, %v10182_v58  ;;  %v10189_v1 = vld [vmem:[#allocation61_spill] sm:$0xff]  ;;  %v10190_v48 = vld [vmem:[#allocation80_spill] sm:$0xff]  ;;  %v10192_v39 = vld [vmem:[#allocation79_spill] sm:$0xff] }
0x1d7e   : > { %5412 = vmatpush.msra.mxu0 %v5232_v50  ;;  %v5226_v50 = vsub.f32 %v9059_v37, %v5210_v45  ;;  %v5336_v3 = vsub.f32 %v8834_v34, %v5320_v21  ;;  %v5312_v4 = vmul.f32 0.01, %v10190_v48 }
0x1d80   : > { %5413 = vmatpush.msra.mxu0 %v5231_v18  ;;  %v5268_v18 = vmul.f32 0.01, %v5091_v33 }
0x1d82   : > { %5414 = vmatpush.msra.mxu0 %v5230_v60  ;;  %v5284_v7 = vsub.f32 %v8952_v32, %v5268_v18  ;;  %v5262_v32 = vmul.f32 0.01, %v9361_v36  ;;  %v10173_v60 = vld [vmem:[#allocation26_spill] sm:$0xff]  ;;  %v5258_v36 = vmul.f32 0.01, %v9353_v22  ;;  %v10185_v18 = vld [vmem:[#allocation59_spill] sm:$0xff] }
0x1d83   : > { %v5277_v11 = vsub.f32 %v10173_v60, %v5261_v5  ;;  %v5254_v22 = vmul.f32 0.01, %v9341_v62  ;;  %v5317_v62 = vmul.f32 0.01, %v9276_v15  ;;  %v10200_v60 = vld [vmem:[#allocation75_spill] sm:$0xff] }
0x1d84   : > { %5415 = vmatpush.msra.mxu0 %v5229_v10  ;;  %v5094_v37 = vpop.f32.mrf.mxu1  ;;  %v5278_v56 = vsub.f32 %v10172_v52, %v5262_v32  ;;  %v10174_v10 = vld [vmem:[#allocation42_spill] sm:$0xff]  ;;  %v10195_v32 = vld [vmem:[#allocation64_spill] sm:$0xff] }
0x1d85   : > { %v5269_v47 = vmul.f32 0.01, %v5094_v37  ;;  %v5276_v45 = vsub.f32 %v10174_v10, %v5260_v24  ;;  %v5328_v35 = vsub.f32 %v10195_v32, %v5312_v4  ;;  %v10198_v24 = vld [vmem:[#allocation76_spill] sm:$0xff] }
0x1d86   : > { %5416 = vmatpush.msra.mxu0 %v5228_v54  ;;  %v10175_v54 = vld [vmem:[#allocation27_spill] sm:$0xff]  ;;  %v5308_v52 = vmul.f32 0.01, %v10198_v24 }
0x1d87   : > { %v5285_v17 = vsub.f32 %v8948_v53, %v5269_v47  ;;  %v5263_v53 = vmul.f32 0.01, %v9363_v46  ;;  %v5259_v46 = vmul.f32 0.01, %v9355_v43  ;;  %v5255_v43 = vmul.f32 0.01, %v9345_v26 }
0x1d88   : > { %5417 = vmatpush.msra.mxu0 %v5227_v23  ;;  %v10176_v23 = vld [vmem:[#allocation41_spill] sm:$0xff]  ;;  %v5318_v26 = vmul.f32 0.01, %v9278_v19  ;;  %v5314_v19 = vmul.f32 0.01, %v10186_v42  ;;  %v10214_v24 = vld [vmem:[#allocation23_spill] sm:$0xff] }
0x1d89   : > { %v5279_v0 = vsub.f32 %v10171_v9, %v5263_v53  ;;  %v5275_v40 = vsub.f32 %v10175_v54, %v5259_v46  ;;  %v5274_v33 = vsub.f32 %v10176_v23, %v5258_v36  ;;  %v10193_v53 = vld [vmem:[#allocation63_spill] sm:$0xff]  ;;  %v10197_v9 = vld [vmem:[#allocation65_spill] sm:$0xff]  ;;  %v10203_v54 = vld [vmem:[#allocation68_spill] sm:$0xff] }
0x1d8a   : > { %5418 = vmatpush.msra.mxu0 %v5226_v50  ;;  %v5273_v50 = vsub.f32 %v10177_v28, %v5257_v27  ;;  %v10201_v36 = vld [vmem:[#allocation67_spill] sm:$0xff]  ;;  %v10206_v28 = vld [vmem:[#allocation70_spill] sm:$0xff] }
0x1d8c   : > { %5419 = vmatpush.msra.mxu0 %v5225_v12  ;;  %v5272_v12 = vsub.f32 %v10178_v6, %v5256_v29  ;;  %v10204_v29 = vld [vmem:[#allocation73_spill] sm:$0xff] }
0x1d8d   : > { %v5305_v23 = vmul.f32 0.01, %v10204_v29 }
0x1d8e   : > { %5420 = vmatpush.msra.mxu0 %v5224_v13  ;;  %v5271_v13 = vsub.f32 %v10179_v2, %v5255_v43 }
0x1d90   : > { %5421 = vmatpush.msra.mxu0 %v5223_v30  ;;  %v5270_v30 = vsub.f32 %v10180_v59, %v5254_v22  ;;  %v10207_v22 = vld [vmem:[#allocation71_spill] sm:$0xff] }
0x1d91   : > { %v5321_v6 = vsub.f32 %v10207_v22, %v5305_v23 }
0x1d92   : > { %5422 = vmatpush.msra.mxu0 %v5222_v51  ;;  %v10181_v51 = vld [vmem:[#allocation57_spill] sm:$0xff] }
0x1d93   : > { %v5335_v37 = vsub.f32 %v10181_v51, %v5319_v25 }
0x1d94   : > { %5423 = vmatpush.msra.mxu0 %v5221_v31  ;;  %v10183_v31 = vld [vmem:[#allocation58_spill] sm:$0xff] }
0x1d95   : > { %v5334_v47 = vsub.f32 %v10183_v31, %v5318_v26  ;;  %v6095_v26 = vld [vmem:[#allocation5 + $0x1] ss:$0 sm:$0xff]  ;;  %v2917_v31 = vpop.xlane.xlu0 %2916 }
0x1d96   : > { %5424 = vmatpush.msra.mxu0 %v5220_v63  ;;  %v10184_v63 = vld [vmem:[#allocation83_spill] sm:$0xff] }
0x1d97   : > { %v5315_v61 = vmul.f32 0.01, %v10184_v63 }
0x1d98   : > { %5425 = vmatpush.msra.mxu0 %v5219_v41  ;;  %v5333_v41 = vsub.f32 %v10185_v18, %v5317_v62  ;;  %v10208_v18 = vld [vmem:[#allocation38_spill] sm:$0xff] }
0x1d99   : > { %5426 = vmatmul.f32.vlgmr.msra.gmra.mxu0 %v6300_v8  ;;  %v10188_v8 = vld [vmem:[#allocation81_spill] sm:$0xff] }
0x1d9a   : > { %5438 = vmatpush.msrb.mxu0 %v5285_v17  ;;  %v10187_v17 = vld [vmem:[#allocation60_spill] sm:$0xff]  ;;  %v5313_v15 = vmul.f32 0.01, %v10188_v8  ;;  %v10209_v8 = vld [vmem:[#allocation31_spill] sm:$0xff] }
0x1d9b   : > { %v5332_v34 = vsub.f32 %v10187_v17, %v5316_v20 }
0x1d9c   : > { %5439 = vmatpush.msrb.mxu0 %v5284_v7  ;;  %v5331_v7 = vsub.f32 %v10189_v1, %v5315_v61  ;;  %v5329_v14 = vsub.f32 %v10193_v53, %v5313_v15 }
0x1d9d   : > { %v2919_v17 = vpop.xlane.xlu0 %2918 }
0x1d9e   : > { %5440 = vmatpush.msrb.mxu0 %v5283_v57  ;;  %v10191_v57 = vld [vmem:[#allocation62_spill] sm:$0xff]  ;;  %v9456_v15 = vsub.f32 %v10209_v8, %v2919_v17 }
0x1d9f   : > { %v5330_v16 = vsub.f32 %v10191_v57, %v5314_v19  ;;  %v10210_v57 = vld [vmem:[#allocation25_spill] sm:$0xff] }
0x1da0   : > { %5441 = vmatpush.msrb.mxu0 %v5282_v55  ;;  %v5311_v55 = vmul.f32 0.01, %v10192_v39  ;;  %v2924_v1 = vmul.f32 1.442695, %v9456_v15  ;;  %v10211_v39 = vld [vmem:[#allocation24_spill] sm:$0xff] }
0x1da1   : > { %5429 = vmatmul.f32.gmra.mxu0 %v6301_v38 }
0x1da2   : > { %5442 = vmatpush.msrb.mxu0 %v5281_v49  ;;  %v10194_v49 = vld [vmem:[#allocation78_spill] sm:$0xff] }
0x1da3   : > { %v5310_v38 = vmul.f32 0.01, %v10194_v49 }
0x1da4   : > { %5443 = vmatpush.msrb.mxu0 %v5280_v44  ;;  %v10196_v44 = vld [vmem:[#allocation77_spill] sm:$0xff] }
0x1da5   : > { %v5309_v5 = vmul.f32 0.01, %v10196_v44 }
0x1da6   : > { %5444 = vmatpush.msrb.mxu0 %v5279_v0  ;;  %v5327_v0 = vsub.f32 %v10197_v9, %v5311_v55 }
0x1da7   : > { %v5325_v10 = vsub.f32 %v10201_v36, %v5309_v5  ;;  %v10213_v5 = vld [vmem:[#allocation13_spill] sm:$0xff] }
0x1da8   : > { %5445 = vmatpush.msrb.mxu0 %v5278_v56  ;;  %v10199_v56 = vld [vmem:[#allocation66_spill] sm:$0xff] }
0x1da9   : > { %v5326_v46 = vsub.f32 %v10199_v56, %v5310_v38  ;;  %v10212_v38 = vld [vmem:[#allocation14_spill] sm:$0xff] }
0x1daa   : > { %5446 = vmatpush.msrb.mxu0 %v5277_v11  ;;  %v5307_v11 = vmul.f32 0.01, %v10200_v60  ;;  %v10215_v60 = vld [vmem:[#allocation22_spill] sm:$0xff] }
0x1dac   : > { %5447 = vmatpush.msrb.mxu0 %v5276_v45  ;;  %v10202_v45 = vld [vmem:[#allocation74_spill] sm:$0xff] }
0x1dad   : > { %v5306_v27 = vmul.f32 0.01, %v10202_v45 }
0x1dae   : > { %5448 = vmatpush.msrb.mxu0 %v5275_v40  ;;  %v5324_v40 = vsub.f32 %v10203_v54, %v5308_v52 }
0x1db0   : > { %5449 = vmatpush.msrb.mxu0 %v5274_v33  ;;  %v10205_v33 = vld [vmem:[#allocation69_spill] sm:$0xff] }
0x1db1   : > { %v5323_v43 = vsub.f32 %v10205_v33, %v5307_v11 }
0x1db2   : > { %5450 = vmatpush.msrb.mxu0 %v5273_v50  ;;  %v5322_v50 = vsub.f32 %v10206_v28, %v5306_v27 }
0x1db4   : > { %5451 = vmatpush.msrb.mxu0 %v5272_v12  ;;  %v6094_v12 = vld [vmem:[#allocation3 + $0x1] ss:$0 sm:$0xff] }
0x1db6   : > { %5452 = vmatpush.msrb.mxu0 %v5271_v13 }
0x1db8   : > { %5453 = vmatpush.msrb.mxu0 %v5270_v30 }
0x1dba   : > { %5466 = vmatpush.msra.mxu0 %v5336_v3 }
0x1dbc   : > { %5467 = vmatpush.msra.mxu0 %v5335_v37 }
0x1dbe   : > { %5468 = vmatpush.msra.mxu0 %v5334_v47  ;;  %v6096_v47 = vld [vmem:[#allocation7 + $0x1] ss:$0 sm:$0xff] }
0x1dc0   : > { %5469 = vmatpush.msra.mxu0 %v5333_v41  ;;  %v9451_v41 = vsub.f32 %v10208_v18, %v2917_v31 }
0x1dc2   : > { %5470 = vmatpush.msra.mxu0 %v5332_v34  ;;  %v2922_v42 = vmul.f32 1.442695, %v9451_v41 }
0x1dc4   : > { %5471 = vmatpush.msra.mxu0 %v5331_v7  ;;  %6157 = vpow2.f32 %v2922_v42 }
0x1dc5   : > { %6159 = vpow2.f32 %v2924_v1  ;;  %v10222_v1 = vld [vmem:[#allocation32_spill] sm:$0xff] }
0x1dc6   : > { %5472 = vmatpush.msra.mxu0 %v5330_v16  ;;  %6161 = vlog2.f32 %v10210_v57 }
0x1dc7   : > { %6163 = vlog2.f32 %v10211_v39  ;;  %v6304_v39 = vld [vmem:[%s6500_s18 + $0x38] sm:$0xff] }
0x1dc8   : > { %5473 = vmatpush.msra.mxu0 %v5329_v14 }
0x1dca   : > { %5474 = vmatpush.msra.mxu0 %v5328_v35  ;;  %v6158_v7 = vpop.eup %6157 }
0x1dcb   : > { %v6160_v48 = vpop.eup %6159 }
0x1dcc   : > { %5475 = vmatpush.msra.mxu0 %v5327_v0  ;;  %v6162_v53 = vpop.eup %6161 }
0x1dcd   : > { %v6164_v49 = vpop.eup %6163  ;;  %v527_v35 = vmul.f32 0.6931472, %v6162_v53  ;;  %v6305_v53 = vld [vmem:[%s6500_s18 + $0x30] sm:$0xff] }
0x1dce   : > { %5476 = vmatpush.msra.mxu0 %v5326_v46  ;;  %v525_v0 = vmul.f32 0.6931472, %v6164_v49 }
0x1dcf   : > { %v529_v52 = vsub.f32 %v10214_v24, %v527_v35 }
0x1dd0   : > { %5477 = vmatpush.msra.mxu0 %v5325_v10  ;;  %v528_v11 = vsub.f32 %v10215_v60, %v525_v0  ;;  %v10216_v10 = vld [vmem:[#allocation29_spill] sm:$0xff]  ;;  %v2187_v0 = vpop.xlane.xlu2 %2186 }
0x1dd1   : > { %v531_v45 = vmul.f32 %v10216_v10, %v529_v52 }
0x1dd2   : > { %5478 = vmatpush.msra.mxu0 %v5324_v40  ;;  %v10217_v40 = vld [vmem:[#allocation30_spill] sm:$0xff] }
0x1dd3   : > { %v530_v29 = vmul.f32 %v10217_v40, %v528_v11  ;;  %v533_v33 = vmul.f32 0.125, %v531_v45  ;;  %v3104_v40 = vpop.xlane.xlu1 %3103 }
0x1dd4   : > { %5479 = vmatpush.msra.mxu0 %v5323_v43  ;;  %v10218_v43 = vld [vmem:[#allocation12_spill] sm:$0xff] }
0x1dd6   : > { %5480 = vmatpush.msra.mxu0 %v5322_v50  ;;  %v10219_v50 = vld [vmem:[#allocation34_spill] sm:$0xff] }
0x1dd8   : > { %5481 = vmatpush.msra.mxu0 %v5321_v6  ;;  %v532_v6 = vmul.f32 0.0, %v530_v29 }
0x1e16   : > { %v5427_v21 = vpop.f32.mrf.mxu0 }
0x1e17   : > { %v5428_v2 = vadd.f32 %v6094_v12, %v5427_v21 }
0x1e19   : > { %v5433_v13 = vmax.f32 %v5428_v2, 0.0 }
0x1e1b   : > { %5454 = vmatmul.f32.vlgmr.msrb.gmra.mxu0 %v5433_v13  ;;  %v534_v13 = vadd.f32 %v533_v33, %v532_v6 }
0x1e1e   : > { %v5430_v25 = vpop.f32.mrf.mxu0 }
0x1e1f   : > { %v5431_v59 = vadd.f32 %v6094_v12, %v5430_v25  ;;  %v10220_v12 = vld [vmem:[#allocation11_spill] sm:$0xff]  ;;  %v6302_v25 = vld [vmem:[%s6500_s18 + $0x18] sm:$0xff] }
0x1e21   : > { %v5434_v30 = vmax.f32 %v5431_v59, 0.0 }
0x1e23   : > { %5457 = vmatmul.f32.gmra.mxu0 %v5434_v30  ;;  %v10221_v30 = vld [vmem:[#allocation33_spill] sm:$0xff] }
0x1e98   : > { %v5455_v3 = vpop.f32.mrf.mxu0 }
0x1e99   : > { %v5456_v62 = vadd.f32 %v6095_v26, %v5455_v3  ;;  %v6303_v3 = vld [vmem:[%s6500_s18 + $0x10] sm:$0xff] }
0x1e9b   : > { %v5461_v51 = vmax.f32 %v5456_v62, 0.0 }
0x1e9d   : > { %5482 = vmatmul.f32.vlgmr.msra.gmra.mxu0 %v5461_v51 }
0x1ea0   : > { %v5458_v37 = vpop.f32.mrf.mxu0 }
0x1ea1   : > { %v5459_v58 = vadd.f32 %v6095_v26, %v5458_v37 }
0x1ea3   : > { %v5462_v20 = vmax.f32 %v5459_v58, 0.0 }
0x1ea5   : > { %5485 = vmatmul.f32.gmra.mxu0 %v5462_v20 }
0x1f1a   : > { %v5483_v63 = vpop.f32.mrf.mxu0 }
0x1f1b   : > { %v5484_v61 = vadd.f32 %v6096_v47, %v5483_v63 }
0x1f1d   : > { %5993 = vst [vmem:[%s8193_s23 + $0x10] sm:$0xff] %v5484_v61  ;;  %5489 = vmax.xlane.f32.xlu0 %v5484_v61 }
0x1f22   : > { %v5486_v19 = vpop.f32.mrf.mxu0 }
0x1f23   : > { %v5487_v34 = vadd.f32 %v6096_v47, %v5486_v19 }
0x1f25   : > { %5994 = vst [vmem:[%s8193_s23 + $0x18] sm:$0xff] %v5487_v34  ;;  %5491 = vmax.xlane.f32.xlu0 %v5487_v34 }
0x1f2d   : > { %2926 = vadd.xlane.f32.xlu0 %v6158_v7 }
0x1f35   : > { %2928 = vadd.xlane.f32.xlu0 %v6160_v48 }
0x1f90   : > { %v5490_v4 = vpop.xlane.xlu0 %5489 }
0x1f91   : > { %v9460_v16 = vsub.f32 %v5484_v61, %v5490_v4  ;;  %v10223_v4 = vld [vmem:[#allocation37_spill] sm:$0xff] }
0x1f93   : > { %v5495_v55 = vmul.f32 1.442695, %v9460_v16 }
0x1f95   : > { %6165 = vpow2.f32 %v5495_v55 }
0x1f96   : > { %6167 = vlog2.f32 %v10212_v38 }
0x1f97   : > { %6169 = vlog2.f32 %v10213_v5 }
0x1f98   : > { %v5492_v14 = vpop.xlane.xlu0 %5491 }
0x1f99   : > { %v9465_v32 = vsub.f32 %v5487_v34, %v5492_v14 }
0x1f9b   : > { %v6166_v44 = vpop.eup %6165  ;;  %v5497_v9 = vmul.f32 1.442695, %v9465_v32 }
0x1f9c   : > { %5499 = vadd.xlane.f32.xlu0 %v6166_v44  ;;  %v6168_v56 = vpop.eup %6167 }
0x1f9d   : > { %6171 = vpow2.f32 %v5497_v9  ;;  %v6170_v36 = vpop.eup %6169  ;;  %v1393_v27 = vmul.f32 0.6931472, %v6168_v56  ;;  %v2188_v56 = vrot.slane %v2187_v0, 4 }
0x1f9e   : > { %v1391_v23 = vmul.f32 0.6931472, %v6170_v36 }
0x1f9f   : > { %v1395_v28 = vsub.f32 %v10218_v43, %v1393_v27  ;;  %v2189_v27 = vadd.f32 %v2188_v56, %v2187_v0 }
0x1fa0   : > { %v2927_v46 = vpop.xlane.xlu0 %2926  ;;  %v1394_v21 = vsub.f32 %v10220_v12, %v1391_v23  ;;  %v3975_v23 = vpop.xlane.xlu2 %3974 }
0x1fa1   : > { %6173 = vlog2.f32 %v2927_v46  ;;  %v1397_v59 = vmul.f32 %v6302_v25, %v1395_v28  ;;  %v3976_v12 = vrot.slane %v3975_v23, 4 }
0x1fa2   : > { %6175 = vlog2.f32 %v10219_v50  ;;  %v1396_v62 = vmul.f32 %v6303_v3, %v1394_v21  ;;  %v2190_v50 = vrot.slane %v2189_v27, 2 }
0x1fa3   : > { %v6172_v54 = vpop.eup %6171  ;;  %v1399_v37 = vmul.f32 0.125, %v1397_v59 }
0x1fa4   : > { %5501 = vadd.xlane.f32.xlu0 %v6172_v54  ;;  %v1398_v47 = vmul.f32 0.0, %v1396_v62  ;;  %v2191_v59 = vadd.f32 %v2190_v50, %v2189_v27 }
0x1fa6   : > { %v1400_v18 = vadd.f32 %v1399_v37, %v1398_v47  ;;  %v2192_v37 = vrot.slane %v2191_v59, 1 }
0x1fa7   : > { %v6174_v2 = vpop.eup %6173 }
0x1fa8   : > { %v2929_v22 = vpop.xlane.xlu0 %2928  ;;  %v2931_v26 = vmul.f32 0.6931472, %v6174_v2  ;;  %v6176_v51 = vpop.eup %6175 }
0x1fa9   : > { %6177 = vlog2.f32 %v2929_v22  ;;  %v4751_v42 = vmul.f32 0.6931472, %v6176_v51  ;;  %v3105_v22 = vrot.slane %v3104_v40, 4 }
0x1faa   : > { %6179 = vlog2.f32 %v10221_v30  ;;  %v2934_v20 = vsub.f32 %v9451_v41, %v2931_v26  ;;  %v3977_v30 = vadd.f32 %v3976_v12, %v3975_v23 }
0x1fab   : > { %v4753_v7 = vsub.f32 %v10222_v1, %v4751_v42 }
0x1fac   : > { %535 = vadd.xlane.f32.xlu0 %v534_v13  ;;  %v2936_v19 = vmul.f32 %v6303_v3, %v2934_v20 }
0x1fad   : > { %v4755_v55 = vmul.f32 %v6304_v39, %v4753_v7 }
0x1fae   : > { %v2938_v48 = vmul.f32 0.0, %v2936_v19 }
0x1faf   : > { %v6178_v58 = vpop.eup %6177  ;;  %v4757_v49 = vmul.f32 0.125, %v4755_v55 }
0x1fb0   : > { %v2933_v31 = vmul.f32 0.6931472, %v6178_v58  ;;  %v6180_v63 = vpop.eup %6179  ;;  %v3978_v58 = vrot.slane %v3977_v30, 2 }
0x1fb1   : > { %v4749_v34 = vmul.f32 0.6931472, %v6180_v63 }
0x1fb2   : > { %v2935_v61 = vsub.f32 %v9456_v15, %v2933_v31  ;;  %v3979_v19 = vadd.f32 %v3978_v58, %v3977_v30 }
0x1fb3   : > { %v4752_v57 = vsub.f32 %v10223_v4, %v4749_v34 }
0x1fb4   : > { %v2937_v17 = vmul.f32 %v6302_v25, %v2935_v61  ;;  %1401 = vadd.xlane.f32.xlu0 %v1400_v18  ;;  %v2193_v18 = vadd.f32 %v2192_v37, %v2191_v59 }
0x1fb5   : > { %v4754_v14 = vmul.f32 %v6305_v53, %v4752_v57 }
0x1fb6   : > { %v2939_v8 = vmul.f32 0.125, %v2937_v17 }
0x1fb7   : > { %v4756_v15 = vmul.f32 0.0, %v4754_v14 }
0x1fb8   : > { %v2940_v41 = vadd.f32 %v2939_v8, %v2938_v48  ;;  %v3980_v48 = vrot.slane %v3979_v19, 1 }
0x1fb9   : > { %v4758_v38 = vadd.f32 %v4757_v49, %v4756_v15  ;;  %v341_v15 = vlaneseq }
0x1fba   : > { %v3981_v55 = vadd.f32 %v3980_v48, %v3979_v19 }
0x1fbc   : > { %2941 = vadd.xlane.f32.xlu0 %v2940_v41 }
0x1fc4   : > { %4759 = vadd.xlane.f32.xlu0 %v4758_v38  ;;  %v342_v38 = vand.u32 127, %v341_v15 }
0x1fc6   : > { %vm2957_vm10 = vcmp.eq.s32.totalorder %v342_v38, 1  ;;  %vm2953_vm13 = vcmp.eq.s32.totalorder %v342_v38, 0  ;;  %vm2961_vm14 = vcmp.eq.s32.totalorder %v342_v38, 2  ;;  %vm2965_vm15 = vcmp.eq.s32.totalorder %v342_v38, 3 }
0x200f   : > { %v5500_v35 = vpop.xlane.xlu0 %5499 }
0x2010   : > { %6181 = vlog2.f32 %v5500_v35 }
0x2016   : > { %v6182_v44 = vpop.eup %6181 }
0x2017   : > { %v5502_v5 = vpop.xlane.xlu0 %5501  ;;  %v5504_v9 = vmul.f32 0.6931472, %v6182_v44 }
0x2018   : > { %6183 = vlog2.f32 %v5502_v5 }
0x2019   : > { %v5507_v24 = vsub.f32 %v9460_v16, %v5504_v9 }
0x201b   : > { %v5509_v36 = vmul.f32 %v6305_v53, %v5507_v24 }
0x201d   : > { %v5511_v33 = vmul.f32 0.0, %v5509_v36 }
0x201e   : > { %v6184_v52 = vpop.eup %6183 }
0x201f   : > { %v5506_v46 = vmul.f32 0.6931472, %v6184_v52  ;;  %v536_v60 = vpop.xlane.xlu0 %535 }
0x2020   : > { %v537_v11 = vrot.slane %v536_v60, 4 }
0x2021   : > { %v5508_v10 = vsub.f32 %v9465_v32, %v5506_v46  ;;  %v3106_v32 = vadd.f32 %v3105_v22, %v3104_v40 }
0x2022   : > { %v538_v45 = vadd.f32 %v537_v11, %v536_v60 }
0x2023   : > { %v5510_v54 = vmul.f32 %v6304_v39, %v5508_v10  ;;  %v3107_v62 = vrot.slane %v3106_v32, 2 }
0x2024   : > { %v539_v29 = vrot.slane %v538_v45, 2 }
0x2025   : > { %v5512_v43 = vmul.f32 0.125, %v5510_v54  ;;  %v3108_v61 = vadd.f32 %v3107_v62, %v3106_v32 }
0x2026   : > { %v540_v28 = vadd.f32 %v539_v29, %v538_v45 }
0x2027   : > { %v1402_v16 = vpop.xlane.xlu0 %1401  ;;  %v5513_v6 = vadd.f32 %v5512_v43, %v5511_v33  ;;  %v3109_v8 = vrot.slane %v3108_v61, 1 }
0x2028   : > { %v1403_v21 = vrot.slane %v1402_v16, 4  ;;  %v541_v2 = vrot.slane %v540_v28, 1 }
0x2029   : > { %5514 = vadd.xlane.f32.xlu2 %v5513_v6  ;;  %v3110_v41 = vadd.f32 %v3109_v8, %v3108_v61 }
0x202a   : > { %v1404_v13 = vadd.f32 %v1403_v21, %v1402_v16  ;;  %v542_v25 = vadd.f32 %v541_v2, %v540_v28 }
0x202c   : > { %v1405_v26 = vrot.slane %v1404_v13, 2  ;;  %6018 = vpush %v542_v25 }
0x202e   : > { %v1406_v3 = vadd.f32 %v1405_v26, %v1404_v13 }
0x202f   : > { %v2942_v51 = vpop.xlane.xlu0 %2941 }
0x2030   : > { %v2943_v20 = vrot.slane %v2942_v51, 4  ;;  %v1407_v31 = vrot.slane %v1406_v3, 1 }
0x2032   : > { %v2944_v47 = vadd.f32 %v2943_v20, %v2942_v51  ;;  %v1408_v63 = vadd.f32 %v1407_v31, %v1406_v3 }
0x2034   : > { %v2945_v42 = vrot.slane %v2944_v47, 2  ;;  %6020 = vpush %v1408_v63 }
0x2035   : > { %6022 = vpush %v2193_v18 }
0x2036   : > { %v2946_v17 = vadd.f32 %v2945_v42, %v2944_v47 }
0x2037   : > { %v4760_v34 = vpop.xlane.xlu0 %4759 }
0x2038   : > { %v4761_v1 = vrot.slane %v4760_v34, 4  ;;  %v2947_v7 = vrot.slane %v2946_v17, 1 }
0x203a   : > { %v4762_v4 = vadd.f32 %v4761_v1, %v4760_v34  ;;  %v2948_v57 = vadd.f32 %v2947_v7, %v2946_v17 }
0x203c   : > { %v4763_v39 = vrot.slane %v4762_v4, 2  ;;  %6024 = vpush %v2948_v57 }
0x203d   : > { %6026 = vpush %v3110_v41 }
0x203e   : > { %v4764_v53 = vadd.f32 %v4763_v39, %v4762_v4  ;;  %6028 = vpush %v3981_v55 }
0x2040   : > { %v4765_v14 = vrot.slane %v4764_v53, 1 }
0x2042   : > { %v4766_v49 = vadd.f32 %v4765_v14, %v4764_v53 }
0x2044   : > { %6030 = vpush %v4766_v49 }
0x205d   : > { %s6019_s18 = spop %6018 }
0x205e   : > { %s544_s23 = ssub.f32 0.0, %s6019_s18 }
0x2060   : > { %v2954_v35 = vstv %s544_s23  ;;  %s310_s23 = scalar_lea.vmem [#allocation8], %s5658_s22  ;;  %s5562_s22 = scalar_lea.hbm %s9539_s8, %s6472_s21 }
0x2061   : > { %v2955_v9 = vsel %vm2953_vm13, %v2954_v35, 0.0 }
0x2065   : > { %s6021_s12 = spop %6020 }
0x2066   : > { %s1410_s13 = ssub.f32 0.0, %s6021_s12  ;;  %s6023_s17 = spop %6022 }
0x2067   : > { %s2195_s19 = ssub.f32 0.0, %s6023_s17  ;;  %s6326_s17 = scalar_lea.hbm %s9539_s8, 4 }
0x2068   : > { %v2958_v44 = vstv %s1410_s13 }
0x2069   : > { %v2959_v5 = vsel %vm2957_vm10, %v2958_v44, 0.0  ;;  %v2962_v24 = vstv %s2195_s19 }
0x206a   : > { %v2960_v0 = vadd.f32 %v2959_v5, %v2955_v9  ;;  %v2963_v52 = vsel %vm2961_vm14, %v2962_v24, 0.0 }
0x206c   : > { %v2964_v56 = vadd.f32 %v2963_v52, %v2960_v0 }
0x206d   : > { %s6025_s25 = spop %6024 }
0x206e   : > { %s2950_s26 = ssub.f32 0.0, %s6025_s25  ;;  %s6027_s24 = spop %6026 }
0x206f   : > { %s3112_s9 = ssub.f32 0.0, %s6027_s24  ;;  %s6029_s10 = spop %6028 }
0x2070   : > { %v2966_v46 = vstv %s2950_s26  ;;  %s3983_s18 = ssub.f32 0.0, %s6029_s10  ;;  %s5563_s26 = sshll.u32 %s310_s23, 4  ;;  %s5564_s26 = int_to_ptr.vmem [resolvable:$true] %s5563_s26 }
0x2071   : > { %v2967_v60 = vsel %vm2965_vm15, %v2966_v46, 0.0  ;;  %v5527_v11 = vstv %s3112_s9  ;;  %s5565_s9 = sshll.u32 %s5562_s22, 4  ;;  %s5548_s10 = scalar_lea.sflag [#allocation9], %s308_s20  ;;  %s5566_s9 = int_to_ptr.hbm [resolvable:$true] %s5565_s9 }
0x2072   : > { %v2968_v36 = vadd.f32 %v2967_v60, %v2964_v56  ;;  %v5528_v10 = vsel %vm2953_vm13, %v5527_v11, 0.0  ;;  %v5530_v45 = vstv %s3983_s18  ;;  %s6320_s18 = sshra.s32 %s5566_s9, 4  ;;  %s6321_s18 = int_to_ptr.hbm [resolvable:$true] %s6320_s18 }
0x2073   : > { %v5531_v27 = vsel %vm2957_vm10, %v5530_v45, 0.0  ;;  %p6327_p0 = scmp.lt.s32.totalorder %s6321_s18, %s9539_s8 }
0x2074   : > { %2969 = vst [vmem:[%s310_s23] sm:$0x1] %v2968_v36  ;;  %v5532_v54 = vadd.f32 %v5531_v27, %v5528_v10 }
0x2075   : > { %s6031_s12 = spop %6030 }
0x2076   : > { %s4768_s13 = ssub.f32 0.0, %s6031_s12  ;;  %s6322_s12 = scalar_lea.hbm %s6321_s18, 2 }
0x2077   : > { %p6323_p11 = scmp.ne.s32.totalorder %s6321_s18, %s6322_s12  ;;  %p6328_p1 = scmp.lt.s32.totalorder %s6326_s17, %s6322_s12 }
0x2078   : > { %v5533_v40 = vstv %s4768_s13 }
0x2079   : > { %v5534_v29 = vsel %vm2961_vm14, %v5533_v40, 0.0  ;;  %p6324_p12 = pnand %p6323_p11, %p6452_p5  ;;  %p6329_p2 = por %p6328_p1, %p6327_p0 }
0x207a   : > { %v5535_v23 = vadd.f32 %v5534_v29, %v5532_v54 }
0x207b   : > { %p6325_p13 = pneg %p6324_p12 }
0x207d   : > { %p6330_p3 = pnand %p6329_p2, %p6325_p13 }
0x209c   : > { %v5515_v33 = vpop.xlane.xlu2 %5514 }
0x209d   : > { %v5516_v43 = vrot.slane %v5515_v33, 4 }
0x209f   : > { %v5517_v28 = vadd.f32 %v5516_v43, %v5515_v33 }
0x20a1   : > { %v5518_v50 = vrot.slane %v5517_v28, 2 }
0x20a3   : > { %v5519_v22 = vadd.f32 %v5518_v50, %v5517_v28 }
0x20a5   : > { %v5520_v16 = vrot.slane %v5519_v22, 1 }
0x20a7   : > { %v5521_v6 = vadd.f32 %v5520_v16, %v5519_v22 }
0x20a9   : > { %6032 = vpush %v5521_v6 }
0x20da   : > { %s6033_s25 = spop %6032 }
0x20db   : > { %s5523_s24 = ssub.f32 0.0, %s6033_s25 }
0x20dd   : > { %v5536_v12 = vstv %s5523_s24 }
0x20de   : > { %v5537_v21 = vsel %vm2965_vm15, %v5536_v12, 0.0 }
0x20df   : > { %v5538_v2 = vadd.f32 %v5537_v21, %v5535_v23 }
0x20e1   : > { %5995 = vst [vmem:[%s310_s23 + $0x1] sm:$0x1] %v5538_v2 }
0x20e2   : > { %6333 = shalt.err (!%p6330_p3)
}
0x20e3   : > { %s6370_s20 = smov 16   ;;  %s6371_s23 = smov 1  }
0x20e4   : > { %6034 = dma.vmem_to_hbm [thread:$0]  (%p6452_p5), %s5564_s26, 32, %s5566_s9, %s5548_s10, %s6370_s20, %s6370_s20, %s6371_s23  }
0x20e5 PF: > { %p6040_p4 = scmp.ge.s32.totalorder %s6368_s30, 2  ;;  %s5589_s25 = sand.u32 1, %s6356_s27  }
0x20e6   : > { %s5590_s24 = scalar_lea.sflag [#allocation9], %s5589_s25 }
0x20e7   : > { %p6037_p7 = pnand %p6040_p4, %p6456_p6 }
0x20e9   : > { %p6038_p8 = pneg %p6037_p7 }
0x20eb   : > { %6351 = dma.done.wait (%p6038_p8), %s5590_s24, 32  }
0x20ec   : > { %6353 = vsyncadd (%p6038_p8), %s5590_s24, 4294967264  ;;  %p19_p9 = scmp.ge.s32.totalorder %s6440_s11, 4   ;;  %s10224_s27 = smov %s6360_s28 }
0x20ed   : > { %s10225_s28 = smov %s6364_s29  ;;  %s10226_s29 = smov %s6450_s14 }
0x20ee   : > { %s10227_s30 = smov %s6440_s11  ;;  %21 = sbr.rel (!%p19_p9) target bundleno = 3 (0x3), region = 104 }
0x20f3   :  { %5596 = vsyncpa [#allocation9], 1 }
0x20f4   :  { %5598 = vsyncpa [#allocation9 + $0x1], 1 }

</bundles_post_ra>
